<compile_context>
chip_gen: v7x
topology: tpu7x:2x2x1
jax: 0.10.0
libtpu: 0.0.40
codegen_flags: <defaults>
</compile_context>

<pallas_src>
import functools

import jax
import jax.numpy as jnp
from jax.experimental import pallas as pl
from jax.experimental.pallas import tpu as pltpu

_EPS = 1e-5        # torch.nn.InstanceNorm2d default eps (affine=False by default)
_NEG_SLOPE = 0.2   # LeakyReLU negative slope


def _zero_border(pad_ref):
    """Zero only the 1-px border of a (Hp, Wp, C) padded scratch buffer.

    The interior is fully overwritten every grid step, so a full memset is wasted
    store bandwidth.  Zeroing per step (instead of once under program_id==0) keeps
    the kernel correct when the batch grid axis is partitioned across TensorCores.
    """
    hp, wp, c = pad_ref.shape
    dt = pad_ref.dtype
    pad_ref[pl.ds(0, 1), :, :] = jnp.zeros((1, wp, c), dt)        # top row
    pad_ref[pl.ds(hp - 1, 1), :, :] = jnp.zeros((1, wp, c), dt)   # bottom row
    pad_ref[:, pl.ds(0, 1), :] = jnp.zeros((hp, 1, c), dt)        # left column
    pad_ref[:, pl.ds(wp - 1, 1), :] = jnp.zeros((hp, 1, c), dt)   # right column


def _double_conv_kernel(x_ref, w1_ref, b1_ref, w2_ref, b2_ref, o_ref,
                        xpad_ref, ypad_ref, *,
                        store_channels_first, fold_kx, x_is_hwc):
    # x_ref   : (1, Cin, H*W)  (or (1, H*W, Cin) in the conservative fallback)
    # w1_ref  : (3, 3*Cin, Cout)   conv1 taps, K dim ordered (kx, cin)
    # b1_ref  : (1, Cout)  f32
    # w2_ref  : (3, 3*Cout, Cout)  conv2 taps
    # b2_ref  : (1, Cout)  f32
    # o_ref   : (1, Cout, H*W) if store_channels_first else (1, H*W, Cout)
    # xpad_ref: (H+2, W+2, Cin)  f32 VMEM scratch (zero 1-px border)
    # ypad_ref: (H+2, W+2, Cout) f32 VMEM scratch (zero 1-px border)
    H = xpad_ref.shape[0] - 2
    W = xpad_ref.shape[1] - 2
    cin = xpad_ref.shape[2]
    cout = ypad_ref.shape[2]
    mm_dtype = w1_ref.dtype          # bf16 on v6e/v7x, f32 on v5e

    def conv3x3(pad_ref, w_ref, b_ref):
        c = pad_ref.shape[2]
        co = w_ref.shape[2]
        # Pre-build the 3 kx-shifted slabs once and reuse them for all 3 ky offsets
        # (ky slicing on the leading dim is a free plane offset), so sublane
        # realignment happens 2x per conv instead of 6x.
        shifts = [pad_ref[:, pl.ds(kx, W), :] for kx in range(3)]   # (H+2, W, c) each
        acc = jnp.zeros((H * W, co), jnp.float32)
        if fold_kx:
            # kx folded into the contraction dim: 3 matmuls with K = 3*c instead of 9
            # with K = c (better MXU cadence, 3x fewer result pops / accumulate adds).
            ex = jnp.concatenate(shifts, axis=-1).astype(mm_dtype)   # (H+2, W, 3c)
            for ky in range(3):
                tap = ex[ky:ky + H].reshape(H * W, 3 * c)
                acc = acc + jnp.dot(tap, w_ref[ky],
                                    preferred_element_type=jnp.float32)
        else:
            # Fallback: 9 matmuls, same folded weight layout (row-sliced per kx).
            for ky in range(3):
                wk = w_ref[ky]
                for kx in range(3):
                    tap = shifts[kx][ky:ky + H].reshape(H * W, c).astype(mm_dtype)
                    acc = acc + jnp.dot(tap, wk[kx * c:(kx + 1) * c, :],
                                        preferred_element_type=jnp.float32)
        return acc + b_ref[...]

    def inorm_lrelu(y):
        # InstanceNorm2d (no affine, biased variance, eps=1e-5) over spatial, then
        # LeakyReLU(0.2).  All elementwise math stays f32 (v5e-safe).
        mean = jnp.mean(y, axis=0, keepdims=True)
        var = jnp.mean(jnp.square(y - mean), axis=0, keepdims=True)
        yhat = (y - mean) * jax.lax.rsqrt(var + _EPS)
        return jnp.where(yhat > 0, yhat, _NEG_SLOPE * yhat)

    # Zero only the 1-px borders; the interiors are fully overwritten below.
    _zero_border(xpad_ref)
    _zero_border(ypad_ref)

    # Stage the zero-padded conv1 input.  Default path: NCHW->HWC relayout happens
    # here on-chip (overlapping the pipeline) instead of as an extra HBM read+write
    # pass in the wrapper.
    if x_is_hwc:
        x_hwc = x_ref[0].reshape(H, W, cin)
    else:
        x_hwc = x_ref[0].T.reshape(H, W, cin)            # (Cin, H*W) -> (H*W, Cin)
    xpad_ref[pl.ds(1, H), pl.ds(1, W), :] = x_hwc.astype(xpad_ref.dtype)

    y1 = inorm_lrelu(conv3x3(xpad_ref, w1_ref, b1_ref))           # (H*W, Cout) f32

    # Single staging store of the normalized intermediate into conv2's padded input
    # (never leaves VMEM).
    ypad_ref[pl.ds(1, H), pl.ds(1, W), :] = (
        y1.reshape(H, W, cout).astype(ypad_ref.dtype))

    y2 = inorm_lrelu(conv3x3(ypad_ref, w2_ref, b2_ref))           # (H*W, Cout) f32

    if store_channels_first:
        # Cout < 128: channels-first flat store -> lane-dense last dim (H*W) and a
        # free wrapper reshape back to NCHW.
        o_ref[0] = y2.T.astype(o_ref.dtype)
    else:
        # Cout >= 128: the last dim (Cout) is already lane-dense; skip the transpose.
        o_ref[0] = y2.astype(o_ref.dtype)


def _device_kind():
    return jax.devices()[0].device_kind.lower()


def _default_matmul_dtype():
    """bf16 MXU operands on bf16-native generations (v6e/v7x); f32 elsewhere (v5e)."""
    kind = _device_kind()
    if "v6" in kind or "v7" in kind or "7x" in kind:
        return jnp.bfloat16
    return jnp.float32


def _vmem_limit_bytes(estimate_bytes):
    kind = _device_kind()
    # 64 MiB physical VMEM on v7x, 128 MiB on v5e/v6e.
    cap = (52 << 20) if ("v7" in kind or "7x" in kind) else (100 << 20)
    return int(min(max(estimate_bytes, 32 << 20), cap))


def double_conv_pallas(x_nchw, w1, b1, w2, b2, *, matmul_dtype=None):
    """x_nchw: (N, Cin, H, W); w1: (Cout, Cin, 3, 3); b1: (Cout,);
    w2: (Cout, Cout, 3, 3); b2: (Cout,).  Returns (N, Cout, H, W) f32 (NCHW)."""
    N, Cin, H, W = x_nchw.shape
    Cout = w1.shape[0]
    if matmul_dtype is None:
        matmul_dtype = _default_matmul_dtype()

    # PyTorch OIHW weights -> (ky, kx*Cin + i, out): kx folded into the contraction dim.
    w1m = jnp.transpose(w1, (2, 3, 1, 0)).reshape(3, 3 * Cin, Cout).astype(matmul_dtype)
    w2m = jnp.transpose(w2, (2, 3, 1, 0)).reshape(3, 3 * Cout, Cout).astype(matmul_dtype)
    b1m = b1.reshape(1, Cout).astype(jnp.float32)
    b2m = b2.reshape(1, Cout).astype(jnp.float32)

    store_channels_first = Cout < 128
    if store_channels_first:
        out_shape = jax.ShapeDtypeStruct((N, Cout, H * W), jnp.float32)
        out_spec = pl.BlockSpec((1, Cout, H * W), lambda n: (n, 0, 0))
    else:
        out_shape = jax.ShapeDtypeStruct((N, H * W, Cout), jnp.float32)
        out_spec = pl.BlockSpec((1, H * W, Cout), lambda n: (n, 0, 0))

    # Per-step VMEM estimate (double-buffered blocks + scratch + main live f32
    # temporaries), with headroom; capped per TPU generation.
    mm_b = jnp.dtype(matmul_dtype).itemsize
    est = (2 * Cin * H * W * 4                                    # x block (x2 buffers)
           + 2 * Cout * H * W * 4                                 # out block (x2 buffers)
           + 2 * (9 * Cin * Cout + 9 * Cout * Cout + 2 * Cout) * mm_b   # weights/biases
           + (H + 2) * (W + 2) * (Cin + Cout) * 4                 # xpad + ypad scratch
           + (H + 2) * W * 3 * (Cin + Cout) * mm_b                # kx-expanded slabs
           + 4 * H * W * Cout * 4)                                # acc / y1 / y2 headroom
    vmem_limit = _vmem_limit_bytes(int(est * 1.5) + (8 << 20))

    def run(fold_kx, x_is_hwc):
        if x_is_hwc:
            # Conservative path: NCHW->NHWC relayout in the wrapper (extra HBM pass).
            x_in = jnp.transpose(x_nchw, (0, 2, 3, 1)).reshape(N, H * W, Cin)
            x_spec = pl.BlockSpec((1, H * W, Cin), lambda n: (n, 0, 0))
        else:
            # Default path: free collapse-reshape; relayout happens on-chip.
            x_in = x_nchw.reshape(N, Cin, H * W)
            x_spec = pl.BlockSpec((1, Cin, H * W), lambda n: (n, 0, 0))
        x_in = x_in.astype(jnp.float32)

        kernel = functools.partial(_double_conv_kernel,
                                   store_channels_first=store_channels_first,
                                   fold_kx=fold_kx, x_is_hwc=x_is_hwc)
        return pl.pallas_call(
            kernel,
            out_shape=out_shape,
            grid_spec=pltpu.PrefetchScalarGridSpec(
                num_scalar_prefetch=0,
                grid=(N,),
                in_specs=[
                    x_spec,                                                  # x (per-sample)
                    pl.BlockSpec((3, 3 * Cin, Cout), lambda n: (0, 0, 0)),   # w1 (invariant)
                    pl.BlockSpec((1, Cout), lambda n: (0, 0)),               # b1
                    pl.BlockSpec((3, 3 * Cout, Cout), lambda n: (0, 0, 0)),  # w2
                    pl.BlockSpec((1, Cout), lambda n: (0, 0)),               # b2
                ],
                out_specs=out_spec,
                scratch_shapes=[
                    pltpu.VMEM((H + 2, W + 2, Cin), jnp.float32),    # conv1 padded input
                    pltpu.VMEM((H + 2, W + 2, Cout), jnp.float32),   # conv2 padded input
                ],
            ),
            compiler_params=pltpu.CompilerParams(
                dimension_semantics=("parallel",),
                vmem_limit_bytes=vmem_limit),
        )(x_in, w1m, b1m, w2m, b2m)

    try:
        out = run(fold_kx=True, x_is_hwc=False)
    except Exception:  # Mosaic builds without unaligned lane-concat / small transposes.
        out = run(fold_kx=False, x_is_hwc=True)

    if store_channels_first:
        # (N, Cout, H*W) is already NCHW element order -> free reshape, no transpose.
        return out.reshape(N, Cout, H, W)
    # NHWC store (Cout >= 128): single transpose back to NCHW in the wrapper.
    return jnp.transpose(out.reshape(N, H, W, Cout), (0, 3, 1, 2))


def double_conv_reference(x, w1, b1, w2, b2):
    """Pure-JAX reference mirroring the PyTorch forward (NCHW)."""
    def block(x, w, b):
        y = jax.lax.conv_general_dilated(
            x, w, window_strides=(1, 1), padding=((1, 1), (1, 1)),
            dimension_numbers=("NCHW", "OIHW", "NCHW"),
            precision=jax.lax.Precision.HIGHEST)
        y = y + b.reshape(1, -1, 1, 1)
        mean = jnp.mean(y, axis=(2, 3), keepdims=True)
        var = jnp.var(y, axis=(2, 3), keepdims=True)
        y = (y - mean) / jnp.sqrt(var + _EPS)
        return jnp.where(y > 0, y, _NEG_SLOPE * y)
    return block(block(x, w1, b1), w2, b2)


if __name__ == "__main__":
    def run_case(n, cin, cout, h, w):
        key = jax.random.PRNGKey(0)
        k_x, kw1, kb1, kw2, kb2 = jax.random.split(key, 5)
        x = jax.random.normal(k_x, (n, cin, h, w), dtype=jnp.float32)
        w1 = jax.random.normal(kw1, (cout, cin, 3, 3), dtype=jnp.float32) * 0.2
        b1 = jax.random.normal(kb1, (cout,), dtype=jnp.float32) * 0.1
        w2 = jax.random.normal(kw2, (cout, cout, 3, 3), dtype=jnp.float32) * 0.2
        b2 = jax.random.normal(kb2, (cout,), dtype=jnp.float32) * 0.1

        out = jax.block_until_ready(double_conv_pallas(x, w1, b1, w2, b2))
        ref = double_conv_reference(x, w1, b1, w2, b2)
        assert out.shape == (n, cout, h, w)
        # bf16 MXU operands (auto-enabled on v6e/v7x) need a looser tolerance.
        bf16 = jnp.dtype(_default_matmul_dtype()) == jnp.dtype(jnp.bfloat16)
        tol = 5e-2 if bf16 else 1e-4
        assert jnp.allclose(out, ref, atol=tol, rtol=tol), \
            f"mismatch vs reference for case {(n, cin, cout, h, w)}"

    run_case(2, 4, 8, 16, 16)      # Cout < 128 -> channels-first flat store path
    run_case(1, 4, 128, 16, 16)    # Cout >= 128 -> NHWC store path (no in-kernel T)
    print("KERNEL_OK")
</pallas_src>

<mosaic_0001>
module attributes {stable_mosaic.version = 11 : i64} {
  func.func @_double_conv_kernel(%arg0: i32, %arg1: memref<1x4x256xf32, #tpu.memory_space<vmem>>, %arg2: memref<3x12x8xf32, #tpu.memory_space<vmem>>, %arg3: memref<1x8xf32, #tpu.memory_space<vmem>>, %arg4: memref<3x24x8xf32, #tpu.memory_space<vmem>>, %arg5: memref<1x8xf32, #tpu.memory_space<vmem>>, %arg6: memref<1x8x256xf32, #tpu.memory_space<vmem>>, %arg7: memref<18x18x4xf32, #tpu.memory_space<vmem>>, %arg8: memref<18x18x8xf32, #tpu.memory_space<vmem>>) attributes {dimension_semantics = [#tpu.dimension_semantics<parallel>], iteration_bounds = array<i64: 2>, scalar_prefetch = 0 : i64, scratch_operands = 2 : i64, tpu.core_type = #tpu.core_type<tc>, window_params = [{transform_indices = @transform_0, window_bounds = array<i64: 1, 4, 256>}, {pipeline_mode = #tpu.pipeline_mode<synchronous>, transform_indices = @transform_1, window_bounds = array<i64: 3, 12, 8>}, {pipeline_mode = #tpu.pipeline_mode<synchronous>, transform_indices = @transform_2, window_bounds = array<i64: 1, 8>}, {pipeline_mode = #tpu.pipeline_mode<synchronous>, transform_indices = @transform_3, window_bounds = array<i64: 3, 24, 8>}, {pipeline_mode = #tpu.pipeline_mode<synchronous>, transform_indices = @transform_4, window_bounds = array<i64: 1, 8>}, {transform_indices = @transform_5, window_bounds = array<i64: 1, 8, 256>}]} {
    %cst = arith.constant 0.000000e+00 : f32
    %0 = vector.broadcast %cst : f32 to vector<1x18x4xf32>
    %c0 = arith.constant 0 : index
    %c0_0 = arith.constant 0 : index
    %c0_1 = arith.constant 0 : index
    %1 = vector.load %arg7[%c0, %c0_0, %c0_1] : memref<18x18x4xf32, #tpu.memory_space<vmem>>, vector<1x18x4xf32>
    tpu.vector_store %arg7[%c0, %c0_0, %c0_1], %0 {strides = array<i32>} : memref<18x18x4xf32, #tpu.memory_space<vmem>>, vector<1x18x4xf32>,
    %cst_2 = arith.constant 0.000000e+00 : f32
    %2 = vector.broadcast %cst_2 : f32 to vector<1x18x4xf32>
    %c17 = arith.constant 17 : index
    %c0_3 = arith.constant 0 : index
    %c0_4 = arith.constant 0 : index
    %3 = vector.load %arg7[%c17, %c0_3, %c0_4] : memref<18x18x4xf32, #tpu.memory_space<vmem>>, vector<1x18x4xf32>
    tpu.vector_store %arg7[%c17, %c0_3, %c0_4], %2 {strides = array<i32>} : memref<18x18x4xf32, #tpu.memory_space<vmem>>, vector<1x18x4xf32>,
    %cst_5 = arith.constant 0.000000e+00 : f32
    %4 = vector.broadcast %cst_5 : f32 to vector<18x1x4xf32>
    %c0_6 = arith.constant 0 : index
    %c0_7 = arith.constant 0 : index
    %c0_8 = arith.constant 0 : index
    %5 = vector.load %arg7[%c0_6, %c0_7, %c0_8] : memref<18x18x4xf32, #tpu.memory_space<vmem>>, vector<18x1x4xf32>
    tpu.vector_store %arg7[%c0_6, %c0_7, %c0_8], %4 {strides = array<i32>} : memref<18x18x4xf32, #tpu.memory_space<vmem>>, vector<18x1x4xf32>,
    %cst_9 = arith.constant 0.000000e+00 : f32
    %6 = vector.broadcast %cst_9 : f32 to vector<18x1x4xf32>
    %c0_10 = arith.constant 0 : index
    %c17_11 = arith.constant 17 : index
    %c0_12 = arith.constant 0 : index
    %7 = vector.load %arg7[%c0_10, %c17_11, %c0_12] : memref<18x18x4xf32, #tpu.memory_space<vmem>>, vector<18x1x4xf32>
    tpu.vector_store %arg7[%c0_10, %c17_11, %c0_12], %6 {strides = array<i32>} : memref<18x18x4xf32, #tpu.memory_space<vmem>>, vector<18x1x4xf32>,
    %cst_13 = arith.constant 0.000000e+00 : f32
    %8 = vector.broadcast %cst_13 : f32 to vector<1x18x8xf32>
    %c0_14 = arith.constant 0 : index
    %c0_15 = arith.constant 0 : index
    %c0_16 = arith.constant 0 : index
    %9 = vector.load %arg8[%c0_14, %c0_15, %c0_16] : memref<18x18x8xf32, #tpu.memory_space<vmem>>, vector<1x18x8xf32>
    tpu.vector_store %arg8[%c0_14, %c0_15, %c0_16], %8 {strides = array<i32>} : memref<18x18x8xf32, #tpu.memory_space<vmem>>, vector<1x18x8xf32>,
    %cst_17 = arith.constant 0.000000e+00 : f32
    %10 = vector.broadcast %cst_17 : f32 to vector<1x18x8xf32>
    %c17_18 = arith.constant 17 : index
    %c0_19 = arith.constant 0 : index
    %c0_20 = arith.constant 0 : index
    %11 = vector.load %arg8[%c17_18, %c0_19, %c0_20] : memref<18x18x8xf32, #tpu.memory_space<vmem>>, vector<1x18x8xf32>
    tpu.vector_store %arg8[%c17_18, %c0_19, %c0_20], %10 {strides = array<i32>} : memref<18x18x8xf32, #tpu.memory_space<vmem>>, vector<1x18x8xf32>,
    %cst_21 = arith.constant 0.000000e+00 : f32
    %12 = vector.broadcast %cst_21 : f32 to vector<18x1x8xf32>
    %c0_22 = arith.constant 0 : index
    %c0_23 = arith.constant 0 : index
    %c0_24 = arith.constant 0 : index
    %13 = vector.load %arg8[%c0_22, %c0_23, %c0_24] : memref<18x18x8xf32, #tpu.memory_space<vmem>>, vector<18x1x8xf32>
    tpu.vector_store %arg8[%c0_22, %c0_23, %c0_24], %12 {strides = array<i32>} : memref<18x18x8xf32, #tpu.memory_space<vmem>>, vector<18x1x8xf32>,
    %cst_25 = arith.constant 0.000000e+00 : f32
    %14 = vector.broadcast %cst_25 : f32 to vector<18x1x8xf32>
    %c0_26 = arith.constant 0 : index
    %c17_27 = arith.constant 17 : index
    %c0_28 = arith.constant 0 : index
    %15 = vector.load %arg8[%c0_26, %c17_27, %c0_28] : memref<18x18x8xf32, #tpu.memory_space<vmem>>, vector<18x1x8xf32>
    tpu.vector_store %arg8[%c0_26, %c17_27, %c0_28], %14 {strides = array<i32>} : memref<18x18x8xf32, #tpu.memory_space<vmem>>, vector<18x1x8xf32>,
    %c0_29 = arith.constant 0 : index
    %c0_30 = arith.constant 0 : index
    %c0_31 = arith.constant 0 : index
    %16 = vector.load %arg1[%c0_29, %c0_30, %c0_31] : memref<1x4x256xf32, #tpu.memory_space<vmem>>, vector<1x4x256xf32>
    %17 = vector.shape_cast %16 : vector<1x4x256xf32> to vector<4x256xf32>
    %18 = tpu.transpose %17, [1, 0] : vector<4x256xf32> -> vector<256x4xf32>
    %19 = vector.shape_cast %18 : vector<256x4xf32> to vector<16x16x4xf32>
    %c1 = arith.constant 1 : index
    %c1_32 = arith.constant 1 : index
    %c0_33 = arith.constant 0 : index
    %20 = vector.load %arg7[%c1, %c1_32, %c0_33] : memref<18x18x4xf32, #tpu.memory_space<vmem>>, vector<16x16x4xf32>
    tpu.vector_store %arg7[%c1, %c1_32, %c0_33], %19 {strides = array<i32>} : memref<18x18x4xf32, #tpu.memory_space<vmem>>, vector<16x16x4xf32>,
    %c0_34 = arith.constant 0 : index
    %c0_35 = arith.constant 0 : index
    %c0_36 = arith.constant 0 : index
    %21 = vector.load %arg7[%c0_34, %c0_35, %c0_36] : memref<18x18x4xf32, #tpu.memory_space<vmem>>, vector<18x16x4xf32>
    %c0_37 = arith.constant 0 : index
    %c1_38 = arith.constant 1 : index
    %c0_39 = arith.constant 0 : index
    %22 = vector.load %arg7[%c0_37, %c1_38, %c0_39] : memref<18x18x4xf32, #tpu.memory_space<vmem>>, vector<18x16x4xf32>
    %c0_40 = arith.constant 0 : index
    %c2 = arith.constant 2 : index
    %c0_41 = arith.constant 0 : index
    %23 = vector.load %arg7[%c0_40, %c2, %c0_41] : memref<18x18x4xf32, #tpu.memory_space<vmem>>, vector<18x16x4xf32>
    %cst_42 = arith.constant 0.000000e+00 : f32
    %24 = vector.broadcast %cst_42 : f32 to vector<256x8xf32>
    %25 = tpu.concatenate %21, %22, %23 in 2 : vector<18x16x4xf32>, vector<18x16x4xf32>, vector<18x16x4xf32> -> vector<18x16x12xf32>
    %26 = vector.extract_strided_slice %25 {offsets = [0, 0, 0], sizes = [16, 16, 12], strides = [1, 1, 1]} : vector<18x16x12xf32> to vector<16x16x12xf32>
    %27 = vector.shape_cast %26 : vector<16x16x12xf32> to vector<256x12xf32>
    %c0_43 = arith.constant 0 : index
    %c0_44 = arith.constant 0 : index
    %c0_45 = arith.constant 0 : index
    %28 = vector.load %arg2[%c0_43, %c0_44, %c0_45] : memref<3x12x8xf32, #tpu.memory_space<vmem>>, vector<1x12x8xf32>
    %29 = vector.shape_cast %28 : vector<1x12x8xf32> to vector<12x8xf32>
    %cst_46 = arith.constant dense<0.000000e+00> : vector<256x8xf32>
    %30 = tpu.matmul %27, %29, %cst_46 {dimension_numbers = #tpu.dot_dimension_numbers<[1], [0], [0], [1], [0, 0, 1, 1], [], []>} : vector<256x12xf32>, vector<12x8xf32>, vector<256x8xf32> -> vector<256x8xf32>
    %31 = arith.addf %24, %30 : vector<256x8xf32>
    %32 = vector.extract_strided_slice %25 {offsets = [1, 0, 0], sizes = [16, 16, 12], strides = [1, 1, 1]} : vector<18x16x12xf32> to vector<16x16x12xf32>
    %33 = vector.shape_cast %32 : vector<16x16x12xf32> to vector<256x12xf32>
    %c1_47 = arith.constant 1 : index
    %c0_48 = arith.constant 0 : index
    %c0_49 = arith.constant 0 : index
    %34 = vector.load %arg2[%c1_47, %c0_48, %c0_49] : memref<3x12x8xf32, #tpu.memory_space<vmem>>, vector<1x12x8xf32>
    %35 = vector.shape_cast %34 : vector<1x12x8xf32> to vector<12x8xf32>
    %cst_50 = arith.constant dense<0.000000e+00> : vector<256x8xf32>
    %36 = tpu.matmul %33, %35, %cst_50 {dimension_numbers = #tpu.dot_dimension_numbers<[1], [0], [0], [1], [0, 0, 1, 1], [], []>} : vector<256x12xf32>, vector<12x8xf32>, vector<256x8xf32> -> vector<256x8xf32>
    %37 = arith.addf %31, %36 : vector<256x8xf32>
    %38 = vector.extract_strided_slice %25 {offsets = [2, 0, 0], sizes = [16, 16, 12], strides = [1, 1, 1]} : vector<18x16x12xf32> to vector<16x16x12xf32>
    %39 = vector.shape_cast %38 : vector<16x16x12xf32> to vector<256x12xf32>
    %c2_51 = arith.constant 2 : index
    %c0_52 = arith.constant 0 : index
    %c0_53 = arith.constant 0 : index
    %40 = vector.load %arg2[%c2_51, %c0_52, %c0_53] : memref<3x12x8xf32, #tpu.memory_space<vmem>>, vector<1x12x8xf32>
    %41 = vector.shape_cast %40 : vector<1x12x8xf32> to vector<12x8xf32>
    %cst_54 = arith.constant dense<0.000000e+00> : vector<256x8xf32>
    %42 = tpu.matmul %39, %41, %cst_54 {dimension_numbers = #tpu.dot_dimension_numbers<[1], [0], [0], [1], [0, 0, 1, 1], [], []>} : vector<256x12xf32>, vector<12x8xf32>, vector<256x8xf32> -> vector<256x8xf32>
    %43 = arith.addf %37, %42 : vector<256x8xf32>
    %c0_55 = arith.constant 0 : index
    %c0_56 = arith.constant 0 : index
    %44 = vector.load %arg3[%c0_55, %c0_56] : memref<1x8xf32, #tpu.memory_space<vmem>>, vector<1x8xf32>
    %45 = vector.broadcast %44 : vector<1x8xf32> to vector<256x8xf32>
    %46 = arith.addf %43, %45 : vector<256x8xf32>
    %cst_57 = arith.constant dense<0.000000e+00> : vector<8xf32>
    %47 = vector.multi_reduction <add>, %46, %cst_57 [0] : vector<256x8xf32> to vector<8xf32>
    %48 = vector.shape_cast %47 : vector<8xf32> to vector<1x8xf32>
    %cst_58 = arith.constant 2.560000e+02 : f32
    %49 = vector.broadcast %cst_58 : f32 to vector<1x8xf32>
    %50 = arith.divf %48, %49 : vector<1x8xf32>
    %51 = vector.broadcast %50 : vector<1x8xf32> to vector<256x8xf32>
    %52 = arith.subf %46, %51 : vector<256x8xf32>
    %53 = arith.mulf %52, %52 : vector<256x8xf32>
    %cst_59 = arith.constant dense<0.000000e+00> : vector<8xf32>
    %54 = vector.multi_reduction <add>, %53, %cst_59 [0] : vector<256x8xf32> to vector<8xf32>
    %55 = vector.shape_cast %54 : vector<8xf32> to vector<1x8xf32>
    %cst_60 = arith.constant 2.560000e+02 : f32
    %56 = vector.broadcast %cst_60 : f32 to vector<1x8xf32>
    %57 = arith.divf %55, %56 : vector<1x8xf32>
    %58 = vector.broadcast %50 : vector<1x8xf32> to vector<256x8xf32>
    %59 = arith.subf %46, %58 : vector<256x8xf32>
    %cst_61 = arith.constant 9.99999974E-6 : f32
    %60 = vector.broadcast %cst_61 : f32 to vector<1x8xf32>
    %61 = arith.addf %57, %60 : vector<1x8xf32>
    %62 = math.rsqrt %61 : vector<1x8xf32>
    %63 = vector.broadcast %62 : vector<1x8xf32> to vector<256x8xf32>
    %64 = arith.mulf %59, %63 : vector<256x8xf32>
    %cst_62 = arith.constant 0.000000e+00 : f32
    %65 = vector.broadcast %cst_62 : f32 to vector<256x8xf32>
    %66 = arith.cmpf ogt, %64, %65 : vector<256x8xf32>
    %cst_63 = arith.constant 2.000000e-01 : f32
    %67 = vector.broadcast %cst_63 : f32 to vector<256x8xf32>
    %68 = arith.mulf %67, %64 : vector<256x8xf32>
    %69 = arith.select %66, %64, %68 : vector<256x8xi1>, vector<256x8xf32>
    %70 = vector.shape_cast %69 : vector<256x8xf32> to vector<16x16x8xf32>
    %c1_64 = arith.constant 1 : index
    %c1_65 = arith.constant 1 : index
    %c0_66 = arith.constant 0 : index
    %71 = vector.load %arg8[%c1_64, %c1_65, %c0_66] : memref<18x18x8xf32, #tpu.memory_space<vmem>>, vector<16x16x8xf32>
    tpu.vector_store %arg8[%c1_64, %c1_65, %c0_66], %70 {strides = array<i32>} : memref<18x18x8xf32, #tpu.memory_space<vmem>>, vector<16x16x8xf32>,
    %c0_67 = arith.constant 0 : index
    %c0_68 = arith.constant 0 : index
    %c0_69 = arith.constant 0 : index
    %72 = vector.load %arg8[%c0_67, %c0_68, %c0_69] : memref<18x18x8xf32, #tpu.memory_space<vmem>>, vector<18x16x8xf32>
    %c0_70 = arith.constant 0 : index
    %c1_71 = arith.constant 1 : index
    %c0_72 = arith.constant 0 : index
    %73 = vector.load %arg8[%c0_70, %c1_71, %c0_72] : memref<18x18x8xf32, #tpu.memory_space<vmem>>, vector<18x16x8xf32>
    %c0_73 = arith.constant 0 : index
    %c2_74 = arith.constant 2 : index
    %c0_75 = arith.constant 0 : index
    %74 = vector.load %arg8[%c0_73, %c2_74, %c0_75] : memref<18x18x8xf32, #tpu.memory_space<vmem>>, vector<18x16x8xf32>
    %cst_76 = arith.constant 0.000000e+00 : f32
    %75 = vector.broadcast %cst_76 : f32 to vector<256x8xf32>
    %76 = tpu.concatenate %72, %73, %74 in 2 : vector<18x16x8xf32>, vector<18x16x8xf32>, vector<18x16x8xf32> -> vector<18x16x24xf32>
    %77 = vector.extract_strided_slice %76 {offsets = [0, 0, 0], sizes = [16, 16, 24], strides = [1, 1, 1]} : vector<18x16x24xf32> to vector<16x16x24xf32>
    %78 = vector.shape_cast %77 : vector<16x16x24xf32> to vector<256x24xf32>
    %c0_77 = arith.constant 0 : index
    %c0_78 = arith.constant 0 : index
    %c0_79 = arith.constant 0 : index
    %79 = vector.load %arg4[%c0_77, %c0_78, %c0_79] : memref<3x24x8xf32, #tpu.memory_space<vmem>>, vector<1x24x8xf32>
    %80 = vector.shape_cast %79 : vector<1x24x8xf32> to vector<24x8xf32>
    %cst_80 = arith.constant dense<0.000000e+00> : vector<256x8xf32>
    %81 = tpu.matmul %78, %80, %cst_80 {dimension_numbers = #tpu.dot_dimension_numbers<[1], [0], [0], [1], [0, 0, 1, 1], [], []>} : vector<256x24xf32>, vector<24x8xf32>, vector<256x8xf32> -> vector<256x8xf32>
    %82 = arith.addf %75, %81 : vector<256x8xf32>
    %83 = vector.extract_strided_slice %76 {offsets = [1, 0, 0], sizes = [16, 16, 24], strides = [1, 1, 1]} : vector<18x16x24xf32> to vector<16x16x24xf32>
    %84 = vector.shape_cast %83 : vector<16x16x24xf32> to vector<256x24xf32>
    %c1_81 = arith.constant 1 : index
    %c0_82 = arith.constant 0 : index
    %c0_83 = arith.constant 0 : index
    %85 = vector.load %arg4[%c1_81, %c0_82, %c0_83] : memref<3x24x8xf32, #tpu.memory_space<vmem>>, vector<1x24x8xf32>
    %86 = vector.shape_cast %85 : vector<1x24x8xf32> to vector<24x8xf32>
    %cst_84 = arith.constant dense<0.000000e+00> : vector<256x8xf32>
    %87 = tpu.matmul %84, %86, %cst_84 {dimension_numbers = #tpu.dot_dimension_numbers<[1], [0], [0], [1], [0, 0, 1, 1], [], []>} : vector<256x24xf32>, vector<24x8xf32>, vector<256x8xf32> -> vector<256x8xf32>
    %88 = arith.addf %82, %87 : vector<256x8xf32>
    %89 = vector.extract_strided_slice %76 {offsets = [2, 0, 0], sizes = [16, 16, 24], strides = [1, 1, 1]} : vector<18x16x24xf32> to vector<16x16x24xf32>
    %90 = vector.shape_cast %89 : vector<16x16x24xf32> to vector<256x24xf32>
    %c2_85 = arith.constant 2 : index
    %c0_86 = arith.constant 0 : index
    %c0_87 = arith.constant 0 : index
    %91 = vector.load %arg4[%c2_85, %c0_86, %c0_87] : memref<3x24x8xf32, #tpu.memory_space<vmem>>, vector<1x24x8xf32>
    %92 = vector.shape_cast %91 : vector<1x24x8xf32> to vector<24x8xf32>
    %cst_88 = arith.constant dense<0.000000e+00> : vector<256x8xf32>
    %93 = tpu.matmul %90, %92, %cst_88 {dimension_numbers = #tpu.dot_dimension_numbers<[1], [0], [0], [1], [0, 0, 1, 1], [], []>} : vector<256x24xf32>, vector<24x8xf32>, vector<256x8xf32> -> vector<256x8xf32>
    %94 = arith.addf %88, %93 : vector<256x8xf32>
    %c0_89 = arith.constant 0 : index
    %c0_90 = arith.constant 0 : index
    %95 = vector.load %arg5[%c0_89, %c0_90] : memref<1x8xf32, #tpu.memory_space<vmem>>, vector<1x8xf32>
    %96 = vector.broadcast %95 : vector<1x8xf32> to vector<256x8xf32>
    %97 = arith.addf %94, %96 : vector<256x8xf32>
    %cst_91 = arith.constant dense<0.000000e+00> : vector<8xf32>
    %98 = vector.multi_reduction <add>, %97, %cst_91 [0] : vector<256x8xf32> to vector<8xf32>
    %99 = vector.shape_cast %98 : vector<8xf32> to vector<1x8xf32>
    %cst_92 = arith.constant 2.560000e+02 : f32
    %100 = vector.broadcast %cst_92 : f32 to vector<1x8xf32>
    %101 = arith.divf %99, %100 : vector<1x8xf32>
    %102 = vector.broadcast %101 : vector<1x8xf32> to vector<256x8xf32>
    %103 = arith.subf %97, %102 : vector<256x8xf32>
    %104 = arith.mulf %103, %103 : vector<256x8xf32>
    %cst_93 = arith.constant dense<0.000000e+00> : vector<8xf32>
    %105 = vector.multi_reduction <add>, %104, %cst_93 [0] : vector<256x8xf32> to vector<8xf32>
    %106 = vector.shape_cast %105 : vector<8xf32> to vector<1x8xf32>
    %cst_94 = arith.constant 2.560000e+02 : f32
    %107 = vector.broadcast %cst_94 : f32 to vector<1x8xf32>
    %108 = arith.divf %106, %107 : vector<1x8xf32>
    %109 = vector.broadcast %101 : vector<1x8xf32> to vector<256x8xf32>
    %110 = arith.subf %97, %109 : vector<256x8xf32>
    %cst_95 = arith.constant 9.99999974E-6 : f32
    %111 = vector.broadcast %cst_95 : f32 to vector<1x8xf32>
    %112 = arith.addf %108, %111 : vector<1x8xf32>
    %113 = math.rsqrt %112 : vector<1x8xf32>
    %114 = vector.broadcast %113 : vector<1x8xf32> to vector<256x8xf32>
    %115 = arith.mulf %110, %114 : vector<256x8xf32>
    %cst_96 = arith.constant 0.000000e+00 : f32
    %116 = vector.broadcast %cst_96 : f32 to vector<256x8xf32>
    %117 = arith.cmpf ogt, %115, %116 : vector<256x8xf32>
    %cst_97 = arith.constant 2.000000e-01 : f32
    %118 = vector.broadcast %cst_97 : f32 to vector<256x8xf32>
    %119 = arith.mulf %118, %115 : vector<256x8xf32>
    %120 = arith.select %117, %115, %119 : vector<256x8xi1>, vector<256x8xf32>
    %121 = tpu.transpose %120, [1, 0] : vector<256x8xf32> -> vector<8x256xf32>
    %c0_98 = arith.constant 0 : index
    %c0_99 = arith.constant 0 : index
    %c0_100 = arith.constant 0 : index
    %122 = vector.load %arg6[%c0_98, %c0_99, %c0_100] : memref<1x8x256xf32, #tpu.memory_space<vmem>>, vector<1x8x256xf32>
    %123 = vector.shape_cast %122 : vector<1x8x256xf32> to vector<8x256xf32>
    %124 = vector.shape_cast %121 : vector<8x256xf32> to vector<1x8x256xf32>
    tpu.vector_store %arg6[%c0_98, %c0_99, %c0_100], %124 {strides = array<i32>} : memref<1x8x256xf32, #tpu.memory_space<vmem>>, vector<1x8x256xf32>,
    return
  }
  func.func @transform_0(%arg0: i32) -> (i32, i32, i32) {
    %c0_i32 = arith.constant 0 : i32
    %c0_i32_0 = arith.constant 0 : i32
    %c0_i32_1 = arith.constant 0 : i32
    return %arg0, %c0_i32, %c0_i32_0 : i32, i32, i32
  }
  func.func @transform_1(%arg0: i32) -> (i32, i32, i32) {
    %c0_i32 = arith.constant 0 : i32
    %c0_i32_0 = arith.constant 0 : i32
    %c0_i32_1 = arith.constant 0 : i32
    %c0_i32_2 = arith.constant 0 : i32
    return %c0_i32, %c0_i32_0, %c0_i32_1 : i32, i32, i32
  }
  func.func @transform_2(%arg0: i32) -> (i32, i32) {
    %c0_i32 = arith.constant 0 : i32
    %c0_i32_0 = arith.constant 0 : i32
    %c0_i32_1 = arith.constant 0 : i32
    return %c0_i32, %c0_i32_0 : i32, i32
  }
  func.func @transform_3(%arg0: i32) -> (i32, i32, i32) {
    %c0_i32 = arith.constant 0 : i32
    %c0_i32_0 = arith.constant 0 : i32
    %c0_i32_1 = arith.constant 0 : i32
    %c0_i32_2 = arith.constant 0 : i32
    return %c0_i32, %c0_i32_0, %c0_i32_1 : i32, i32, i32
  }
  func.func @transform_4(%arg0: i32) -> (i32, i32) {
    %c0_i32 = arith.constant 0 : i32
    %c0_i32_0 = arith.constant 0 : i32
    %c0_i32_1 = arith.constant 0 : i32
    return %c0_i32, %c0_i32_0 : i32, i32
  }
  func.func @transform_5(%arg0: i32) -> (i32, i32, i32) {
    %c0_i32 = arith.constant 0 : i32
    %c0_i32_0 = arith.constant 0 : i32
    %c0_i32_1 = arith.constant 0 : i32
    return %arg0, %c0_i32, %c0_i32_0 : i32, i32, i32
  }
}

module attributes {stable_mosaic.version = 11 : i64} {
  func.func @_double_conv_kernel(%arg0: i32, %arg1: memref<1x256x4xf32, #tpu.memory_space<vmem>>, %arg2: memref<3x12x8xf32, #tpu.memory_space<vmem>>, %arg3: memref<1x8xf32, #tpu.memory_space<vmem>>, %arg4: memref<3x24x8xf32, #tpu.memory_space<vmem>>, %arg5: memref<1x8xf32, #tpu.memory_space<vmem>>, %arg6: memref<1x8x256xf32, #tpu.memory_space<vmem>>, %arg7: memref<18x18x4xf32, #tpu.memory_space<vmem>>, %arg8: memref<18x18x8xf32, #tpu.memory_space<vmem>>) attributes {dimension_semantics = [#tpu.dimension_semantics<parallel>], iteration_bounds = array<i64: 2>, scalar_prefetch = 0 : i64, scratch_operands = 2 : i64, tpu.core_type = #tpu.core_type<tc>, window_params = [{transform_indices = @transform_0, window_bounds = array<i64: 1, 256, 4>}, {pipeline_mode = #tpu.pipeline_mode<synchronous>, transform_indices = @transform_1, window_bounds = array<i64: 3, 12, 8>}, {pipeline_mode = #tpu.pipeline_mode<synchronous>, transform_indices = @transform_2, window_bounds = array<i64: 1, 8>}, {pipeline_mode = #tpu.pipeline_mode<synchronous>, transform_indices = @transform_3, window_bounds = array<i64: 3, 24, 8>}, {pipeline_mode = #tpu.pipeline_mode<synchronous>, transform_indices = @transform_4, window_bounds = array<i64: 1, 8>}, {transform_indices = @transform_5, window_bounds = array<i64: 1, 8, 256>}]} {
    %cst = arith.constant 0.000000e+00 : f32
    %0 = vector.broadcast %cst : f32 to vector<1x18x4xf32>
    %c0 = arith.constant 0 : index
    %c0_0 = arith.constant 0 : index
    %c0_1 = arith.constant 0 : index
    %1 = vector.load %arg7[%c0, %c0_0, %c0_1] : memref<18x18x4xf32, #tpu.memory_space<vmem>>, vector<1x18x4xf32>
    tpu.vector_store %arg7[%c0, %c0_0, %c0_1], %0 {strides = array<i32>} : memref<18x18x4xf32, #tpu.memory_space<vmem>>, vector<1x18x4xf32>,
    %cst_2 = arith.constant 0.000000e+00 : f32
    %2 = vector.broadcast %cst_2 : f32 to vector<1x18x4xf32>
    %c17 = arith.constant 17 : index
    %c0_3 = arith.constant 0 : index
    %c0_4 = arith.constant 0 : index
    %3 = vector.load %arg7[%c17, %c0_3, %c0_4] : memref<18x18x4xf32, #tpu.memory_space<vmem>>, vector<1x18x4xf32>
    tpu.vector_store %arg7[%c17, %c0_3, %c0_4], %2 {strides = array<i32>} : memref<18x18x4xf32, #tpu.memory_space<vmem>>, vector<1x18x4xf32>,
    %cst_5 = arith.constant 0.000000e+00 : f32
    %4 = vector.broadcast %cst_5 : f32 to vector<18x1x4xf32>
    %c0_6 = arith.constant 0 : index
    %c0_7 = arith.constant 0 : index
    %c0_8 = arith.constant 0 : index
    %5 = vector.load %arg7[%c0_6, %c0_7, %c0_8] : memref<18x18x4xf32, #tpu.memory_space<vmem>>, vector<18x1x4xf32>
    tpu.vector_store %arg7[%c0_6, %c0_7, %c0_8], %4 {strides = array<i32>} : memref<18x18x4xf32, #tpu.memory_space<vmem>>, vector<18x1x4xf32>,
    %cst_9 = arith.constant 0.000000e+00 : f32
    %6 = vector.broadcast %cst_9 : f32 to vector<18x1x4xf32>
    %c0_10 = arith.constant 0 : index
    %c17_11 = arith.constant 17 : index
    %c0_12 = arith.constant 0 : index
    %7 = vector.load %arg7[%c0_10, %c17_11, %c0_12] : memref<18x18x4xf32, #tpu.memory_space<vmem>>, vector<18x1x4xf32>
    tpu.vector_store %arg7[%c0_10, %c17_11, %c0_12], %6 {strides = array<i32>} : memref<18x18x4xf32, #tpu.memory_space<vmem>>, vector<18x1x4xf32>,
    %cst_13 = arith.constant 0.000000e+00 : f32
    %8 = vector.broadcast %cst_13 : f32 to vector<1x18x8xf32>
    %c0_14 = arith.constant 0 : index
    %c0_15 = arith.constant 0 : index
    %c0_16 = arith.constant 0 : index
    %9 = vector.load %arg8[%c0_14, %c0_15, %c0_16] : memref<18x18x8xf32, #tpu.memory_space<vmem>>, vector<1x18x8xf32>
    tpu.vector_store %arg8[%c0_14, %c0_15, %c0_16], %8 {strides = array<i32>} : memref<18x18x8xf32, #tpu.memory_space<vmem>>, vector<1x18x8xf32>,
    %cst_17 = arith.constant 0.000000e+00 : f32
    %10 = vector.broadcast %cst_17 : f32 to vector<1x18x8xf32>
    %c17_18 = arith.constant 17 : index
    %c0_19 = arith.constant 0 : index
    %c0_20 = arith.constant 0 : index
    %11 = vector.load %arg8[%c17_18, %c0_19, %c0_20] : memref<18x18x8xf32, #tpu.memory_space<vmem>>, vector<1x18x8xf32>
    tpu.vector_store %arg8[%c17_18, %c0_19, %c0_20], %10 {strides = array<i32>} : memref<18x18x8xf32, #tpu.memory_space<vmem>>, vector<1x18x8xf32>,
    %cst_21 = arith.constant 0.000000e+00 : f32
    %12 = vector.broadcast %cst_21 : f32 to vector<18x1x8xf32>
    %c0_22 = arith.constant 0 : index
    %c0_23 = arith.constant 0 : index
    %c0_24 = arith.constant 0 : index
    %13 = vector.load %arg8[%c0_22, %c0_23, %c0_24] : memref<18x18x8xf32, #tpu.memory_space<vmem>>, vector<18x1x8xf32>
    tpu.vector_store %arg8[%c0_22, %c0_23, %c0_24], %12 {strides = array<i32>} : memref<18x18x8xf32, #tpu.memory_space<vmem>>, vector<18x1x8xf32>,
    %cst_25 = arith.constant 0.000000e+00 : f32
    %14 = vector.broadcast %cst_25 : f32 to vector<18x1x8xf32>
    %c0_26 = arith.constant 0 : index
    %c17_27 = arith.constant 17 : index
    %c0_28 = arith.constant 0 : index
    %15 = vector.load %arg8[%c0_26, %c17_27, %c0_28] : memref<18x18x8xf32, #tpu.memory_space<vmem>>, vector<18x1x8xf32>
    tpu.vector_store %arg8[%c0_26, %c17_27, %c0_28], %14 {strides = array<i32>} : memref<18x18x8xf32, #tpu.memory_space<vmem>>, vector<18x1x8xf32>,
    %c0_29 = arith.constant 0 : index
    %c0_30 = arith.constant 0 : index
    %c0_31 = arith.constant 0 : index
    %16 = vector.load %arg1[%c0_29, %c0_30, %c0_31] : memref<1x256x4xf32, #tpu.memory_space<vmem>>, vector<1x256x4xf32>
    %17 = vector.shape_cast %16 : vector<1x256x4xf32> to vector<256x4xf32>
    %18 = vector.shape_cast %17 : vector<256x4xf32> to vector<16x16x4xf32>
    %c1 = arith.constant 1 : index
    %c1_32 = arith.constant 1 : index
    %c0_33 = arith.constant 0 : index
    %19 = vector.load %arg7[%c1, %c1_32, %c0_33] : memref<18x18x4xf32, #tpu.memory_space<vmem>>, vector<16x16x4xf32>
    tpu.vector_store %arg7[%c1, %c1_32, %c0_33], %18 {strides = array<i32>} : memref<18x18x4xf32, #tpu.memory_space<vmem>>, vector<16x16x4xf32>,
    %c0_34 = arith.constant 0 : index
    %c0_35 = arith.constant 0 : index
    %c0_36 = arith.constant 0 : index
    %20 = vector.load %arg7[%c0_34, %c0_35, %c0_36] : memref<18x18x4xf32, #tpu.memory_space<vmem>>, vector<18x16x4xf32>
    %c0_37 = arith.constant 0 : index
    %c1_38 = arith.constant 1 : index
    %c0_39 = arith.constant 0 : index
    %21 = vector.load %arg7[%c0_37, %c1_38, %c0_39] : memref<18x18x4xf32, #tpu.memory_space<vmem>>, vector<18x16x4xf32>
    %c0_40 = arith.constant 0 : index
    %c2 = arith.constant 2 : index
    %c0_41 = arith.constant 0 : index
    %22 = vector.load %arg7[%c0_40, %c2, %c0_41] : memref<18x18x4xf32, #tpu.memory_space<vmem>>, vector<18x16x4xf32>
    %cst_42 = arith.constant 0.000000e+00 : f32
    %23 = vector.broadcast %cst_42 : f32 to vector<256x8xf32>
    %c0_43 = arith.constant 0 : index
    %c0_44 = arith.constant 0 : index
    %c0_45 = arith.constant 0 : index
    %24 = vector.load %arg2[%c0_43, %c0_44, %c0_45] : memref<3x12x8xf32, #tpu.memory_space<vmem>>, vector<1x12x8xf32>
    %25 = vector.shape_cast %24 : vector<1x12x8xf32> to vector<12x8xf32>
    %26 = vector.extract_strided_slice %20 {offsets = [0, 0, 0], sizes = [16, 16, 4], strides = [1, 1, 1]} : vector<18x16x4xf32> to vector<16x16x4xf32>
    %27 = vector.shape_cast %26 : vector<16x16x4xf32> to vector<256x4xf32>
    %28 = vector.extract_strided_slice %25 {offsets = [0, 0], sizes = [4, 8], strides = [1, 1]} : vector<12x8xf32> to vector<4x8xf32>
    %cst_46 = arith.constant dense<0.000000e+00> : vector<256x8xf32>
    %29 = tpu.matmul %27, %28, %cst_46 {dimension_numbers = #tpu.dot_dimension_numbers<[1], [0], [0], [1], [0, 0, 1, 1], [], []>} : vector<256x4xf32>, vector<4x8xf32>, vector<256x8xf32> -> vector<256x8xf32>
    %30 = arith.addf %23, %29 : vector<256x8xf32>
    %31 = vector.extract_strided_slice %21 {offsets = [0, 0, 0], sizes = [16, 16, 4], strides = [1, 1, 1]} : vector<18x16x4xf32> to vector<16x16x4xf32>
    %32 = vector.shape_cast %31 : vector<16x16x4xf32> to vector<256x4xf32>
    %33 = vector.extract_strided_slice %25 {offsets = [4, 0], sizes = [4, 8], strides = [1, 1]} : vector<12x8xf32> to vector<4x8xf32>
    %cst_47 = arith.constant dense<0.000000e+00> : vector<256x8xf32>
    %34 = tpu.matmul %32, %33, %cst_47 {dimension_numbers = #tpu.dot_dimension_numbers<[1], [0], [0], [1], [0, 0, 1, 1], [], []>} : vector<256x4xf32>, vector<4x8xf32>, vector<256x8xf32> -> vector<256x8xf32>
    %35 = arith.addf %30, %34 : vector<256x8xf32>
    %36 = vector.extract_strided_slice %22 {offsets = [0, 0, 0], sizes = [16, 16, 4], strides = [1, 1, 1]} : vector<18x16x4xf32> to vector<16x16x4xf32>
    %37 = vector.shape_cast %36 : vector<16x16x4xf32> to vector<256x4xf32>
    %38 = vector.extract_strided_slice %25 {offsets = [8, 0], sizes = [4, 8], strides = [1, 1]} : vector<12x8xf32> to vector<4x8xf32>
    %cst_48 = arith.constant dense<0.000000e+00> : vector<256x8xf32>
    %39 = tpu.matmul %37, %38, %cst_48 {dimension_numbers = #tpu.dot_dimension_numbers<[1], [0], [0], [1], [0, 0, 1, 1], [], []>} : vector<256x4xf32>, vector<4x8xf32>, vector<256x8xf32> -> vector<256x8xf32>
    %40 = arith.addf %35, %39 : vector<256x8xf32>
    %c1_49 = arith.constant 1 : index
    %c0_50 = arith.constant 0 : index
    %c0_51 = arith.constant 0 : index
    %41 = vector.load %arg2[%c1_49, %c0_50, %c0_51] : memref<3x12x8xf32, #tpu.memory_space<vmem>>, vector<1x12x8xf32>
    %42 = vector.shape_cast %41 : vector<1x12x8xf32> to vector<12x8xf32>
    %43 = vector.extract_strided_slice %20 {offsets = [1, 0, 0], sizes = [16, 16, 4], strides = [1, 1, 1]} : vector<18x16x4xf32> to vector<16x16x4xf32>
    %44 = vector.shape_cast %43 : vector<16x16x4xf32> to vector<256x4xf32>
    %45 = vector.extract_strided_slice %42 {offsets = [0, 0], sizes = [4, 8], strides = [1, 1]} : vector<12x8xf32> to vector<4x8xf32>
    %cst_52 = arith.constant dense<0.000000e+00> : vector<256x8xf32>
    %46 = tpu.matmul %44, %45, %cst_52 {dimension_numbers = #tpu.dot_dimension_numbers<[1], [0], [0], [1], [0, 0, 1, 1], [], []>} : vector<256x4xf32>, vector<4x8xf32>, vector<256x8xf32> -> vector<256x8xf32>
    %47 = arith.addf %40, %46 : vector<256x8xf32>
    %48 = vector.extract_strided_slice %21 {offsets = [1, 0, 0], sizes = [16, 16, 4], strides = [1, 1, 1]} : vector<18x16x4xf32> to vector<16x16x4xf32>
    %49 = vector.shape_cast %48 : vector<16x16x4xf32> to vector<256x4xf32>
    %50 = vector.extract_strided_slice %42 {offsets = [4, 0], sizes = [4, 8], strides = [1, 1]} : vector<12x8xf32> to vector<4x8xf32>
    %cst_53 = arith.constant dense<0.000000e+00> : vector<256x8xf32>
    %51 = tpu.matmul %49, %50, %cst_53 {dimension_numbers = #tpu.dot_dimension_numbers<[1], [0], [0], [1], [0, 0, 1, 1], [], []>} : vector<256x4xf32>, vector<4x8xf32>, vector<256x8xf32> -> vector<256x8xf32>
    %52 = arith.addf %47, %51 : vector<256x8xf32>
    %53 = vector.extract_strided_slice %22 {offsets = [1, 0, 0], sizes = [16, 16, 4], strides = [1, 1, 1]} : vector<18x16x4xf32> to vector<16x16x4xf32>
    %54 = vector.shape_cast %53 : vector<16x16x4xf32> to vector<256x4xf32>
    %55 = vector.extract_strided_slice %42 {offsets = [8, 0], sizes = [4, 8], strides = [1, 1]} : vector<12x8xf32> to vector<4x8xf32>
    %cst_54 = arith.constant dense<0.000000e+00> : vector<256x8xf32>
    %56 = tpu.matmul %54, %55, %cst_54 {dimension_numbers = #tpu.dot_dimension_numbers<[1], [0], [0], [1], [0, 0, 1, 1], [], []>} : vector<256x4xf32>, vector<4x8xf32>, vector<256x8xf32> -> vector<256x8xf32>
    %57 = arith.addf %52, %56 : vector<256x8xf32>
    %c2_55 = arith.constant 2 : index
    %c0_56 = arith.constant 0 : index
    %c0_57 = arith.constant 0 : index
    %58 = vector.load %arg2[%c2_55, %c0_56, %c0_57] : memref<3x12x8xf32, #tpu.memory_space<vmem>>, vector<1x12x8xf32>
    %59 = vector.shape_cast %58 : vector<1x12x8xf32> to vector<12x8xf32>
    %60 = vector.extract_strided_slice %20 {offsets = [2, 0, 0], sizes = [16, 16, 4], strides = [1, 1, 1]} : vector<18x16x4xf32> to vector<16x16x4xf32>
    %61 = vector.shape_cast %60 : vector<16x16x4xf32> to vector<256x4xf32>
    %62 = vector.extract_strided_slice %59 {offsets = [0, 0], sizes = [4, 8], strides = [1, 1]} : vector<12x8xf32> to vector<4x8xf32>
    %cst_58 = arith.constant dense<0.000000e+00> : vector<256x8xf32>
    %63 = tpu.matmul %61, %62, %cst_58 {dimension_numbers = #tpu.dot_dimension_numbers<[1], [0], [0], [1], [0, 0, 1, 1], [], []>} : vector<256x4xf32>, vector<4x8xf32>, vector<256x8xf32> -> vector<256x8xf32>
    %64 = arith.addf %57, %63 : vector<256x8xf32>
    %65 = vector.extract_strided_slice %21 {offsets = [2, 0, 0], sizes = [16, 16, 4], strides = [1, 1, 1]} : vector<18x16x4xf32> to vector<16x16x4xf32>
    %66 = vector.shape_cast %65 : vector<16x16x4xf32> to vector<256x4xf32>
    %67 = vector.extract_strided_slice %59 {offsets = [4, 0], sizes = [4, 8], strides = [1, 1]} : vector<12x8xf32> to vector<4x8xf32>
    %cst_59 = arith.constant dense<0.000000e+00> : vector<256x8xf32>
    %68 = tpu.matmul %66, %67, %cst_59 {dimension_numbers = #tpu.dot_dimension_numbers<[1], [0], [0], [1], [0, 0, 1, 1], [], []>} : vector<256x4xf32>, vector<4x8xf32>, vector<256x8xf32> -> vector<256x8xf32>
    %69 = arith.addf %64, %68 : vector<256x8xf32>
    %70 = vector.extract_strided_slice %22 {offsets = [2, 0, 0], sizes = [16, 16, 4], strides = [1, 1, 1]} : vector<18x16x4xf32> to vector<16x16x4xf32>
    %71 = vector.shape_cast %70 : vector<16x16x4xf32> to vector<256x4xf32>
    %72 = vector.extract_strided_slice %59 {offsets = [8, 0], sizes = [4, 8], strides = [1, 1]} : vector<12x8xf32> to vector<4x8xf32>
    %cst_60 = arith.constant dense<0.000000e+00> : vector<256x8xf32>
    %73 = tpu.matmul %71, %72, %cst_60 {dimension_numbers = #tpu.dot_dimension_numbers<[1], [0], [0], [1], [0, 0, 1, 1], [], []>} : vector<256x4xf32>, vector<4x8xf32>, vector<256x8xf32> -> vector<256x8xf32>
    %74 = arith.addf %69, %73 : vector<256x8xf32>
    %c0_61 = arith.constant 0 : index
    %c0_62 = arith.constant 0 : index
    %75 = vector.load %arg3[%c0_61, %c0_62] : memref<1x8xf32, #tpu.memory_space<vmem>>, vector<1x8xf32>
    %76 = vector.broadcast %75 : vector<1x8xf32> to vector<256x8xf32>
    %77 = arith.addf %74, %76 : vector<256x8xf32>
    %cst_63 = arith.constant dense<0.000000e+00> : vector<8xf32>
    %78 = vector.multi_reduction <add>, %77, %cst_63 [0] : vector<256x8xf32> to vector<8xf32>
    %79 = vector.shape_cast %78 : vector<8xf32> to vector<1x8xf32>
    %cst_64 = arith.constant 2.560000e+02 : f32
    %80 = vector.broadcast %cst_64 : f32 to vector<1x8xf32>
    %81 = arith.divf %79, %80 : vector<1x8xf32>
    %82 = vector.broadcast %81 : vector<1x8xf32> to vector<256x8xf32>
    %83 = arith.subf %77, %82 : vector<256x8xf32>
    %84 = arith.mulf %83, %83 : vector<256x8xf32>
    %cst_65 = arith.constant dense<0.000000e+00> : vector<8xf32>
    %85 = vector.multi_reduction <add>, %84, %cst_65 [0] : vector<256x8xf32> to vector<8xf32>
    %86 = vector.shape_cast %85 : vector<8xf32> to vector<1x8xf32>
    %cst_66 = arith.constant 2.560000e+02 : f32
    %87 = vector.broadcast %cst_66 : f32 to vector<1x8xf32>
    %88 = arith.divf %86, %87 : vector<1x8xf32>
    %89 = vector.broadcast %81 : vector<1x8xf32> to vector<256x8xf32>
    %90 = arith.subf %77, %89 : vector<256x8xf32>
    %cst_67 = arith.constant 9.99999974E-6 : f32
    %91 = vector.broadcast %cst_67 : f32 to vector<1x8xf32>
    %92 = arith.addf %88, %91 : vector<1x8xf32>
    %93 = math.rsqrt %92 : vector<1x8xf32>
    %94 = vector.broadcast %93 : vector<1x8xf32> to vector<256x8xf32>
    %95 = arith.mulf %90, %94 : vector<256x8xf32>
    %cst_68 = arith.constant 0.000000e+00 : f32
    %96 = vector.broadcast %cst_68 : f32 to vector<256x8xf32>
    %97 = arith.cmpf ogt, %95, %96 : vector<256x8xf32>
    %cst_69 = arith.constant 2.000000e-01 : f32
    %98 = vector.broadcast %cst_69 : f32 to vector<256x8xf32>
    %99 = arith.mulf %98, %95 : vector<256x8xf32>
    %100 = arith.select %97, %95, %99 : vector<256x8xi1>, vector<256x8xf32>
    %101 = vector.shape_cast %100 : vector<256x8xf32> to vector<16x16x8xf32>
    %c1_70 = arith.constant 1 : index
    %c1_71 = arith.constant 1 : index
    %c0_72 = arith.constant 0 : index
    %102 = vector.load %arg8[%c1_70, %c1_71, %c0_72] : memref<18x18x8xf32, #tpu.memory_space<vmem>>, vector<16x16x8xf32>
    tpu.vector_store %arg8[%c1_70, %c1_71, %c0_72], %101 {strides = array<i32>} : memref<18x18x8xf32, #tpu.memory_space<vmem>>, vector<16x16x8xf32>,
    %c0_73 = arith.constant 0 : index
    %c0_74 = arith.constant 0 : index
    %c0_75 = arith.constant 0 : index
    %103 = vector.load %arg8[%c0_73, %c0_74, %c0_75] : memref<18x18x8xf32, #tpu.memory_space<vmem>>, vector<18x16x8xf32>
    %c0_76 = arith.constant 0 : index
    %c1_77 = arith.constant 1 : index
    %c0_78 = arith.constant 0 : index
    %104 = vector.load %arg8[%c0_76, %c1_77, %c0_78] : memref<18x18x8xf32, #tpu.memory_space<vmem>>, vector<18x16x8xf32>
    %c0_79 = arith.constant 0 : index
    %c2_80 = arith.constant 2 : index
    %c0_81 = arith.constant 0 : index
    %105 = vector.load %arg8[%c0_79, %c2_80, %c0_81] : memref<18x18x8xf32, #tpu.memory_space<vmem>>, vector<18x16x8xf32>
    %cst_82 = arith.constant 0.000000e+00 : f32
    %106 = vector.broadcast %cst_82 : f32 to vector<256x8xf32>
    %c0_83 = arith.constant 0 : index
    %c0_84 = arith.constant 0 : index
    %c0_85 = arith.constant 0 : index
    %107 = vector.load %arg4[%c0_83, %c0_84, %c0_85] : memref<3x24x8xf32, #tpu.memory_space<vmem>>, vector<1x24x8xf32>
    %108 = vector.shape_cast %107 : vector<1x24x8xf32> to vector<24x8xf32>
    %109 = vector.extract_strided_slice %103 {offsets = [0, 0, 0], sizes = [16, 16, 8], strides = [1, 1, 1]} : vector<18x16x8xf32> to vector<16x16x8xf32>
    %110 = vector.shape_cast %109 : vector<16x16x8xf32> to vector<256x8xf32>
    %111 = vector.extract_strided_slice %108 {offsets = [0, 0], sizes = [8, 8], strides = [1, 1]} : vector<24x8xf32> to vector<8x8xf32>
    %cst_86 = arith.constant dense<0.000000e+00> : vector<256x8xf32>
    %112 = tpu.matmul %110, %111, %cst_86 {dimension_numbers = #tpu.dot_dimension_numbers<[1], [0], [0], [1], [0, 0, 1, 1], [], []>} : vector<256x8xf32>, vector<8x8xf32>, vector<256x8xf32> -> vector<256x8xf32>
    %113 = arith.addf %106, %112 : vector<256x8xf32>
    %114 = vector.extract_strided_slice %104 {offsets = [0, 0, 0], sizes = [16, 16, 8], strides = [1, 1, 1]} : vector<18x16x8xf32> to vector<16x16x8xf32>
    %115 = vector.shape_cast %114 : vector<16x16x8xf32> to vector<256x8xf32>
    %116 = vector.extract_strided_slice %108 {offsets = [8, 0], sizes = [8, 8], strides = [1, 1]} : vector<24x8xf32> to vector<8x8xf32>
    %cst_87 = arith.constant dense<0.000000e+00> : vector<256x8xf32>
    %117 = tpu.matmul %115, %116, %cst_87 {dimension_numbers = #tpu.dot_dimension_numbers<[1], [0], [0], [1], [0, 0, 1, 1], [], []>} : vector<256x8xf32>, vector<8x8xf32>, vector<256x8xf32> -> vector<256x8xf32>
    %118 = arith.addf %113, %117 : vector<256x8xf32>
    %119 = vector.extract_strided_slice %105 {offsets = [0, 0, 0], sizes = [16, 16, 8], strides = [1, 1, 1]} : vector<18x16x8xf32> to vector<16x16x8xf32>
    %120 = vector.shape_cast %119 : vector<16x16x8xf32> to vector<256x8xf32>
    %121 = vector.extract_strided_slice %108 {offsets = [16, 0], sizes = [8, 8], strides = [1, 1]} : vector<24x8xf32> to vector<8x8xf32>
    %cst_88 = arith.constant dense<0.000000e+00> : vector<256x8xf32>
    %122 = tpu.matmul %120, %121, %cst_88 {dimension_numbers = #tpu.dot_dimension_numbers<[1], [0], [0], [1], [0, 0, 1, 1], [], []>} : vector<256x8xf32>, vector<8x8xf32>, vector<256x8xf32> -> vector<256x8xf32>
    %123 = arith.addf %118, %122 : vector<256x8xf32>
    %c1_89 = arith.constant 1 : index
    %c0_90 = arith.constant 0 : index
    %c0_91 = arith.constant 0 : index
    %124 = vector.load %arg4[%c1_89, %c0_90, %c0_91] : memref<3x24x8xf32, #tpu.memory_space<vmem>>, vector<1x24x8xf32>
    %125 = vector.shape_cast %124 : vector<1x24x8xf32> to vector<24x8xf32>
    %126 = vector.extract_strided_slice %103 {offsets = [1, 0, 0], sizes = [16, 16, 8], strides = [1, 1, 1]} : vector<18x16x8xf32> to vector<16x16x8xf32>
    %127 = vector.shape_cast %126 : vector<16x16x8xf32> to vector<256x8xf32>
    %128 = vector.extract_strided_slice %125 {offsets = [0, 0], sizes = [8, 8], strides = [1, 1]} : vector<24x8xf32> to vector<8x8xf32>
    %cst_92 = arith.constant dense<0.000000e+00> : vector<256x8xf32>
    %129 = tpu.matmul %127, %128, %cst_92 {dimension_numbers = #tpu.dot_dimension_numbers<[1], [0], [0], [1], [0, 0, 1, 1], [], []>} : vector<256x8xf32>, vector<8x8xf32>, vector<256x8xf32> -> vector<256x8xf32>
    %130 = arith.addf %123, %129 : vector<256x8xf32>
    %131 = vector.extract_strided_slice %104 {offsets = [1, 0, 0], sizes = [16, 16, 8], strides = [1, 1, 1]} : vector<18x16x8xf32> to vector<16x16x8xf32>
    %132 = vector.shape_cast %131 : vector<16x16x8xf32> to vector<256x8xf32>
    %133 = vector.extract_strided_slice %125 {offsets = [8, 0], sizes = [8, 8], strides = [1, 1]} : vector<24x8xf32> to vector<8x8xf32>
    %cst_93 = arith.constant dense<0.000000e+00> : vector<256x8xf32>
    %134 = tpu.matmul %132, %133, %cst_93 {dimension_numbers = #tpu.dot_dimension_numbers<[1], [0], [0], [1], [0, 0, 1, 1], [], []>} : vector<256x8xf32>, vector<8x8xf32>, vector<256x8xf32> -> vector<256x8xf32>
    %135 = arith.addf %130, %134 : vector<256x8xf32>
    %136 = vector.extract_strided_slice %105 {offsets = [1, 0, 0], sizes = [16, 16, 8], strides = [1, 1, 1]} : vector<18x16x8xf32> to vector<16x16x8xf32>
    %137 = vector.shape_cast %136 : vector<16x16x8xf32> to vector<256x8xf32>
    %138 = vector.extract_strided_slice %125 {offsets = [16, 0], sizes = [8, 8], strides = [1, 1]} : vector<24x8xf32> to vector<8x8xf32>
    %cst_94 = arith.constant dense<0.000000e+00> : vector<256x8xf32>
    %139 = tpu.matmul %137, %138, %cst_94 {dimension_numbers = #tpu.dot_dimension_numbers<[1], [0], [0], [1], [0, 0, 1, 1], [], []>} : vector<256x8xf32>, vector<8x8xf32>, vector<256x8xf32> -> vector<256x8xf32>
    %140 = arith.addf %135, %139 : vector<256x8xf32>
    %c2_95 = arith.constant 2 : index
    %c0_96 = arith.constant 0 : index
    %c0_97 = arith.constant 0 : index
    %141 = vector.load %arg4[%c2_95, %c0_96, %c0_97] : memref<3x24x8xf32, #tpu.memory_space<vmem>>, vector<1x24x8xf32>
    %142 = vector.shape_cast %141 : vector<1x24x8xf32> to vector<24x8xf32>
    %143 = vector.extract_strided_slice %103 {offsets = [2, 0, 0], sizes = [16, 16, 8], strides = [1, 1, 1]} : vector<18x16x8xf32> to vector<16x16x8xf32>
    %144 = vector.shape_cast %143 : vector<16x16x8xf32> to vector<256x8xf32>
    %145 = vector.extract_strided_slice %142 {offsets = [0, 0], sizes = [8, 8], strides = [1, 1]} : vector<24x8xf32> to vector<8x8xf32>
    %cst_98 = arith.constant dense<0.000000e+00> : vector<256x8xf32>
    %146 = tpu.matmul %144, %145, %cst_98 {dimension_numbers = #tpu.dot_dimension_numbers<[1], [0], [0], [1], [0, 0, 1, 1], [], []>} : vector<256x8xf32>, vector<8x8xf32>, vector<256x8xf32> -> vector<256x8xf32>
    %147 = arith.addf %140, %146 : vector<256x8xf32>
    %148 = vector.extract_strided_slice %104 {offsets = [2, 0, 0], sizes = [16, 16, 8], strides = [1, 1, 1]} : vector<18x16x8xf32> to vector<16x16x8xf32>
    %149 = vector.shape_cast %148 : vector<16x16x8xf32> to vector<256x8xf32>
    %150 = vector.extract_strided_slice %142 {offsets = [8, 0], sizes = [8, 8], strides = [1, 1]} : vector<24x8xf32> to vector<8x8xf32>
    %cst_99 = arith.constant dense<0.000000e+00> : vector<256x8xf32>
    %151 = tpu.matmul %149, %150, %cst_99 {dimension_numbers = #tpu.dot_dimension_numbers<[1], [0], [0], [1], [0, 0, 1, 1], [], []>} : vector<256x8xf32>, vector<8x8xf32>, vector<256x8xf32> -> vector<256x8xf32>
    %152 = arith.addf %147, %151 : vector<256x8xf32>
    %153 = vector.extract_strided_slice %105 {offsets = [2, 0, 0], sizes = [16, 16, 8], strides = [1, 1, 1]} : vector<18x16x8xf32> to vector<16x16x8xf32>
    %154 = vector.shape_cast %153 : vector<16x16x8xf32> to vector<256x8xf32>
    %155 = vector.extract_strided_slice %142 {offsets = [16, 0], sizes = [8, 8], strides = [1, 1]} : vector<24x8xf32> to vector<8x8xf32>
    %cst_100 = arith.constant dense<0.000000e+00> : vector<256x8xf32>
    %156 = tpu.matmul %154, %155, %cst_100 {dimension_numbers = #tpu.dot_dimension_numbers<[1], [0], [0], [1], [0, 0, 1, 1], [], []>} : vector<256x8xf32>, vector<8x8xf32>, vector<256x8xf32> -> vector<256x8xf32>
    %157 = arith.addf %152, %156 : vector<256x8xf32>
    %c0_101 = arith.constant 0 : index
    %c0_102 = arith.constant 0 : index
    %158 = vector.load %arg5[%c0_101, %c0_102] : memref<1x8xf32, #tpu.memory_space<vmem>>, vector<1x8xf32>
    %159 = vector.broadcast %158 : vector<1x8xf32> to vector<256x8xf32>
    %160 = arith.addf %157, %159 : vector<256x8xf32>
    %cst_103 = arith.constant dense<0.000000e+00> : vector<8xf32>
    %161 = vector.multi_reduction <add>, %160, %cst_103 [0] : vector<256x8xf32> to vector<8xf32>
    %162 = vector.shape_cast %161 : vector<8xf32> to vector<1x8xf32>
    %cst_104 = arith.constant 2.560000e+02 : f32
    %163 = vector.broadcast %cst_104 : f32 to vector<1x8xf32>
    %164 = arith.divf %162, %163 : vector<1x8xf32>
    %165 = vector.broadcast %164 : vector<1x8xf32> to vector<256x8xf32>
    %166 = arith.subf %160, %165 : vector<256x8xf32>
    %167 = arith.mulf %166, %166 : vector<256x8xf32>
    %cst_105 = arith.constant dense<0.000000e+00> : vector<8xf32>
    %168 = vector.multi_reduction <add>, %167, %cst_105 [0] : vector<256x8xf32> to vector<8xf32>
    %169 = vector.shape_cast %168 : vector<8xf32> to vector<1x8xf32>
    %cst_106 = arith.constant 2.560000e+02 : f32
    %170 = vector.broadcast %cst_106 : f32 to vector<1x8xf32>
    %171 = arith.divf %169, %170 : vector<1x8xf32>
    %172 = vector.broadcast %164 : vector<1x8xf32> to vector<256x8xf32>
    %173 = arith.subf %160, %172 : vector<256x8xf32>
    %cst_107 = arith.constant 9.99999974E-6 : f32
    %174 = vector.broadcast %cst_107 : f32 to vector<1x8xf32>
    %175 = arith.addf %171, %174 : vector<1x8xf32>
    %176 = math.rsqrt %175 : vector<1x8xf32>
    %177 = vector.broadcast %176 : vector<1x8xf32> to vector<256x8xf32>
    %178 = arith.mulf %173, %177 : vector<256x8xf32>
    %cst_108 = arith.constant 0.000000e+00 : f32
    %179 = vector.broadcast %cst_108 : f32 to vector<256x8xf32>
    %180 = arith.cmpf ogt, %178, %179 : vector<256x8xf32>
    %cst_109 = arith.constant 2.000000e-01 : f32
    %181 = vector.broadcast %cst_109 : f32 to vector<256x8xf32>
    %182 = arith.mulf %181, %178 : vector<256x8xf32>
    %183 = arith.select %180, %178, %182 : vector<256x8xi1>, vector<256x8xf32>
    %184 = tpu.transpose %183, [1, 0] : vector<256x8xf32> -> vector<8x256xf32>
    %c0_110 = arith.constant 0 : index
    %c0_111 = arith.constant 0 : index
    %c0_112 = arith.constant 0 : index
    %185 = vector.load %arg6[%c0_110, %c0_111, %c0_112] : memref<1x8x256xf32, #tpu.memory_space<vmem>>, vector<1x8x256xf32>
    %186 = vector.shape_cast %185 : vector<1x8x256xf32> to vector<8x256xf32>
    %187 = vector.shape_cast %184 : vector<8x256xf32> to vector<1x8x256xf32>
    tpu.vector_store %arg6[%c0_110, %c0_111, %c0_112], %187 {strides = array<i32>} : memref<1x8x256xf32, #tpu.memory_space<vmem>>, vector<1x8x256xf32>,
    return
  }
  func.func @transform_0(%arg0: i32) -> (i32, i32, i32) {
    %c0_i32 = arith.constant 0 : i32
    %c0_i32_0 = arith.constant 0 : i32
    %c0_i32_1 = arith.constant 0 : i32
    return %arg0, %c0_i32, %c0_i32_0 : i32, i32, i32
  }
  func.func @transform_1(%arg0: i32) -> (i32, i32, i32) {
    %c0_i32 = arith.constant 0 : i32
    %c0_i32_0 = arith.constant 0 : i32
    %c0_i32_1 = arith.constant 0 : i32
    %c0_i32_2 = arith.constant 0 : i32
    return %c0_i32, %c0_i32_0, %c0_i32_1 : i32, i32, i32
  }
  func.func @transform_2(%arg0: i32) -> (i32, i32) {
    %c0_i32 = arith.constant 0 : i32
    %c0_i32_0 = arith.constant 0 : i32
    %c0_i32_1 = arith.constant 0 : i32
    return %c0_i32, %c0_i32_0 : i32, i32
  }
  func.func @transform_3(%arg0: i32) -> (i32, i32, i32) {
    %c0_i32 = arith.constant 0 : i32
    %c0_i32_0 = arith.constant 0 : i32
    %c0_i32_1 = arith.constant 0 : i32
    %c0_i32_2 = arith.constant 0 : i32
    return %c0_i32, %c0_i32_0, %c0_i32_1 : i32, i32, i32
  }
  func.func @transform_4(%arg0: i32) -> (i32, i32) {
    %c0_i32 = arith.constant 0 : i32
    %c0_i32_0 = arith.constant 0 : i32
    %c0_i32_1 = arith.constant 0 : i32
    return %c0_i32, %c0_i32_0 : i32, i32
  }
  func.func @transform_5(%arg0: i32) -> (i32, i32, i32) {
    %c0_i32 = arith.constant 0 : i32
    %c0_i32_0 = arith.constant 0 : i32
    %c0_i32_1 = arith.constant 0 : i32
    return %arg0, %c0_i32, %c0_i32_0 : i32, i32, i32
  }
}

</mosaic_0001>

<bundles_post_ra>
// kernel: tpu_custom_call.1
= control target key start
LH: loop header
LB: loop body
LE: loop exit
PB: predicated region body
PF: predicated region fallthrough
CT: control target
= control target key end

     0   :  { %10 = vsyncpa [#allocation5], 0  ;;  %s7147_s0 = inlined_call_operand.vmem [shape: f32[2,4,256], index: 0, kind: input, shape index: {}]   ;;  %s7148_s1 = inlined_call_operand.vmem [shape: f32[3,12,8], index: 1, kind: input, shape index: {}]   ;;  %s7149_s2 = inlined_call_operand.vmem [shape: f32[1,8], index: 2, kind: input, shape index: {}]   ;;  %s7150_s3 = inlined_call_operand.vmem [shape: f32[3,24,8], index: 3, kind: input, shape index: {}]   ;;  %s7151_s4 = inlined_call_operand.vmem [shape: f32[1,8], index: 4, kind: input, shape index: {}]   ;;  %s7152_s5 = inlined_call_operand.hbm [shape: f32[2,8,256], index: 5, kind: output, shape index: {}]  }
   0x1   :  { %12 = vsyncpa [#allocation5 + $0x1], 0  ;;  %s4987_s18 = smov 0   ;;  %s4989_s19 = smov 0  }
   0x2   :  { %s4991_s20 = smov 0   ;;  %s4993_s21 = smov 0  }
   0x3 LB: > { %s5008_s22 = sadd.s32 4294967295, %s4949_s21   ;;  %s3934_s23 = sadd.s32 4294967294, %s4949_s21   ;;  %s4949_s21 = sphi %s4993_s21, %s7174_s21   ;;  %s4945_s20 = sphi %s4991_s20, %s7173_s20   ;;  %s4941_s19 = sphi %s4989_s19, %s7172_s19   ;;  %s4937_s18 = sphi %s4987_s18, %s7171_s18  }
   0x4   : > { %s5012_s24 = sadd.s32 1, %s4949_s21   ;;  %s135_s25 = sadd.s32 1, %s4945_s20 }
   0x5   : > { %s132_s26 = ssub.s32 %s4949_s21, %s5012_s24  ;;  %p145_p0 = scmp.ne.s32.totalorder %s4945_s20, %s4941_s19 }
   0x6   : > { %p133_p1 = scmp.eq.s32.totalorder %s132_s26, 0  ;;  %p146_p2 = scmp.eq.s32.totalorder %s5008_s22, 1 }
   0x7   : > { %p151_p3 = scmp.ne.s32.totalorder %s4941_s19, %s4937_s18  ;;  %p152_p4 = scmp.eq.s32.totalorder %s3934_s23, 1 }
   0x8   : > { %s5023_s27 = scalar_select %p133_p1, %s4945_s20, %s135_s25  }
   0x9   : > { %p5025_p5 = por %p146_p2, %p145_p0  ;;  %p5029_p6 = por %p152_p4, %p151_p3 }
   0xa   : > { %p3937_p7 = scmp.ge.s32.totalorder %s4949_s21, 1  ;;  %p190_p8 = scmp.lt.s32.totalorder %s4949_s21, 3 }
   0xc   : > { %p191_p9 = pnand %p3937_p7, %p190_p8 }
   0xd   : > { %p218_p10 = scmp.lt.s32.totalorder (!%p191_p9), %s5008_s22, 1  ;;  %vm223_vm0 = vcmask (!%p191_p9), 31744   ;;  %vm232_vm1 = vcmask (!%p191_p9), 24576   ;;  %v4951_v1 = vmov (!%p191_p9), 0.0   ;;  %v3941_v4 = vld [vmem:[%s7148_s1 + $0x10] sm:$0xff] (!%p191_p9)  ;;  %vm986_vm2 = vcmask (!%p191_p9), 1043456  }
   0xe   : > { %194 = sbr.rel (%p191_p9) target bundleno = 1825 (0x721), region = 40  ;;  %252 = vst.msk [vmem:[#allocation2 + $0x29] sm:$0x1] (!%p191_p9), %vm232_vm1, %v4951_v1  ;;  %234 = vst.msk [vmem:[#allocation2 + $0x18] sm:$0x1] (!%p191_p9), %vm232_vm1, %v4951_v1  ;;  %vm269_vm3 = vcmask (!%p191_p9), 64512  }
   0xf   : > { %224 = vst.msk [vmem:[#allocation2] sm:$0xff] (!%p191_p9), %vm223_vm0, %v4951_v1  ;;  %225 = vst.msk [vmem:[#allocation2 + $0x8] sm:$0xff] (!%p191_p9), %vm223_vm0, %v4951_v1  ;;  %v3942_v5 = vld [vmem:[%s7148_s1 + $0x18] sm:$0xf] (!%p191_p9)  ;;  %vm4952_vm4 = vmmov (!%p191_p9), 1   ;;  %s4953_s14 = smov (!%p191_p9), 4  }
  0x10   : > { %229 = vst.msk [vmem:[#allocation2 + $0x198] sm:$0xff] (!%p191_p9), %vm223_vm0, %v4951_v1  ;;  %230 = vst.msk [vmem:[#allocation2 + $0x1a0] sm:$0xff] (!%p191_p9), %vm223_vm0, %v4951_v1  ;;  %v4680_v7 = vpack.c.bf16 (!%p191_p9), %v3942_v5, %v3941_v4  ;;  %s4954_s15 = smov (!%p191_p9), 8   ;;  %vm226_vm6 = vcmask (!%p191_p9), 25600   ;;  %vm889_vm7 = vcmask (!%p191_p9), 97280   ;;  %vm272_vm8 = vcmask (!%p191_p9), 58368  }
  0x11   : > { %235 = vst.msk [vmem:[#allocation2 + $0x30] sm:$0x1] (!%p191_p9), %vm232_vm1, %v4951_v1  ;;  %236 = vst.msk [vmem:[#allocation2 + $0x48] sm:$0x1] (!%p191_p9), %vm232_vm1, %v4951_v1  ;;  %vm278_vm9 = vcmask (!%p191_p9), 57344   ;;  %s215_s16 = sand.u32 (!%p191_p9), 1, %s4941_s19  }
  0x12   : > { %237 = vst.msk [vmem:[#allocation2 + $0x60] sm:$0x1] (!%p191_p9), %vm232_vm1, %v4951_v1  ;;  %238 = vst.msk [vmem:[#allocation2 + $0x78] sm:$0x1] (!%p191_p9), %vm232_vm1, %v4951_v1  ;;  %s3938_s17 = sshll.u32 (!%p191_p9), %s215_s16, 4  ;;  %s4154_s26 = sshll.u32 (!%p191_p9), %s5008_s22, 8 }
  0x13   : > { %239 = vst.msk [vmem:[#allocation2 + $0x90] sm:$0x1] (!%p191_p9), %vm232_vm1, %v4951_v1  ;;  %240 = vst.msk [vmem:[#allocation2 + $0xa8] sm:$0x1] (!%p191_p9), %vm232_vm1, %v4951_v1  ;;  %s217_s23 = scalar_lea.vmem (!%p191_p9), [#allocation4], %s3938_s17  ;;  %s7107_s7 = scalar_lea.hbm (!%p191_p9), %s7152_s5, %s4154_s26 }
  0x14   : > { %241 = vst.msk [vmem:[#allocation2 + $0xc0] sm:$0x1] (!%p191_p9), %vm232_vm1, %v4951_v1  ;;  %242 = vst.msk [vmem:[#allocation2 + $0xd8] sm:$0x1] (!%p191_p9), %vm232_vm1, %v4951_v1  ;;  %s3875_s25 = sshll.u32 (!%p191_p9), %s217_s23, 4  ;;  %s3861_s8 = scalar_lea.sflag (!%p191_p9), [#allocation5], %s215_s16  ;;  %s7102_s25 = int_to_ptr.vmem [resolvable:$true] %s3875_s25 }
  0x15   : > { %s219_s30 = scalar_select %p218_p10, %s5008_s22, 1  ;;  %243 = vst.msk [vmem:[#allocation2 + $0xf0] sm:$0x1] %vm232_vm1, %v4951_v1  ;;  %244 = vst.msk [vmem:[#allocation2 + $0x108] sm:$0x1] %vm232_vm1, %v4951_v1 }
  0x16   : > { %245 = vst.msk [vmem:[#allocation2 + $0x120] sm:$0x1] %vm232_vm1, %v4951_v1  ;;  %246 = vst.msk [vmem:[#allocation2 + $0x138] sm:$0x1] %vm232_vm1, %v4951_v1  ;;  %s4956_s22 = smov [#allocation4]  }
  0x17   : > { %s4153_s6 = sshll.u32 %s219_s30, 3  ;;  %247 = vst.msk [vmem:[#allocation2 + $0x150] sm:$0x1] %vm232_vm1, %v4951_v1  ;;  %248 = vst.msk [vmem:[#allocation2 + $0x168] sm:$0x1] %vm232_vm1, %v4951_v1  ;;  %s4891_s10 = sshll.u32 %s4956_s22, 4  ;;  %s4892_s10 = int_to_ptr.vmem [resolvable:$false] %s4891_s10 }
  0x18   : > { %s222_s9 = scalar_lea.vmem %s7147_s0, %s4153_s6  ;;  %249 = vst.msk [vmem:[#allocation2 + $0x180] sm:$0x1] %vm232_vm1, %v4951_v1  ;;  %253 = vst.msk [vmem:[#allocation2 + $0x41] sm:$0x1] %vm232_vm1, %v4951_v1  ;;  %s4893_s11 = scalar_lea.vmem %s4892_s10, 512 }
  0x19   : > { %v315_v0 = vld [vmem:[%s222_s9] sm:$0xff]  ;;  %254 = vst.msk [vmem:[#allocation2 + $0x59] sm:$0x1] %vm232_vm1, %v4951_v1  ;;  %255 = vst.msk [vmem:[#allocation2 + $0x71] sm:$0x1] %vm232_vm1, %v4951_v1  ;;  %s4887_s9 = scalar_lea.vmem %s7102_s25, 256  ;;  %p4894_p0 = scmp.lt.s32.totalorder %s7102_s25, %s4892_s10 }
  0x1a   : > { %319 = vxpose.xlu0.b32.start.end [1/1] (short) %v315_v0, 128  ;;  %256 = vst.msk [vmem:[#allocation2 + $0x89] sm:$0x1] %vm232_vm1, %v4951_v1  ;;  %257 = vst.msk [vmem:[#allocation2 + $0xa1] sm:$0x1] %vm232_vm1, %v4951_v1  ;;  %v317_v2 = vcombine.high %v315_v0, %v315_v0  ;;  %p4888_p11 = scmp.ne.s32.totalorder %s7102_s25, %s4887_s9  ;;  %p4895_p1 = scmp.lt.s32.totalorder %s4893_s11, %s4887_s9 }
  0x1b   : > { %258 = vst.msk [vmem:[#allocation2 + $0xb9] sm:$0x1] %vm232_vm1, %v4951_v1  ;;  %259 = vst.msk [vmem:[#allocation2 + $0xd1] sm:$0x1] %vm232_vm1, %v4951_v1 }
  0x1c   : > { %260 = vst.msk [vmem:[#allocation2 + $0xe9] sm:$0x1] %vm232_vm1, %v4951_v1  ;;  %261 = vst.msk [vmem:[#allocation2 + $0x101] sm:$0x1] %vm232_vm1, %v4951_v1  ;;  %p4889_p12 = pnand %p4888_p11, %p5025_p5  ;;  %p4896_p2 = por %p4895_p1, %p4894_p0 }
  0x1d   : > { %262 = vst.msk [vmem:[#allocation2 + $0x119] sm:$0x1] %vm232_vm1, %v4951_v1  ;;  %263 = vst.msk [vmem:[#allocation2 + $0x131] sm:$0x1] %vm232_vm1, %v4951_v1 }
  0x1e   : > { %264 = vst.msk [vmem:[#allocation2 + $0x149] sm:$0x1] %vm232_vm1, %v4951_v1  ;;  %265 = vst.msk [vmem:[#allocation2 + $0x161] sm:$0x1] %vm232_vm1, %v4951_v1  ;;  %p4890_p13 = pneg %p4889_p12 }
  0x1f   : > { %266 = vst.msk [vmem:[#allocation2 + $0x179] sm:$0x1] %vm232_vm1, %v4951_v1  ;;  %267 = vst.msk [vmem:[#allocation2 + $0x191] sm:$0x1] %vm232_vm1, %v4951_v1 }
  0x20   : > { %233 = vst.msk [vmem:[#allocation2] sm:$0x1] %vm232_vm1, %v4951_v1  ;;  %250 = vst.msk [vmem:[#allocation2 + $0x198] sm:$0x1] %vm232_vm1, %v4951_v1  ;;  %p4897_p3 = pnand %p4896_p2, %p4890_p13 }
  0x21   : > { %vm5123_vm5 = vmpackc.low %vm986_vm2, %vm4952_vm4  ;;  %270 = vst.msk [vmem:[#allocation3] sm:$0xff] %vm269_vm3, %v4951_v1 }
  0x22   : > { %271 = vst.msk [vmem:[#allocation3 + $0x8] sm:$0xff] %vm269_vm3, %v4951_v1  ;;  %275 = vst.msk [vmem:[#allocation3 + $0x198] sm:$0xff] %vm269_vm3, %v4951_v1  ;;  %4682 = vmatprep.subr.msk.bf16.mxu0 %vm5123_vm5, %v4680_v7 }
  0x23   : > { %276 = vst.msk [vmem:[#allocation3 + $0x1a0] sm:$0xff] %vm269_vm3, %v4951_v1  ;;  %4685 = vmatpush3.bf16.msk.msra.mxu0 %vm5123_vm5, %v4680_v7 }
  0x24   : > { %227 = vst.msk [vmem:[#allocation2 + $0x10] sm:$0x3] %vm226_vm6, %v4951_v1  ;;  %231 = vst.msk [vmem:[#allocation2 + $0x1a8] sm:$0x3] %vm226_vm6, %v4951_v1 }
  0x25   : > { %251 = vst.msk [vmem:[#allocation2 + $0x11] sm:$0x1] %vm232_vm1, %v4951_v1  ;;  %268 = vst.msk [vmem:[#allocation2 + $0x1a9] sm:$0x1] %vm232_vm1, %v4951_v1 }
  0x26   : > { %273 = vst.msk [vmem:[#allocation3 + $0x10] sm:$0x3] %vm272_vm8, %v4951_v1  ;;  %277 = vst.msk [vmem:[#allocation3 + $0x1a8] sm:$0x3] %vm272_vm8, %v4951_v1 }
  0x27   : > { %298 = vst.msk [vmem:[#allocation3 + $0x29] sm:$0x1] %vm278_vm9, %v4951_v1  ;;  %279 = vst.msk [vmem:[#allocation3] sm:$0x1] %vm278_vm9, %v4951_v1 }
  0x28   : > { %280 = vst.msk [vmem:[#allocation3 + $0x18] sm:$0x1] %vm278_vm9, %v4951_v1  ;;  %281 = vst.msk [vmem:[#allocation3 + $0x30] sm:$0x1] %vm278_vm9, %v4951_v1 }
  0x29   : > { %282 = vst.msk [vmem:[#allocation3 + $0x48] sm:$0x1] %vm278_vm9, %v4951_v1  ;;  %283 = vst.msk [vmem:[#allocation3 + $0x60] sm:$0x1] %vm278_vm9, %v4951_v1 }
  0x2a   : > { %284 = vst.msk [vmem:[#allocation3 + $0x78] sm:$0x1] %vm278_vm9, %v4951_v1  ;;  %285 = vst.msk [vmem:[#allocation3 + $0x90] sm:$0x1] %vm278_vm9, %v4951_v1 }
  0x2b   : > { %286 = vst.msk [vmem:[#allocation3 + $0xa8] sm:$0x1] %vm278_vm9, %v4951_v1  ;;  %287 = vst.msk [vmem:[#allocation3 + $0xc0] sm:$0x1] %vm278_vm9, %v4951_v1 }
  0x2c   : > { %288 = vst.msk [vmem:[#allocation3 + $0xd8] sm:$0x1] %vm278_vm9, %v4951_v1  ;;  %289 = vst.msk [vmem:[#allocation3 + $0xf0] sm:$0x1] %vm278_vm9, %v4951_v1 }
  0x2d   : > { %290 = vst.msk [vmem:[#allocation3 + $0x108] sm:$0x1] %vm278_vm9, %v4951_v1  ;;  %291 = vst.msk [vmem:[#allocation3 + $0x120] sm:$0x1] %vm278_vm9, %v4951_v1 }
  0x2e   : > { %292 = vst.msk [vmem:[#allocation3 + $0x138] sm:$0x1] %vm278_vm9, %v4951_v1  ;;  %293 = vst.msk [vmem:[#allocation3 + $0x150] sm:$0x1] %vm278_vm9, %v4951_v1 }
  0x2f   : > { %294 = vst.msk [vmem:[#allocation3 + $0x168] sm:$0x1] %vm278_vm9, %v4951_v1  ;;  %295 = vst.msk [vmem:[#allocation3 + $0x180] sm:$0x1] %vm278_vm9, %v4951_v1 }
  0x30   : > { %296 = vst.msk [vmem:[#allocation3 + $0x198] sm:$0x1] %vm278_vm9, %v4951_v1  ;;  %299 = vst.msk [vmem:[#allocation3 + $0x41] sm:$0x1] %vm278_vm9, %v4951_v1 }
  0x31   : > { %300 = vst.msk [vmem:[#allocation3 + $0x59] sm:$0x1] %vm278_vm9, %v4951_v1  ;;  %301 = vst.msk [vmem:[#allocation3 + $0x71] sm:$0x1] %vm278_vm9, %v4951_v1 }
  0x32   : > { %302 = vst.msk [vmem:[#allocation3 + $0x89] sm:$0x1] %vm278_vm9, %v4951_v1  ;;  %303 = vst.msk [vmem:[#allocation3 + $0xa1] sm:$0x1] %vm278_vm9, %v4951_v1 }
  0x33   : > { %304 = vst.msk [vmem:[#allocation3 + $0xb9] sm:$0x1] %vm278_vm9, %v4951_v1  ;;  %305 = vst.msk [vmem:[#allocation3 + $0xd1] sm:$0x1] %vm278_vm9, %v4951_v1 }
  0x34   : > { %306 = vst.msk [vmem:[#allocation3 + $0xe9] sm:$0x1] %vm278_vm9, %v4951_v1  ;;  %307 = vst.msk [vmem:[#allocation3 + $0x101] sm:$0x1] %vm278_vm9, %v4951_v1 }
  0x35   : > { %308 = vst.msk [vmem:[#allocation3 + $0x119] sm:$0x1] %vm278_vm9, %v4951_v1  ;;  %309 = vst.msk [vmem:[#allocation3 + $0x131] sm:$0x1] %vm278_vm9, %v4951_v1 }
  0x36   : > { %310 = vst.msk [vmem:[#allocation3 + $0x149] sm:$0x1] %vm278_vm9, %v4951_v1  ;;  %311 = vst.msk [vmem:[#allocation3 + $0x161] sm:$0x1] %vm278_vm9, %v4951_v1 }
  0x37   : > { %312 = vst.msk [vmem:[#allocation3 + $0x179] sm:$0x1] %vm278_vm9, %v4951_v1  ;;  %313 = vst.msk [vmem:[#allocation3 + $0x191] sm:$0x1] %vm278_vm9, %v4951_v1 }
  0x38   : > { %297 = vst.msk [vmem:[#allocation3 + $0x11] sm:$0x1] %vm278_vm9, %v4951_v1  ;;  %314 = vst.msk [vmem:[#allocation3 + $0x1a9] sm:$0x1] %vm278_vm9, %v4951_v1 }
  0x57   : > { %351 = vxpose.xlu0.b32.start.end [1/1] (short) %v317_v2, 128 }
  0x9a   : > { %v335_v3 = vpop.trf.xlu0 }
  0x9b   : > { %384 = vst.msk [vmem:[#allocation2 + $0x19] sm:$0xff] %vm223_vm0, %v335_v3 }
  0x9e   : > { %v336_v6 = vpop.trf.xlu0 }
  0x9f   : > { %385 = vst.msk [vmem:[#allocation2 + $0x21] sm:$0xff] %vm223_vm0, %v336_v6 }
  0xa2   : > { %v337_v9 = vpop.trf.xlu0  ;;  %v454_v10 = vld [vmem:[#allocation2 + $0x19] sm:$0xff] }
  0xa3   : > { %386 = vst.msk [vmem:[#allocation2 + $0x31] sm:$0xff] %vm223_vm0, %v337_v9  ;;  %564 = vrot.lane.b32.xlu1 %v454_v10, %s4953_s14 }
  0xa6   : > { %v338_v11 = vpop.trf.xlu0  ;;  %v455_v12 = vld [vmem:[#allocation2 + $0x21] sm:$0xff] }
  0xa7   : > { %387 = vst.msk [vmem:[#allocation2 + $0x39] sm:$0xff] %vm223_vm0, %v338_v11  ;;  %566 = vrot.lane.b32.xlu1 %v455_v12, %s4953_s14  ;;  %v490_v14 = vld [vmem:[#allocation2 + $0x1a] sm:$0xff]  ;;  %v491_v16 = vld [vmem:[#allocation2 + $0x22] sm:$0xff] }
  0xaa   : > { %v339_v13 = vpop.trf.xlu0  ;;  %v456_v18 = vld [vmem:[#allocation2 + $0x31] sm:$0xff] }
  0xab   : > { %388 = vst.msk [vmem:[#allocation2 + $0x49] sm:$0xff] %vm223_vm0, %v339_v13  ;;  %708 = vrot.lane.b32.xlu1 %v490_v14, %s4954_s15 }
  0xae   : > { %v340_v15 = vpop.trf.xlu0  ;;  %v457_v20 = vld [vmem:[#allocation2 + $0x39] sm:$0xff] }
  0xaf   : > { %389 = vst.msk [vmem:[#allocation2 + $0x51] sm:$0xff] %vm223_vm0, %v340_v15  ;;  %710 = vrot.lane.b32.xlu1 %v491_v16, %s4954_s15  ;;  %v492_v22 = vld [vmem:[#allocation2 + $0x32] sm:$0xff]  ;;  %v493_v24 = vld [vmem:[#allocation2 + $0x3a] sm:$0xff] }
  0xb2   : > { %v341_v17 = vpop.trf.xlu0  ;;  %v458_v26 = vld [vmem:[#allocation2 + $0x49] sm:$0xff] }
  0xb3   : > { %390 = vst.msk [vmem:[#allocation2 + $0x61] sm:$0xff] %vm223_vm0, %v341_v17  ;;  %568 = vrot.lane.b32.xlu1 %v456_v18, %s4953_s14 }
  0xb6   : > { %v342_v19 = vpop.trf.xlu0  ;;  %v459_v28 = vld [vmem:[#allocation2 + $0x51] sm:$0xff] }
  0xb7   : > { %391 = vst.msk [vmem:[#allocation2 + $0x69] sm:$0xff] %vm223_vm0, %v342_v19  ;;  %570 = vrot.lane.b32.xlu1 %v457_v20, %s4953_s14  ;;  %v494_v31 = vld [vmem:[#allocation2 + $0x4a] sm:$0xff]  ;;  %v495_v33 = vld [vmem:[#allocation2 + $0x52] sm:$0xff] }
  0xb8   : > { %v418_v20 = vld [vmem:[#allocation2 + $0x18] sm:$0xff] }
  0xba   : > { %v343_v21 = vpop.trf.xlu0  ;;  %v460_v35 = vld [vmem:[#allocation2 + $0x61] sm:$0xff] }
  0xbb   : > { %392 = vst.msk [vmem:[#allocation2 + $0x79] sm:$0xff] %vm223_vm0, %v343_v21  ;;  %712 = vrot.lane.b32.xlu1 %v492_v22, %s4954_s15 }
  0xbe   : > { %v344_v23 = vpop.trf.xlu0  ;;  %v461_v37 = vld [vmem:[#allocation2 + $0x69] sm:$0xff] }
  0xbf   : > { %393 = vst.msk [vmem:[#allocation2 + $0x81] sm:$0xff] %vm223_vm0, %v344_v23  ;;  %714 = vrot.lane.b32.xlu1 %v493_v24, %s4954_s15  ;;  %v496_v39 = vld [vmem:[#allocation2 + $0x62] sm:$0xff]  ;;  %v497_v41 = vld [vmem:[#allocation2 + $0x6a] sm:$0xff] }
  0xc2   : > { %v345_v25 = vpop.trf.xlu0  ;;  %v462_v43 = vld [vmem:[#allocation2 + $0x79] sm:$0xff] }
  0xc3   : > { %394 = vst.msk [vmem:[#allocation2 + $0x91] sm:$0xff] %vm223_vm0, %v345_v25  ;;  %572 = vrot.lane.b32.xlu1 %v458_v26, %s4953_s14  ;;  %v419_v26 = vld [vmem:[#allocation2 + $0x20] sm:$0xff] }
  0xc6   : > { %v346_v27 = vpop.trf.xlu0  ;;  %v463_v29 = vld [vmem:[#allocation2 + $0x81] sm:$0xff] }
  0xc7   : > { %395 = vst.msk [vmem:[#allocation2 + $0x99] sm:$0xff] %vm223_vm0, %v346_v27  ;;  %574 = vrot.lane.b32.xlu1 %v459_v28, %s4953_s14  ;;  %582 = vrot.lane.b32.xlu0 %v463_v29, %s4953_s14  ;;  %v498_v58 = vld [vmem:[#allocation2 + $0x7a] sm:$0xff]  ;;  %v499_v62 = vld [vmem:[#allocation2 + $0x82] sm:$0xff] }
  0xca   : > { %v347_v30 = vpop.trf.xlu0  ;;  %v464_v0 = vld [vmem:[#allocation2 + $0x91] sm:$0xff] }
  0xcb   : > { %396 = vst.msk [vmem:[#allocation2 + $0xa9] sm:$0xff] %vm223_vm0, %v347_v30  ;;  %716 = vrot.lane.b32.xlu1 %v494_v31, %s4954_s15 }
  0xce   : > { %v348_v32 = vpop.trf.xlu0  ;;  %v465_v5 = vld [vmem:[#allocation2 + $0x99] sm:$0xff] }
  0xcf   : > { %397 = vst.msk [vmem:[#allocation2 + $0xb1] sm:$0xff] %vm223_vm0, %v348_v32  ;;  %718 = vrot.lane.b32.xlu1 %v495_v33, %s4954_s15  ;;  %v500_v7 = vld [vmem:[#allocation2 + $0x92] sm:$0xff]  ;;  %v501_v12 = vld [vmem:[#allocation2 + $0x9a] sm:$0xff]  ;;  %v453_v33 = vld [vmem:[#allocation2 + $0x9] sm:$0xff] }
  0xd2   : > { %v349_v34 = vpop.trf.xlu0  ;;  %v466_v15 = vld [vmem:[#allocation2 + $0xa9] sm:$0xff] }
  0xd3   : > { %398 = vst.msk [vmem:[#allocation2 + $0xc1] sm:$0xff] %vm223_vm0, %v349_v34  ;;  %576 = vrot.lane.b32.xlu1 %v460_v35, %s4953_s14 }
  0xd6   : > { %v350_v36 = vpop.trf.xlu0  ;;  %v467_v19 = vld [vmem:[#allocation2 + $0xb1] sm:$0xff] }
  0xd7   : > { %399 = vst.msk [vmem:[#allocation2 + $0xc9] sm:$0xff] %vm223_vm0, %v350_v36  ;;  %578 = vrot.lane.b32.xlu1 %v461_v37, %s4953_s14  ;;  %v502_v24 = vld [vmem:[#allocation2 + $0xaa] sm:$0xff]  ;;  %v503_v31 = vld [vmem:[#allocation2 + $0xb2] sm:$0xff] }
  0xd8   : > { %v489_v36 = vld [vmem:[#allocation2 + $0xa] sm:$0xff] }
  0xda   : > { %v367_v38 = vpop.trf.xlu0  ;;  %v468_v34 = vld [vmem:[#allocation2 + $0xc1] sm:$0xff] }
  0xdb   : > { %400 = vst.msk [vmem:[#allocation2 + $0xd9] sm:$0xff] %vm223_vm0, %v367_v38  ;;  %720 = vrot.lane.b32.xlu1 %v496_v39, %s4954_s15  ;;  %v884_v38 = vld [vmem:[%s7148_s1] sm:$0xff]  ;;  %v885_v39 = vld [vmem:[%s7148_s1 + $0x8] sm:$0xf] }
  0xde   : > { %v368_v40 = vpop.trf.xlu0  ;;  %v469_v37 = vld [vmem:[#allocation2 + $0xc9] sm:$0xff] }
  0xdf   : > { %401 = vst.msk [vmem:[#allocation2 + $0xe1] sm:$0xff] %vm223_vm0, %v368_v40  ;;  %722 = vrot.lane.b32.xlu1 %v497_v41, %s4954_s15  ;;  %v420_v40 = vld [vmem:[#allocation2 + $0x30] sm:$0xff]  ;;  %v4686_v41 = vpack.c.bf16 %v885_v39, %v884_v38  ;;  %v452_v38 = vld [vmem:[#allocation2 + $0x1] sm:$0xff] }
  0xe0   : > { %v523_v39 = vld [vmem:[#allocation2 + $0x1a2] sm:$0xff] }
  0xe1   : > { %4688 = vmatprep.subr.msk.bf16.mxu0 %vm5123_vm5, %v4686_v41 }
  0xe2   : > { %v369_v42 = vpop.trf.xlu0  ;;  %v470_v44 = vld [vmem:[#allocation2 + $0xd9] sm:$0xff] }
  0xe3   : > { %402 = vst.msk [vmem:[#allocation2 + $0xf1] sm:$0xff] %vm223_vm0, %v369_v42  ;;  %580 = vrot.lane.b32.xlu1 %v462_v43, %s4953_s14 }
  0xe6   : > { %v370_v45 = vpop.trf.xlu0  ;;  %v471_v46 = vld [vmem:[#allocation2 + $0xe1] sm:$0xff] }
  0xe7   : > { %403 = vst.msk [vmem:[#allocation2 + $0xf9] sm:$0xff] %vm223_vm0, %v370_v45  ;;  %596 = vrot.lane.b32.xlu1 %v470_v44, %s4953_s14  ;;  %v506_v49 = vld [vmem:[#allocation2 + $0xda] sm:$0xff]  ;;  %v507_v51 = vld [vmem:[#allocation2 + $0xe2] sm:$0xff] }
  0xe8   : > { %v504_v45 = vld [vmem:[#allocation2 + $0xc2] sm:$0xff] }
  0xea   : > { %v371_v47 = vpop.trf.xlu0  ;;  %v472_v52 = vld [vmem:[#allocation2 + $0xf1] sm:$0xff] }
  0xeb   : > { %404 = vst.msk [vmem:[#allocation2 + $0x109] sm:$0xff] %vm223_vm0, %v371_v47  ;;  %598 = vrot.lane.b32.xlu1 %v471_v46, %s4953_s14  ;;  %v421_v46 = vld [vmem:[#allocation2 + $0x38] sm:$0xff] }
  0xee   : > { %v372_v48 = vpop.trf.xlu0  ;;  %v473_v55 = vld [vmem:[#allocation2 + $0xf9] sm:$0xff] }
  0xef   : > { %405 = vst.msk [vmem:[#allocation2 + $0x111] sm:$0xff] %vm223_vm0, %v372_v48  ;;  %740 = vrot.lane.b32.xlu1 %v506_v49, %s4954_s15 }
  0xf2   : > { %v373_v50 = vpop.trf.xlu0 }
  0xf3   : > { %406 = vst.msk [vmem:[#allocation2 + $0x121] sm:$0xff] %vm223_vm0, %v373_v50  ;;  %742 = vrot.lane.b32.xlu1 %v507_v51, %s4954_s15  ;;  %v505_v50 = vld [vmem:[#allocation2 + $0xca] sm:$0xff] }
  0xf6   : > { %v374_v53 = vpop.trf.xlu0  ;;  %v511_v54 = vld [vmem:[#allocation2 + $0x112] sm:$0xff] }
  0xf7   : > { %407 = vst.msk [vmem:[#allocation2 + $0x129] sm:$0xff] %vm223_vm0, %v374_v53  ;;  %600 = vrot.lane.b32.xlu1 %v472_v52, %s4953_s14  ;;  %750 = vrot.lane.b32.xlu0 %v511_v54, %s4954_s15  ;;  %v508_v52 = vld [vmem:[#allocation2 + $0xf2] sm:$0xff]  ;;  %v509_v54 = vld [vmem:[#allocation2 + $0xfa] sm:$0xff] }
  0xfa   : > { %v375_v56 = vpop.trf.xlu0 }
  0xfb   : > { %408 = vst.msk [vmem:[#allocation2 + $0x139] sm:$0xff] %vm223_vm0, %v375_v56  ;;  %602 = vrot.lane.b32.xlu1 %v473_v55, %s4953_s14  ;;  %v422_v55 = vld [vmem:[#allocation2 + $0x48] sm:$0xff] }
  0xfc   : > { %v474_v56 = vld [vmem:[#allocation2 + $0x109] sm:$0xff] }
  0xfe   : > { %v376_v57 = vpop.trf.xlu0  ;;  %v477_v59 = vld [vmem:[#allocation2 + $0x129] sm:$0xff] }
  0xff   : > { %409 = vst.msk [vmem:[#allocation2 + $0x141] sm:$0xff] %vm223_vm0, %v376_v57  ;;  %724 = vrot.lane.b32.xlu1 %v498_v58, %s4954_s15  ;;  %610 = vrot.lane.b32.xlu0 %v477_v59, %s4953_s14  ;;  %v513_v60 = vld [vmem:[#allocation2 + $0x12a] sm:$0xff] }
 0x102   : > { %v377_v61 = vpop.trf.xlu0 }
 0x103   : > { %410 = vst.msk [vmem:[#allocation2 + $0x151] sm:$0xff] %vm223_vm0, %v377_v61  ;;  %726 = vrot.lane.b32.xlu1 %v499_v62, %s4954_s15  ;;  %754 = vrot.lane.b32.xlu0 %v513_v60, %s4954_s15  ;;  %v423_v60 = vld [vmem:[#allocation2 + $0x50] sm:$0xff] }
 0x104   : > { %v475_v61 = vld [vmem:[#allocation2 + $0x111] sm:$0xff] }
 0x106   : > { %v378_v63 = vpop.trf.xlu0  ;;  %v479_v2 = vld [vmem:[#allocation2 + $0x141] sm:$0xff] }
 0x107   : > { %411 = vst.msk [vmem:[#allocation2 + $0x159] sm:$0xff] %vm223_vm0, %v378_v63  ;;  %584 = vrot.lane.b32.xlu1 %v464_v0, %s4953_s14  ;;  %614 = vrot.lane.b32.xlu0 %v479_v2, %s4953_s14  ;;  %v515_v3 = vld [vmem:[#allocation2 + $0x142] sm:$0xff] }
 0x10a   : > { %v379_v4 = vpop.trf.xlu0 }
 0x10b   : > { %412 = vst.msk [vmem:[#allocation2 + $0x169] sm:$0xff] %vm223_vm0, %v379_v4  ;;  %586 = vrot.lane.b32.xlu1 %v465_v5, %s4953_s14  ;;  %758 = vrot.lane.b32.xlu0 %v515_v3, %s4954_s15  ;;  %v510_v3 = vld [vmem:[#allocation2 + $0x10a] sm:$0xff]  ;;  %v476_v5 = vld [vmem:[#allocation2 + $0x121] sm:$0xff] }
 0x10e   : > { %v380_v6 = vpop.trf.xlu0  ;;  %v481_v9 = vld [vmem:[#allocation2 + $0x159] sm:$0xff] }
 0x10f   : > { %413 = vst.msk [vmem:[#allocation2 + $0x171] sm:$0xff] %vm223_vm0, %v380_v6  ;;  %728 = vrot.lane.b32.xlu1 %v500_v7, %s4954_s15  ;;  %618 = vrot.lane.b32.xlu0 %v481_v9, %s4953_s14  ;;  %v517_v10 = vld [vmem:[#allocation2 + $0x15a] sm:$0xff] }
 0x110   : > { %v424_v6 = vld [vmem:[#allocation2 + $0x60] sm:$0xff] }
 0x112   : > { %v381_v11 = vpop.trf.xlu0 }
 0x113   : > { %414 = vst.msk [vmem:[#allocation2 + $0x181] sm:$0xff] %vm223_vm0, %v381_v11  ;;  %730 = vrot.lane.b32.xlu1 %v501_v12, %s4954_s15  ;;  %762 = vrot.lane.b32.xlu0 %v517_v10, %s4954_s15  ;;  %v512_v11 = vld [vmem:[#allocation2 + $0x122] sm:$0xff] }
 0x114   : > { %v425_v12 = vld [vmem:[#allocation2 + $0x68] sm:$0xff] }
 0x115   : > { %v565_v13 = vpop.permute.xlu1 %564 }
 0x116   : > { %v382_v14 = vpop.trf.xlu0  ;;  %v483_v16 = vld [vmem:[#allocation2 + $0x171] sm:$0xff]  ;;  %v814_v21 = vsel %vm223_vm0, %v418_v20, %v565_v13 }
 0x117   : > { %415 = vst.msk [vmem:[#allocation2 + $0x189] sm:$0xff] %vm223_vm0, %v382_v14  ;;  %588 = vrot.lane.b32.xlu1 %v466_v15, %s4953_s14  ;;  %622 = vrot.lane.b32.xlu0 %v483_v16, %s4953_s14  ;;  %v519_v17 = vld [vmem:[#allocation2 + $0x172] sm:$0xff] }
 0x118   : > { %v478_v16 = vld [vmem:[#allocation2 + $0x139] sm:$0xff]  ;;  %v480_v20 = vld [vmem:[#allocation2 + $0x151] sm:$0xff] }
 0x119   : > { %v567_v18 = vpop.permute.xlu1 %566 }
 0x11a   : > { %v815_v27 = vsel %vm223_vm0, %v419_v26, %v567_v18  ;;  %v514_v18 = vld [vmem:[#allocation2 + $0x13a] sm:$0xff] }
 0x11b   : > { %590 = vrot.lane.b32.xlu1 %v467_v19, %s4953_s14  ;;  %766 = vrot.lane.b32.xlu0 %v519_v17, %s4954_s15 }
 0x11d   : > { %v709_v22 = vpop.permute.xlu1 %708 }
 0x11e   : > { %v5219_v23 = vsel %vm269_vm3, %v814_v21, %v709_v22  ;;  %v485_v25 = vld [vmem:[#allocation2 + $0x189] sm:$0xff]  ;;  %v516_v22 = vld [vmem:[#allocation2 + $0x152] sm:$0xff] }
 0x11f   : > { %4366 = vmatprep.mubr.msk.f32.mxu0 %vm889_vm7, %v5219_v23  ;;  %732 = vrot.lane.b32.xlu1 %v502_v24, %s4954_s15  ;;  %v521_v29 = vld [vmem:[#allocation2 + $0x18a] sm:$0xff] }
 0x120   : > { %626 = vrot.lane.b32.xlu0 %v485_v25, %s4953_s14  ;;  %v482_v25 = vld [vmem:[#allocation2 + $0x169] sm:$0xff] }
 0x121   : > { %v711_v28 = vpop.permute.xlu1 %710 }
 0x122   : > { %v5227_v30 = vsel %vm269_vm3, %v815_v27, %v711_v28  ;;  %v518_v27 = vld [vmem:[#allocation2 + $0x16a] sm:$0xff] }
 0x123   : > { %4367 = vmatmul.mubr.msk.f32.vlgmr.msra.gmra.mrb[0].mxu0 %vm889_vm7, %v5227_v30  ;;  %734 = vrot.lane.b32.xlu1 %v503_v31, %s4954_s15  ;;  %v4009_v31 = vld [vmem:[%s7148_s1 + $0x20] sm:$0xff] }
 0x124   : > { %770 = vrot.lane.b32.xlu0 %v521_v29, %s4954_s15  ;;  %4691 = vmatpush3.bf16.msk.msra.mxu0 %vm5123_vm5, %v4686_v41  ;;  %v484_v29 = vld [vmem:[#allocation2 + $0x181] sm:$0xff] }
 0x125   : > { %v569_v32 = vpop.permute.xlu1 %568 }
 0x126   : > { %v816_v42 = vsel %vm223_vm0, %v420_v40, %v569_v32  ;;  %v4010_v32 = vld [vmem:[%s7148_s1 + $0x28] sm:$0xf] }
 0x127   : > { %592 = vrot.lane.b32.xlu1 %v468_v34, %s4953_s14 }
 0x128   : > { %562 = vrot.lane.b32.xlu0 %v453_v33, %s4953_s14  ;;  %v5315_v33 = vpack.c.bf16 %v4010_v32, %v4009_v31 }
 0x129   : > { %v571_v35 = vpop.permute.xlu1 %570 }
 0x12a   : > { %v817_v47 = vsel %vm223_vm0, %v421_v46, %v571_v35  ;;  %v487_v35 = vld [vmem:[#allocation2 + $0x1a1] sm:$0xff]  ;;  %4694 = vmatprep.subr.msk.bf16.mxu0 %vm5123_vm5, %v5315_v33 }
 0x12b   : > { %594 = vrot.lane.b32.xlu1 %v469_v37, %s4953_s14  ;;  %v426_v37 = vld [vmem:[#allocation2 + $0x78] sm:$0xff]  ;;  %v488_v46 = vld [vmem:[#allocation2 + $0x2] sm:$0xff] }
 0x12c   : > { %706 = vrot.lane.b32.xlu0 %v489_v36, %s4954_s15  ;;  %v520_v36 = vld [vmem:[#allocation2 + $0x182] sm:$0xff] }
 0x12d   : > { %v713_v43 = vpop.permute.xlu1 %712 }
 0x12e   : > { %v5245_v44 = vsel %vm269_vm3, %v816_v42, %v713_v43 }
 0x12f   : > { %4369 = vmatprep.mubr.msk.f32.mxu0 %vm889_vm7, %v5245_v44  ;;  %736 = vrot.lane.b32.xlu1 %v504_v45, %s4954_s15  ;;  %v427_v45 = vld [vmem:[#allocation2 + $0x80] sm:$0xff] }
 0x130   : > { %630 = vrot.lane.b32.xlu0 %v487_v35, %s4953_s14 }
 0x131   : > { %v715_v48 = vpop.permute.xlu1 %714 }
 0x132   : > { %v5256_v49 = vsel %vm269_vm3, %v817_v47, %v715_v48 }
 0x133   : > { %4370 = vmatmul.mubr.msk.f32.gmra.mrb[2].mxu0 %vm889_vm7, %v5256_v49  ;;  %738 = vrot.lane.b32.xlu1 %v505_v50, %s4954_s15 }
 0x134   : > { %774 = vrot.lane.b32.xlu0 %v523_v39, %s4954_s15  ;;  %v436_v39 = vld [vmem:[#allocation2 + $0xf0] sm:$0xff] }
 0x135   : > { %v573_v51 = vpop.permute.xlu1 %572 }
 0x136   : > { %v818_v57 = vsel %vm223_vm0, %v422_v55, %v573_v51  ;;  %v486_v51 = vld [vmem:[#allocation2 + $0x199] sm:$0xff]  ;;  %v428_v55 = vld [vmem:[#allocation2 + $0x90] sm:$0xff] }
 0x137   : > { %744 = vrot.lane.b32.xlu1 %v508_v52, %s4954_s15 }
 0x139   : > { %v575_v53 = vpop.permute.xlu1 %574  ;;  %v583_v42 = vpop.permute.xlu0 %582 }
 0x13a   : > { %v819_v62 = vsel %vm223_vm0, %v423_v60, %v575_v53  ;;  %v823_v47 = vsel %vm223_vm0, %v427_v45, %v583_v42  ;;  %v522_v53 = vld [vmem:[#allocation2 + $0x19a] sm:$0xff] }
 0x13b   : > { %746 = vrot.lane.b32.xlu1 %v509_v54, %s4954_s15  ;;  %v429_v60 = vld [vmem:[#allocation2 + $0x98] sm:$0xff] }
 0x13d   : > { %v717_v58 = vpop.permute.xlu1 %716 }
 0x13e   : > { %v5265_v59 = vsel %vm269_vm3, %v818_v57, %v717_v58 }
 0x13f   : > { %4372 = vmatprep.mubr.msk.f32.mxu0 %vm889_vm7, %v5265_v59  ;;  %604 = vrot.lane.b32.xlu1 %v474_v56, %s4953_s14 }
 0x141   : > { %v719_v63 = vpop.permute.xlu1 %718 }
 0x142   : > { %v5272_v0 = vsel %vm269_vm3, %v819_v62, %v719_v63 }
 0x143   : > { %4373 = vmatmul.mubr.msk.f32.gmra.mrb[4].mxu0 %vm889_vm7, %v5272_v0  ;;  %606 = vrot.lane.b32.xlu1 %v475_v61, %s4953_s14 }
 0x145   : > { %v577_v2 = vpop.permute.xlu1 %576 }
 0x146   : > { %v820_v7 = vsel %vm223_vm0, %v424_v6, %v577_v2 }
 0x147   : > { %748 = vrot.lane.b32.xlu1 %v510_v3, %s4954_s15 }
 0x149   : > { %v579_v4 = vpop.permute.xlu1 %578 }
 0x14a   : > { %v821_v13 = vsel %vm223_vm0, %v425_v12, %v579_v4  ;;  %v430_v4 = vld [vmem:[#allocation2 + $0xa8] sm:$0xff] }
 0x14b   : > { %608 = vrot.lane.b32.xlu1 %v476_v5, %s4953_s14 }
 0x14d   : > { %v721_v9 = vpop.permute.xlu1 %720 }
 0x14e   : > { %v5281_v10 = vsel %vm269_vm3, %v820_v7, %v721_v9  ;;  %v431_v9 = vld [vmem:[#allocation2 + $0xb0] sm:$0xff] }
 0x14f   : > { %4375 = vmatprep.mubr.msk.f32.mxu0 %vm889_vm7, %v5281_v10  ;;  %752 = vrot.lane.b32.xlu1 %v512_v11, %s4954_s15 }
 0x151   : > { %v723_v14 = vpop.permute.xlu1 %722 }
 0x152   : > { %v5288_v15 = vsel %vm269_vm3, %v821_v13, %v723_v14 }
 0x153   : > { %4376 = vmatmul.mubr.msk.f32.gmra.mrb[6].mxu0 %vm889_vm7, %v5288_v15  ;;  %612 = vrot.lane.b32.xlu1 %v478_v16, %s4953_s14 }
 0x155   : > { %v581_v17 = vpop.permute.xlu1 %580 }
 0x156   : > { %v822_v40 = vsel %vm223_vm0, %v426_v37, %v581_v17  ;;  %v432_v17 = vld [vmem:[#allocation2 + $0xc0] sm:$0xff] }
 0x157   : > { %756 = vrot.lane.b32.xlu1 %v514_v18, %s4954_s15 }
 0x159   : > { %v5294_v19 = vpop.permute.xlu1 %596 }
 0x15b   : > { %616 = vrot.lane.b32.xlu1 %v480_v20, %s4953_s14 }
 0x15d   : > { %v5297_v21 = vpop.permute.xlu1 %598 }
 0x15f   : > { %760 = vrot.lane.b32.xlu1 %v516_v22, %s4954_s15 }
 0x161   : > { %v5300_v24 = vpop.permute.xlu1 %740 }
 0x163   : > { %620 = vrot.lane.b32.xlu1 %v482_v25, %s4953_s14 }
 0x165   : > { %v5303_v26 = vpop.permute.xlu1 %742 }
 0x167   : > { %764 = vrot.lane.b32.xlu1 %v518_v27, %s4954_s15  ;;  %v433_v27 = vld [vmem:[#allocation2 + $0xc8] sm:$0xff] }
 0x169   : > { %v5306_v28 = vpop.permute.xlu1 %600  ;;  %v751_v22 = vpop.permute.xlu0 %750 }
 0x16b   : > { %624 = vrot.lane.b32.xlu1 %v484_v29, %s4953_s14  ;;  %v434_v29 = vld [vmem:[#allocation2 + $0xd8] sm:$0xff] }
 0x16c   : > { %v830_v35 = vsel %vm223_vm0, %v434_v29, %v5294_v19  ;;  %v832_v19 = vsel %vm223_vm0, %v436_v39, %v5306_v28  ;;  %v445_v39 = vld [vmem:[#allocation2 + $0x158] sm:$0xff] }
 0x16d   : > { %v5317_v34 = vpop.permute.xlu1 %602  ;;  %v5379_v37 = vsel %vm269_vm3, %v830_v35, %v5300_v24 }
 0x16f   : > { %768 = vrot.lane.b32.xlu1 %v520_v36, %s4954_s15 }
 0x171   : > { %v725_v41 = vpop.permute.xlu1 %724 }
 0x172   : > { %v5326_v43 = vsel %vm269_vm3, %v822_v40, %v725_v41  ;;  %v611_v40 = vpop.permute.xlu0 %610 }
 0x173   : > { %4378 = vmatprep.mubr.msk.f32.mxu0 %vm889_vm7, %v5326_v43  ;;  %560 = vrot.lane.b32.xlu1 %v452_v38, %s4953_s14  ;;  %v435_v38 = vld [vmem:[#allocation2 + $0xe0] sm:$0xff] }
 0x174   : > { %v831_v41 = vsel %vm223_vm0, %v435_v38, %v5297_v21  ;;  %v444_v38 = vld [vmem:[#allocation2 + $0x150] sm:$0xff] }
 0x175   : > { %v727_v48 = vpop.permute.xlu1 %726  ;;  %v5391_v24 = vsel %vm269_vm3, %v831_v41, %v5303_v26 }
 0x176   : > { %v5334_v50 = vsel %vm269_vm3, %v823_v47, %v727_v48  ;;  %v755_v28 = vpop.permute.xlu0 %754 }
 0x177   : > { %704 = vrot.lane.b32.xlu1 %v488_v46, %s4954_s15  ;;  %4379 = vmatmul.mubr.msk.f32.gmra.mrb[8].mxu0 %vm889_vm7, %v5334_v50  ;;  %v437_v46 = vld [vmem:[#allocation2 + $0xf8] sm:$0xff] }
 0x178   : > { %v833_v21 = vsel %vm223_vm0, %v437_v46, %v5317_v34 }
 0x179   : > { %v585_v52 = vpop.permute.xlu1 %584 }
 0x17a   : > { %v824_v56 = vsel %vm223_vm0, %v428_v55, %v585_v52 }
 0x17b   : > { %628 = vrot.lane.b32.xlu1 %v486_v51, %s4953_s14  ;;  %v615_v51 = vpop.permute.xlu0 %614  ;;  %s4955_s14 = smov 16  }
 0x17d   : > { %v587_v54 = vpop.permute.xlu1 %586 }
 0x17e   : > { %v825_v61 = vsel %vm223_vm0, %v429_v60, %v587_v54  ;;  %v438_v54 = vld [vmem:[#allocation2 + $0x108] sm:$0xff] }
 0x17f   : > { %772 = vrot.lane.b32.xlu1 %v522_v53, %s4954_s15  ;;  %v439_v53 = vld [vmem:[#allocation2 + $0x110] sm:$0xff]  ;;  %v759_v60 = vpop.permute.xlu0 %758 }
 0x181   : > { %v729_v57 = vpop.permute.xlu1 %728 }
 0x182   : > { %v5343_v58 = vsel %vm269_vm3, %v824_v56, %v729_v57 }
 0x183   : > { %4381 = vmatprep.mubr.msk.f32.mxu0 %vm889_vm7, %v5343_v58 }
 0x185   : > { %v731_v62 = vpop.permute.xlu1 %730 }
 0x186   : > { %v5349_v63 = vsel %vm269_vm3, %v825_v61, %v731_v62 }
 0x187   : > { %4382 = vmatmul.mubr.msk.f32.gmra.mrb[10].mxu0 %vm889_vm7, %v5349_v63 }
 0x189   : > { %v589_v2 = vpop.permute.xlu1 %588 }
 0x18a   : > { %v826_v5 = vsel %vm223_vm0, %v430_v4, %v589_v2  ;;  %v619_v2 = vpop.permute.xlu0 %618  ;;  %v441_v4 = vld [vmem:[#allocation2 + $0x128] sm:$0xff] }
 0x18d   : > { %v591_v3 = vpop.permute.xlu1 %590 }
 0x18e   : > { %v827_v11 = vsel %vm223_vm0, %v431_v9, %v591_v3  ;;  %v440_v3 = vld [vmem:[#allocation2 + $0x120] sm:$0xff]  ;;  %v837_v9 = vsel %vm223_vm0, %v441_v4, %v611_v40 }
 0x191   : > { %v733_v6 = vpop.permute.xlu1 %732 }
 0x192   : > { %v5355_v7 = vsel %vm269_vm3, %v826_v5, %v733_v6 }
 0x193   : > { %4384 = vmatprep.mubr.msk.f32.mxu0 %vm889_vm7, %v5355_v7 }
 0x195   : > { %v735_v12 = vpop.permute.xlu1 %734 }
 0x196   : > { %v5361_v13 = vsel %vm269_vm3, %v827_v11, %v735_v12  ;;  %v5425_v12 = vsel %vm269_vm3, %v837_v9, %v755_v28 }
 0x197   : > { %4385 = vmatmul.mubr.msk.f32.gmra.mrb[12].mxu0 %vm889_vm7, %v5361_v13 }
 0x199   : > { %v593_v14 = vpop.permute.xlu1 %592 }
 0x19a   : > { %v828_v18 = vsel %vm223_vm0, %v432_v17, %v593_v14  ;;  %v442_v17 = vld [vmem:[#allocation2 + $0x138] sm:$0xff] }
 0x19d   : > { %v595_v16 = vpop.permute.xlu1 %594 }
 0x19e   : > { %v829_v31 = vsel %vm223_vm0, %v433_v27, %v595_v16  ;;  %v763_v16 = vpop.permute.xlu0 %762 }
 0x1a1   : > { %v737_v20 = vpop.permute.xlu1 %736 }
 0x1a2   : > { %v5367_v25 = vsel %vm269_vm3, %v828_v18, %v737_v20  ;;  %v443_v18 = vld [vmem:[#allocation2 + $0x140] sm:$0xff] }
 0x1a3   : > { %4387 = vmatprep.mubr.msk.f32.mxu0 %vm889_vm7, %v5367_v25  ;;  %v839_v27 = vsel %vm223_vm0, %v443_v18, %v615_v51  ;;  %v447_v51 = vld [vmem:[#allocation2 + $0x170] sm:$0xff]  ;;  %v416_v18 = vld [vmem:[#allocation2] sm:$0xff] }
 0x1a5   : > { %v739_v32 = vpop.permute.xlu1 %738 }
 0x1a6   : > { %v5375_v36 = vsel %vm269_vm3, %v829_v31, %v739_v32  ;;  %v5437_v31 = vsel %vm269_vm3, %v839_v27, %v759_v60  ;;  %v623_v32 = vpop.permute.xlu0 %622 }
 0x1a7   : > { %4388 = vmatmul.mubr.msk.f32.gmra.mrb[14].mxu0 %vm889_vm7, %v5375_v36 }
 0x1a8   : > { %4390 = vmatprep.mubr.msk.f32.mxu0 %vm889_vm7, %v5379_v37 }
 0x1a9   : > { %v745_v42 = vpop.permute.xlu1 %744 }
 0x1aa   : > { %v5394_v45 = vsel %vm269_vm3, %v832_v19, %v745_v42  ;;  %v841_v19 = vsel %vm223_vm0, %v445_v39, %v619_v2  ;;  %v767_v42 = vpop.permute.xlu0 %766  ;;  %v449_v2 = vld [vmem:[#allocation2 + $0x188] sm:$0xff] }
 0x1ab   : > { %4391 = vmatmul.mubr.msk.f32.gmra.mrb[16].mxu0 %vm889_vm7, %v5391_v24 }
 0x1ac   : > { %4393 = vmatprep.mubr.msk.f32.mxu0 %vm889_vm7, %v5394_v45 }
 0x1ad   : > { %v747_v47 = vpop.permute.xlu1 %746 }
 0x1ae   : > { %v5403_v48 = vsel %vm269_vm3, %v833_v21, %v747_v47  ;;  %v5449_v21 = vsel %vm269_vm3, %v841_v19, %v763_v16  ;;  %v627_v28 = vpop.permute.xlu0 %626  ;;  %v417_v16 = vld [vmem:[#allocation2 + $0x8] sm:$0xff] }
 0x1af   : > { %4394 = vmatmul.mubr.msk.f32.gmra.mrb[18].mxu0 %vm889_vm7, %v5403_v48 }
 0x1b1   : > { %v605_v26 = vpop.permute.xlu1 %604 }
 0x1b2   : > { %v834_v56 = vsel %vm223_vm0, %v438_v54, %v605_v26  ;;  %v446_v26 = vld [vmem:[#allocation2 + $0x168] sm:$0xff]  ;;  %v843_v54 = vsel %vm223_vm0, %v447_v51, %v623_v32  ;;  %v771_v60 = vpop.permute.xlu0 %770 }
 0x1b5   : > { %v607_v52 = vpop.permute.xlu1 %606 }
 0x1b6   : > { %v835_v55 = vsel %vm223_vm0, %v439_v53, %v607_v52  ;;  %v563_v9 = vpop.permute.xlu0 %562 }
 0x1b7   : > { %v5415_v61 = vsel %vm269_vm3, %v835_v55, %v751_v22 }
 0x1b9   : > { %v749_v57 = vpop.permute.xlu1 %748 }
 0x1ba   : > { %v5410_v34 = vsel %vm269_vm3, %v834_v56, %v749_v57  ;;  %v5461_v56 = vsel %vm269_vm3, %v843_v54, %v767_v42 }
 0x1bb   : > { %4396 = vmatprep.mubr.msk.f32.mxu0 %vm889_vm7, %v5410_v34 }
 0x1bc   : > { %4397 = vmatmul.mubr.msk.f32.gmra.mrb[20].mxu0 %vm889_vm7, %v5415_v61 }
 0x1bd   : > { %v609_v62 = vpop.permute.xlu1 %608 }
 0x1be   : > { %v836_v5 = vsel %vm223_vm0, %v440_v3, %v609_v62  ;;  %v448_v62 = vld [vmem:[#allocation2 + $0x180] sm:$0xff] }
 0x1c1   : > { %v753_v6 = vpop.permute.xlu1 %752 }
 0x1c2   : > { %v5422_v11 = vsel %vm269_vm3, %v836_v5, %v753_v6  ;;  %v845_v5 = vsel %vm223_vm0, %v449_v2, %v627_v28 }
 0x1c3   : > { %4399 = vmatprep.mubr.msk.f32.mxu0 %vm889_vm7, %v5422_v11 }
 0x1c4   : > { %4400 = vmatmul.mubr.msk.f32.gmra.mrb[22].mxu0 %vm889_vm7, %v5425_v12 }
 0x1c5   : > { %v613_v14 = vpop.permute.xlu1 %612 }
 0x1c6   : > { %v838_v20 = vsel %vm223_vm0, %v442_v17, %v613_v14  ;;  %v5473_v14 = vsel %vm269_vm3, %v845_v5, %v771_v60 }
 0x1c9   : > { %v757_v22 = vpop.permute.xlu1 %756 }
 0x1ca   : > { %v5434_v29 = vsel %vm269_vm3, %v838_v20, %v757_v22  ;;  %v813_v20 = vsel %vm223_vm0, %v417_v16, %v563_v9  ;;  %v707_v22 = vpop.permute.xlu0 %706 }
 0x1cb   : > { %4402 = vmatprep.mubr.msk.f32.mxu0 %vm889_vm7, %v5434_v29 }
 0x1cc   : > { %4403 = vmatmul.mubr.msk.f32.gmra.mrb[24].mxu0 %vm889_vm7, %v5437_v31 }
 0x1cd   : > { %v617_v35 = vpop.permute.xlu1 %616 }
 0x1ce   : > { %v840_v40 = vsel %vm223_vm0, %v444_v38, %v617_v35  ;;  %v849_v38 = vsel %vm269_vm3, %v813_v20, %v707_v22 }
 0x1d1   : > { %v761_v41 = vpop.permute.xlu1 %760 }
 0x1d2   : > { %v5446_v46 = vsel %vm269_vm3, %v840_v40, %v761_v41 }
 0x1d3   : > { %4405 = vmatprep.mubr.msk.f32.mxu0 %vm889_vm7, %v5446_v46 }
 0x1d4   : > { %4406 = vmatmul.mubr.msk.f32.gmra.mrb[26].mxu0 %vm889_vm7, %v5449_v21 }
 0x1d5   : > { %v621_v47 = vpop.permute.xlu1 %620 }
 0x1d6   : > { %v842_v52 = vsel %vm223_vm0, %v446_v26, %v621_v47 }
 0x1d9   : > { %v765_v53 = vpop.permute.xlu1 %764 }
 0x1da   : > { %v5458_v55 = vsel %vm269_vm3, %v842_v52, %v765_v53 }
 0x1db   : > { %4408 = vmatprep.mubr.msk.f32.mxu0 %vm889_vm7, %v5458_v55 }
 0x1dc   : > { %4409 = vmatmul.mubr.msk.f32.gmra.mrb[28].mxu0 %vm889_vm7, %v5461_v56 }
 0x1dd   : > { %v625_v57 = vpop.permute.xlu1 %624 }
 0x1de   : > { %v844_v3 = vsel %vm223_vm0, %v448_v62, %v625_v57 }
 0x1e1   : > { %v769_v4 = vpop.permute.xlu1 %768 }
 0x1e2   : > { %v5470_v6 = vsel %vm269_vm3, %v844_v3, %v769_v4 }
 0x1e3   : > { %4411 = vmatprep.mubr.msk.f32.mxu0 %vm889_vm7, %v5470_v6 }
 0x1e4   : > { %4412 = vmatmul.mubr.msk.f32.gmra.mrb[30].mxu0 %vm889_vm7, %v5473_v14 }
 0x1e5   : > { %v561_v17 = vpop.permute.xlu1 %560 }
 0x1e6   : > { %v812_v27 = vsel %vm223_vm0, %v416_v18, %v561_v17 }
 0x1e9   : > { %v705_v32 = vpop.permute.xlu1 %704 }
 0x1ea   : > { %v848_v35 = vsel %vm269_vm3, %v812_v27, %v705_v32 }
 0x1eb   : > { %4418 = vmatprep.mubr.msk.f32.mxu0 %vm889_vm7, %v848_v35 }
 0x1ec   : > { %4419 = vmatmul.mubr.msk.f32.vlgmr.msra.gmra.mrb[0].mxu0 %vm889_vm7, %v849_v38 }
 0x1ed   : > { %4697 = vmatpush3.bf16.msk.msra.mxu0 %vm5123_vm5, %v5315_v33  ;;  %4421 = vmatprep.mubr.msk.f32.mxu0 %vm889_vm7, %v5219_v23  ;;  %v629_v8 = vpop.permute.xlu1 %628  ;;  %v450_v23 = vld [vmem:[#allocation2 + $0x198] sm:$0xff] }
 0x1f0   : > { %4422 = vmatmul.mubr.msk.f32.gmra.mrb[2].mxu0 %vm889_vm7, %v5227_v30  ;;  %v631_v30 = vpop.permute.xlu0 %630 }
 0x1f1   : > { %4424 = vmatprep.mubr.msk.f32.mxu0 %vm889_vm7, %v5245_v44 }
 0x1f4   : > { %4425 = vmatmul.mubr.msk.f32.gmra.mrb[4].mxu0 %vm889_vm7, %v5256_v49 }
 0x1f5   : > { %4427 = vmatprep.mubr.msk.f32.mxu0 %vm889_vm7, %v5265_v59 }
 0x1f8   : > { %4428 = vmatmul.mubr.msk.f32.gmra.mrb[6].mxu0 %vm889_vm7, %v5272_v0 }
 0x1f9   : > { %4430 = vmatprep.mubr.msk.f32.mxu0 %vm889_vm7, %v5281_v10 }
 0x1fc   : > { %4431 = vmatmul.mubr.msk.f32.gmra.mrb[8].mxu0 %vm889_vm7, %v5288_v15 }
 0x1fd   : > { %4433 = vmatprep.mubr.msk.f32.mxu0 %vm889_vm7, %v5326_v43 }
 0x200   : > { %4434 = vmatmul.mubr.msk.f32.gmra.mrb[10].mxu0 %vm889_vm7, %v5334_v50 }
 0x201   : > { %4436 = vmatprep.mubr.msk.f32.mxu0 %vm889_vm7, %v5343_v58 }
 0x204   : > { %4437 = vmatmul.mubr.msk.f32.gmra.mrb[12].mxu0 %vm889_vm7, %v5349_v63 }
 0x205   : > { %4439 = vmatprep.mubr.msk.f32.mxu0 %vm889_vm7, %v5355_v7 }
 0x208   : > { %4440 = vmatmul.mubr.msk.f32.gmra.mrb[14].mxu0 %vm889_vm7, %v5361_v13 }
 0x209   : > { %4442 = vmatprep.mubr.msk.f32.mxu0 %vm889_vm7, %v5367_v25 }
 0x20c   : > { %4443 = vmatmul.mubr.msk.f32.gmra.mrb[16].mxu0 %vm889_vm7, %v5375_v36 }
 0x20d   : > { %4445 = vmatprep.mubr.msk.f32.mxu0 %vm889_vm7, %v5379_v37 }
 0x210   : > { %4446 = vmatmul.mubr.msk.f32.gmra.mrb[18].mxu0 %vm889_vm7, %v5391_v24 }
 0x211   : > { %4448 = vmatprep.mubr.msk.f32.mxu0 %vm889_vm7, %v5394_v45 }
 0x214   : > { %4449 = vmatmul.mubr.msk.f32.gmra.mrb[20].mxu0 %vm889_vm7, %v5403_v48 }
 0x215   : > { %4451 = vmatprep.mubr.msk.f32.mxu0 %vm889_vm7, %v5410_v34 }
 0x218   : > { %4452 = vmatmul.mubr.msk.f32.gmra.mrb[22].mxu0 %vm889_vm7, %v5415_v61 }
 0x219   : > { %4454 = vmatprep.mubr.msk.f32.mxu0 %vm889_vm7, %v5422_v11 }
 0x21c   : > { %4455 = vmatmul.mubr.msk.f32.gmra.mrb[24].mxu0 %vm889_vm7, %v5425_v12 }
 0x21d   : > { %4457 = vmatprep.mubr.msk.f32.mxu0 %vm889_vm7, %v5434_v29 }
 0x220   : > { %4458 = vmatmul.mubr.msk.f32.gmra.mrb[26].mxu0 %vm889_vm7, %v5437_v31 }
 0x221   : > { %4460 = vmatprep.mubr.msk.f32.mxu0 %vm889_vm7, %v5446_v46 }
 0x224   : > { %4461 = vmatmul.mubr.msk.f32.gmra.mrb[28].mxu0 %vm889_vm7, %v5449_v21 }
 0x225   : > { %4463 = vmatprep.mubr.msk.f32.mxu0 %vm889_vm7, %v5458_v55 }
 0x228   : > { %4464 = vmatmul.mubr.msk.f32.gmra.mrb[30].mxu0 %vm889_vm7, %v5461_v56 }
 0x229   : > { %4470 = vmatprep.mubr.msk.f32.mxu0 %vm889_vm7, %v5245_v44  ;;  %v846_v44 = vsel %vm223_vm0, %v450_v23, %v629_v8 }
 0x22c   : > { %4471 = vmatmul.mubr.msk.f32.vlgmr.msra.gmra.mrb[0].mxu0 %vm889_vm7, %v5256_v49  ;;  %v773_v49 = vpop.permute.xlu1 %772 }
 0x22d   : > { %4473 = vmatprep.mubr.msk.f32.mxu0 %vm889_vm7, %v5265_v59  ;;  %v451_v59 = vld [vmem:[#allocation2 + $0x1a0] sm:$0xff] }
 0x230   : > { %4474 = vmatmul.mubr.msk.f32.gmra.mrb[2].mxu0 %vm889_vm7, %v5272_v0  ;;  %v882_v0 = vsel %vm269_vm3, %v846_v44, %v773_v49 }
 0x231   : > { %4476 = vmatprep.mubr.msk.f32.mxu0 %vm889_vm7, %v5281_v10  ;;  %v847_v10 = vsel %vm223_vm0, %v451_v59, %v631_v30 }
 0x234   : > { %4477 = vmatmul.mubr.msk.f32.gmra.mrb[4].mxu0 %vm889_vm7, %v5288_v15  ;;  %v775_v15 = vpop.permute.xlu0 %774 }
 0x235   : > { %4479 = vmatprep.mubr.msk.f32.mxu0 %vm889_vm7, %v5326_v43  ;;  %v883_v33 = vsel %vm269_vm3, %v847_v10, %v775_v15  ;;  %v5617_v43 = vld [vmem:[%s7149_s2] ss:$0 sm:$0xff] }
 0x238   : > { %4480 = vmatmul.mubr.msk.f32.gmra.mrb[6].mxu0 %vm889_vm7, %v5334_v50 }
 0x239   : > { %4482 = vmatprep.mubr.msk.f32.mxu0 %vm889_vm7, %v5343_v58 }
 0x23c   : > { %4483 = vmatmul.mubr.msk.f32.gmra.mrb[8].mxu0 %vm889_vm7, %v5349_v63 }
 0x23d   : > { %4485 = vmatprep.mubr.msk.f32.mxu0 %vm889_vm7, %v5355_v7 }
 0x240   : > { %4486 = vmatmul.mubr.msk.f32.gmra.mrb[10].mxu0 %vm889_vm7, %v5361_v13 }
 0x241   : > { %4488 = vmatprep.mubr.msk.f32.mxu0 %vm889_vm7, %v5367_v25 }
 0x244   : > { %4489 = vmatmul.mubr.msk.f32.gmra.mrb[12].mxu0 %vm889_vm7, %v5375_v36 }
 0x245   : > { %4491 = vmatprep.mubr.msk.f32.mxu0 %vm889_vm7, %v5379_v37 }
 0x248   : > { %4492 = vmatmul.mubr.msk.f32.gmra.mrb[14].mxu0 %vm889_vm7, %v5391_v24 }
 0x249   : > { %4494 = vmatprep.mubr.msk.f32.mxu0 %vm889_vm7, %v5394_v45 }
 0x24c   : > { %4495 = vmatmul.mubr.msk.f32.gmra.mrb[16].mxu0 %vm889_vm7, %v5403_v48 }
 0x24d   : > { %4497 = vmatprep.mubr.msk.f32.mxu0 %vm889_vm7, %v5410_v34 }
 0x250   : > { %4498 = vmatmul.mubr.msk.f32.gmra.mrb[18].mxu0 %vm889_vm7, %v5415_v61 }
 0x251   : > { %4500 = vmatprep.mubr.msk.f32.mxu0 %vm889_vm7, %v5422_v11 }
 0x254   : > { %4501 = vmatmul.mubr.msk.f32.gmra.mrb[20].mxu0 %vm889_vm7, %v5425_v12 }
 0x255   : > { %4503 = vmatprep.mubr.msk.f32.mxu0 %vm889_vm7, %v5434_v29 }
 0x258   : > { %4504 = vmatmul.mubr.msk.f32.gmra.mrb[22].mxu0 %vm889_vm7, %v5437_v31 }
 0x259   : > { %4506 = vmatprep.mubr.msk.f32.mxu0 %vm889_vm7, %v5446_v46 }
 0x25c   : > { %4507 = vmatmul.mubr.msk.f32.gmra.mrb[24].mxu0 %vm889_vm7, %v5449_v21 }
 0x25d   : > { %4509 = vmatprep.mubr.msk.f32.mxu0 %vm889_vm7, %v5458_v55 }
 0x260   : > { %4510 = vmatmul.mubr.msk.f32.gmra.mrb[26].mxu0 %vm889_vm7, %v5461_v56 }
 0x261   : > { %4512 = vmatprep.mubr.msk.f32.mxu0 %vm889_vm7, %v5470_v6 }
 0x264   : > { %4513 = vmatmul.mubr.msk.f32.gmra.mrb[28].mxu0 %vm889_vm7, %v5473_v14 }
 0x265   : > { %4515 = vmatprep.mubr.msk.f32.mxu0 %vm889_vm7, %v882_v0 }
 0x268   : > { %4516 = vmatmul.mubr.msk.f32.gmra.mrb[30].mxu0 %vm889_vm7, %v883_v33 }
 0x2ff   : > { %v4472_v50 = vpop.f32.mrb[0].mxu0 }
 0x300   : > { %v5620_v58 = vadd.f32 %v4472_v50, %v5617_v43  ;;  %v1527_v63 = vpop.f32.mrb[1].mxu0 }
 0x301   : > { %v5623_v7 = vadd.f32 %v5617_v43, %v1527_v63 }
 0x302   : > { %v1758_v13 = vsel %vm269_vm3, %v5620_v58, 0.0 }
 0x303   : > { %v1757_v25 = vsel %vm269_vm3, %v5623_v7, 0.0  ;;  %v4475_v36 = vpop.f32.mrb[2].mxu0 }
 0x304   : > { %v1537_v37 = vpop.f32.mrb[3].mxu0  ;;  %v5630_v24 = vadd.f32 %v4475_v36, %v5617_v43  ;;  %v1759_v48 = vadd.f32 %v1758_v13, %v1757_v25 }
 0x305   : > { %v5633_v45 = vadd.f32 %v5617_v43, %v1537_v37 }
 0x306   : > { %v1762_v29 = vsel %vm269_vm3, %v5630_v24, 0.0 }
 0x307   : > { %v1760_v34 = vsel %vm269_vm3, %v5633_v45, 0.0  ;;  %v4478_v61 = vpop.f32.mrb[4].mxu0 }
 0x308   : > { %v1761_v11 = vadd.f32 %v1760_v34, %v1759_v48  ;;  %v1547_v12 = vpop.f32.mrb[5].mxu0  ;;  %v5640_v31 = vadd.f32 %v4478_v61, %v5617_v43 }
 0x309   : > { %v5643_v39 = vadd.f32 %v5617_v43, %v1547_v12 }
 0x30a   : > { %v1763_v40 = vadd.f32 %v1762_v29, %v1761_v11  ;;  %v1766_v21 = vsel %vm269_vm3, %v5640_v31, 0.0 }
 0x30b   : > { %v1764_v41 = vsel %vm269_vm3, %v5643_v39, 0.0  ;;  %v4481_v19 = vpop.f32.mrb[6].mxu0 }
 0x30c   : > { %v1765_v42 = vadd.f32 %v1764_v41, %v1763_v40  ;;  %v1557_v46 = vpop.f32.mrb[7].mxu0  ;;  %v5650_v47 = vadd.f32 %v4481_v19, %v5617_v43 }
 0x30d   : > { %v5653_v28 = vadd.f32 %v5617_v43, %v1557_v46 }
 0x30e   : > { %v1767_v26 = vadd.f32 %v1766_v21, %v1765_v42  ;;  %v1770_v55 = vsel %vm269_vm3, %v5650_v47, 0.0 }
 0x30f   : > { %v1768_v51 = vsel %vm269_vm3, %v5653_v28, 0.0  ;;  %v4484_v52 = vpop.f32.mrb[8].mxu0 }
 0x310   : > { %v1769_v53 = vadd.f32 %v1768_v51, %v1767_v26  ;;  %v1567_v54 = vpop.f32.mrb[9].mxu0  ;;  %v5660_v56 = vadd.f32 %v4484_v52, %v5617_v43 }
 0x311   : > { %v5663_v57 = vadd.f32 %v5617_v43, %v1567_v54 }
 0x312   : > { %v1771_v60 = vadd.f32 %v1770_v55, %v1769_v53  ;;  %v1774_v5 = vsel %vm269_vm3, %v5660_v56, 0.0 }
 0x313   : > { %v1772_v62 = vsel %vm269_vm3, %v5663_v57, 0.0  ;;  %v4487_v2 = vpop.f32.mrb[10].mxu0 }
 0x314   : > { %v1773_v3 = vadd.f32 %v1772_v62, %v1771_v60  ;;  %v1577_v4 = vpop.f32.mrb[11].mxu0  ;;  %v5670_v6 = vadd.f32 %v4487_v2, %v5617_v43 }
 0x315   : > { %v5673_v9 = vadd.f32 %v5617_v43, %v1577_v4 }
 0x316   : > { %v1775_v14 = vadd.f32 %v1774_v5, %v1773_v3  ;;  %v1778_v22 = vsel %vm269_vm3, %v5670_v6, 0.0 }
 0x317   : > { %v1776_v16 = vsel %vm269_vm3, %v5673_v9, 0.0  ;;  %v4490_v17 = vpop.f32.mrb[12].mxu0 }
 0x318   : > { %v1777_v18 = vadd.f32 %v1776_v16, %v1775_v14  ;;  %v1587_v20 = vpop.f32.mrb[13].mxu0  ;;  %v5680_v27 = vadd.f32 %v4490_v17, %v5617_v43 }
 0x319   : > { %v5683_v32 = vadd.f32 %v5617_v43, %v1587_v20 }
 0x31a   : > { %v1779_v35 = vadd.f32 %v1778_v22, %v1777_v18  ;;  %v1782_v44 = vsel %vm269_vm3, %v5680_v27, 0.0 }
 0x31b   : > { %v1780_v38 = vsel %vm269_vm3, %v5683_v32, 0.0  ;;  %v4493_v8 = vpop.f32.mrb[14].mxu0 }
 0x31c   : > { %v1781_v23 = vadd.f32 %v1780_v38, %v1779_v35  ;;  %v1597_v30 = vpop.f32.mrb[15].mxu0  ;;  %v5690_v49 = vadd.f32 %v4493_v8, %v5617_v43 }
 0x31d   : > { %v5693_v59 = vadd.f32 %v5617_v43, %v1597_v30 }
 0x31e   : > { %v1783_v0 = vadd.f32 %v1782_v44, %v1781_v23  ;;  %v1786_v63 = vsel %vm269_vm3, %v5690_v49, 0.0 }
 0x31f   : > { %v1784_v10 = vsel %vm269_vm3, %v5693_v59, 0.0  ;;  %v4496_v15 = vpop.f32.mrb[16].mxu0 }
 0x320   : > { %v1785_v33 = vadd.f32 %v1784_v10, %v1783_v0  ;;  %v1607_v50 = vpop.f32.mrb[17].mxu0  ;;  %v5700_v13 = vadd.f32 %v4496_v15, %v5617_v43 }
 0x321   : > { %v5703_v25 = vadd.f32 %v5617_v43, %v1607_v50 }
 0x322   : > { %v1787_v36 = vadd.f32 %v1786_v63, %v1785_v33  ;;  %v1790_v11 = vsel %vm269_vm3, %v5700_v13, 0.0 }
 0x323   : > { %v1788_v37 = vsel %vm269_vm3, %v5703_v25, 0.0  ;;  %v4499_v48 = vpop.f32.mrb[18].mxu0 }
 0x324   : > { %v1789_v34 = vadd.f32 %v1788_v37, %v1787_v36  ;;  %v1617_v61 = vpop.f32.mrb[19].mxu0  ;;  %v5710_v12 = vadd.f32 %v4499_v48, %v5617_v43 }
 0x325   : > { %v5713_v29 = vadd.f32 %v5617_v43, %v1617_v61 }
 0x326   : > { %v1791_v40 = vadd.f32 %v1790_v11, %v1789_v34  ;;  %v1794_v21 = vsel %vm269_vm3, %v5710_v12, 0.0 }
 0x327   : > { %v1792_v41 = vsel %vm269_vm3, %v5713_v29, 0.0  ;;  %v4502_v19 = vpop.f32.mrb[20].mxu0 }
 0x328   : > { %v1793_v42 = vadd.f32 %v1792_v41, %v1791_v40  ;;  %v1627_v46 = vpop.f32.mrb[21].mxu0  ;;  %v5720_v26 = vadd.f32 %v4502_v19, %v5617_v43 }
 0x329   : > { %v5723_v51 = vadd.f32 %v5617_v43, %v1627_v46 }
 0x32a   : > { %v1795_v52 = vadd.f32 %v1794_v21, %v1793_v42  ;;  %v1798_v62 = vsel %vm269_vm3, %v5720_v26, 0.0 }
 0x32b   : > { %v1796_v53 = vsel %vm269_vm3, %v5723_v51, 0.0  ;;  %v4505_v54 = vpop.f32.mrb[22].mxu0 }
 0x32c   : > { %v1797_v55 = vadd.f32 %v1796_v53, %v1795_v52  ;;  %v1637_v60 = vpop.f32.mrb[23].mxu0  ;;  %v1748_v2 = vadd.f32 %v4505_v54, %v5617_v43 }
 0x32d   : > { %v1747_v3 = vadd.f32 %v5617_v43, %v1637_v60 }
 0x32e   : > { %v1799_v4 = vadd.f32 %v1798_v62, %v1797_v55  ;;  %v1802_v18 = vsel %vm269_vm3, %v1748_v2, 0.0 }
 0x32f   : > { %v1800_v5 = vsel %vm269_vm3, %v1747_v3, 0.0  ;;  %v4508_v14 = vpop.f32.mrb[24].mxu0 }
 0x330   : > { %v1801_v16 = vadd.f32 %v1800_v5, %v1799_v4  ;;  %v1647_v17 = vpop.f32.mrb[25].mxu0  ;;  %v1750_v20 = vadd.f32 %v4508_v14, %v5617_v43  ;;  %v2161_v4 = vld [vmem:[#allocation3 + $0x1] sm:$0xff] }
 0x331   : > { %v1749_v22 = vadd.f32 %v5617_v43, %v1647_v17  ;;  %2269 = vrot.lane.b32.xlu1 %v2161_v4, %s4954_s15 }
 0x332   : > { %v1803_v35 = vadd.f32 %v1802_v18, %v1801_v16  ;;  %v1806_v44 = vsel %vm269_vm3, %v1750_v20, 0.0 }
 0x333   : > { %v1804_v38 = vsel %vm269_vm3, %v1749_v22, 0.0  ;;  %v4511_v8 = vpop.f32.mrb[26].mxu0 }
 0x334   : > { %v1805_v23 = vadd.f32 %v1804_v38, %v1803_v35  ;;  %v1657_v30 = vpop.f32.mrb[27].mxu0  ;;  %v1752_v0 = vadd.f32 %v4511_v8, %v5617_v43 }
 0x335   : > { %v1751_v10 = vadd.f32 %v5617_v43, %v1657_v30 }
 0x336   : > { %v1807_v15 = vadd.f32 %v1806_v44, %v1805_v23  ;;  %v1810_v37 = vsel %vm269_vm3, %v1752_v0, 0.0 }
 0x337   : > { %v1808_v33 = vsel %vm269_vm3, %v1751_v10, 0.0  ;;  %v4514_v50 = vpop.f32.mrb[28].mxu0 }
 0x338   : > { %v1809_v63 = vadd.f32 %v1808_v33, %v1807_v15  ;;  %v1667_v36 = vpop.f32.mrb[29].mxu0  ;;  %v1754_v48 = vadd.f32 %v4514_v50, %v5617_v43 }
 0x339   : > { %v1753_v34 = vadd.f32 %v5617_v43, %v1667_v36 }
 0x33a   : > { %v1811_v61 = vadd.f32 %v1810_v37, %v1809_v63  ;;  %v1814_v42 = vsel %vm269_vm3, %v1754_v48, 0.0 }
 0x33b   : > { %v1812_v11 = vsel %vm269_vm3, %v1753_v34, 0.0  ;;  %v4517_v40 = vpop.f32.mrb[30].mxu0 }
 0x33c   : > { %v1813_v41 = vadd.f32 %v1812_v11, %v1811_v61  ;;  %v1677_v19 = vpop.f32.mrb[31].mxu0  ;;  %v1756_v46 = vadd.f32 %v4517_v40, %v5617_v43 }
 0x33d   : > { %v1755_v21 = vadd.f32 %v5617_v43, %v1677_v19 }
 0x33e   : > { %v1815_v52 = vadd.f32 %v1814_v42, %v1813_v41  ;;  %v1818_v55 = vsel %vm269_vm3, %v1756_v46, 0.0 }
 0x33f   : > { %v1816_v53 = vsel %vm269_vm3, %v1755_v21, 0.0 }
 0x340   : > { %v1817_v54 = vadd.f32 %v1816_v53, %v1815_v52 }
 0x342   : > { %v1819_v60 = vadd.f32 %v1818_v55, %v1817_v54 }
 0x344   : > { %v1820_v62 = vrot.slane %v1819_v60, 4 }
 0x346   : > { %v1821_v5 = vadd.f32 %v1820_v62, %v1819_v60 }
 0x348   : > { %v1822_v14 = vrot.slane %v1821_v5, 2 }
 0x34a   : > { %v1823_v16 = vadd.f32 %v1822_v14, %v1821_v5 }
 0x34c   : > { %v1824_v17 = vrot.slane %v1823_v16, 1 }
 0x34e   : > { %v1825_v18 = vadd.f32 %v1824_v17, %v1823_v16 }
 0x350   : > { %v1827_v35 = vmul.f32 0.00390625, %v1825_v18 }
 0x352   : > { %v5751_v38 = vsub.f32 %v5673_v9, %v1827_v35  ;;  %v5754_v43 = vsub.f32 %v5670_v6, %v1827_v35  ;;  %v5757_v8 = vsub.f32 %v5683_v32, %v1827_v35  ;;  %v5760_v23 = vsub.f32 %v5680_v27, %v1827_v35 }
 0x353   : > { %v5763_v30 = vsub.f32 %v5693_v59, %v1827_v35  ;;  %v5766_v44 = vsub.f32 %v5690_v49, %v1827_v35  ;;  %v5769_v15 = vsub.f32 %v5703_v25, %v1827_v35  ;;  %v5772_v9 = vsub.f32 %v5700_v13, %v1827_v35 }
 0x354   : > { %v5775_v6 = vsub.f32 %v5713_v29, %v1827_v35  ;;  %v5778_v32 = vsub.f32 %v5710_v12, %v1827_v35  ;;  %v5781_v27 = vsub.f32 %v5723_v51, %v1827_v35  ;;  %v5784_v59 = vsub.f32 %v5720_v26, %v1827_v35 }
 0x355   : > { %v5786_v49 = vsub.f32 %v1747_v3, %v1827_v35  ;;  %v5788_v33 = vsub.f32 %v1748_v2, %v1827_v35  ;;  %v5790_v25 = vsub.f32 %v1749_v22, %v1827_v35  ;;  %v5792_v13 = vsub.f32 %v1750_v20, %v1827_v35 }
 0x356   : > { %v5794_v50 = vsub.f32 %v1751_v10, %v1827_v35  ;;  %v5796_v29 = vsub.f32 %v1752_v0, %v1827_v35  ;;  %v5798_v12 = vsub.f32 %v1753_v34, %v1827_v35  ;;  %v5800_v63 = vsub.f32 %v1754_v48, %v1827_v35 }
 0x357   : > { %v5802_v51 = vsub.f32 %v1755_v21, %v1827_v35  ;;  %v5804_v26 = vsub.f32 %v1756_v46, %v1827_v35  ;;  %v5807_v3 = vsub.f32 %v5623_v7, %v1827_v35  ;;  %v5810_v2 = vsub.f32 %v5620_v58, %v1827_v35 }
 0x358   : > { %v5813_v20 = vsub.f32 %v5633_v45, %v1827_v35  ;;  %v5816_v22 = vsub.f32 %v5630_v24, %v1827_v35  ;;  %v5823_v36 = vsub.f32 %v5643_v39, %v1827_v35  ;;  %v5828_v58 = vsub.f32 %v5640_v31, %v1827_v35 }
 0x359   : > { %v1860_v0 = vmul.f32 %v5807_v3, %v5807_v3  ;;  %v1861_v10 = vmul.f32 %v5810_v2, %v5810_v2  ;;  %v5835_v34 = vsub.f32 %v5653_v28, %v1827_v35  ;;  %v5841_v31 = vsub.f32 %v5650_v47, %v1827_v35 }
 0x35a   : > { %v1862_v7 = vmul.f32 %v5813_v20, %v5813_v20  ;;  %v1863_v45 = vmul.f32 %v5816_v22, %v5816_v22  ;;  %v1864_v39 = vmul.f32 %v5823_v36, %v5823_v36  ;;  %v1865_v40 = vmul.f32 %v5828_v58, %v5828_v58 }
 0x35b   : > { %v1892_v24 = vsel %vm269_vm3, %v1860_v0, 0.0  ;;  %v1893_v37 = vsel %vm269_vm3, %v1861_v10, 0.0  ;;  %v5847_v42 = vsub.f32 %v5663_v57, %v1827_v35  ;;  %v1866_v28 = vmul.f32 %v5835_v34, %v5835_v34  ;;  %v2162_v0 = vld [vmem:[#allocation3 + $0x9] sm:$0xff] }
 0x35c   : > { %v1894_v48 = vadd.f32 %v1893_v37, %v1892_v24  ;;  %v1895_v61 = vsel %vm269_vm3, %v1862_v7, 0.0  ;;  %v1897_v41 = vsel %vm269_vm3, %v1863_v45, 0.0  ;;  %v1899_v46 = vsel %vm269_vm3, %v1864_v39, 0.0  ;;  %2271 = vrot.lane.b32.xlu0 %v2162_v0, %s4954_s15 }
 0x35d   : > { %v5853_v52 = vsub.f32 %v5660_v56, %v1827_v35  ;;  %v1867_v47 = vmul.f32 %v5841_v31, %v5841_v31  ;;  %v1901_v53 = vsel %vm269_vm3, %v1865_v40, 0.0  ;;  %v1868_v57 = vmul.f32 %v5847_v42, %v5847_v42 }
 0x35e   : > { %v1896_v11 = vadd.f32 %v1895_v61, %v1894_v48  ;;  %v1903_v55 = vsel %vm269_vm3, %v1866_v28, 0.0  ;;  %v1870_v5 = vmul.f32 %v5751_v38, %v5751_v38  ;;  %v1871_v17 = vmul.f32 %v5754_v43, %v5754_v43 }
 0x35f   : > { %v1869_v60 = vmul.f32 %v5853_v52, %v5853_v52  ;;  %v1905_v62 = vsel %vm269_vm3, %v1867_v47, 0.0  ;;  %v1907_v14 = vsel %vm269_vm3, %v1868_v57, 0.0  ;;  %v1872_v1 = vmul.f32 %v5757_v8, %v5757_v8 }
 0x360   : > { %v1898_v19 = vadd.f32 %v1897_v41, %v1896_v11  ;;  %v1911_v10 = vsel %vm269_vm3, %v1870_v5, 0.0  ;;  %v1873_v45 = vmul.f32 %v5760_v23, %v5760_v23  ;;  %v1913_v24 = vsel %vm269_vm3, %v1871_v17, 0.0 }
 0x361   : > { %v1909_v18 = vsel %vm269_vm3, %v1869_v60, 0.0  ;;  %v1874_v48 = vmul.f32 %v5763_v30, %v5763_v30  ;;  %v1915_v39 = vsel %vm269_vm3, %v1872_v1, 0.0  ;;  %v1875_v11 = vmul.f32 %v5766_v44, %v5766_v44 }
 0x362   : > { %v1900_v21 = vadd.f32 %v1899_v46, %v1898_v19  ;;  %v1917_v40 = vsel %vm269_vm3, %v1873_v45, 0.0  ;;  %v1876_v19 = vmul.f32 %v5769_v15, %v5769_v15 }
 0x363   : > { %v1919_v28 = vsel %vm269_vm3, %v1874_v48, 0.0  ;;  %v1921_v47 = vsel %vm269_vm3, %v1875_v11, 0.0 }
 0x364   : > { %v1902_v54 = vadd.f32 %v1901_v53, %v1900_v21  ;;  %v1877_v21 = vmul.f32 %v5772_v9, %v5772_v9  ;;  %v1923_v57 = vsel %vm269_vm3, %v1876_v19, 0.0 }
 0x366   : > { %v1904_v56 = vadd.f32 %v1903_v55, %v1902_v54  ;;  %v1878_v54 = vmul.f32 %v5775_v6, %v5775_v6  ;;  %v1925_v60 = vsel %vm269_vm3, %v1877_v21, 0.0 }
 0x368   : > { %v1906_v4 = vadd.f32 %v1905_v62, %v1904_v56  ;;  %v1879_v56 = vmul.f32 %v5778_v32, %v5778_v32  ;;  %v1927_v5 = vsel %vm269_vm3, %v1878_v54, 0.0 }
 0x36a   : > { %v1908_v16 = vadd.f32 %v1907_v14, %v1906_v4  ;;  %v1880_v4 = vmul.f32 %v5781_v27, %v5781_v27  ;;  %v1929_v17 = vsel %vm269_vm3, %v1879_v56, 0.0 }
 0x36c   : > { %v1910_v35 = vadd.f32 %v1909_v18, %v1908_v16  ;;  %v1881_v16 = vmul.f32 %v5784_v59, %v5784_v59  ;;  %v1931_v0 = vsel %vm269_vm3, %v1880_v4, 0.0 }
 0x36e   : > { %v1912_v7 = vadd.f32 %v1911_v10, %v1910_v35  ;;  %v1882_v35 = vmul.f32 %v5786_v49, %v5786_v49  ;;  %v1883_v10 = vmul.f32 %v5788_v33, %v5788_v33 }
 0x370   : > { %v1914_v37 = vadd.f32 %v1913_v24, %v1912_v7  ;;  %v1933_v7 = vsel %vm269_vm3, %v1881_v16, 0.0  ;;  %v1884_v24 = vmul.f32 %v5790_v25, %v5790_v25 }
 0x372   : > { %v1916_v61 = vadd.f32 %v1915_v39, %v1914_v37  ;;  %v1935_v37 = vsel %vm269_vm3, %v1882_v35, 0.0  ;;  %v1885_v39 = vmul.f32 %v5792_v13, %v5792_v13 }
 0x374   : > { %v1918_v41 = vadd.f32 %v1917_v40, %v1916_v61  ;;  %v1937_v61 = vsel %vm269_vm3, %v1883_v10, 0.0  ;;  %v1886_v40 = vmul.f32 %v5794_v50, %v5794_v50 }
 0x376   : > { %v1920_v46 = vadd.f32 %v1919_v28, %v1918_v41  ;;  %v1939_v41 = vsel %vm269_vm3, %v1884_v24, 0.0  ;;  %v1887_v28 = vmul.f32 %v5796_v29, %v5796_v29 }
 0x378   : > { %v1922_v53 = vadd.f32 %v1921_v47, %v1920_v46  ;;  %v1941_v46 = vsel %vm269_vm3, %v1885_v39, 0.0  ;;  %v1888_v47 = vmul.f32 %v5798_v12, %v5798_v12 }
 0x37a   : > { %v1924_v55 = vadd.f32 %v1923_v57, %v1922_v53  ;;  %v1943_v53 = vsel %vm269_vm3, %v1886_v40, 0.0  ;;  %v1889_v57 = vmul.f32 %v5800_v63, %v5800_v63 }
 0x37c   : > { %v1926_v62 = vadd.f32 %v1925_v60, %v1924_v55  ;;  %v1945_v55 = vsel %vm269_vm3, %v1887_v28, 0.0  ;;  %v1890_v60 = vmul.f32 %v5802_v51, %v5802_v51 }
 0x37e   : > { %v1928_v14 = vadd.f32 %v1927_v5, %v1926_v62  ;;  %v1947_v62 = vsel %vm269_vm3, %v1888_v47, 0.0  ;;  %v1891_v5 = vmul.f32 %v5804_v26, %v5804_v26 }
 0x380   : > { %v1930_v18 = vadd.f32 %v1929_v17, %v1928_v14  ;;  %v1949_v14 = vsel %vm269_vm3, %v1889_v57, 0.0  ;;  %v1951_v17 = vsel %vm269_vm3, %v1890_v60, 0.0  ;;  %v1953_v35 = vsel %vm269_vm3, %v1891_v5, 0.0 }
 0x382   : > { %v1932_v1 = vadd.f32 %v1931_v0, %v1930_v18 }
 0x384   : > { %v1934_v45 = vadd.f32 %v1933_v7, %v1932_v1 }
 0x386   : > { %v1936_v48 = vadd.f32 %v1935_v37, %v1934_v45 }
 0x388   : > { %v1938_v11 = vadd.f32 %v1937_v61, %v1936_v48 }
 0x38a   : > { %v1940_v19 = vadd.f32 %v1939_v41, %v1938_v11 }
 0x38c   : > { %v1942_v21 = vadd.f32 %v1941_v46, %v1940_v19 }
 0x38e   : > { %v1944_v54 = vadd.f32 %v1943_v53, %v1942_v21 }
 0x390   : > { %v1946_v56 = vadd.f32 %v1945_v55, %v1944_v54 }
 0x392   : > { %v1948_v4 = vadd.f32 %v1947_v62, %v1946_v56 }
 0x394   : > { %v1950_v16 = vadd.f32 %v1949_v14, %v1948_v4 }
 0x396   : > { %v1952_v18 = vadd.f32 %v1951_v17, %v1950_v16 }
 0x398   : > { %v1954_v0 = vadd.f32 %v1953_v35, %v1952_v18 }
 0x39a   : > { %v1955_v1 = vrot.slane %v1954_v0, 4 }
 0x39c   : > { %v1956_v10 = vadd.f32 %v1955_v1, %v1954_v0 }
 0x39e   : > { %v1957_v7 = vrot.slane %v1956_v10, 2 }
 0x3a0   : > { %v1958_v45 = vadd.f32 %v1957_v7, %v1956_v10 }
 0x3a2   : > { %v1959_v24 = vrot.slane %v1958_v45, 1 }
 0x3a4   : > { %v1960_v37 = vadd.f32 %v1959_v24, %v1958_v45 }
 0x3a6   : > { %v1961_v48 = vmul.f32 0.00390625, %v1960_v37 }
 0x3a8   : > { %v1962_v39 = vadd.f32 1e-05, %v1961_v48 }
 0x3aa   : > { %4883 = vrsqrt.f32 %v1962_v39 }
 0x3b4   : > { %v4884_v61 = vpop.eup %4883 }
 0x3b5   : > { %v1994_v11 = vmul.f32 %v4884_v61, %v5802_v51  ;;  %v1964_v19 = vmul.f32 %v4884_v61, %v5807_v3  ;;  %v6011_v28 = vmul.f32 %v4884_v61, %v5810_v2  ;;  %v6014_v46 = vmul.f32 %v4884_v61, %v5813_v20 }
 0x3b6   : > { %v6017_v21 = vmul.f32 %v4884_v61, %v5816_v22  ;;  %v6020_v47 = vmul.f32 %v4884_v61, %v5823_v36  ;;  %v6023_v51 = vmul.f32 %v4884_v61, %v5828_v58  ;;  %v6026_v53 = vmul.f32 %v4884_v61, %v5835_v34 }
 0x3b7   : > { %vm2026_vm10 = vcmp.gt.f32.partialorder %v1994_v11, 0.0  ;;  %v2058_v40 = vmul.f32 0.2, %v1994_v11  ;;  %v6029_v3 = vmul.f32 %v4884_v61, %v5841_v31  ;;  %v6032_v2 = vmul.f32 %v4884_v61, %v5847_v42 }
 0x3b8   : > { %v6035_v20 = vmul.f32 %v4884_v61, %v5853_v52  ;;  %v6038_v22 = vmul.f32 %v4884_v61, %v5751_v38  ;;  %v6041_v36 = vmul.f32 %v4884_v61, %v5800_v63  ;;  %v6044_v58 = vmul.f32 %v4884_v61, %v5804_v26 }
 0x3b9   : > { %v2090_v41 = vsel %vm2026_vm10, %v1994_v11, %v2058_v40  ;;  %v6047_v34 = vmul.f32 %v4884_v61, %v5754_v43  ;;  %v6050_v31 = vmul.f32 %v4884_v61, %v5757_v8  ;;  %v6053_v42 = vmul.f32 %v4884_v61, %v5760_v23 }
 0x3ba   : > { %2123 = vst.msk [vmem:[#allocation3 + $0x181] sm:$0xff] %vm269_vm3, %v2090_v41  ;;  %v6056_v52 = vmul.f32 %v4884_v61, %v5763_v30  ;;  %v6059_v38 = vmul.f32 %v4884_v61, %v5766_v44  ;;  %v6062_v63 = vmul.f32 %v4884_v61, %v5769_v15  ;;  %v6065_v26 = vmul.f32 %v4884_v61, %v5772_v9 }
 0x3bb   : > { %v6068_v43 = vmul.f32 %v4884_v61, %v5775_v6  ;;  %v6071_v8 = vmul.f32 %v4884_v61, %v5778_v32  ;;  %v6074_v23 = vmul.f32 %v4884_v61, %v5781_v27  ;;  %v6077_v30 = vmul.f32 %v4884_v61, %v5784_v59 }
 0x3bc   : > { %v6080_v44 = vmul.f32 %v4884_v61, %v5786_v49  ;;  %v6083_v15 = vmul.f32 %v4884_v61, %v5788_v33  ;;  %v6086_v9 = vmul.f32 %v4884_v61, %v5790_v25  ;;  %v6089_v6 = vmul.f32 %v4884_v61, %v5792_v13 }
 0x3bd   : > { %v6092_v32 = vmul.f32 %v4884_v61, %v5794_v50  ;;  %v6095_v27 = vmul.f32 %v4884_v61, %v5796_v29  ;;  %v6098_v59 = vmul.f32 %v4884_v61, %v5798_v12  ;;  %vm1996_vm11 = vcmp.gt.f32.partialorder %v1964_v19, 0.0 }
 0x3be   : > { %vm1997_vm12 = vcmp.gt.f32.partialorder %v6011_v28, 0.0  ;;  %vm1998_vm13 = vcmp.gt.f32.partialorder %v6014_v46, 0.0  ;;  %vm1999_vm14 = vcmp.gt.f32.partialorder %v6017_v21, 0.0  ;;  %vm2000_vm15 = vcmp.gt.f32.partialorder %v6020_v47, 0.0 }
 0x3bf   : > { %vm2001_vm0 = vcmp.gt.f32.partialorder %v6023_v51, 0.0  ;;  %vm2005_vm5 = vcmp.gt.f32.partialorder %v6035_v20, 0.0  ;;  %vm2006_vm6 = vcmp.gt.f32.partialorder %v6038_v22, 0.0  ;;  %v2028_v49 = vmul.f32 0.2, %v1964_v19 }
 0x3c0   : > { %v2029_v33 = vmul.f32 0.2, %v6011_v28  ;;  %vm2011_vm1 = vcmp.gt.f32.partialorder %v6059_v38, 0.0  ;;  %v2030_v25 = vmul.f32 0.2, %v6014_v46  ;;  %vm2016_vm7 = vcmp.gt.f32.partialorder %v6074_v23, 0.0 }
 0x3c1   : > { %v2031_v13 = vmul.f32 0.2, %v6017_v21  ;;  %v2032_v50 = vmul.f32 0.2, %v6020_v47  ;;  %vm2017_vm10 = vcmp.gt.f32.partialorder %v6077_v30, 0.0  ;;  %v2060_v57 = vsel %vm1996_vm11, %v1964_v19, %v2028_v49 }
 0x3c2   : > { %v2033_v29 = vmul.f32 0.2, %v6023_v51  ;;  %v2034_v12 = vmul.f32 0.2, %v6026_v53  ;;  %v2035_v54 = vmul.f32 0.2, %v6029_v3  ;;  %v2061_v62 = vsel %vm1997_vm12, %v6011_v28, %v2029_v33 }
 0x3c3   : > { %vm2018_vm4 = vcmp.gt.f32.partialorder %v6080_v44, 0.0  ;;  %v2036_v55 = vmul.f32 0.2, %v6032_v2  ;;  %v2037_v56 = vmul.f32 0.2, %v6035_v20  ;;  %2093 = vst.msk [vmem:[#allocation3 + $0x19] sm:$0xff] %vm269_vm3, %v2060_v57  ;;  %v2062_v16 = vsel %vm1998_vm13, %v6014_v46, %v2030_v25 }
 0x3c4   : > { %v2038_v60 = vmul.f32 0.2, %v6038_v22  ;;  %vm2022_vm11 = vcmp.gt.f32.partialorder %v6092_v32, 0.0  ;;  %vm2023_vm2 = vcmp.gt.f32.partialorder %v6095_v27, 0.0  ;;  %vm2024_vm8 = vcmp.gt.f32.partialorder %v6098_v59, 0.0  ;;  %2094 = vst.msk [vmem:[#allocation3 + $0x21] sm:$0xff] %vm269_vm3, %v2061_v62 }
 0x3c5   : > { %vm2025_vm9 = vcmp.gt.f32.partialorder %v6041_v36, 0.0  ;;  %v2039_v4 = vmul.f32 0.2, %v6047_v34  ;;  %v2040_v5 = vmul.f32 0.2, %v6050_v31  ;;  %vm2027_vm12 = vcmp.gt.f32.partialorder %v6044_v58, 0.0 }
 0x3c6   : > { %v2041_v14 = vmul.f32 0.2, %v6053_v42  ;;  %v2042_v17 = vmul.f32 0.2, %v6056_v52  ;;  %v2043_v18 = vmul.f32 0.2, %v6059_v38  ;;  %v2063_v0 = vsel %vm1999_vm14, %v6017_v21, %v2031_v13 }
 0x3c7   : > { %v2044_v35 = vmul.f32 0.2, %v6062_v63  ;;  %2095 = vst.msk [vmem:[#allocation3 + $0x31] sm:$0xff] %vm269_vm3, %v2062_v16  ;;  %v2045_v1 = vmul.f32 0.2, %v6065_v26  ;;  %v2064_v45 = vsel %vm2000_vm15, %v6020_v47, %v2032_v50  ;;  %2096 = vst.msk [vmem:[#allocation3 + $0x39] sm:$0xff] %vm269_vm3, %v2063_v0  ;;  %v2065_v39 = vsel %vm2001_vm0, %v6023_v51, %v2033_v29 }
 0x3c8   : > { %v2046_v10 = vmul.f32 0.2, %v6068_v43  ;;  %v2047_v7 = vmul.f32 0.2, %v6071_v8  ;;  %v2048_v24 = vmul.f32 0.2, %v6074_v23  ;;  %v2069_v49 = vsel %vm2005_vm5, %v6035_v20, %v2037_v56 }
 0x3c9   : > { %v2049_v37 = vmul.f32 0.2, %v6077_v30  ;;  %v2050_v48 = vmul.f32 0.2, %v6080_v44  ;;  %2097 = vst.msk [vmem:[#allocation3 + $0x49] sm:$0xff] %vm269_vm3, %v2064_v45  ;;  %vm7157_vm13 = vcmp.gt.f32.partialorder %v6026_v53, 0.0 }
 0x3ca   : > { %v2051_v61 = vmul.f32 0.2, %v6083_v15  ;;  %v2052_v11 = vmul.f32 0.2, %v6086_v9  ;;  %v2053_v40 = vmul.f32 0.2, %v6089_v6  ;;  %v2066_v41 = vsel %vm7157_vm13, %v6026_v53, %v2034_v12 }
 0x3cb   : > { %2098 = vst.msk [vmem:[#allocation3 + $0x51] sm:$0xff] %vm269_vm3, %v2065_v39  ;;  %v2054_v19 = vmul.f32 0.2, %v6092_v32  ;;  %v2055_v28 = vmul.f32 0.2, %v6095_v27  ;;  %vm7158_vm14 = vcmp.gt.f32.partialorder %v6029_v3, 0.0 }
 0x3cc   : > { %v2056_v46 = vmul.f32 0.2, %v6098_v59  ;;  %v2067_v21 = vsel %vm7158_vm14, %v6029_v3, %v2035_v54  ;;  %2099 = vst.msk [vmem:[#allocation3 + $0x61] sm:$0xff] %vm269_vm3, %v2066_v41  ;;  %v2057_v47 = vmul.f32 0.2, %v6041_v36  ;;  %vm7159_vm15 = vcmp.gt.f32.partialorder %v6032_v2, 0.0 }
 0x3cd   : > { %v2059_v51 = vmul.f32 0.2, %v6044_v58  ;;  %v2068_v53 = vsel %vm7159_vm15, %v6032_v2, %v2036_v55  ;;  %2100 = vst.msk [vmem:[#allocation3 + $0x69] sm:$0xff] %vm269_vm3, %v2067_v21  ;;  %v2163_v33 = vld [vmem:[#allocation3 + $0x19] sm:$0xff]  ;;  %v2070_v3 = vsel %vm2006_vm6, %v6038_v22, %v2038_v60  ;;  %vm7160_vm0 = vcmp.gt.f32.partialorder %v6047_v34, 0.0  ;;  %v2164_v20 = vld [vmem:[#allocation3 + $0x21] sm:$0xff] }
 0x3ce   : > { %v2071_v25 = vsel %vm7160_vm0, %v6047_v34, %v2039_v4  ;;  %vm7161_vm13 = vcmp.gt.f32.partialorder %v6050_v31, 0.0  ;;  %vm7162_vm14 = vcmp.gt.f32.partialorder %v6053_v42, 0.0  ;;  %2101 = vst.msk [vmem:[#allocation3 + $0x79] sm:$0xff] %vm269_vm3, %v2068_v53  ;;  %2102 = vst.msk [vmem:[#allocation3 + $0x81] sm:$0xff] %vm269_vm3, %v2069_v49  ;;  %2273 = vrot.lane.b32.xlu1 %v2163_v33, %s4954_s15  ;;  %vm7163_vm5 = vcmp.gt.f32.partialorder %v6056_v52, 0.0  ;;  %2275 = vrot.lane.b32.xlu0 %v2164_v20, %s4954_s15  ;;  %v2165_v54 = vld [vmem:[#allocation3 + $0x31] sm:$0xff] }
 0x3cf   : > { %v2072_v13 = vsel %vm7161_vm13, %v6050_v31, %v2040_v5  ;;  %v2073_v2 = vsel %vm7162_vm14, %v6053_v42, %v2041_v14  ;;  %v2074_v22 = vsel %vm7163_vm5, %v6056_v52, %v2042_v17  ;;  %v2075_v34 = vsel %vm2011_vm1, %v6059_v38, %v2043_v18  ;;  %2103 = vst.msk [vmem:[#allocation3 + $0x91] sm:$0xff] %vm269_vm3, %v2070_v3  ;;  %v2201_v57 = vld [vmem:[#allocation3 + $0x32] sm:$0xff]  ;;  %v2202_v55 = vld [vmem:[#allocation3 + $0x3a] sm:$0xff] }
 0x3d0   : > { %vm7164_vm6 = vcmp.gt.f32.partialorder %v6062_v63, 0.0  ;;  %vm7165_vm15 = vcmp.gt.f32.partialorder %v6065_v26, 0.0  ;;  %2104 = vst.msk [vmem:[#allocation3 + $0x99] sm:$0xff] %vm269_vm3, %v2071_v25  ;;  %2105 = vst.msk [vmem:[#allocation3 + $0xa9] sm:$0xff] %vm269_vm3, %v2072_v13  ;;  %vm7166_vm1 = vcmp.gt.f32.partialorder %v6068_v43, 0.0  ;;  %vm7167_vm0 = vcmp.gt.f32.partialorder %v6071_v8, 0.0 }
 0x3d1   : > { %v2076_v31 = vsel %vm7164_vm6, %v6062_v63, %v2044_v35  ;;  %v2077_v42 = vsel %vm7165_vm15, %v6065_v26, %v2045_v1  ;;  %2106 = vst.msk [vmem:[#allocation3 + $0xb1] sm:$0xff] %vm269_vm3, %v2073_v2  ;;  %v2078_v52 = vsel %vm7166_vm1, %v6068_v43, %v2046_v10  ;;  %v2079_v38 = vsel %vm7167_vm0, %v6071_v8, %v2047_v7  ;;  %v4045_v43 = vld [vmem:[%s7150_s3 + $0x18] sm:$0xff]  ;;  %v4046_v8 = vld [vmem:[%s7150_s3 + $0x20] sm:$0xff] }
 0x3d2   : > { %v2080_v63 = vsel %vm2016_vm7, %v6074_v23, %v2048_v24  ;;  %v2081_v26 = vsel %vm2017_vm10, %v6077_v30, %v2049_v37  ;;  %2107 = vst.msk [vmem:[#allocation3 + $0xc1] sm:$0xff] %vm269_vm3, %v2074_v22  ;;  %2108 = vst.msk [vmem:[#allocation3 + $0xc9] sm:$0xff] %vm269_vm3, %v2075_v34  ;;  %v2082_v23 = vsel %vm2018_vm4, %v6080_v44, %v2050_v48  ;;  %vm7168_vm7 = vcmp.gt.f32.partialorder %v6083_v15, 0.0  ;;  %v2199_v44 = vld [vmem:[#allocation3 + $0x1a] sm:$0xff]  ;;  %v2167_v56 = vld [vmem:[#allocation3 + $0x49] sm:$0xff] }
 0x3d3   : > { %2109 = vst.msk [vmem:[#allocation3 + $0xd9] sm:$0xff] %vm269_vm3, %v2076_v31  ;;  %2110 = vst.msk [vmem:[#allocation3 + $0xe1] sm:$0xff] %vm269_vm3, %v2077_v42  ;;  %v2083_v30 = vsel %vm7168_vm7, %v6083_v15, %v2051_v61  ;;  %vm7169_vm10 = vcmp.gt.f32.partialorder %v6086_v9, 0.0  ;;  %vm7170_vm13 = vcmp.gt.f32.partialorder %v6089_v6, 0.0  ;;  %v2086_v15 = vsel %vm2022_vm11, %v6092_v32, %v2054_v19  ;;  %v2200_v32 = vld [vmem:[#allocation3 + $0x22] sm:$0xff]  ;;  %2417 = vrot.lane.b32.xlu1 %v2199_v44, %s4955_s14  ;;  %v2168_v60 = vld [vmem:[#allocation3 + $0x51] sm:$0xff]  ;;  %v6355_v44 = vpop.permute.xlu1 %2269 }
 0x3d4   : > { %v2084_v50 = vsel %vm7169_vm10, %v6086_v9, %v2052_v11  ;;  %v2085_v29 = vsel %vm7170_vm13, %v6089_v6, %v2053_v40  ;;  %2111 = vst.msk [vmem:[#allocation3 + $0xf1] sm:$0xff] %vm269_vm3, %v2078_v52  ;;  %2112 = vst.msk [vmem:[#allocation3 + $0xf9] sm:$0xff] %vm269_vm3, %v2079_v38  ;;  %v2087_v9 = vsel %vm2023_vm2, %v6095_v27, %v2055_v28  ;;  %2419 = vrot.lane.b32.xlu0 %v2200_v32, %s4955_s14  ;;  %v2203_v62 = vld [vmem:[#allocation3 + $0x4a] sm:$0xff]  ;;  %v2204_v4 = vld [vmem:[#allocation3 + $0x52] sm:$0xff]  ;;  %vm2557_vm2 = vcmask 130048  }
 0x3d5   : > { %2113 = vst.msk [vmem:[#allocation3 + $0x109] sm:$0xff] %vm269_vm3, %v2080_v63  ;;  %2114 = vst.msk [vmem:[#allocation3 + $0x111] sm:$0xff] %vm269_vm3, %v2081_v26  ;;  %v2088_v6 = vsel %vm2024_vm8, %v6098_v59, %v2056_v46  ;;  %v2089_v12 = vsel %vm2025_vm9, %v6041_v36, %v2057_v47  ;;  %v2091_v27 = vsel %vm2027_vm12, %v6044_v58, %v2059_v51  ;;  %v4047_v59 = vld [vmem:[%s7150_s3 + $0x28] sm:$0xff]  ;;  %v2169_v5 = vld [vmem:[#allocation3 + $0x61] sm:$0xff]  ;;  %vm2601_vm4 = vcmask 195584  }
 0x3d6   : > { %2115 = vst.msk [vmem:[#allocation3 + $0x121] sm:$0xff] %vm269_vm3, %v2082_v23  ;;  %2116 = vst.msk [vmem:[#allocation3 + $0x129] sm:$0xff] %vm269_vm3, %v2083_v30  ;;  %v4698_v36 = vpack.c.bf16 %v4046_v8, %v4045_v43  ;;  %v2166_v58 = vld [vmem:[#allocation3 + $0x39] sm:$0xff]  ;;  %v2170_v14 = vld [vmem:[#allocation3 + $0x69] sm:$0xff] }
 0x3d7   : > { %2117 = vst.msk [vmem:[#allocation3 + $0x139] sm:$0xff] %vm269_vm3, %v2084_v50  ;;  %2118 = vst.msk [vmem:[#allocation3 + $0x141] sm:$0xff] %vm269_vm3, %v2085_v29  ;;  %2277 = vrot.lane.b32.xlu1 %v2165_v54, %s4954_s15  ;;  %v2205_v16 = vld [vmem:[#allocation3 + $0x62] sm:$0xff]  ;;  %v2206_v17 = vld [vmem:[#allocation3 + $0x6a] sm:$0xff] }
 0x3d8   : > { %2119 = vst.msk [vmem:[#allocation3 + $0x151] sm:$0xff] %vm269_vm3, %v2086_v15  ;;  %2120 = vst.msk [vmem:[#allocation3 + $0x159] sm:$0xff] %vm269_vm3, %v2087_v9  ;;  %4699 = vmatprep.subr.bf16.mxu1 %v4698_v36  ;;  %2279 = vrot.lane.b32.xlu0 %v2166_v58, %s4954_s15  ;;  %v2171_v18 = vld [vmem:[#allocation3 + $0x79] sm:$0xff]  ;;  %v2172_v35 = vld [vmem:[#allocation3 + $0x81] sm:$0xff]  ;;  %v6358_v15 = vpop.permute.xlu0 %2271 }
 0x3d9   : > { %2121 = vst.msk [vmem:[#allocation3 + $0x169] sm:$0xff] %vm269_vm3, %v2088_v6  ;;  %2122 = vst.msk [vmem:[#allocation3 + $0x171] sm:$0xff] %vm269_vm3, %v2089_v12  ;;  %4701 = vmatpush3.bf16.msra.mxu1 %v4698_v36  ;;  %v2207_v0 = vld [vmem:[#allocation3 + $0x7a] sm:$0xff]  ;;  %v2208_v1 = vld [vmem:[#allocation3 + $0x82] sm:$0xff] }
 0x3da   : > { %2124 = vst.msk [vmem:[#allocation3 + $0x189] sm:$0xff] %vm269_vm3, %v2091_v27  ;;  %4522 = vmatprep.subr.mxu1 %v4047_v59  ;;  %v2173_v10 = vld [vmem:[#allocation3 + $0x91] sm:$0xff]  ;;  %v2174_v7 = vld [vmem:[#allocation3 + $0x99] sm:$0xff]  ;;  %v2175_v37 = vld [vmem:[#allocation3 + $0xa9] sm:$0xff] }
 0x3db   : > { %2421 = vrot.lane.b32.xlu1 %v2201_v57, %s4955_s14  ;;  %v2209_v45 = vld [vmem:[#allocation3 + $0x92] sm:$0xff]  ;;  %v2210_v24 = vld [vmem:[#allocation3 + $0x9a] sm:$0xff]  ;;  %v2211_v39 = vld [vmem:[#allocation3 + $0xaa] sm:$0xff] }
 0x3dc   : > { %2423 = vrot.lane.b32.xlu0 %v2202_v55, %s4955_s14  ;;  %v2176_v48 = vld [vmem:[#allocation3 + $0xb1] sm:$0xff]  ;;  %v2177_v19 = vld [vmem:[#allocation3 + $0xc1] sm:$0xff]  ;;  %v2178_v28 = vld [vmem:[#allocation3 + $0xc9] sm:$0xff] }
 0x3dd   : > { %4523 = vmatpush3.msra.mxu1 %v4047_v59  ;;  %v2212_v61 = vld [vmem:[#allocation3 + $0xb2] sm:$0xff]  ;;  %v2213_v46 = vld [vmem:[#allocation3 + $0xc2] sm:$0xff]  ;;  %v2214_v21 = vld [vmem:[#allocation3 + $0xca] sm:$0xff] }
 0x3de   : > { %v2594_v11 = vld [vmem:[%s7150_s3] sm:$0xff]  ;;  %v2595_v40 = vld [vmem:[%s7150_s3 + $0x8] sm:$0xff]  ;;  %v2180_v51 = vld [vmem:[#allocation3 + $0xe1] sm:$0xff] }
 0x3df   : > { %2281 = vrot.lane.b32.xlu1 %v2167_v56, %s4954_s15  ;;  %v6325_v41 = vpack.c.bf16 %v2595_v40, %v2594_v11  ;;  %v2179_v47 = vld [vmem:[#allocation3 + $0xd9] sm:$0xff]  ;;  %v2216_v49 = vld [vmem:[#allocation3 + $0xe2] sm:$0xff]  ;;  %v2181_v33 = vld [vmem:[#allocation3 + $0xf1] sm:$0xff] }
 0x3e0   : > { %2283 = vrot.lane.b32.xlu0 %v2168_v60, %s4954_s15  ;;  %v2215_v53 = vld [vmem:[#allocation3 + $0xda] sm:$0xff]  ;;  %v2217_v25 = vld [vmem:[#allocation3 + $0xf2] sm:$0xff]  ;;  %v2183_v2 = vld [vmem:[#allocation3 + $0x109] sm:$0xff] }
 0x3e1   : > { %4703 = vmatprep.subr.bf16.mxu1 %v6325_v41  ;;  %v2182_v3 = vld [vmem:[#allocation3 + $0xf9] sm:$0xff]  ;;  %v2184_v20 = vld [vmem:[#allocation3 + $0x111] sm:$0xff]  ;;  %v2185_v31 = vld [vmem:[#allocation3 + $0x121] sm:$0xff] }
 0x3e2   : > { %v2218_v13 = vld [vmem:[#allocation3 + $0xfa] sm:$0xff]  ;;  %v2219_v22 = vld [vmem:[#allocation3 + $0x10a] sm:$0xff]  ;;  %v2220_v34 = vld [vmem:[#allocation3 + $0x112] sm:$0xff] }
 0x3e3   : > { %2425 = vrot.lane.b32.xlu1 %v2203_v62, %s4955_s14  ;;  %v2186_v42 = vld [vmem:[#allocation3 + $0x129] sm:$0xff]  ;;  %v2187_v63 = vld [vmem:[#allocation3 + $0x139] sm:$0xff]  ;;  %v2188_v26 = vld [vmem:[#allocation3 + $0x141] sm:$0xff] }
 0x3e4   : > { %2427 = vrot.lane.b32.xlu0 %v2204_v4, %s4955_s14  ;;  %v2221_v52 = vld [vmem:[#allocation3 + $0x122] sm:$0xff]  ;;  %v2222_v38 = vld [vmem:[#allocation3 + $0x12a] sm:$0xff]  ;;  %v2223_v43 = vld [vmem:[#allocation3 + $0x13a] sm:$0xff] }
 0x3e5   : > { %v2224_v8 = vld [vmem:[#allocation3 + $0x142] sm:$0xff]  ;;  %v2189_v23 = vld [vmem:[#allocation3 + $0x151] sm:$0xff]  ;;  %v2190_v30 = vld [vmem:[#allocation3 + $0x159] sm:$0xff] }
 0x3e6   : > { %v2225_v50 = vld [vmem:[#allocation3 + $0x152] sm:$0xff]  ;;  %v2226_v29 = vld [vmem:[#allocation3 + $0x15a] sm:$0xff]  ;;  %v2191_v9 = vld [vmem:[#allocation3 + $0x169] sm:$0xff] }
 0x3e7   : > { %2285 = vrot.lane.b32.xlu1 %v2169_v5, %s4954_s15  ;;  %v2192_v6 = vld [vmem:[#allocation3 + $0x171] sm:$0xff]  ;;  %v2128_v58 = vld [vmem:[#allocation3 + $0x20] sm:$0xff]  ;;  %v2194_v60 = vld [vmem:[#allocation3 + $0x189] sm:$0xff] }
 0x3e8   : > { %2287 = vrot.lane.b32.xlu0 %v2170_v14, %s4954_s15  ;;  %v2227_v27 = vld [vmem:[#allocation3 + $0x16a] sm:$0xff]  ;;  %v2228_v36 = vld [vmem:[#allocation3 + $0x172] sm:$0xff]  ;;  %v2193_v62 = vld [vmem:[#allocation3 + $0x181] sm:$0xff] }
 0x3e9   : > { %v2127_v59 = vld [vmem:[#allocation3 + $0x18] sm:$0xff]  ;;  %v2596_v14 = vld [vmem:[%s7150_s3 + $0x10] sm:$0xff] }
 0x3eb   : > { %2429 = vrot.lane.b32.xlu1 %v2205_v16, %s4955_s14  ;;  %v4112_v16 = vld [vmem:[%s7150_s3 + $0x30] sm:$0xff] }
 0x3ec   : > { %2431 = vrot.lane.b32.xlu0 %v2206_v17, %s4955_s14  ;;  %v4113_v17 = vld [vmem:[%s7150_s3 + $0x38] sm:$0xff] }
 0x3ef   : > { %2289 = vrot.lane.b32.xlu1 %v2171_v18, %s4954_s15 }
 0x3f0   : > { %2291 = vrot.lane.b32.xlu0 %v2172_v35, %s4954_s15 }
 0x3f3   : > { %2433 = vrot.lane.b32.xlu1 %v2207_v0, %s4955_s14  ;;  %v2229_v0 = vld [vmem:[#allocation3 + $0x182] sm:$0xff] }
 0x3f4   : > { %2435 = vrot.lane.b32.xlu0 %v2208_v1, %s4955_s14  ;;  %v6388_v1 = vpack.c.bf16 %v4113_v17, %v4112_v16 }
 0x3f7   : > { %2293 = vrot.lane.b32.xlu1 %v2173_v10, %s4954_s15  ;;  %v2230_v10 = vld [vmem:[#allocation3 + $0x18a] sm:$0xff] }
 0x3f8   : > { %2295 = vrot.lane.b32.xlu0 %v2174_v7, %s4954_s15  ;;  %v2129_v7 = vld [vmem:[#allocation3 + $0x30] sm:$0xff] }
 0x3fb   : > { %2437 = vrot.lane.b32.xlu1 %v2209_v45, %s4955_s14  ;;  %v2197_v45 = vld [vmem:[#allocation3 + $0x2] sm:$0xff] }
 0x3fc   : > { %2439 = vrot.lane.b32.xlu0 %v2210_v24, %s4955_s14 }
 0x3ff   : > { %2297 = vrot.lane.b32.xlu1 %v2175_v37, %s4954_s15  ;;  %v2130_v37 = vld [vmem:[#allocation3 + $0x38] sm:$0xff] }
 0x400   : > { %2299 = vrot.lane.b32.xlu0 %v2176_v48, %s4954_s15 }
 0x403   : > { %2441 = vrot.lane.b32.xlu1 %v2211_v39, %s4955_s14  ;;  %v2198_v39 = vld [vmem:[#allocation3 + $0xa] sm:$0xff] }
 0x404   : > { %2443 = vrot.lane.b32.xlu0 %v2212_v61, %s4955_s14 }
 0x407   : > { %2301 = vrot.lane.b32.xlu1 %v2177_v19, %s4954_s15  ;;  %v2195_v19 = vld [vmem:[#allocation3 + $0x199] sm:$0xff] }
 0x408   : > { %2303 = vrot.lane.b32.xlu0 %v2178_v28, %s4954_s15 }
 0x40b   : > { %2445 = vrot.lane.b32.xlu1 %v2213_v46, %s4955_s14  ;;  %v2196_v46 = vld [vmem:[#allocation3 + $0x1a1] sm:$0xff] }
 0x40c   : > { %2447 = vrot.lane.b32.xlu0 %v2214_v21, %s4955_s14 }
 0x40f   : > { %2305 = vrot.lane.b32.xlu1 %v2179_v47, %s4954_s15  ;;  %v2131_v47 = vld [vmem:[#allocation3 + $0x48] sm:$0xff] }
 0x410   : > { %2307 = vrot.lane.b32.xlu0 %v2180_v51, %s4954_s15  ;;  %v2231_v51 = vld [vmem:[#allocation3 + $0x19a] sm:$0xff] }
 0x413   : > { %2449 = vrot.lane.b32.xlu1 %v2215_v53, %s4955_s14 }
 0x414   : > { %2451 = vrot.lane.b32.xlu0 %v2216_v49, %s4955_s14  ;;  %v2132_v49 = vld [vmem:[#allocation3 + $0x50] sm:$0xff] }
 0x417   : > { %2309 = vrot.lane.b32.xlu1 %v2181_v33, %s4954_s15 }
 0x418   : > { %2311 = vrot.lane.b32.xlu0 %v2182_v3, %s4954_s15  ;;  %v2232_v3 = vld [vmem:[#allocation3 + $0x1a2] sm:$0xff] }
 0x41b   : > { %2453 = vrot.lane.b32.xlu1 %v2217_v25, %s4955_s14 }
 0x41c   : > { %2455 = vrot.lane.b32.xlu0 %v2218_v13, %s4955_s14 }
 0x41f   : > { %2313 = vrot.lane.b32.xlu1 %v2183_v2, %s4954_s15 }
 0x420   : > { %2315 = vrot.lane.b32.xlu0 %v2184_v20, %s4954_s15 }
 0x423   : > { %2457 = vrot.lane.b32.xlu1 %v2219_v22, %s4955_s14 }
 0x424   : > { %2459 = vrot.lane.b32.xlu0 %v2220_v34, %s4955_s14 }
 0x427   : > { %2317 = vrot.lane.b32.xlu1 %v2185_v31, %s4954_s15  ;;  %v2133_v31 = vld [vmem:[#allocation3 + $0x60] sm:$0xff] }
 0x428   : > { %2319 = vrot.lane.b32.xlu0 %v2186_v42, %s4954_s15 }
 0x42b   : > { %2461 = vrot.lane.b32.xlu1 %v2221_v52, %s4955_s14  ;;  %v2134_v52 = vld [vmem:[#allocation3 + $0x68] sm:$0xff] }
 0x42c   : > { %2463 = vrot.lane.b32.xlu0 %v2222_v38, %s4955_s14 }
 0x42f   : > { %2321 = vrot.lane.b32.xlu1 %v2187_v63, %s4954_s15 }
 0x430   : > { %2323 = vrot.lane.b32.xlu0 %v2188_v26, %s4954_s15 }
 0x433   : > { %2465 = vrot.lane.b32.xlu1 %v2223_v43, %s4955_s14 }
 0x434   : > { %2467 = vrot.lane.b32.xlu0 %v2224_v8, %s4955_s14 }
 0x437   : > { %2325 = vrot.lane.b32.xlu1 %v2189_v23, %s4954_s15 }
 0x438   : > { %2327 = vrot.lane.b32.xlu0 %v2190_v30, %s4954_s15 }
 0x43b   : > { %2469 = vrot.lane.b32.xlu1 %v2225_v50, %s4955_s14  ;;  %v2135_v50 = vld [vmem:[#allocation3 + $0x78] sm:$0xff] }
 0x43c   : > { %2471 = vrot.lane.b32.xlu0 %v2226_v29, %s4955_s14 }
 0x43f   : > { %2329 = vrot.lane.b32.xlu1 %v2191_v9, %s4954_s15  ;;  %v2136_v9 = vld [vmem:[#allocation3 + $0x80] sm:$0xff] }
 0x440   : > { %2331 = vrot.lane.b32.xlu0 %v2192_v6, %s4954_s15  ;;  %v2274_v12 = vpop.permute.xlu1 %2273  ;;  %v2276_v32 = vpop.permute.xlu0 %2275 }
 0x441   : > { %v2523_v54 = vsel %vm269_vm3, %v2127_v59, %v2274_v12  ;;  %v2524_v55 = vsel %vm269_vm3, %v2128_v58, %v2276_v32  ;;  %v2137_v58 = vld [vmem:[#allocation3 + $0x90] sm:$0xff] }
 0x443   : > { %2473 = vrot.lane.b32.xlu1 %v2227_v27, %s4955_s14 }
 0x444   : > { %2475 = vrot.lane.b32.xlu0 %v2228_v36, %s4955_s14 }
 0x445   : > { %v2418_v57 = vpop.permute.xlu1 %2417 }
 0x446   : > { %v2420_v56 = vpop.permute.xlu0 %2419  ;;  %v6367_v4 = vsel %vm2557_vm2, %v2523_v54, %v2418_v57 }
 0x447   : > { %v6370_v5 = vsel %vm2557_vm2, %v2524_v55, %v2420_v56  ;;  %2333 = vrot.lane.b32.xlu1 %v2193_v62, %s4954_s15  ;;  %4524 = vmatprep.mubr.msk.f32.mxu1 %vm2601_vm4, %v6367_v4  ;;  %v2138_v55 = vld [vmem:[#allocation3 + $0x98] sm:$0xff] }
 0x448   : > { %2335 = vrot.lane.b32.xlu0 %v2194_v60, %s4954_s15  ;;  %4525 = vmatmul.mubr.msk.f32.vlgmr.msra.gmra.mrb[0].mxu1 %vm2601_vm4, %v6370_v5 }
 0x449   : > { %v2278_v18 = vpop.permute.xlu1 %2277  ;;  %4705 = vmatpush3.bf16.msra.mxu1 %v6325_v41 }
 0x44a   : > { %v2280_v35 = vpop.permute.xlu0 %2279  ;;  %4576 = vmatprep.subr.mxu1 %v2596_v14  ;;  %v2525_v24 = vsel %vm269_vm3, %v2129_v7, %v2278_v18 }
 0x44b   : > { %2477 = vrot.lane.b32.xlu1 %v2229_v0, %s4955_s14  ;;  %v2526_v61 = vsel %vm269_vm3, %v2130_v37, %v2280_v35  ;;  %v2139_v35 = vld [vmem:[#allocation3 + $0xa8] sm:$0xff] }
 0x44c   : > { %2479 = vrot.lane.b32.xlu0 %v2230_v10, %s4955_s14  ;;  %v2140_v10 = vld [vmem:[#allocation3 + $0xb0] sm:$0xff] }
 0x44d   : > { %v2422_v48 = vpop.permute.xlu1 %2421  ;;  %4577 = vmatpush3.msra.mxu1 %v2596_v14 }
 0x44e   : > { %v6395_v11 = vsel %vm2557_vm2, %v2525_v24, %v2422_v48  ;;  %v2424_v40 = vpop.permute.xlu0 %2423  ;;  %4707 = vmatprep.subr.bf16.mxu1 %v6388_v1 }
 0x44f   : > { %v6399_v41 = vsel %vm2557_vm2, %v2526_v61, %v2424_v40  ;;  %2413 = vrot.lane.b32.xlu1 %v2197_v45, %s4955_s14  ;;  %4527 = vmatprep.mubr.msk.f32.mxu1 %vm2601_vm4, %v6395_v11  ;;  %v2141_v40 = vld [vmem:[#allocation3 + $0xc0] sm:$0xff] }
 0x450   : > { %2415 = vrot.lane.b32.xlu0 %v2198_v39, %s4955_s14  ;;  %4528 = vmatmul.mubr.msk.f32.gmra.mrb[2].mxu1 %vm2601_vm4, %v6399_v41 }
 0x451   : > { %v2282_v28 = vpop.permute.xlu1 %2281 }
 0x452   : > { %v2284_v21 = vpop.permute.xlu0 %2283  ;;  %v2527_v53 = vsel %vm269_vm3, %v2131_v47, %v2282_v28  ;;  %v2142_v28 = vld [vmem:[#allocation3 + $0xc8] sm:$0xff] }
 0x453   : > { %2337 = vrot.lane.b32.xlu1 %v2195_v19, %s4954_s15  ;;  %v2528_v25 = vsel %vm269_vm3, %v2132_v49, %v2284_v21 }
 0x454   : > { %2339 = vrot.lane.b32.xlu0 %v2196_v46, %s4954_s15 }
 0x455   : > { %v2426_v33 = vpop.permute.xlu1 %2425 }
 0x456   : > { %v6412_v13 = vsel %vm2557_vm2, %v2527_v53, %v2426_v33  ;;  %v2428_v2 = vpop.permute.xlu0 %2427 }
 0x457   : > { %v6415_v20 = vsel %vm2557_vm2, %v2528_v25, %v2428_v2  ;;  %4530 = vmatprep.mubr.msk.f32.mxu1 %vm2601_vm4, %v6412_v13  ;;  %2481 = vrot.lane.b32.xlu1 %v2231_v51, %s4955_s14  ;;  %v2144_v2 = vld [vmem:[#allocation3 + $0xe0] sm:$0xff] }
 0x458   : > { %4531 = vmatmul.mubr.msk.f32.gmra.mrb[4].mxu1 %vm2601_vm4, %v6415_v20  ;;  %2483 = vrot.lane.b32.xlu0 %v2232_v3, %s4955_s14  ;;  %v2143_v3 = vld [vmem:[#allocation3 + $0xd8] sm:$0xff] }
 0x459   : > { %v2286_v22 = vpop.permute.xlu1 %2285 }
 0x45a   : > { %v2288_v34 = vpop.permute.xlu0 %2287  ;;  %v2529_v42 = vsel %vm269_vm3, %v2133_v31, %v2286_v22 }
 0x45b   : > { %v2530_v63 = vsel %vm269_vm3, %v2134_v52, %v2288_v34 }
 0x45d   : > { %v2430_v38 = vpop.permute.xlu1 %2429 }
 0x45e   : > { %v6426_v26 = vsel %vm2557_vm2, %v2529_v42, %v2430_v38  ;;  %v2432_v43 = vpop.permute.xlu0 %2431 }
 0x45f   : > { %v6429_v8 = vsel %vm2557_vm2, %v2530_v63, %v2432_v43  ;;  %4533 = vmatprep.mubr.msk.f32.mxu1 %vm2601_vm4, %v6426_v26  ;;  %v2145_v43 = vld [vmem:[#allocation3 + $0xf0] sm:$0xff] }
 0x460   : > { %4534 = vmatmul.mubr.msk.f32.gmra.mrb[6].mxu1 %vm2601_vm4, %v6429_v8 }
 0x461   : > { %v2290_v23 = vpop.permute.xlu1 %2289 }
 0x462   : > { %v2292_v30 = vpop.permute.xlu0 %2291  ;;  %v2531_v29 = vsel %vm269_vm3, %v2135_v50, %v2290_v23 }
 0x463   : > { %v2532_v12 = vsel %vm269_vm3, %v2136_v9, %v2292_v30  ;;  %v2146_v30 = vld [vmem:[#allocation3 + $0xf8] sm:$0xff] }
 0x465   : > { %v2434_v6 = vpop.permute.xlu1 %2433 }
 0x466   : > { %v6438_v32 = vsel %vm2557_vm2, %v2531_v29, %v2434_v6  ;;  %v2436_v27 = vpop.permute.xlu0 %2435 }
 0x467   : > { %v6441_v36 = vsel %vm2557_vm2, %v2532_v12, %v2436_v27  ;;  %4536 = vmatprep.mubr.msk.f32.mxu1 %vm2601_vm4, %v6438_v32 }
 0x468   : > { %4537 = vmatmul.mubr.msk.f32.gmra.mrb[8].mxu1 %vm2601_vm4, %v6441_v36 }
 0x469   : > { %v2294_v59 = vpop.permute.xlu1 %2293 }
 0x46a   : > { %v2296_v54 = vpop.permute.xlu0 %2295  ;;  %v2533_v57 = vsel %vm269_vm3, %v2137_v58, %v2294_v59 }
 0x46b   : > { %v2534_v60 = vsel %vm269_vm3, %v2138_v55, %v2296_v54  ;;  %v2147_v54 = vld [vmem:[#allocation3 + $0x108] sm:$0xff] }
 0x46d   : > { %v2438_v56 = vpop.permute.xlu1 %2437 }
 0x46e   : > { %v6450_v62 = vsel %vm2557_vm2, %v2533_v57, %v2438_v56  ;;  %v2440_v14 = vpop.permute.xlu0 %2439  ;;  %v2148_v57 = vld [vmem:[#allocation3 + $0x110] sm:$0xff] }
 0x46f   : > { %v6453_v16 = vsel %vm2557_vm2, %v2534_v60, %v2440_v14  ;;  %4539 = vmatprep.mubr.msk.f32.mxu1 %vm2601_vm4, %v6450_v62 }
 0x470   : > { %4540 = vmatmul.mubr.msk.f32.gmra.mrb[10].mxu1 %vm2601_vm4, %v6453_v16 }
 0x471   : > { %v2298_v17 = vpop.permute.xlu1 %2297 }
 0x472   : > { %v2300_v18 = vpop.permute.xlu0 %2299  ;;  %v2535_v0 = vsel %vm269_vm3, %v2139_v35, %v2298_v17 }
 0x473   : > { %v2536_v45 = vsel %vm269_vm3, %v2140_v10, %v2300_v18 }
 0x475   : > { %v2442_v7 = vpop.permute.xlu1 %2441 }
 0x476   : > { %v6462_v24 = vsel %vm2557_vm2, %v2535_v0, %v2442_v7  ;;  %v2444_v37 = vpop.permute.xlu0 %2443  ;;  %v2149_v0 = vld [vmem:[#allocation3 + $0x120] sm:$0xff]  ;;  %v2150_v7 = vld [vmem:[#allocation3 + $0x128] sm:$0xff] }
 0x477   : > { %v6465_v48 = vsel %vm2557_vm2, %v2536_v45, %v2444_v37  ;;  %4542 = vmatprep.mubr.msk.f32.mxu1 %vm2601_vm4, %v6462_v24 }
 0x478   : > { %4543 = vmatmul.mubr.msk.f32.gmra.mrb[12].mxu1 %vm2601_vm4, %v6465_v48 }
 0x479   : > { %v2302_v39 = vpop.permute.xlu1 %2301 }
 0x47a   : > { %v2304_v61 = vpop.permute.xlu0 %2303  ;;  %v2537_v19 = vsel %vm269_vm3, %v2141_v40, %v2302_v39 }
 0x47b   : > { %v2538_v21 = vsel %vm269_vm3, %v2142_v28, %v2304_v61 }
 0x47d   : > { %v2446_v46 = vpop.permute.xlu1 %2445 }
 0x47e   : > { %v6474_v47 = vsel %vm2557_vm2, %v2537_v19, %v2446_v46  ;;  %v2448_v51 = vpop.permute.xlu0 %2447  ;;  %v2151_v46 = vld [vmem:[#allocation3 + $0x138] sm:$0xff] }
 0x47f   : > { %v6477_v53 = vsel %vm2557_vm2, %v2538_v21, %v2448_v51  ;;  %4545 = vmatprep.mubr.msk.f32.mxu1 %vm2601_vm4, %v6474_v47  ;;  %v2152_v51 = vld [vmem:[#allocation3 + $0x140] sm:$0xff] }
 0x480   : > { %4546 = vmatmul.mubr.msk.f32.gmra.mrb[14].mxu1 %vm2601_vm4, %v6477_v53 }
 0x481   : > { %v2306_v49 = vpop.permute.xlu1 %2305 }
 0x482   : > { %v2308_v33 = vpop.permute.xlu0 %2307  ;;  %v2539_v25 = vsel %vm269_vm3, %v2143_v3, %v2306_v49 }
 0x483   : > { %v2540_v34 = vsel %vm269_vm3, %v2144_v2, %v2308_v33 }
 0x485   : > { %v2450_v22 = vpop.permute.xlu1 %2449 }
 0x486   : > { %v6486_v31 = vsel %vm2557_vm2, %v2539_v25, %v2450_v22  ;;  %v2452_v42 = vpop.permute.xlu0 %2451 }
 0x487   : > { %v6489_v52 = vsel %vm2557_vm2, %v2540_v34, %v2452_v42  ;;  %4548 = vmatprep.mubr.msk.f32.mxu1 %vm2601_vm4, %v6486_v31  ;;  %v2153_v42 = vld [vmem:[#allocation3 + $0x150] sm:$0xff] }
 0x488   : > { %4549 = vmatmul.mubr.msk.f32.gmra.mrb[16].mxu1 %vm2601_vm4, %v6489_v52 }
 0x489   : > { %v2310_v38 = vpop.permute.xlu1 %2309 }
 0x48a   : > { %v2312_v63 = vpop.permute.xlu0 %2311  ;;  %v2541_v23 = vsel %vm269_vm3, %v2145_v43, %v2310_v38 }
 0x48b   : > { %v2542_v29 = vsel %vm269_vm3, %v2146_v30, %v2312_v63  ;;  %v2154_v63 = vld [vmem:[#allocation3 + $0x158] sm:$0xff] }
 0x48d   : > { %v2454_v50 = vpop.permute.xlu1 %2453 }
 0x48e   : > { %v6498_v9 = vsel %vm2557_vm2, %v2541_v23, %v2454_v50  ;;  %v2456_v6 = vpop.permute.xlu0 %2455 }
 0x48f   : > { %v6501_v12 = vsel %vm2557_vm2, %v2542_v29, %v2456_v6  ;;  %4551 = vmatprep.mubr.msk.f32.mxu1 %vm2601_vm4, %v6498_v9 }
 0x490   : > { %4552 = vmatmul.mubr.msk.f32.gmra.mrb[18].mxu1 %vm2601_vm4, %v6501_v12 }
 0x491   : > { %v2314_v27 = vpop.permute.xlu1 %2313 }
 0x492   : > { %v2316_v59 = vpop.permute.xlu0 %2315  ;;  %v2543_v58 = vsel %vm269_vm3, %v2147_v54, %v2314_v27 }
 0x493   : > { %v2544_v56 = vsel %vm269_vm3, %v2148_v57, %v2316_v59  ;;  %v2155_v59 = vld [vmem:[#allocation3 + $0x168] sm:$0xff] }
 0x495   : > { %v2458_v55 = vpop.permute.xlu1 %2457 }
 0x496   : > { %v6510_v60 = vsel %vm2557_vm2, %v2543_v58, %v2458_v55  ;;  %v2460_v14 = vpop.permute.xlu0 %2459  ;;  %v2156_v58 = vld [vmem:[#allocation3 + $0x170] sm:$0xff] }
 0x497   : > { %v6513_v17 = vsel %vm2557_vm2, %v2544_v56, %v2460_v14  ;;  %4554 = vmatprep.mubr.msk.f32.mxu1 %vm2601_vm4, %v6510_v60 }
 0x498   : > { %4555 = vmatmul.mubr.msk.f32.gmra.mrb[20].mxu1 %vm2601_vm4, %v6513_v17 }
 0x499   : > { %v2318_v18 = vpop.permute.xlu1 %2317 }
 0x49a   : > { %v2320_v35 = vpop.permute.xlu0 %2319  ;;  %v2545_v10 = vsel %vm269_vm3, %v2149_v0, %v2318_v18 }
 0x49b   : > { %v2546_v37 = vsel %vm269_vm3, %v2150_v7, %v2320_v35 }
 0x49d   : > { %v2462_v45 = vpop.permute.xlu1 %2461 }
 0x49e   : > { %v6522_v39 = vsel %vm2557_vm2, %v2545_v10, %v2462_v45  ;;  %v2464_v61 = vpop.permute.xlu0 %2463  ;;  %v2157_v10 = vld [vmem:[#allocation3 + $0x180] sm:$0xff]  ;;  %v2158_v45 = vld [vmem:[#allocation3 + $0x188] sm:$0xff] }
 0x49f   : > { %v6525_v40 = vsel %vm2557_vm2, %v2546_v37, %v2464_v61  ;;  %4557 = vmatprep.mubr.msk.f32.mxu1 %vm2601_vm4, %v6522_v39  ;;  %v2125_v61 = vld [vmem:[#allocation3] sm:$0xff] }
 0x4a0   : > { %4558 = vmatmul.mubr.msk.f32.gmra.mrb[22].mxu1 %vm2601_vm4, %v6525_v40 }
 0x4a1   : > { %v2322_v19 = vpop.permute.xlu1 %2321 }
 0x4a2   : > { %v2324_v28 = vpop.permute.xlu0 %2323  ;;  %v2547_v21 = vsel %vm269_vm3, %v2151_v46, %v2322_v19 }
 0x4a3   : > { %v2548_v33 = vsel %vm269_vm3, %v2152_v51, %v2324_v28 }
 0x4a5   : > { %v2466_v49 = vpop.permute.xlu1 %2465 }
 0x4a6   : > { %v6534_v3 = vsel %vm2557_vm2, %v2547_v21, %v2466_v49  ;;  %v2468_v25 = vpop.permute.xlu0 %2467  ;;  %v2126_v21 = vld [vmem:[#allocation3 + $0x8] sm:$0xff]  ;;  %v2521_v49 = vsel %vm269_vm3, %v2125_v61, %v6355_v44 }
 0x4a7   : > { %v6537_v2 = vsel %vm2557_vm2, %v2548_v33, %v2468_v25  ;;  %4560 = vmatprep.mubr.msk.f32.mxu1 %vm2601_vm4, %v6534_v3  ;;  %v2522_v25 = vsel %vm269_vm3, %v2126_v21, %v6358_v15  ;;  %v2159_v15 = vld [vmem:[#allocation3 + $0x198] sm:$0xff] }
 0x4a8   : > { %4561 = vmatmul.mubr.msk.f32.gmra.mrb[24].mxu1 %vm2601_vm4, %v6537_v2 }
 0x4a9   : > { %v2326_v22 = vpop.permute.xlu1 %2325 }
 0x4aa   : > { %v2328_v34 = vpop.permute.xlu0 %2327  ;;  %v2549_v38 = vsel %vm269_vm3, %v2153_v42, %v2326_v22 }
 0x4ab   : > { %v2550_v23 = vsel %vm269_vm3, %v2154_v63, %v2328_v34 }
 0x4ad   : > { %v2470_v43 = vpop.permute.xlu1 %2469 }
 0x4ae   : > { %v6546_v30 = vsel %vm2557_vm2, %v2549_v38, %v2470_v43  ;;  %v2472_v50 = vpop.permute.xlu0 %2471  ;;  %v4114_v38 = vld [vmem:[%s7150_s3 + $0x40] sm:$0xff] }
 0x4af   : > { %v6549_v29 = vsel %vm2557_vm2, %v2550_v23, %v2472_v50  ;;  %4563 = vmatprep.mubr.msk.f32.mxu1 %vm2601_vm4, %v6546_v30 }
 0x4b0   : > { %4564 = vmatmul.mubr.msk.f32.gmra.mrb[26].mxu1 %vm2601_vm4, %v6549_v29 }
 0x4b1   : > { %v2330_v6 = vpop.permute.xlu1 %2329 }
 0x4b2   : > { %v2332_v27 = vpop.permute.xlu0 %2331  ;;  %v2551_v54 = vsel %vm269_vm3, %v2155_v59, %v2330_v6 }
 0x4b3   : > { %v2552_v55 = vsel %vm269_vm3, %v2156_v58, %v2332_v27 }
 0x4b5   : > { %v2474_v57 = vpop.permute.xlu1 %2473 }
 0x4b6   : > { %v6558_v56 = vsel %vm2557_vm2, %v2551_v54, %v2474_v57  ;;  %v2476_v14 = vpop.permute.xlu0 %2475 }
 0x4b7   : > { %v6561_v18 = vsel %vm2557_vm2, %v2552_v55, %v2476_v14  ;;  %4566 = vmatprep.mubr.msk.f32.mxu1 %vm2601_vm4, %v6558_v56 }
 0x4b8   : > { %4567 = vmatmul.mubr.msk.f32.gmra.mrb[28].mxu1 %vm2601_vm4, %v6561_v18 }
 0x4b9   : > { %v2334_v35 = vpop.permute.xlu1 %2333 }
 0x4ba   : > { %v2336_v0 = vpop.permute.xlu0 %2335  ;;  %v2553_v7 = vsel %vm269_vm3, %v2157_v10, %v2334_v35 }
 0x4bb   : > { %v2554_v19 = vsel %vm269_vm3, %v2158_v45, %v2336_v0 }
 0x4bd   : > { %v2478_v37 = vpop.permute.xlu1 %2477 }
 0x4be   : > { %v6570_v28 = vsel %vm2557_vm2, %v2553_v7, %v2478_v37  ;;  %v2480_v46 = vpop.permute.xlu0 %2479 }
 0x4bf   : > { %v6573_v51 = vsel %vm2557_vm2, %v2554_v19, %v2480_v46  ;;  %4569 = vmatprep.mubr.msk.f32.mxu1 %vm2601_vm4, %v6570_v28 }
 0x4c0   : > { %4570 = vmatmul.mubr.msk.f32.gmra.mrb[30].mxu1 %vm2601_vm4, %v6573_v51 }
 0x4c1   : > { %v2414_v33 = vpop.permute.xlu1 %2413 }
 0x4c2   : > { %v2558_v22 = vsel %vm2557_vm2, %v2521_v49, %v2414_v33  ;;  %v2416_v34 = vpop.permute.xlu0 %2415 }
 0x4c3   : > { %v2559_v42 = vsel %vm2557_vm2, %v2522_v25, %v2416_v34  ;;  %4578 = vmatprep.mubr.msk.f32.mxu1 %vm2601_vm4, %v2558_v22 }
 0x4c4   : > { %4579 = vmatmul.mubr.msk.f32.vlgmr.msra.gmra.mrb[0].mxu1 %vm2601_vm4, %v2559_v42 }
 0x4c5   : > { %4709 = vmatpush3.bf16.msra.mxu1 %v6388_v1  ;;  %4581 = vmatprep.mubr.msk.f32.mxu1 %vm2601_vm4, %v6367_v4  ;;  %v2338_v44 = vpop.permute.xlu1 %2337 }
 0x4c6   : > { %4630 = vmatprep.subr.mxu1 %v4114_v38  ;;  %v2340_v4 = vpop.permute.xlu0 %2339 }
 0x4c8   : > { %4582 = vmatmul.mubr.msk.f32.gmra.mrb[2].mxu1 %vm2601_vm4, %v6370_v5  ;;  %v2555_v5 = vsel %vm269_vm3, %v2159_v15, %v2338_v44 }
 0x4c9   : > { %4584 = vmatprep.mubr.msk.f32.mxu1 %vm2601_vm4, %v6395_v11  ;;  %4631 = vmatpush3.msra.mxu1 %v4114_v38  ;;  %v2482_v1 = vpop.permute.xlu1 %2481 }
 0x4cc   : > { %4585 = vmatmul.mubr.msk.f32.gmra.mrb[4].mxu1 %vm2601_vm4, %v6399_v41 }
 0x4cd   : > { %4587 = vmatprep.mubr.msk.f32.mxu1 %vm2601_vm4, %v6412_v13 }
 0x4d0   : > { %4588 = vmatmul.mubr.msk.f32.gmra.mrb[6].mxu1 %vm2601_vm4, %v6415_v20 }
 0x4d1   : > { %4590 = vmatprep.mubr.msk.f32.mxu1 %vm2601_vm4, %v6426_v26 }
 0x4d4   : > { %4591 = vmatmul.mubr.msk.f32.gmra.mrb[8].mxu1 %vm2601_vm4, %v6429_v8 }
 0x4d5   : > { %4593 = vmatprep.mubr.msk.f32.mxu1 %vm2601_vm4, %v6438_v32 }
 0x4d8   : > { %4594 = vmatmul.mubr.msk.f32.gmra.mrb[10].mxu1 %vm2601_vm4, %v6441_v36 }
 0x4d9   : > { %4596 = vmatprep.mubr.msk.f32.mxu1 %vm2601_vm4, %v6450_v62 }
 0x4dc   : > { %4597 = vmatmul.mubr.msk.f32.gmra.mrb[12].mxu1 %vm2601_vm4, %v6453_v16 }
 0x4dd   : > { %4599 = vmatprep.mubr.msk.f32.mxu1 %vm2601_vm4, %v6462_v24 }
 0x4e0   : > { %4600 = vmatmul.mubr.msk.f32.gmra.mrb[14].mxu1 %vm2601_vm4, %v6465_v48 }
 0x4e1   : > { %4602 = vmatprep.mubr.msk.f32.mxu1 %vm2601_vm4, %v6474_v47 }
 0x4e4   : > { %4603 = vmatmul.mubr.msk.f32.gmra.mrb[16].mxu1 %vm2601_vm4, %v6477_v53 }
 0x4e5   : > { %4605 = vmatprep.mubr.msk.f32.mxu1 %vm2601_vm4, %v6486_v31 }
 0x4e8   : > { %4606 = vmatmul.mubr.msk.f32.gmra.mrb[18].mxu1 %vm2601_vm4, %v6489_v52 }
 0x4e9   : > { %4608 = vmatprep.mubr.msk.f32.mxu1 %vm2601_vm4, %v6498_v9 }
 0x4ec   : > { %4609 = vmatmul.mubr.msk.f32.gmra.mrb[20].mxu1 %vm2601_vm4, %v6501_v12 }
 0x4ed   : > { %4611 = vmatprep.mubr.msk.f32.mxu1 %vm2601_vm4, %v6510_v60 }
 0x4f0   : > { %4612 = vmatmul.mubr.msk.f32.gmra.mrb[22].mxu1 %vm2601_vm4, %v6513_v17 }
 0x4f1   : > { %4614 = vmatprep.mubr.msk.f32.mxu1 %vm2601_vm4, %v6522_v39 }
 0x4f4   : > { %4615 = vmatmul.mubr.msk.f32.gmra.mrb[24].mxu1 %vm2601_vm4, %v6525_v40 }
 0x4f5   : > { %4617 = vmatprep.mubr.msk.f32.mxu1 %vm2601_vm4, %v6534_v3 }
 0x4f8   : > { %4618 = vmatmul.mubr.msk.f32.gmra.mrb[26].mxu1 %vm2601_vm4, %v6537_v2 }
 0x4f9   : > { %4620 = vmatprep.mubr.msk.f32.mxu1 %vm2601_vm4, %v6546_v30 }
 0x4fc   : > { %4621 = vmatmul.mubr.msk.f32.gmra.mrb[28].mxu1 %vm2601_vm4, %v6549_v29 }
 0x4fd   : > { %4623 = vmatprep.mubr.msk.f32.mxu1 %vm2601_vm4, %v6558_v56 }
 0x500   : > { %4624 = vmatmul.mubr.msk.f32.gmra.mrb[30].mxu1 %vm2601_vm4, %v6561_v18 }
 0x501   : > { %4632 = vmatprep.mubr.msk.f32.mxu1 %vm2601_vm4, %v6395_v11  ;;  %v2160_v11 = vld [vmem:[#allocation3 + $0x1a0] sm:$0xff] }
 0x504   : > { %4633 = vmatmul.mubr.msk.f32.vlgmr.msra.gmra.mrb[0].mxu1 %vm2601_vm4, %v6399_v41  ;;  %v2592_v41 = vsel %vm2557_vm2, %v2555_v5, %v2482_v1 }
 0x505   : > { %4635 = vmatprep.mubr.msk.f32.mxu1 %vm2601_vm4, %v6412_v13  ;;  %v2556_v13 = vsel %vm269_vm3, %v2160_v11, %v2340_v4 }
 0x508   : > { %4636 = vmatmul.mubr.msk.f32.gmra.mrb[2].mxu1 %vm2601_vm4, %v6415_v20  ;;  %v2484_v20 = vpop.permute.xlu0 %2483 }
 0x509   : > { %4638 = vmatprep.mubr.msk.f32.mxu1 %vm2601_vm4, %v6426_v26  ;;  %v2593_v26 = vsel %vm2557_vm2, %v2556_v13, %v2484_v20 }
 0x50c   : > { %4639 = vmatmul.mubr.msk.f32.gmra.mrb[4].mxu1 %vm2601_vm4, %v6429_v8  ;;  %v6720_v8 = vld [vmem:[%s7151_s4] ss:$0 sm:$0xff] }
 0x50d   : > { %4641 = vmatprep.mubr.msk.f32.mxu1 %vm2601_vm4, %v6438_v32 }
 0x510   : > { %4642 = vmatmul.mubr.msk.f32.gmra.mrb[6].mxu1 %vm2601_vm4, %v6441_v36 }
 0x511   : > { %4644 = vmatprep.mubr.msk.f32.mxu1 %vm2601_vm4, %v6450_v62 }
 0x514   : > { %4645 = vmatmul.mubr.msk.f32.gmra.mrb[8].mxu1 %vm2601_vm4, %v6453_v16 }
 0x515   : > { %4647 = vmatprep.mubr.msk.f32.mxu1 %vm2601_vm4, %v6462_v24 }
 0x518   : > { %4648 = vmatmul.mubr.msk.f32.gmra.mrb[10].mxu1 %vm2601_vm4, %v6465_v48 }
 0x519   : > { %4650 = vmatprep.mubr.msk.f32.mxu1 %vm2601_vm4, %v6474_v47 }
 0x51c   : > { %4651 = vmatmul.mubr.msk.f32.gmra.mrb[12].mxu1 %vm2601_vm4, %v6477_v53 }
 0x51d   : > { %4653 = vmatprep.mubr.msk.f32.mxu1 %vm2601_vm4, %v6486_v31 }
 0x520   : > { %4654 = vmatmul.mubr.msk.f32.gmra.mrb[14].mxu1 %vm2601_vm4, %v6489_v52 }
 0x521   : > { %4656 = vmatprep.mubr.msk.f32.mxu1 %vm2601_vm4, %v6498_v9 }
 0x524   : > { %4657 = vmatmul.mubr.msk.f32.gmra.mrb[16].mxu1 %vm2601_vm4, %v6501_v12 }
 0x525   : > { %4659 = vmatprep.mubr.msk.f32.mxu1 %vm2601_vm4, %v6510_v60 }
 0x528   : > { %4660 = vmatmul.mubr.msk.f32.gmra.mrb[18].mxu1 %vm2601_vm4, %v6513_v17 }
 0x529   : > { %4662 = vmatprep.mubr.msk.f32.mxu1 %vm2601_vm4, %v6522_v39 }
 0x52c   : > { %4663 = vmatmul.mubr.msk.f32.gmra.mrb[20].mxu1 %vm2601_vm4, %v6525_v40 }
 0x52d   : > { %4665 = vmatprep.mubr.msk.f32.mxu1 %vm2601_vm4, %v6534_v3 }
 0x530   : > { %4666 = vmatmul.mubr.msk.f32.gmra.mrb[22].mxu1 %vm2601_vm4, %v6537_v2 }
 0x531   : > { %4668 = vmatprep.mubr.msk.f32.mxu1 %vm2601_vm4, %v6546_v30 }
 0x534   : > { %4669 = vmatmul.mubr.msk.f32.gmra.mrb[24].mxu1 %vm2601_vm4, %v6549_v29 }
 0x535   : > { %4671 = vmatprep.mubr.msk.f32.mxu1 %vm2601_vm4, %v6558_v56 }
 0x538   : > { %4672 = vmatmul.mubr.msk.f32.gmra.mrb[26].mxu1 %vm2601_vm4, %v6561_v18 }
 0x539   : > { %4674 = vmatprep.mubr.msk.f32.mxu1 %vm2601_vm4, %v6570_v28 }
 0x53c   : > { %4675 = vmatmul.mubr.msk.f32.gmra.mrb[28].mxu1 %vm2601_vm4, %v6573_v51 }
 0x53d   : > { %4677 = vmatprep.mubr.msk.f32.mxu1 %vm2601_vm4, %v2592_v41 }
 0x540   : > { %4678 = vmatmul.mubr.msk.f32.gmra.mrb[30].mxu1 %vm2601_vm4, %v2593_v26 }
 0x5d7   : > { %v4634_v32 = vpop.f32.mrb[0].mxu1 }
 0x5d8   : > { %v6723_v36 = vadd.f32 %v4634_v32, %v6720_v8  ;;  %v3230_v62 = vpop.f32.mrb[1].mxu1 }
 0x5d9   : > { %v6726_v16 = vadd.f32 %v6720_v8, %v3230_v62 }
 0x5da   : > { %v3461_v24 = vsel %vm269_vm3, %v6723_v36, 0.0 }
 0x5db   : > { %v3460_v48 = vsel %vm269_vm3, %v6726_v16, 0.0  ;;  %v4637_v47 = vpop.f32.mrb[2].mxu1 }
 0x5dc   : > { %v3240_v53 = vpop.f32.mrb[3].mxu1  ;;  %v6733_v31 = vadd.f32 %v4637_v47, %v6720_v8  ;;  %v3462_v9 = vadd.f32 %v3461_v24, %v3460_v48 }
 0x5dd   : > { %v6736_v52 = vadd.f32 %v6720_v8, %v3240_v53 }
 0x5de   : > { %v3465_v40 = vsel %vm269_vm3, %v6733_v31, 0.0 }
 0x5df   : > { %v3463_v12 = vsel %vm269_vm3, %v6736_v52, 0.0  ;;  %v4640_v60 = vpop.f32.mrb[4].mxu1 }
 0x5e0   : > { %v3464_v17 = vadd.f32 %v3463_v12, %v3462_v9  ;;  %v3250_v39 = vpop.f32.mrb[5].mxu1  ;;  %v6743_v3 = vadd.f32 %v4640_v60, %v6720_v8 }
 0x5e1   : > { %v6746_v2 = vadd.f32 %v6720_v8, %v3250_v39 }
 0x5e2   : > { %v3466_v63 = vadd.f32 %v3465_v40, %v3464_v17  ;;  %v3469_v29 = vsel %vm269_vm3, %v6743_v3, 0.0 }
 0x5e3   : > { %v3467_v43 = vsel %vm269_vm3, %v6746_v2, 0.0  ;;  %v4643_v23 = vpop.f32.mrb[6].mxu1 }
 0x5e4   : > { %v3468_v30 = vadd.f32 %v3467_v43, %v3466_v63  ;;  %v3260_v50 = vpop.f32.mrb[7].mxu1  ;;  %v6753_v6 = vadd.f32 %v4643_v23, %v6720_v8 }
 0x5e5   : > { %v6756_v27 = vadd.f32 %v6720_v8, %v3260_v50 }
 0x5e6   : > { %v3470_v59 = vadd.f32 %v3469_v29, %v3468_v30  ;;  %v3473_v56 = vsel %vm269_vm3, %v6753_v6, 0.0 }
 0x5e7   : > { %v3471_v54 = vsel %vm269_vm3, %v6756_v27, 0.0  ;;  %v4646_v58 = vpop.f32.mrb[8].mxu1 }
 0x5e8   : > { %v3472_v57 = vadd.f32 %v3471_v54, %v3470_v59  ;;  %v3270_v55 = vpop.f32.mrb[9].mxu1  ;;  %v6763_v14 = vadd.f32 %v4646_v58, %v6720_v8 }
 0x5e9   : > { %v6766_v18 = vadd.f32 %v6720_v8, %v3270_v55 }
 0x5ea   : > { %v3474_v35 = vadd.f32 %v3473_v56, %v3472_v57  ;;  %v3477_v37 = vsel %vm269_vm3, %v6763_v14, 0.0 }
 0x5eb   : > { %v3475_v0 = vsel %vm269_vm3, %v6766_v18, 0.0  ;;  %v4649_v10 = vpop.f32.mrb[10].mxu1 }
 0x5ec   : > { %v3476_v7 = vadd.f32 %v3475_v0, %v3474_v35  ;;  %v3280_v45 = vpop.f32.mrb[11].mxu1  ;;  %v6773_v61 = vadd.f32 %v4649_v10, %v6720_v8 }
 0x5ed   : > { %v6776_v19 = vadd.f32 %v6720_v8, %v3280_v45 }
 0x5ee   : > { %v3478_v28 = vadd.f32 %v3477_v37, %v3476_v7  ;;  %v3481_v33 = vsel %vm269_vm3, %v6773_v61, 0.0 }
 0x5ef   : > { %v3479_v46 = vsel %vm269_vm3, %v6776_v19, 0.0  ;;  %v4652_v21 = vpop.f32.mrb[12].mxu1 }
 0x5f0   : > { %v3480_v51 = vadd.f32 %v3479_v46, %v3478_v28  ;;  %v3290_v49 = vpop.f32.mrb[13].mxu1  ;;  %v6783_v25 = vadd.f32 %v4652_v21, %v6720_v8 }
 0x5f1   : > { %v6786_v22 = vadd.f32 %v6720_v8, %v3290_v49 }
 0x5f2   : > { %v3482_v34 = vadd.f32 %v3481_v33, %v3480_v51  ;;  %v3485_v4 = vsel %vm269_vm3, %v6783_v25, 0.0 }
 0x5f3   : > { %v3483_v42 = vsel %vm269_vm3, %v6786_v22, 0.0  ;;  %v4655_v38 = vpop.f32.mrb[14].mxu1 }
 0x5f4   : > { %v3484_v44 = vadd.f32 %v3483_v42, %v3482_v34  ;;  %v3300_v15 = vpop.f32.mrb[15].mxu1  ;;  %v6793_v5 = vadd.f32 %v4655_v38, %v6720_v8 }
 0x5f5   : > { %v6796_v1 = vadd.f32 %v6720_v8, %v3300_v15 }
 0x5f6   : > { %v3486_v11 = vadd.f32 %v3485_v4, %v3484_v44  ;;  %v3489_v32 = vsel %vm269_vm3, %v6793_v5, 0.0 }
 0x5f7   : > { %v3487_v41 = vsel %vm269_vm3, %v6796_v1, 0.0  ;;  %v4658_v13 = vpop.f32.mrb[16].mxu1 }
 0x5f8   : > { %v3488_v20 = vadd.f32 %v3487_v41, %v3486_v11  ;;  %v3310_v26 = vpop.f32.mrb[17].mxu1  ;;  %v6803_v62 = vadd.f32 %v4658_v13, %v6720_v8 }
 0x5f9   : > { %v6806_v24 = vadd.f32 %v6720_v8, %v3310_v26 }
 0x5fa   : > { %v3490_v48 = vadd.f32 %v3489_v32, %v3488_v20  ;;  %v3493_v60 = vsel %vm269_vm3, %v6803_v62, 0.0 }
 0x5fb   : > { %v3491_v47 = vsel %vm269_vm3, %v6806_v24, 0.0  ;;  %v4661_v53 = vpop.f32.mrb[18].mxu1 }
 0x5fc   : > { %v3492_v9 = vadd.f32 %v3491_v47, %v3490_v48  ;;  %v3320_v12 = vpop.f32.mrb[19].mxu1  ;;  %v6813_v17 = vadd.f32 %v4661_v53, %v6720_v8 }
 0x5fd   : > { %v6816_v39 = vadd.f32 %v6720_v8, %v3320_v12 }
 0x5fe   : > { %v3494_v40 = vadd.f32 %v3493_v60, %v3492_v9  ;;  %v3497_v50 = vsel %vm269_vm3, %v6813_v17, 0.0 }
 0x5ff   : > { %v3495_v63 = vsel %vm269_vm3, %v6816_v39, 0.0  ;;  %v4664_v43 = vpop.f32.mrb[20].mxu1 }
 0x600   : > { %v3496_v23 = vadd.f32 %v3495_v63, %v3494_v40  ;;  %v3330_v30 = vpop.f32.mrb[21].mxu1  ;;  %v6823_v29 = vadd.f32 %v4664_v43, %v6720_v8 }
 0x601   : > { %v6826_v59 = vadd.f32 %v6720_v8, %v3330_v30 }
 0x602   : > { %v3498_v54 = vadd.f32 %v3497_v50, %v3496_v23  ;;  %v3501_v35 = vsel %vm269_vm3, %v6823_v29, 0.0 }
 0x603   : > { %v3499_v58 = vsel %vm269_vm3, %v6826_v59, 0.0  ;;  %v4667_v57 = vpop.f32.mrb[22].mxu1 }
 0x604   : > { %v3500_v55 = vadd.f32 %v3499_v58, %v3498_v54  ;;  %v3340_v56 = vpop.f32.mrb[23].mxu1  ;;  %v3451_v0 = vadd.f32 %v4667_v57, %v6720_v8 }
 0x605   : > { %v3450_v10 = vadd.f32 %v6720_v8, %v3340_v56 }
 0x606   : > { %v3502_v7 = vadd.f32 %v3501_v35, %v3500_v55  ;;  %v3505_v21 = vsel %vm269_vm3, %v3451_v0, 0.0 }
 0x607   : > { %v3503_v45 = vsel %vm269_vm3, %v3450_v10, 0.0  ;;  %v4670_v37 = vpop.f32.mrb[24].mxu1 }
 0x608   : > { %v3504_v28 = vadd.f32 %v3503_v45, %v3502_v7  ;;  %v3350_v46 = vpop.f32.mrb[25].mxu1  ;;  %v3453_v51 = vadd.f32 %v4670_v37, %v6720_v8 }
 0x609   : > { %v3452_v49 = vadd.f32 %v6720_v8, %v3350_v46 }
 0x60a   : > { %v3506_v33 = vadd.f32 %v3505_v21, %v3504_v28  ;;  %v3509_v15 = vsel %vm269_vm3, %v3453_v51, 0.0 }
 0x60b   : > { %v3507_v34 = vsel %vm269_vm3, %v3452_v49, 0.0  ;;  %v4673_v42 = vpop.f32.mrb[26].mxu1 }
 0x60c   : > { %v3508_v38 = vadd.f32 %v3507_v34, %v3506_v33  ;;  %v3360_v44 = vpop.f32.mrb[27].mxu1  ;;  %v3455_v4 = vadd.f32 %v4673_v42, %v6720_v8 }
 0x60d   : > { %v3454_v11 = vadd.f32 %v6720_v8, %v3360_v44 }
 0x60e   : > { %v3510_v41 = vadd.f32 %v3509_v15, %v3508_v38  ;;  %v3513_v48 = vsel %vm269_vm3, %v3455_v4, 0.0 }
 0x60f   : > { %v3511_v13 = vsel %vm269_vm3, %v3454_v11, 0.0  ;;  %v4676_v20 = vpop.f32.mrb[28].mxu1 }
 0x610   : > { %v3512_v26 = vadd.f32 %v3511_v13, %v3510_v41  ;;  %v3370_v32 = vpop.f32.mrb[29].mxu1  ;;  %v3457_v47 = vadd.f32 %v4676_v20, %v6720_v8 }
 0x611   : > { %v3456_v53 = vadd.f32 %v6720_v8, %v3370_v32 }
 0x612   : > { %v3514_v9 = vadd.f32 %v3513_v48, %v3512_v26  ;;  %v3517_v43 = vsel %vm269_vm3, %v3457_v47, 0.0 }
 0x613   : > { %v3515_v12 = vsel %vm269_vm3, %v3456_v53, 0.0  ;;  %v4679_v60 = vpop.f32.mrb[30].mxu1 }
 0x614   : > { %v3516_v40 = vadd.f32 %v3515_v12, %v3514_v9  ;;  %v3380_v63 = vpop.f32.mrb[31].mxu1  ;;  %v3459_v23 = vadd.f32 %v4679_v60, %v6720_v8 }
 0x615   : > { %v3458_v30 = vadd.f32 %v6720_v8, %v3380_v63 }
 0x616   : > { %v3518_v50 = vadd.f32 %v3517_v43, %v3516_v40  ;;  %v3521_v57 = vsel %vm269_vm3, %v3459_v23, 0.0 }
 0x617   : > { %v3519_v54 = vsel %vm269_vm3, %v3458_v30, 0.0 }
 0x618   : > { %v3520_v58 = vadd.f32 %v3519_v54, %v3518_v50 }
 0x61a   : > { %v3522_v55 = vadd.f32 %v3521_v57, %v3520_v58 }
 0x61c   : > { %v3523_v56 = vrot.slane %v3522_v55, 4 }
 0x61e   : > { %v3524_v35 = vadd.f32 %v3523_v56, %v3522_v55 }
 0x620   : > { %v3525_v7 = vrot.slane %v3524_v35, 2 }
 0x622   : > { %v3526_v45 = vadd.f32 %v3525_v7, %v3524_v35 }
 0x624   : > { %v3527_v37 = vrot.slane %v3526_v45, 1 }
 0x626   : > { %v3528_v28 = vadd.f32 %v3527_v37, %v3526_v45 }
 0x628   : > { %v3529_v46 = vmul.f32 0.00390625, %v3528_v28 }
 0x62a   : > { %v6853_v21 = vsub.f32 %v6776_v19, %v3529_v46  ;;  %v6856_v33 = vsub.f32 %v6773_v61, %v3529_v46  ;;  %v6859_v8 = vsub.f32 %v6786_v22, %v3529_v46  ;;  %v6862_v34 = vsub.f32 %v6783_v25, %v3529_v46 }
 0x62b   : > { %v6865_v42 = vsub.f32 %v6796_v1, %v3529_v46  ;;  %v6868_v38 = vsub.f32 %v6793_v5, %v3529_v46  ;;  %v6871_v44 = vsub.f32 %v6806_v24, %v3529_v46  ;;  %v6874_v19 = vsub.f32 %v6803_v62, %v3529_v46 }
 0x62c   : > { %v6877_v61 = vsub.f32 %v6816_v39, %v3529_v46  ;;  %v6880_v22 = vsub.f32 %v6813_v17, %v3529_v46  ;;  %v6883_v25 = vsub.f32 %v6826_v59, %v3529_v46  ;;  %v6886_v1 = vsub.f32 %v6823_v29, %v3529_v46 }
 0x62d   : > { %v6888_v5 = vsub.f32 %v3450_v10, %v3529_v46  ;;  %v6890_v15 = vsub.f32 %v3451_v0, %v3529_v46  ;;  %v6892_v24 = vsub.f32 %v3452_v49, %v3529_v46  ;;  %v6894_v62 = vsub.f32 %v3453_v51, %v3529_v46 }
 0x62e   : > { %v6896_v41 = vsub.f32 %v3454_v11, %v3529_v46  ;;  %v6898_v39 = vsub.f32 %v3455_v4, %v3529_v46  ;;  %v6900_v17 = vsub.f32 %v3456_v53, %v3529_v46  ;;  %v6902_v13 = vsub.f32 %v3457_v47, %v3529_v46 }
 0x62f   : > { %v6904_v59 = vsub.f32 %v3458_v30, %v3529_v46  ;;  %v6906_v29 = vsub.f32 %v3459_v23, %v3529_v46  ;;  %v6909_v10 = vsub.f32 %v6726_v16, %v3529_v46  ;;  %v6912_v0 = vsub.f32 %v6723_v36, %v3529_v46 }
 0x630   : > { %v6915_v51 = vsub.f32 %v6736_v52, %v3529_v46  ;;  %v6918_v49 = vsub.f32 %v6733_v31, %v3529_v46  ;;  %v6925_v20 = vsub.f32 %v6746_v2, %v3529_v46  ;;  %v6930_v36 = vsub.f32 %v6743_v3, %v3529_v46 }
 0x631   : > { %v3562_v4 = vmul.f32 %v6909_v10, %v6909_v10  ;;  %v3563_v11 = vmul.f32 %v6912_v0, %v6912_v0  ;;  %v6937_v48 = vsub.f32 %v6756_v27, %v3529_v46  ;;  %v6943_v3 = vsub.f32 %v6753_v6, %v3529_v46 }
 0x632   : > { %v3564_v16 = vmul.f32 %v6915_v51, %v6915_v51  ;;  %v3565_v52 = vmul.f32 %v6918_v49, %v6918_v49  ;;  %v3566_v2 = vmul.f32 %v6925_v20, %v6925_v20  ;;  %v3567_v9 = vmul.f32 %v6930_v36, %v6930_v36 }
 0x633   : > { %v3594_v31 = vsel %vm269_vm3, %v3562_v4, 0.0  ;;  %v3595_v26 = vsel %vm269_vm3, %v3563_v11, 0.0  ;;  %v6949_v40 = vsub.f32 %v6766_v18, %v3529_v46  ;;  %v3568_v27 = vmul.f32 %v6937_v48, %v6937_v48 }
 0x634   : > { %v3596_v32 = vadd.f32 %v3595_v26, %v3594_v31  ;;  %v3597_v47 = vsel %vm269_vm3, %v3564_v16, 0.0  ;;  %v3599_v12 = vsel %vm269_vm3, %v3565_v52, 0.0  ;;  %v3601_v63 = vsel %vm269_vm3, %v3566_v2, 0.0 }
 0x635   : > { %v6955_v23 = vsub.f32 %v6763_v14, %v3529_v46  ;;  %v3569_v6 = vmul.f32 %v6943_v3, %v6943_v3  ;;  %v3603_v30 = vsel %vm269_vm3, %v3567_v9, 0.0  ;;  %v3570_v54 = vmul.f32 %v6949_v40, %v6949_v40 }
 0x636   : > { %v3598_v53 = vadd.f32 %v3597_v47, %v3596_v32  ;;  %v3605_v18 = vsel %vm269_vm3, %v3568_v27, 0.0  ;;  %v3572_v14 = vmul.f32 %v6853_v21, %v6853_v21  ;;  %v3573_v45 = vmul.f32 %v6856_v33, %v6856_v33 }
 0x637   : > { %v3571_v57 = vmul.f32 %v6955_v23, %v6955_v23  ;;  %v3607_v55 = vsel %vm269_vm3, %v3569_v6, 0.0  ;;  %v3609_v35 = vsel %vm269_vm3, %v3570_v54, 0.0  ;;  %v3574_v46 = vmul.f32 %v6859_v8, %v6859_v8 }
 0x638   : > { %v3600_v60 = vadd.f32 %v3599_v12, %v3598_v53  ;;  %v3613_v4 = vsel %vm269_vm3, %v3572_v14, 0.0  ;;  %v3575_v16 = vmul.f32 %v6862_v34, %v6862_v34  ;;  %v3615_v52 = vsel %vm269_vm3, %v3573_v45, 0.0 }
 0x639   : > { %v3611_v37 = vsel %vm269_vm3, %v3571_v57, 0.0  ;;  %v3576_v26 = vmul.f32 %v6865_v42, %v6865_v42  ;;  %v3617_v32 = vsel %vm269_vm3, %v3574_v46, 0.0  ;;  %v3577_v47 = vmul.f32 %v6868_v38, %v6868_v38 }
 0x63a   : > { %v3602_v43 = vadd.f32 %v3601_v63, %v3600_v60  ;;  %v3619_v53 = vsel %vm269_vm3, %v3575_v16, 0.0  ;;  %v3578_v12 = vmul.f32 %v6871_v44, %v6871_v44  ;;  %v3579_v63 = vmul.f32 %v6874_v19, %v6874_v19 }
 0x63b   : > { %v3621_v60 = vsel %vm269_vm3, %v3576_v26, 0.0 }
 0x63c   : > { %v3604_v50 = vadd.f32 %v3603_v30, %v3602_v43  ;;  %v3623_v43 = vsel %vm269_vm3, %v3577_v47, 0.0  ;;  %v3580_v30 = vmul.f32 %v6877_v61, %v6877_v61 }
 0x63e   : > { %v3606_v58 = vadd.f32 %v3605_v18, %v3604_v50  ;;  %v3625_v50 = vsel %vm269_vm3, %v3578_v12, 0.0  ;;  %v3581_v18 = vmul.f32 %v6880_v22, %v6880_v22 }
 0x640   : > { %v3608_v56 = vadd.f32 %v3607_v55, %v3606_v58  ;;  %v3627_v58 = vsel %vm269_vm3, %v3579_v63, 0.0  ;;  %v3582_v55 = vmul.f32 %v6883_v25, %v6883_v25 }
 0x642   : > { %v3610_v7 = vadd.f32 %v3609_v35, %v3608_v56  ;;  %v3629_v56 = vsel %vm269_vm3, %v3580_v30, 0.0  ;;  %v3583_v35 = vmul.f32 %v6886_v1, %v6886_v1 }
 0x644   : > { %v3612_v28 = vadd.f32 %v3611_v37, %v3610_v7  ;;  %v3631_v7 = vsel %vm269_vm3, %v3581_v18, 0.0  ;;  %v3584_v37 = vmul.f32 %v6888_v5, %v6888_v5 }
 0x646   : > { %v3614_v11 = vadd.f32 %v3613_v4, %v3612_v28  ;;  %v3633_v28 = vsel %vm269_vm3, %v3582_v55, 0.0  ;;  %v3585_v4 = vmul.f32 %v6890_v15, %v6890_v15 }
 0x648   : > { %v3616_v31 = vadd.f32 %v3615_v52, %v3614_v11  ;;  %v3635_v11 = vsel %vm269_vm3, %v3583_v35, 0.0  ;;  %v3586_v52 = vmul.f32 %v6892_v24, %v6892_v24 }
 0x64a   : > { %v3618_v2 = vadd.f32 %v3617_v32, %v3616_v31  ;;  %v3637_v31 = vsel %vm269_vm3, %v3584_v37, 0.0  ;;  %v3587_v32 = vmul.f32 %v6894_v62, %v6894_v62 }
 0x64c   : > { %v3620_v9 = vadd.f32 %v3619_v53, %v3618_v2  ;;  %v3639_v2 = vsel %vm269_vm3, %v3585_v4, 0.0  ;;  %v3588_v53 = vmul.f32 %v6896_v41, %v6896_v41 }
 0x64e   : > { %v3622_v27 = vadd.f32 %v3621_v60, %v3620_v9  ;;  %v3641_v9 = vsel %vm269_vm3, %v3586_v52, 0.0  ;;  %v3589_v60 = vmul.f32 %v6898_v39, %v6898_v39 }
 0x650   : > { %v3624_v6 = vadd.f32 %v3623_v43, %v3622_v27  ;;  %v3643_v27 = vsel %vm269_vm3, %v3587_v32, 0.0  ;;  %v3590_v43 = vmul.f32 %v6900_v17, %v6900_v17 }
 0x652   : > { %v3626_v54 = vadd.f32 %v3625_v50, %v3624_v6  ;;  %v3645_v6 = vsel %vm269_vm3, %v3588_v53, 0.0  ;;  %v3591_v50 = vmul.f32 %v6902_v13, %v6902_v13 }
 0x654   : > { %v3628_v57 = vadd.f32 %v3627_v58, %v3626_v54  ;;  %v3647_v54 = vsel %vm269_vm3, %v3589_v60, 0.0  ;;  %v3592_v58 = vmul.f32 %v6904_v59, %v6904_v59 }
 0x656   : > { %v3630_v14 = vadd.f32 %v3629_v56, %v3628_v57  ;;  %v3649_v57 = vsel %vm269_vm3, %v3590_v43, 0.0  ;;  %v3593_v56 = vmul.f32 %v6906_v29, %v6906_v29 }
 0x658   : > { %v3632_v45 = vadd.f32 %v3631_v7, %v3630_v14  ;;  %v3651_v14 = vsel %vm269_vm3, %v3591_v50, 0.0  ;;  %v3653_v7 = vsel %vm269_vm3, %v3592_v58, 0.0  ;;  %v3655_v37 = vsel %vm269_vm3, %v3593_v56, 0.0 }
 0x65a   : > { %v3634_v46 = vadd.f32 %v3633_v28, %v3632_v45 }
 0x65c   : > { %v3636_v16 = vadd.f32 %v3635_v11, %v3634_v46 }
 0x65e   : > { %v3638_v26 = vadd.f32 %v3637_v31, %v3636_v16 }
 0x660   : > { %v3640_v47 = vadd.f32 %v3639_v2, %v3638_v26 }
 0x662   : > { %v3642_v12 = vadd.f32 %v3641_v9, %v3640_v47 }
 0x664   : > { %v3644_v63 = vadd.f32 %v3643_v27, %v3642_v12 }
 0x666   : > { %v3646_v30 = vadd.f32 %v3645_v6, %v3644_v63 }
 0x668   : > { %v3648_v18 = vadd.f32 %v3647_v54, %v3646_v30 }
 0x66a   : > { %v3650_v55 = vadd.f32 %v3649_v57, %v3648_v18 }
 0x66c   : > { %v3652_v35 = vadd.f32 %v3651_v14, %v3650_v55 }
 0x66e   : > { %v3654_v45 = vadd.f32 %v3653_v7, %v3652_v35 }
 0x670   : > { %v3656_v28 = vadd.f32 %v3655_v37, %v3654_v45 }
 0x672   : > { %v3657_v46 = vrot.slane %v3656_v28, 4 }
 0x674   : > { %v3658_v4 = vadd.f32 %v3657_v46, %v3656_v28 }
 0x676   : > { %v3659_v11 = vrot.slane %v3658_v4, 2 }
 0x678   : > { %v3660_v16 = vadd.f32 %v3659_v11, %v3658_v4 }
 0x67a   : > { %v3661_v52 = vrot.slane %v3660_v16, 1 }
 0x67c   : > { %v3662_v31 = vadd.f32 %v3661_v52, %v3660_v16 }
 0x67e   : > { %v3663_v26 = vmul.f32 0.00390625, %v3662_v31 }
 0x680   : > { %v3664_v32 = vadd.f32 1e-05, %v3663_v26 }
 0x682   : > { %4885 = vrsqrt.f32 %v3664_v32 }
 0x68c   : > { %v7034_v2 = vpop.eup %4885 }
 0x68d   : > { %v3666_v47 = vmul.f32 %v7034_v2, %v6909_v10  ;;  %v3682_v53 = vmul.f32 %v7034_v2, %v6871_v44  ;;  %v3683_v9 = vmul.f32 %v7034_v2, %v6874_v19  ;;  %v3667_v12 = vmul.f32 %v7034_v2, %v6912_v0 }
 0x68e   : > { %v3668_v63 = vmul.f32 %v7034_v2, %v6915_v51  ;;  %v3684_v43 = vmul.f32 %v7034_v2, %v6877_v61  ;;  %v3669_v19 = vmul.f32 %v7034_v2, %v6918_v49  ;;  %v3685_v0 = vmul.f32 %v7034_v2, %v6880_v22 }
 0x68f   : > { %vm3714_vm3 = vcmp.gt.f32.partialorder %v3682_v53, 0.0  ;;  %v3746_v60 = vmul.f32 0.2, %v3682_v53  ;;  %vm3698_vm8 = vcmp.gt.f32.partialorder %v3666_v47, 0.0  ;;  %v3730_v27 = vmul.f32 0.2, %v3666_v47 }
 0x690   : > { %v3747_v30 = vmul.f32 0.2, %v3683_v9  ;;  %v3731_v44 = vmul.f32 0.2, %v3667_v12  ;;  %vm3715_vm9 = vcmp.gt.f32.partialorder %v3683_v9, 0.0  ;;  %vm3699_vm11 = vcmp.gt.f32.partialorder %v3667_v12, 0.0 }
 0x691   : > { %v3778_v10 = vsel %vm3714_vm3, %v3682_v53, %v3746_v60  ;;  %v3762_v6 = vsel %vm3698_vm8, %v3666_v47, %v3730_v27  ;;  %v3748_v51 = vmul.f32 0.2, %v3684_v43  ;;  %v3732_v18 = vmul.f32 0.2, %v3668_v63 }
 0x692   : > { %3826 = vxpose.xlu0.b32.start [1/16] (narrow) %v3778_v10, 8  ;;  %3794 = vxpose.xlu1.b32.start [1/16] (narrow) %v3762_v6, 8  ;;  %v3779_v50 = vsel %vm3715_vm9, %v3683_v9, %v3747_v30  ;;  %v3763_v54 = vsel %vm3699_vm11, %v3667_v12, %v3731_v44  ;;  %vm3716_vm12 = vcmp.gt.f32.partialorder %v3684_v43, 0.0  ;;  %vm3700_vm14 = vcmp.gt.f32.partialorder %v3668_v63, 0.0 }
 0x693   : > { %v3670_v61 = vmul.f32 %v7034_v2, %v6925_v20  ;;  %v3686_v58 = vmul.f32 %v7034_v2, %v6883_v25  ;;  %v3780_v57 = vsel %vm3716_vm12, %v3684_v43, %v3748_v51  ;;  %v3764_v55 = vsel %vm3700_vm14, %v3668_v63, %v3732_v18 }
 0x694   : > { %v3749_v49 = vmul.f32 0.2, %v3685_v0  ;;  %v3733_v56 = vmul.f32 0.2, %v3669_v19  ;;  %vm3717_vm5 = vcmp.gt.f32.partialorder %v3685_v0, 0.0  ;;  %vm3701_vm6 = vcmp.gt.f32.partialorder %v3669_v19, 0.0 }
 0x695   : > { %v3671_v22 = vmul.f32 %v7034_v2, %v6930_v36  ;;  %v3687_v14 = vmul.f32 %v7034_v2, %v6886_v1  ;;  %v3750_v20 = vmul.f32 0.2, %v3686_v58  ;;  %v3734_v45 = vmul.f32 0.2, %v3670_v61 }
 0x696   : > { %3827 = vxpose.xlu0.b32.cont [2/16] (narrow) %v3779_v50, 8  ;;  %3795 = vxpose.xlu1.b32.cont [2/16] (narrow) %v3763_v54, 8  ;;  %v3781_v35 = vsel %vm3717_vm5, %v3685_v0, %v3749_v49  ;;  %v3765_v7 = vsel %vm3701_vm6, %v3669_v19, %v3733_v56  ;;  %vm3718_vm15 = vcmp.gt.f32.partialorder %v3686_v58, 0.0  ;;  %vm3702_vm1 = vcmp.gt.f32.partialorder %v3670_v61, 0.0 }
 0x697   : > { %v3672_v25 = vmul.f32 %v7034_v2, %v6937_v48  ;;  %v3688_v37 = vmul.f32 %v7034_v2, %v6888_v5  ;;  %v3782_v28 = vsel %vm3718_vm15, %v3686_v58, %v3750_v20  ;;  %v3766_v46 = vsel %vm3702_vm1, %v3670_v61, %v3734_v45 }
 0x698   : > { %v3751_v36 = vmul.f32 0.2, %v3687_v14  ;;  %v3735_v4 = vmul.f32 0.2, %v3671_v22  ;;  %vm3719_vm0 = vcmp.gt.f32.partialorder %v3687_v14, 0.0  ;;  %vm3703_vm7 = vcmp.gt.f32.partialorder %v3671_v22, 0.0 }
 0x699   : > { %v3673_v1 = vmul.f32 %v7034_v2, %v6943_v3  ;;  %v3689_v11 = vmul.f32 %v7034_v2, %v6890_v15  ;;  %v3752_v48 = vmul.f32 0.2, %v3688_v37  ;;  %v3736_v31 = vmul.f32 0.2, %v3672_v25 }
 0x69a   : > { %3828 = vxpose.xlu0.b32.cont [3/16] (narrow) %v3780_v57, 8  ;;  %3796 = vxpose.xlu1.b32.cont [3/16] (narrow) %v3764_v55, 8  ;;  %v3783_v16 = vsel %vm3719_vm0, %v3687_v14, %v3751_v36  ;;  %v3767_v52 = vsel %vm3703_vm7, %v3671_v22, %v3735_v4  ;;  %vm3720_vm10 = vcmp.gt.f32.partialorder %v3688_v37, 0.0  ;;  %vm3704_vm13 = vcmp.gt.f32.partialorder %v3672_v25, 0.0 }
 0x69b   : > { %v3674_v5 = vmul.f32 %v7034_v2, %v6949_v40  ;;  %v3690_v26 = vmul.f32 %v7034_v2, %v6892_v24  ;;  %v3784_v32 = vsel %vm3720_vm10, %v3688_v37, %v3752_v48  ;;  %v3768_v47 = vsel %vm3704_vm13, %v3672_v25, %v3736_v31 }
 0x69c   : > { %v3753_v3 = vmul.f32 0.2, %v3689_v11  ;;  %v3737_v53 = vmul.f32 0.2, %v3673_v1  ;;  %vm3721_vm2 = vcmp.gt.f32.partialorder %v3689_v11, 0.0  ;;  %vm3705_vm4 = vcmp.gt.f32.partialorder %v3673_v1, 0.0 }
 0x69d   : > { %v3675_v15 = vmul.f32 %v7034_v2, %v6955_v23  ;;  %v3691_v9 = vmul.f32 %v7034_v2, %v6894_v62  ;;  %v3754_v40 = vmul.f32 0.2, %v3690_v26  ;;  %v3738_v27 = vmul.f32 0.2, %v3674_v5 }
 0x69e   : > { %3829 = vxpose.xlu0.b32.cont [4/16] (narrow) %v3781_v35, 8  ;;  %3797 = vxpose.xlu1.b32.cont [4/16] (narrow) %v3765_v7, 8  ;;  %v3785_v12 = vsel %vm3721_vm2, %v3689_v11, %v3753_v3  ;;  %v3769_v60 = vsel %vm3705_vm4, %v3673_v1, %v3737_v53  ;;  %vm3722_vm3 = vcmp.gt.f32.partialorder %v3690_v26, 0.0  ;;  %vm3706_vm8 = vcmp.gt.f32.partialorder %v3674_v5, 0.0 }
 0x69f   : > { %v3676_v24 = vmul.f32 %v7034_v2, %v6853_v21  ;;  %v3692_v63 = vmul.f32 %v7034_v2, %v6896_v41  ;;  %v3786_v43 = vsel %vm3722_vm3, %v3690_v26, %v3754_v40  ;;  %v3770_v10 = vsel %vm3706_vm8, %v3674_v5, %v3738_v27 }
 0x6a0   : > { %v3755_v23 = vmul.f32 0.2, %v3691_v9  ;;  %v3739_v6 = vmul.f32 0.2, %v3675_v15  ;;  %vm3723_vm9 = vcmp.gt.f32.partialorder %v3691_v9, 0.0  ;;  %vm3707_vm11 = vcmp.gt.f32.partialorder %v3675_v15, 0.0 }
 0x6a1   : > { %v3677_v62 = vmul.f32 %v7034_v2, %v6856_v33  ;;  %v3693_v30 = vmul.f32 %v7034_v2, %v6898_v39  ;;  %v3756_v21 = vmul.f32 0.2, %v3692_v63  ;;  %v3740_v0 = vmul.f32 0.2, %v3676_v24 }
 0x6a2   : > { %3830 = vxpose.xlu0.b32.cont [5/16] (narrow) %v3782_v28, 8  ;;  %3798 = vxpose.xlu1.b32.cont [5/16] (narrow) %v3766_v46, 8  ;;  %v3787_v44 = vsel %vm3723_vm9, %v3691_v9, %v3755_v23  ;;  %v3771_v19 = vsel %vm3707_vm11, %v3675_v15, %v3739_v6  ;;  %vm3724_vm12 = vcmp.gt.f32.partialorder %v3692_v63, 0.0  ;;  %vm3708_vm14 = vcmp.gt.f32.partialorder %v3676_v24, 0.0 }
 0x6a3   : > { %v3678_v41 = vmul.f32 %v7034_v2, %v6859_v8  ;;  %v3694_v50 = vmul.f32 %v7034_v2, %v6900_v17  ;;  %v3788_v54 = vsel %vm3724_vm12, %v3692_v63, %v3756_v21  ;;  %v3772_v51 = vsel %vm3708_vm14, %v3676_v24, %v3740_v0 }
 0x6a4   : > { %v3757_v33 = vmul.f32 0.2, %v3693_v30  ;;  %v3741_v18 = vmul.f32 0.2, %v3677_v62  ;;  %vm3725_vm5 = vcmp.gt.f32.partialorder %v3693_v30, 0.0  ;;  %vm3709_vm6 = vcmp.gt.f32.partialorder %v3677_v62, 0.0 }
 0x6a5   : > { %v3679_v39 = vmul.f32 %v7034_v2, %v6862_v34  ;;  %v3695_v61 = vmul.f32 %v7034_v2, %v6902_v13  ;;  %v3758_v8 = vmul.f32 0.2, %v3694_v50  ;;  %v3742_v55 = vmul.f32 0.2, %v3678_v41 }
 0x6a6   : > { %3831 = vxpose.xlu0.b32.cont [6/16] (narrow) %v3783_v16, 8  ;;  %3799 = vxpose.xlu1.b32.cont [6/16] (narrow) %v3767_v52, 8  ;;  %v3789_v58 = vsel %vm3725_vm5, %v3693_v30, %v3757_v33  ;;  %v3773_v57 = vsel %vm3709_vm6, %v3677_v62, %v3741_v18  ;;  %vm3726_vm15 = vcmp.gt.f32.partialorder %v3694_v50, 0.0  ;;  %vm3710_vm1 = vcmp.gt.f32.partialorder %v3678_v41, 0.0 }
 0x6a7   : > { %v3696_v17 = vmul.f32 %v7034_v2, %v6904_v59  ;;  %v3680_v49 = vmul.f32 %v7034_v2, %v6865_v42  ;;  %v3790_v56 = vsel %vm3726_vm15, %v3694_v50, %v3758_v8  ;;  %v3774_v22 = vsel %vm3710_vm1, %v3678_v41, %v3742_v55 }
 0x6a8   : > { %v3759_v34 = vmul.f32 0.2, %v3695_v61  ;;  %v3743_v14 = vmul.f32 0.2, %v3679_v39  ;;  %vm3727_vm0 = vcmp.gt.f32.partialorder %v3695_v61, 0.0  ;;  %vm3711_vm7 = vcmp.gt.f32.partialorder %v3679_v39, 0.0 }
 0x6a9   : > { %v3681_v13 = vmul.f32 %v7034_v2, %v6868_v38  ;;  %v3697_v35 = vmul.f32 %v7034_v2, %v6906_v29  ;;  %v3760_v59 = vmul.f32 0.2, %v3696_v17  ;;  %v3744_v45 = vmul.f32 0.2, %v3680_v49 }
 0x6aa   : > { %3832 = vxpose.xlu0.b32.cont [7/16] (narrow) %v3784_v32, 8  ;;  %3800 = vxpose.xlu1.b32.cont [7/16] (narrow) %v3768_v47, 8  ;;  %v3791_v7 = vsel %vm3727_vm0, %v3695_v61, %v3759_v34  ;;  %v3775_v20 = vsel %vm3711_vm7, %v3679_v39, %v3743_v14  ;;  %vm3728_vm10 = vcmp.gt.f32.partialorder %v3696_v17, 0.0  ;;  %vm3712_vm13 = vcmp.gt.f32.partialorder %v3680_v49, 0.0 }
 0x6ab   : > { %v3792_v42 = vsel %vm3728_vm10, %v3696_v17, %v3760_v59  ;;  %v3776_v25 = vsel %vm3712_vm13, %v3680_v49, %v3744_v45  ;;  %v3761_v37 = vmul.f32 0.2, %v3697_v35  ;;  %v3745_v28 = vmul.f32 0.2, %v3681_v13 }
 0x6ac   : > { %vm3729_vm2 = vcmp.gt.f32.partialorder %v3697_v35, 0.0  ;;  %vm3713_vm4 = vcmp.gt.f32.partialorder %v3681_v13, 0.0 }
 0x6ad   : > { %v3793_v38 = vsel %vm3729_vm2, %v3697_v35, %v3761_v37  ;;  %v3777_v29 = vsel %vm3713_vm4, %v3681_v13, %v3745_v28 }
 0x6ae   : > { %3833 = vxpose.xlu0.b32.cont [8/16] (narrow) %v3785_v12, 8  ;;  %3801 = vxpose.xlu1.b32.cont [8/16] (narrow) %v3769_v60, 8 }
 0x6b2   : > { %3834 = vxpose.xlu0.b32.cont [9/16] (narrow) %v3786_v43, 8  ;;  %3802 = vxpose.xlu1.b32.cont [9/16] (narrow) %v3770_v10, 8 }
 0x6b6   : > { %3835 = vxpose.xlu0.b32.cont [10/16] (narrow) %v3787_v44, 8  ;;  %3803 = vxpose.xlu1.b32.cont [10/16] (narrow) %v3771_v19, 8 }
 0x6ba   : > { %3836 = vxpose.xlu0.b32.cont [11/16] (narrow) %v3788_v54, 8  ;;  %3804 = vxpose.xlu1.b32.cont [11/16] (narrow) %v3772_v51, 8 }
 0x6be   : > { %3837 = vxpose.xlu0.b32.cont [12/16] (narrow) %v3789_v58, 8  ;;  %3805 = vxpose.xlu1.b32.cont [12/16] (narrow) %v3773_v57, 8 }
 0x6c2   : > { %3838 = vxpose.xlu0.b32.cont [13/16] (narrow) %v3790_v56, 8  ;;  %3806 = vxpose.xlu1.b32.cont [13/16] (narrow) %v3774_v22, 8 }
 0x6c6   : > { %3839 = vxpose.xlu0.b32.cont [14/16] (narrow) %v3791_v7, 8  ;;  %3807 = vxpose.xlu1.b32.cont [14/16] (narrow) %v3775_v20, 8 }
 0x6ca   : > { %3840 = vxpose.xlu0.b32.cont [15/16] (narrow) %v3792_v42, 8  ;;  %3808 = vxpose.xlu1.b32.cont [15/16] (narrow) %v3776_v25, 8 }
 0x6ce   : > { %3841 = vxpose.xlu0.b32.end [16/16] (narrow) %v3793_v38, 8  ;;  %3809 = vxpose.xlu1.b32.end [16/16] (narrow) %v3777_v29, 8 }
 0x712   : > { %v3842_v2 = vpop.trf.xlu0  ;;  %v3810_v46 = vpop.trf.xlu1 }
 0x713   : > { %3859 = vst [vmem:[%s217_s23 + $0x8] sm:$0xff] %v3842_v2  ;;  %3858 = vst [vmem:[%s217_s23] sm:$0xff] %v3810_v46 }
 0x714   : > { %4900 = shalt.err (!%p4897_p3)
}
 0x715   : > { %s4901_s15 = scalar_lea.hbm %s7107_s7, 256  ;;  %s4905_s14 = scalar_lea.hbm %s7152_s5, 512 }
 0x716   : > { %p4902_p4 = scmp.ne.s32.totalorder %s7107_s7, %s4901_s15  ;;  %p4906_p9 = scmp.lt.u32.totalorder %s7107_s7, %s7152_s5 }
 0x717   : > { %p4907_p10 = scmp.lt.u32.totalorder %s4905_s14, %s4901_s15  ;;  %p4909_p12 = scmp.lt.u32.totalorder %s4901_s15, %s7107_s7 }
 0x718   : > { %p4903_p7 = pnand %p4902_p4, %p5025_p5 }
 0x719   : > { %p4908_p11 = por %p4907_p10, %p4906_p9 }
 0x71a   : > { %p4904_p8 = pneg %p4903_p7 }
 0x71b   : > { %p4910_p13 = por %p4909_p12, %p4908_p11 }
 0x71d   : > { %p4911_p0 = pnand %p4910_p13, %p4904_p8 }
 0x71f   : > { %4914 = shalt.err (!%p4911_p0)
}
 0x720   : > { %4838 = dma.vmem_to_hbm [thread:$0]  (%p5025_p5), %s7102_s25, 256, %s7107_s7, %s3861_s8  }
 0x721 PF: > { %p4844_p1 = scmp.ge.s32.totalorder %s4949_s21, 2  ;;  %s3887_s23 = sand.u32 1, %s4937_s18  }
 0x722   : > { %s3888_s26 = scalar_lea.sflag [#allocation5], %s3887_s23 }
 0x723   : > { %p4841_p2 = pnand %p4844_p1, %p5029_p6 }
 0x725   : > { %4932 = dma.done.wait (!%p4841_p2), %s3888_s26, 256  }
 0x726   : > { %4934 = vsyncadd (!%p4841_p2), %s3888_s26, 4294967040  ;;  %p15_p3 = scmp.ge.s32.totalorder %s5012_s24, 4   ;;  %s7171_s18 = smov %s4941_s19 }
 0x727   : > { %s7172_s19 = smov %s4945_s20  ;;  %s7173_s20 = smov %s5023_s27 }
 0x728   : > { %s7174_s21 = smov %s5012_s24  ;;  %17 = sbr.rel (!%p15_p3) target bundleno = 3 (0x3), region = 83 }
 0x72f   :  { %3893 = vsyncpa [#allocation5], 1 }
 0x730   :  { %3895 = vsyncpa [#allocation5 + $0x1], 1 }

// kernel: tpu_custom_call.1
= control target key start
LH: loop header
LB: loop body
LE: loop exit
PB: predicated region body
PF: predicated region fallthrough
CT: control target
= control target key end

     0   :  { %10 = vsyncpa [#allocation5], 0  ;;  %s12387_s0 = inlined_call_operand.vmem [shape: f32[2,256,4], index: 0, kind: input, shape index: {}]   ;;  %s12388_s1 = inlined_call_operand.vmem [shape: f32[3,12,8], index: 1, kind: input, shape index: {}]   ;;  %s12389_s2 = inlined_call_operand.vmem [shape: f32[1,8], index: 2, kind: input, shape index: {}]   ;;  %s12390_s3 = inlined_call_operand.vmem [shape: f32[3,24,8], index: 3, kind: input, shape index: {}]   ;;  %s12391_s4 = inlined_call_operand.vmem [shape: f32[1,8], index: 4, kind: input, shape index: {}]   ;;  %s12392_s5 = inlined_call_operand.hbm [shape: f32[2,8,256], index: 5, kind: output, shape index: {}]  }
   0x1   :  { %12 = vsyncpa [#allocation5 + $0x1], 0  ;;  %s9466_s18 = smov 0   ;;  %s9468_s19 = smov 0  }
   0x2   :  { %s9470_s20 = smov 0   ;;  %s9472_s21 = smov 0  }
   0x3 LB: > { %s9487_s22 = sadd.s32 4294967295, %s9432_s21   ;;  %s6709_s23 = sadd.s32 4294967294, %s9432_s21   ;;  %s9432_s21 = sphi %s9472_s21, %s12726_s21   ;;  %s9428_s20 = sphi %s9470_s20, %s12725_s20   ;;  %s9424_s19 = sphi %s9468_s19, %s12724_s19   ;;  %s9420_s18 = sphi %s9466_s18, %s12723_s18  }
   0x4   : > { %s9491_s24 = sadd.s32 1, %s9432_s21   ;;  %s135_s25 = sadd.s32 1, %s9428_s20 }
   0x5   : > { %s132_s26 = ssub.s32 %s9432_s21, %s9491_s24  ;;  %p145_p0 = scmp.ne.s32.totalorder %s9428_s20, %s9424_s19 }
   0x6   : > { %p133_p1 = scmp.eq.s32.totalorder %s132_s26, 0  ;;  %p146_p2 = scmp.eq.s32.totalorder %s9487_s22, 1 }
   0x7   : > { %p151_p3 = scmp.ne.s32.totalorder %s9424_s19, %s9420_s18  ;;  %p152_p4 = scmp.eq.s32.totalorder %s6709_s23, 1 }
   0x8   : > { %s9502_s27 = scalar_select %p133_p1, %s9428_s20, %s135_s25  }
   0x9   : > { %p9504_p5 = por %p146_p2, %p145_p0  ;;  %p9508_p6 = por %p152_p4, %p151_p3 }
   0xa   : > { %p6712_p7 = scmp.ge.s32.totalorder %s9432_s21, 1  ;;  %p190_p8 = scmp.lt.s32.totalorder %s9432_s21, 3 }
   0xc   : > { %p191_p9 = pnand %p6712_p7, %p190_p8 }
   0xe   : > { %194 = sbr.rel (%p191_p9) target bundleno = 2029 (0x7ed), region = 40 }
  0x15   : > { %v9517_v0 = vld [vmem:[%s12388_s1] sm:$0xff]  ;;  %vm588_vm0 = vcmask 1043456   ;;  %vm223_vm1 = vcmask 31744   ;;  %vm226_vm2 = vcmask 25600   ;;  %p218_p10 = scmp.lt.s32.totalorder %s9487_s22, 1  ;;  %v12393_v2 = vmov 0.0  }
  0x16   : > { %v491_v1 = vrot.slane %v9517_v0, 4  ;;  %224 = vst.msk [vmem:[#allocation2] sm:$0xff] %vm223_vm1, %v12393_v2  ;;  %225 = vst.msk [vmem:[#allocation2 + $0x8] sm:$0xff] %vm223_vm1, %v12393_v2  ;;  %vm232_vm3 = vcmask 24576   ;;  %v9627_v9 = vld [vmem:[%s12388_s1 + $0x8] sm:$0xf] }
  0x17   : > { %229 = vst.msk [vmem:[#allocation2 + $0x198] sm:$0xff] %vm223_vm1, %v12393_v2  ;;  %230 = vst.msk [vmem:[#allocation2 + $0x1a0] sm:$0xff] %vm223_vm1, %v12393_v2  ;;  %s219_s7 = scalar_select %p218_p10, %s9487_s22, 1  ;;  %vm269_vm4 = vcmask 64512   ;;  %vm272_vm5 = vcmask 58368   ;;  %vm278_vm6 = vcmask 57344  }
  0x18   : > { %227 = vst.msk [vmem:[#allocation2 + $0x10] sm:$0x3] %vm226_vm2, %v12393_v2  ;;  %231 = vst.msk [vmem:[#allocation2 + $0x1a8] sm:$0x3] %vm226_vm2, %v12393_v2  ;;  %7914 = vmatprep.subr.msk.mxu0 %vm588_vm0, %v491_v1  ;;  %s215_s12 = sand.u32 1, %s9424_s19   ;;  %s7319_s16 = sshll.u32 %s9487_s22, 8 }
  0x19   : > { %251 = vst.msk [vmem:[#allocation2 + $0x11] sm:$0x1] %vm232_vm3, %v12393_v2  ;;  %233 = vst.msk [vmem:[#allocation2] sm:$0x1] %vm232_vm3, %v12393_v2  ;;  %7915 = vmatpush3.msk.msra.mxu0 %vm588_vm0, %v491_v1  ;;  %s7318_s8 = sshll.u32 %s219_s7, 8  ;;  %s6713_s13 = sshll.u32 %s215_s12, 4 }
  0x1a   : > { %234 = vst.msk [vmem:[#allocation2 + $0x18] sm:$0x1] %vm232_vm3, %v12393_v2  ;;  %235 = vst.msk [vmem:[#allocation2 + $0x30] sm:$0x1] %vm232_vm3, %v12393_v2  ;;  %7964 = vmatprep.subr.msk.mxu0 %vm588_vm0, %v9517_v0  ;;  %s9613_s11 = scalar_lea.vmem %s12387_s0, %s7318_s8  ;;  %s217_s14 = scalar_lea.vmem [#allocation4], %s6713_s13 }
  0x1b   : > { %236 = vst.msk [vmem:[#allocation2 + $0x48] sm:$0x1] %vm232_vm3, %v12393_v2  ;;  %237 = vst.msk [vmem:[#allocation2 + $0x60] sm:$0x1] %vm232_vm3, %v12393_v2  ;;  %v315_v3 = vld [vmem:[%s9613_s11] sm:$0xff]  ;;  %v316_v4 = vld [vmem:[%s9613_s11 + $0x8] sm:$0xff]  ;;  %s12347_s25 = scalar_lea.hbm %s12392_s5, %s7319_s16 }
  0x1c   : > { %238 = vst.msk [vmem:[#allocation2 + $0x78] sm:$0x1] %vm232_vm3, %v12393_v2  ;;  %239 = vst.msk [vmem:[#allocation2 + $0x90] sm:$0x1] %vm232_vm3, %v12393_v2  ;;  %v317_v5 = vld [vmem:[%s9613_s11 + $0x10] sm:$0xff]  ;;  %v318_v6 = vld [vmem:[%s9613_s11 + $0x18] sm:$0xff] }
  0x1d   : > { %240 = vst.msk [vmem:[#allocation2 + $0xa8] sm:$0x1] %vm232_vm3, %v12393_v2  ;;  %241 = vst.msk [vmem:[#allocation2 + $0xc0] sm:$0x1] %vm232_vm3, %v12393_v2  ;;  %v319_v7 = vld [vmem:[%s9613_s11 + $0x20] sm:$0xff]  ;;  %v320_v8 = vld [vmem:[%s9613_s11 + $0x28] sm:$0xff] }
  0x1e   : > { %242 = vst.msk [vmem:[#allocation2 + $0xd8] sm:$0x1] %vm232_vm3, %v12393_v2  ;;  %243 = vst.msk [vmem:[#allocation2 + $0xf0] sm:$0x1] %vm232_vm3, %v12393_v2  ;;  %v416_v10 = vld [vmem:[#allocation2 + $0x1] sm:$0xff]  ;;  %v321_v12 = vld [vmem:[%s9613_s11 + $0x30] sm:$0xff] }
  0x1f   : > { %244 = vst.msk [vmem:[#allocation2 + $0x108] sm:$0x1] %vm232_vm3, %v12393_v2  ;;  %245 = vst.msk [vmem:[#allocation2 + $0x120] sm:$0x1] %vm232_vm3, %v12393_v2  ;;  %v417_v11 = vld [vmem:[#allocation2 + $0x9] sm:$0xff]  ;;  %7916 = vmatprep.mubr.msk.f32.mxu0 %vm223_vm1, %v416_v10  ;;  %v322_v13 = vld [vmem:[%s9613_s11 + $0x38] sm:$0xff] }
  0x20   : > { %246 = vst.msk [vmem:[#allocation2 + $0x138] sm:$0x1] %vm232_vm3, %v12393_v2  ;;  %247 = vst.msk [vmem:[#allocation2 + $0x150] sm:$0x1] %vm232_vm3, %v12393_v2  ;;  %v323_v14 = vld [vmem:[%s9613_s11 + $0x40] sm:$0xff]  ;;  %v324_v15 = vld [vmem:[%s9613_s11 + $0x48] sm:$0xff]  ;;  %7917 = vmatmul.mubr.msk.f32.vlgmr.msra.gmra.mrb[0].mxu0 %vm223_vm1, %v417_v11 }
  0x21   : > { %248 = vst.msk [vmem:[#allocation2 + $0x168] sm:$0x1] %vm232_vm3, %v12393_v2  ;;  %249 = vst.msk [vmem:[#allocation2 + $0x180] sm:$0x1] %vm232_vm3, %v12393_v2  ;;  %v325_v16 = vld [vmem:[%s9613_s11 + $0x50] sm:$0xff]  ;;  %v326_v17 = vld [vmem:[%s9613_s11 + $0x58] sm:$0xff]  ;;  %7965 = vmatpush3.msk.msra.mxu0 %vm588_vm0, %v9517_v0 }
  0x22   : > { %250 = vst.msk [vmem:[#allocation2 + $0x198] sm:$0x1] %vm232_vm3, %v12393_v2  ;;  %252 = vst.msk [vmem:[#allocation2 + $0x29] sm:$0x1] %vm232_vm3, %v12393_v2  ;;  %v327_v18 = vld [vmem:[%s9613_s11 + $0x60] sm:$0xff]  ;;  %v328_v19 = vld [vmem:[%s9613_s11 + $0x68] sm:$0xff]  ;;  %8014 = vmatprep.subr.msk.mxu0 %vm588_vm0, %v9627_v9 }
  0x23   : > { %253 = vst.msk [vmem:[#allocation2 + $0x41] sm:$0x1] %vm232_vm3, %v12393_v2  ;;  %254 = vst.msk [vmem:[#allocation2 + $0x59] sm:$0x1] %vm232_vm3, %v12393_v2  ;;  %v329_v20 = vld [vmem:[%s9613_s11 + $0x70] sm:$0xff]  ;;  %v330_v21 = vld [vmem:[%s9613_s11 + $0x78] sm:$0xff] }
  0x24   : > { %255 = vst.msk [vmem:[#allocation2 + $0x71] sm:$0x1] %vm232_vm3, %v12393_v2  ;;  %256 = vst.msk [vmem:[#allocation2 + $0x89] sm:$0x1] %vm232_vm3, %v12393_v2  ;;  %v331_v22 = vld [vmem:[%s9613_s11 + $0x80] sm:$0xff]  ;;  %v332_v23 = vld [vmem:[%s9613_s11 + $0x88] sm:$0xff] }
  0x25   : > { %257 = vst.msk [vmem:[#allocation2 + $0xa1] sm:$0x1] %vm232_vm3, %v12393_v2  ;;  %258 = vst.msk [vmem:[#allocation2 + $0xb9] sm:$0x1] %vm232_vm3, %v12393_v2  ;;  %v333_v24 = vld [vmem:[%s9613_s11 + $0x90] sm:$0xff]  ;;  %v334_v25 = vld [vmem:[%s9613_s11 + $0x98] sm:$0xff] }
  0x26   : > { %259 = vst.msk [vmem:[#allocation2 + $0xd1] sm:$0x1] %vm232_vm3, %v12393_v2  ;;  %260 = vst.msk [vmem:[#allocation2 + $0xe9] sm:$0x1] %vm232_vm3, %v12393_v2  ;;  %v335_v26 = vld [vmem:[%s9613_s11 + $0xa0] sm:$0xff]  ;;  %v336_v27 = vld [vmem:[%s9613_s11 + $0xa8] sm:$0xff] }
  0x27   : > { %261 = vst.msk [vmem:[#allocation2 + $0x101] sm:$0x1] %vm232_vm3, %v12393_v2  ;;  %262 = vst.msk [vmem:[#allocation2 + $0x119] sm:$0x1] %vm232_vm3, %v12393_v2  ;;  %v337_v31 = vld [vmem:[%s9613_s11 + $0xb0] sm:$0xff]  ;;  %v338_v32 = vld [vmem:[%s9613_s11 + $0xb8] sm:$0xff] }
  0x28   : > { %263 = vst.msk [vmem:[#allocation2 + $0x131] sm:$0x1] %vm232_vm3, %v12393_v2  ;;  %264 = vst.msk [vmem:[#allocation2 + $0x149] sm:$0x1] %vm232_vm3, %v12393_v2  ;;  %v339_v37 = vld [vmem:[%s9613_s11 + $0xc0] sm:$0xff]  ;;  %v340_v38 = vld [vmem:[%s9613_s11 + $0xc8] sm:$0xff] }
  0x29   : > { %265 = vst.msk [vmem:[#allocation2 + $0x161] sm:$0x1] %vm232_vm3, %v12393_v2  ;;  %266 = vst.msk [vmem:[#allocation2 + $0x179] sm:$0x1] %vm232_vm3, %v12393_v2  ;;  %v341_v39 = vld [vmem:[%s9613_s11 + $0xd0] sm:$0xff]  ;;  %v342_v40 = vld [vmem:[%s9613_s11 + $0xd8] sm:$0xff] }
  0x2a   : > { %267 = vst.msk [vmem:[#allocation2 + $0x191] sm:$0x1] %vm232_vm3, %v12393_v2  ;;  %268 = vst.msk [vmem:[#allocation2 + $0x1a9] sm:$0x1] %vm232_vm3, %v12393_v2  ;;  %v343_v41 = vld [vmem:[%s9613_s11 + $0xe0] sm:$0xff]  ;;  %v344_v42 = vld [vmem:[%s9613_s11 + $0xe8] sm:$0xff] }
  0x2b   : > { %348 = vst.msk [vmem:[#allocation2 + $0x19] sm:$0xff] %vm223_vm1, %v315_v3  ;;  %349 = vst.msk [vmem:[#allocation2 + $0x21] sm:$0xff] %vm223_vm1, %v316_v4  ;;  %v380_v3 = vld [vmem:[#allocation2] sm:$0xff]  ;;  %v381_v4 = vld [vmem:[#allocation2 + $0x8] sm:$0xff]  ;;  %s6650_s15 = sshll.u32 %s217_s14, 4  ;;  %s6636_s26 = scalar_lea.sflag [#allocation5], %s215_s12  ;;  %s12342_s15 = int_to_ptr.vmem [resolvable:$true] %s6650_s15 }
  0x2c   : > { %350 = vst.msk [vmem:[#allocation2 + $0x31] sm:$0xff] %vm223_vm1, %v317_v5  ;;  %351 = vst.msk [vmem:[#allocation2 + $0x39] sm:$0xff] %vm223_vm1, %v318_v6  ;;  %v9812_v6 = vld [vmem:[%s12388_s1 + $0x10] sm:$0xff]  ;;  %s9370_s30 = scalar_lea.vmem %s12342_s15, 256  ;;  %s9435_s22 = smov [#allocation4]  }
  0x2d   : > { %352 = vst.msk [vmem:[#allocation2 + $0x49] sm:$0xff] %vm223_vm1, %v319_v7  ;;  %353 = vst.msk [vmem:[#allocation2 + $0x51] sm:$0xff] %vm223_vm1, %v320_v8  ;;  %v12404_v2 = vrot.slane %v9812_v6, 4  ;;  %p9371_p11 = scmp.ne.s32.totalorder %s12342_s15, %s9370_s30  ;;  %s9374_s6 = sshll.u32 %s9435_s22, 4  ;;  %s9375_s6 = int_to_ptr.vmem [resolvable:$false] %s9374_s6 }
  0x2e   : > { %354 = vst.msk [vmem:[#allocation2 + $0x61] sm:$0xff] %vm223_vm1, %v321_v12  ;;  %355 = vst.msk [vmem:[#allocation2 + $0x69] sm:$0xff] %vm223_vm1, %v322_v13  ;;  %s9376_s7 = scalar_lea.vmem %s9375_s6, 512  ;;  %p9377_p0 = scmp.lt.s32.totalorder %s12342_s15, %s9375_s6 }
  0x2f   : > { %356 = vst.msk [vmem:[#allocation2 + $0x79] sm:$0xff] %vm223_vm1, %v323_v14  ;;  %357 = vst.msk [vmem:[#allocation2 + $0x81] sm:$0xff] %vm223_vm1, %v324_v15  ;;  %p9372_p12 = pnand %p9371_p11, %p9504_p5  ;;  %p9378_p1 = scmp.lt.s32.totalorder %s9376_s7, %s9370_s30 }
  0x30   : > { %358 = vst.msk [vmem:[#allocation2 + $0x91] sm:$0xff] %vm223_vm1, %v325_v16  ;;  %359 = vst.msk [vmem:[#allocation2 + $0x99] sm:$0xff] %vm223_vm1, %v326_v17 }
  0x31   : > { %360 = vst.msk [vmem:[#allocation2 + $0xa9] sm:$0xff] %vm223_vm1, %v327_v18  ;;  %361 = vst.msk [vmem:[#allocation2 + $0xb1] sm:$0xff] %vm223_vm1, %v328_v19  ;;  %p9373_p13 = pneg %p9372_p12  ;;  %p9379_p2 = por %p9378_p1, %p9377_p0 }
  0x32   : > { %362 = vst.msk [vmem:[#allocation2 + $0xc1] sm:$0xff] %vm223_vm1, %v329_v20  ;;  %363 = vst.msk [vmem:[#allocation2 + $0xc9] sm:$0xff] %vm223_vm1, %v330_v21  ;;  %v9667_v28 = vld [vmem:[#allocation2 + $0x19] sm:$0xff]  ;;  %v9669_v29 = vld [vmem:[#allocation2 + $0x21] sm:$0xff] }
  0x33   : > { %364 = vst.msk [vmem:[#allocation2 + $0xd9] sm:$0xff] %vm223_vm1, %v331_v22  ;;  %365 = vst.msk [vmem:[#allocation2 + $0xe1] sm:$0xff] %vm223_vm1, %v332_v23  ;;  %v9671_v30 = vld [vmem:[#allocation2 + $0x31] sm:$0xff]  ;;  %7919 = vmatprep.mubr.msk.f32.mxu0 %vm223_vm1, %v9667_v28  ;;  %v9684_v33 = vld [vmem:[#allocation2 + $0x39] sm:$0xff]  ;;  %p9380_p3 = pnand %p9379_p2, %p9373_p13 }
  0x34   : > { %366 = vst.msk [vmem:[#allocation2 + $0xf1] sm:$0xff] %vm223_vm1, %v333_v24  ;;  %367 = vst.msk [vmem:[#allocation2 + $0xf9] sm:$0xff] %vm223_vm1, %v334_v25  ;;  %7920 = vmatmul.mubr.msk.f32.gmra.mrb[2].mxu0 %vm223_vm1, %v9669_v29  ;;  %v9688_v34 = vld [vmem:[#allocation2 + $0x49] sm:$0xff]  ;;  %v9694_v35 = vld [vmem:[#allocation2 + $0x51] sm:$0xff] }
  0x35   : > { %368 = vst.msk [vmem:[#allocation2 + $0x109] sm:$0xff] %vm223_vm1, %v335_v26  ;;  %369 = vst.msk [vmem:[#allocation2 + $0x111] sm:$0xff] %vm223_vm1, %v336_v27  ;;  %7922 = vmatprep.mubr.msk.f32.mxu0 %vm223_vm1, %v9671_v30  ;;  %v9696_v36 = vld [vmem:[#allocation2 + $0x61] sm:$0xff]  ;;  %v9714_v43 = vld [vmem:[#allocation2 + $0x69] sm:$0xff] }
  0x36   : > { %370 = vst.msk [vmem:[#allocation2 + $0x121] sm:$0xff] %vm223_vm1, %v337_v31  ;;  %371 = vst.msk [vmem:[#allocation2 + $0x129] sm:$0xff] %vm223_vm1, %v338_v32  ;;  %v9716_v44 = vld [vmem:[#allocation2 + $0x79] sm:$0xff]  ;;  %v9722_v45 = vld [vmem:[#allocation2 + $0x81] sm:$0xff] }
  0x37   : > { %372 = vst.msk [vmem:[#allocation2 + $0x139] sm:$0xff] %vm223_vm1, %v339_v37  ;;  %373 = vst.msk [vmem:[#allocation2 + $0x141] sm:$0xff] %vm223_vm1, %v340_v38  ;;  %v9724_v46 = vld [vmem:[#allocation2 + $0x91] sm:$0xff]  ;;  %v9730_v47 = vld [vmem:[#allocation2 + $0x99] sm:$0xff] }
  0x38   : > { %7923 = vmatmul.mubr.msk.f32.gmra.mrb[4].mxu0 %vm223_vm1, %v9684_v33  ;;  %374 = vst.msk [vmem:[#allocation2 + $0x151] sm:$0xff] %vm223_vm1, %v341_v39  ;;  %375 = vst.msk [vmem:[#allocation2 + $0x159] sm:$0xff] %vm223_vm1, %v342_v40  ;;  %v9732_v48 = vld [vmem:[#allocation2 + $0xa9] sm:$0xff]  ;;  %v9738_v49 = vld [vmem:[#allocation2 + $0xb1] sm:$0xff] }
  0x39   : > { %7925 = vmatprep.mubr.msk.f32.mxu0 %vm223_vm1, %v9688_v34  ;;  %376 = vst.msk [vmem:[#allocation2 + $0x169] sm:$0xff] %vm223_vm1, %v343_v41  ;;  %377 = vst.msk [vmem:[#allocation2 + $0x171] sm:$0xff] %vm223_vm1, %v344_v42  ;;  %v9740_v50 = vld [vmem:[#allocation2 + $0xc1] sm:$0xff]  ;;  %v9746_v51 = vld [vmem:[#allocation2 + $0xc9] sm:$0xff] }
  0x3a   : > { %v9748_v52 = vld [vmem:[#allocation2 + $0xd9] sm:$0xff]  ;;  %v9754_v53 = vld [vmem:[#allocation2 + $0xe1] sm:$0xff]  ;;  %v9821_v8 = vld [vmem:[#allocation2 + $0x30] sm:$0xff] }
  0x3b   : > { %v9756_v54 = vld [vmem:[#allocation2 + $0xf1] sm:$0xff]  ;;  %v9762_v55 = vld [vmem:[#allocation2 + $0xf9] sm:$0xff]  ;;  %v9831_v11 = vld [vmem:[#allocation2 + $0x48] sm:$0xff] }
  0x3c   : > { %7926 = vmatmul.mubr.msk.f32.gmra.mrb[6].mxu0 %vm223_vm1, %v9694_v35  ;;  %v9764_v56 = vld [vmem:[#allocation2 + $0x109] sm:$0xff]  ;;  %v9770_v57 = vld [vmem:[#allocation2 + $0x111] sm:$0xff]  ;;  %v9819_v7 = vld [vmem:[#allocation2 + $0x20] sm:$0xff] }
  0x3d   : > { %7928 = vmatprep.mubr.msk.f32.mxu0 %vm223_vm1, %v9696_v36  ;;  %v9772_v58 = vld [vmem:[#allocation2 + $0x121] sm:$0xff]  ;;  %v9778_v59 = vld [vmem:[#allocation2 + $0x129] sm:$0xff]  ;;  %v9807_v5 = vld [vmem:[#allocation2 + $0x18] sm:$0xff] }
  0x3e   : > { %12523 = vst [vmem:[#allocation7_spill] sm:$0xff] %v9772_v58  ;;  %v9780_v60 = vld [vmem:[#allocation2 + $0x139] sm:$0xff]  ;;  %v9786_v61 = vld [vmem:[#allocation2 + $0x141] sm:$0xff]  ;;  %v9855_v16 = vld [vmem:[#allocation2 + $0x90] sm:$0xff] }
  0x3f   : > { %12524 = vst [vmem:[#allocation8_spill] sm:$0xff] %v9780_v60  ;;  %12525 = vst [vmem:[#allocation9_spill] sm:$0xff] %v9786_v61  ;;  %v9788_v62 = vld [vmem:[#allocation2 + $0x151] sm:$0xff]  ;;  %v9794_v63 = vld [vmem:[#allocation2 + $0x159] sm:$0xff] }
  0x40   : > { %7929 = vmatmul.mubr.msk.f32.gmra.mrb[8].mxu0 %vm223_vm1, %v9714_v43  ;;  %12526 = vst [vmem:[#allocation10_spill] sm:$0xff] %v9788_v62  ;;  %12527 = vst [vmem:[#allocation11_spill] sm:$0xff] %v9794_v63  ;;  %v9796_v0 = vld [vmem:[#allocation2 + $0x169] sm:$0xff]  ;;  %v9802_v1 = vld [vmem:[#allocation2 + $0x171] sm:$0xff] }
  0x41   : > { %7931 = vmatprep.mubr.msk.f32.mxu0 %vm223_vm1, %v9716_v44  ;;  %12528 = vst [vmem:[#allocation12_spill] sm:$0xff] %v9796_v0  ;;  %12529 = vst [vmem:[#allocation13_spill] sm:$0xff] %v9802_v1  ;;  %v9829_v10 = vld [vmem:[#allocation2 + $0x38] sm:$0xff]  ;;  %v9839_v12 = vld [vmem:[#allocation2 + $0x60] sm:$0xff] }
  0x42   : > { %v9845_v13 = vld [vmem:[#allocation2 + $0x68] sm:$0xff]  ;;  %v9847_v14 = vld [vmem:[#allocation2 + $0x78] sm:$0xff]  ;;  %v9853_v15 = vld [vmem:[#allocation2 + $0x80] sm:$0xff] }
  0x43   : > { %v9861_v17 = vld [vmem:[#allocation2 + $0x98] sm:$0xff]  ;;  %v9863_v18 = vld [vmem:[#allocation2 + $0xa8] sm:$0xff]  ;;  %v9869_v19 = vld [vmem:[#allocation2 + $0xb0] sm:$0xff] }
  0x44   : > { %7932 = vmatmul.mubr.msk.f32.gmra.mrb[10].mxu0 %vm223_vm1, %v9722_v45  ;;  %v9871_v20 = vld [vmem:[#allocation2 + $0xc0] sm:$0xff]  ;;  %v9877_v21 = vld [vmem:[#allocation2 + $0xc8] sm:$0xff]  ;;  %v9879_v22 = vld [vmem:[#allocation2 + $0xd8] sm:$0xff] }
  0x45   : > { %7934 = vmatprep.mubr.msk.f32.mxu0 %vm223_vm1, %v9724_v46  ;;  %v9885_v23 = vld [vmem:[#allocation2 + $0xe0] sm:$0xff]  ;;  %v9887_v24 = vld [vmem:[#allocation2 + $0xf0] sm:$0xff]  ;;  %v9893_v25 = vld [vmem:[#allocation2 + $0xf8] sm:$0xff] }
  0x46   : > { %v9895_v26 = vld [vmem:[#allocation2 + $0x108] sm:$0xff]  ;;  %v9901_v27 = vld [vmem:[#allocation2 + $0x110] sm:$0xff]  ;;  %v9903_v31 = vld [vmem:[#allocation2 + $0x120] sm:$0xff] }
  0x47   : > { %v9909_v32 = vld [vmem:[#allocation2 + $0x128] sm:$0xff]  ;;  %v9911_v37 = vld [vmem:[#allocation2 + $0x138] sm:$0xff]  ;;  %v9917_v38 = vld [vmem:[#allocation2 + $0x140] sm:$0xff] }
  0x48   : > { %7935 = vmatmul.mubr.msk.f32.gmra.mrb[12].mxu0 %vm223_vm1, %v9730_v47  ;;  %v9919_v39 = vld [vmem:[#allocation2 + $0x150] sm:$0xff]  ;;  %v346_v41 = vld [vmem:[%s9613_s11 + $0xf8] sm:$0xff] }
  0x49   : > { %7937 = vmatprep.mubr.msk.f32.mxu0 %vm223_vm1, %v9732_v48  ;;  %v345_v40 = vld [vmem:[%s9613_s11 + $0xf0] sm:$0xff]  ;;  %379 = vst.msk [vmem:[#allocation2 + $0x189] sm:$0xff] %vm223_vm1, %v346_v41  ;;  %v9929_v42 = vld [vmem:[#allocation2 + $0x158] sm:$0xff] }
  0x4a   : > { %378 = vst.msk [vmem:[#allocation2 + $0x181] sm:$0xff] %vm223_vm1, %v345_v40  ;;  %v452_v40 = vld [vmem:[#allocation2 + $0x2] sm:$0xff]  ;;  %v453_v41 = vld [vmem:[#allocation2 + $0xa] sm:$0xff] }
  0x4c   : > { %7938 = vmatmul.mubr.msk.f32.gmra.mrb[14].mxu0 %vm223_vm1, %v9738_v49 }
  0x4d   : > { %7940 = vmatprep.mubr.msk.f32.mxu0 %vm223_vm1, %v9740_v50 }
  0x50   : > { %7941 = vmatmul.mubr.msk.f32.gmra.mrb[16].mxu0 %vm223_vm1, %v9746_v51 }
  0x51   : > { %7943 = vmatprep.mubr.msk.f32.mxu0 %vm223_vm1, %v9748_v52 }
  0x54   : > { %7944 = vmatmul.mubr.msk.f32.gmra.mrb[18].mxu0 %vm223_vm1, %v9754_v53 }
  0x55   : > { %7946 = vmatprep.mubr.msk.f32.mxu0 %vm223_vm1, %v9756_v54 }
  0x58   : > { %7947 = vmatmul.mubr.msk.f32.gmra.mrb[20].mxu0 %vm223_vm1, %v9762_v55 }
  0x59   : > { %7949 = vmatprep.mubr.msk.f32.mxu0 %vm223_vm1, %v9764_v56 }
  0x5c   : > { %7950 = vmatmul.mubr.msk.f32.gmra.mrb[22].mxu0 %vm223_vm1, %v9770_v57 }
  0x5d   : > { %7952 = vmatprep.mubr.msk.f32.mxu0 %vm223_vm1, %v9772_v58 }
  0x60   : > { %7953 = vmatmul.mubr.msk.f32.gmra.mrb[24].mxu0 %vm223_vm1, %v9778_v59 }
  0x61   : > { %7955 = vmatprep.mubr.msk.f32.mxu0 %vm223_vm1, %v9780_v60 }
  0x64   : > { %7956 = vmatmul.mubr.msk.f32.gmra.mrb[26].mxu0 %vm223_vm1, %v9786_v61 }
  0x65   : > { %7958 = vmatprep.mubr.msk.f32.mxu0 %vm223_vm1, %v9788_v62  ;;  %v9971_v62 = vld [vmem:[#allocation2 + $0x62] sm:$0xff] }
  0x66   : > { %12535 = vst [vmem:[#allocation19_spill] sm:$0xff] %v9971_v62 }
  0x68   : > { %7959 = vmatmul.mubr.msk.f32.gmra.mrb[28].mxu0 %vm223_vm1, %v9794_v63  ;;  %v9952_v63 = vld [vmem:[#allocation2 + $0x32] sm:$0xff] }
  0x69   : > { %7961 = vmatprep.mubr.msk.f32.mxu0 %vm223_vm1, %v9796_v0  ;;  %v9950_v0 = vld [vmem:[#allocation2 + $0x22] sm:$0xff]  ;;  %12531 = vst [vmem:[#allocation15_spill] sm:$0xff] %v9952_v63 }
  0x6c   : > { %7962 = vmatmul.mubr.msk.f32.gmra.mrb[30].mxu0 %vm223_vm1, %v9802_v1  ;;  %v9943_v1 = vld [vmem:[#allocation2 + $0x1a] sm:$0xff] }
  0x6d   : > { %7966 = vmatprep.mubr.msk.f32.mxu0 %vm223_vm1, %v380_v3  ;;  %v9931_v3 = vld [vmem:[#allocation2 + $0x168] sm:$0xff]  ;;  %12530 = vst [vmem:[#allocation14_spill] sm:$0xff] %v9943_v1 }
  0x70   : > { %7967 = vmatmul.mubr.msk.f32.vlgmr.msra.gmra.mrb[0].mxu0 %vm223_vm1, %v381_v4  ;;  %v9937_v4 = vld [vmem:[#allocation2 + $0x170] sm:$0xff] }
  0x71   : > { %8015 = vmatpush3.msk.msra.mxu0 %vm588_vm0, %v9627_v9  ;;  %7969 = vmatprep.mubr.msk.f32.mxu0 %vm223_vm1, %v9807_v5  ;;  %v9837_v9 = vld [vmem:[#allocation2 + $0x50] sm:$0xff] }
  0x72   : > { %8064 = vmatprep.subr.msk.mxu0 %vm588_vm0, %v9812_v6 }
  0x74   : > { %7970 = vmatmul.mubr.msk.f32.gmra.mrb[2].mxu0 %vm223_vm1, %v9819_v7 }
  0x75   : > { %7972 = vmatprep.mubr.msk.f32.mxu0 %vm223_vm1, %v9821_v8 }
  0x78   : > { %7973 = vmatmul.mubr.msk.f32.gmra.mrb[4].mxu0 %vm223_vm1, %v9829_v10 }
  0x79   : > { %7975 = vmatprep.mubr.msk.f32.mxu0 %vm223_vm1, %v9831_v11 }
  0x7c   : > { %7976 = vmatmul.mubr.msk.f32.gmra.mrb[6].mxu0 %vm223_vm1, %v9837_v9 }
  0x7d   : > { %7978 = vmatprep.mubr.msk.f32.mxu0 %vm223_vm1, %v9839_v12 }
  0x80   : > { %7979 = vmatmul.mubr.msk.f32.gmra.mrb[8].mxu0 %vm223_vm1, %v9845_v13 }
  0x81   : > { %7981 = vmatprep.mubr.msk.f32.mxu0 %vm223_vm1, %v9847_v14 }
  0x84   : > { %7982 = vmatmul.mubr.msk.f32.gmra.mrb[10].mxu0 %vm223_vm1, %v9853_v15 }
  0x85   : > { %7984 = vmatprep.mubr.msk.f32.mxu0 %vm223_vm1, %v9855_v16 }
  0x88   : > { %7985 = vmatmul.mubr.msk.f32.gmra.mrb[12].mxu0 %vm223_vm1, %v9861_v17 }
  0x89   : > { %7987 = vmatprep.mubr.msk.f32.mxu0 %vm223_vm1, %v9863_v18 }
  0x8c   : > { %7988 = vmatmul.mubr.msk.f32.gmra.mrb[14].mxu0 %vm223_vm1, %v9869_v19 }
  0x8d   : > { %7990 = vmatprep.mubr.msk.f32.mxu0 %vm223_vm1, %v9871_v20 }
  0x90   : > { %7991 = vmatmul.mubr.msk.f32.gmra.mrb[16].mxu0 %vm223_vm1, %v9877_v21 }
  0x91   : > { %7993 = vmatprep.mubr.msk.f32.mxu0 %vm223_vm1, %v9879_v22 }
  0x94   : > { %7994 = vmatmul.mubr.msk.f32.gmra.mrb[18].mxu0 %vm223_vm1, %v9885_v23 }
  0x95   : > { %7996 = vmatprep.mubr.msk.f32.mxu0 %vm223_vm1, %v9887_v24 }
  0x98   : > { %7997 = vmatmul.mubr.msk.f32.gmra.mrb[20].mxu0 %vm223_vm1, %v9893_v25 }
  0x99   : > { %7999 = vmatprep.mubr.msk.f32.mxu0 %vm223_vm1, %v9895_v26 }
  0x9c   : > { %8000 = vmatmul.mubr.msk.f32.gmra.mrb[22].mxu0 %vm223_vm1, %v9901_v27 }
  0x9d   : > { %8002 = vmatprep.mubr.msk.f32.mxu0 %vm223_vm1, %v9903_v31 }
  0xa0   : > { %8003 = vmatmul.mubr.msk.f32.gmra.mrb[24].mxu0 %vm223_vm1, %v9909_v32 }
  0xa1   : > { %8005 = vmatprep.mubr.msk.f32.mxu0 %vm223_vm1, %v9911_v37 }
  0xa4   : > { %8006 = vmatmul.mubr.msk.f32.gmra.mrb[26].mxu0 %vm223_vm1, %v9917_v38 }
  0xa5   : > { %8008 = vmatprep.mubr.msk.f32.mxu0 %vm223_vm1, %v9919_v39 }
  0xa8   : > { %8009 = vmatmul.mubr.msk.f32.gmra.mrb[28].mxu0 %vm223_vm1, %v9929_v42 }
  0xa9   : > { %8011 = vmatprep.mubr.msk.f32.mxu0 %vm223_vm1, %v9931_v3 }
  0xac   : > { %8012 = vmatmul.mubr.msk.f32.gmra.mrb[30].mxu0 %vm223_vm1, %v9937_v4 }
  0xad   : > { %8016 = vmatprep.mubr.msk.f32.mxu0 %vm223_vm1, %v452_v40  ;;  %v9961_v40 = vld [vmem:[#allocation2 + $0x3a] sm:$0xff] }
  0xae   : > { %12532 = vst [vmem:[#allocation16_spill] sm:$0xff] %v9961_v40 }
  0xb0   : > { %8017 = vmatmul.mubr.msk.f32.vlgmr.msra.gmra.mrb[0].mxu0 %vm223_vm1, %v453_v41  ;;  %v9963_v41 = vld [vmem:[#allocation2 + $0x4a] sm:$0xff] }
  0xb1   : > { %8065 = vmatpush3.msk.msra.mxu0 %vm588_vm0, %v9812_v6  ;;  %8019 = vmatprep.mubr.msk.f32.mxu0 %vm223_vm1, %v9943_v1  ;;  %12533 = vst [vmem:[#allocation17_spill] sm:$0xff] %v9963_v41  ;;  %v9969_v1 = vld [vmem:[#allocation2 + $0x52] sm:$0xff] }
  0xb2   : > { %8114 = vmatprep.subr.msk.mxu0 %vm588_vm0, %v12404_v2  ;;  %12534 = vst [vmem:[#allocation18_spill] sm:$0xff] %v9969_v1  ;;  %v9977_v2 = vld [vmem:[#allocation2 + $0x6a] sm:$0xff] }
  0xb3   : > { %12536 = vst [vmem:[#allocation20_spill] sm:$0xff] %v9977_v2 }
  0xb4   : > { %8020 = vmatmul.mubr.msk.f32.gmra.mrb[2].mxu0 %vm223_vm1, %v9950_v0 }
  0xb5   : > { %8022 = vmatprep.mubr.msk.f32.mxu0 %vm223_vm1, %v9952_v63  ;;  %v9979_v63 = vld [vmem:[#allocation2 + $0x7a] sm:$0xff] }
  0xb6   : > { %12537 = vst [vmem:[#allocation21_spill] sm:$0xff] %v9979_v63 }
  0xb8   : > { %8023 = vmatmul.mubr.msk.f32.gmra.mrb[4].mxu0 %vm223_vm1, %v9961_v40  ;;  %v9987_v40 = vld [vmem:[#allocation2 + $0x92] sm:$0xff] }
  0xb9   : > { %8025 = vmatprep.mubr.msk.f32.mxu0 %vm223_vm1, %v9963_v41  ;;  %v9985_v41 = vld [vmem:[#allocation2 + $0x82] sm:$0xff]  ;;  %12539 = vst [vmem:[#allocation23_spill] sm:$0xff] %v9987_v40 }
  0xba   : > { %12538 = vst [vmem:[#allocation22_spill] sm:$0xff] %v9985_v41 }
  0xbc   : > { %8026 = vmatmul.mubr.msk.f32.gmra.mrb[6].mxu0 %vm223_vm1, %v9969_v1  ;;  %v9995_v1 = vld [vmem:[#allocation2 + $0xaa] sm:$0xff] }
  0xbd   : > { %8028 = vmatprep.mubr.msk.f32.mxu0 %vm223_vm1, %v9971_v62  ;;  %v9993_v62 = vld [vmem:[#allocation2 + $0x9a] sm:$0xff]  ;;  %12541 = vst [vmem:[#allocation25_spill] sm:$0xff] %v9995_v1 }
  0xbe   : > { %12540 = vst [vmem:[#allocation24_spill] sm:$0xff] %v9993_v62 }
  0xc0   : > { %8029 = vmatmul.mubr.msk.f32.gmra.mrb[8].mxu0 %vm223_vm1, %v9977_v2  ;;  %v10003_v2 = vld [vmem:[#allocation2 + $0xc2] sm:$0xff] }
  0xc1   : > { %8031 = vmatprep.mubr.msk.f32.mxu0 %vm223_vm1, %v9979_v63  ;;  %v10001_v63 = vld [vmem:[#allocation2 + $0xb2] sm:$0xff]  ;;  %12543 = vst [vmem:[#allocation27_spill] sm:$0xff] %v10003_v2 }
  0xc2   : > { %12542 = vst [vmem:[#allocation26_spill] sm:$0xff] %v10001_v63 }
  0xc4   : > { %8032 = vmatmul.mubr.msk.f32.gmra.mrb[10].mxu0 %vm223_vm1, %v9985_v41  ;;  %v10011_v41 = vld [vmem:[#allocation2 + $0xda] sm:$0xff] }
  0xc5   : > { %8034 = vmatprep.mubr.msk.f32.mxu0 %vm223_vm1, %v9987_v40  ;;  %v10009_v40 = vld [vmem:[#allocation2 + $0xca] sm:$0xff]  ;;  %12545 = vst [vmem:[#allocation29_spill] sm:$0xff] %v10011_v41 }
  0xc6   : > { %12544 = vst [vmem:[#allocation28_spill] sm:$0xff] %v10009_v40 }
  0xc8   : > { %8035 = vmatmul.mubr.msk.f32.gmra.mrb[12].mxu0 %vm223_vm1, %v9993_v62  ;;  %v10019_v62 = vld [vmem:[#allocation2 + $0xf2] sm:$0xff] }
  0xc9   : > { %8037 = vmatprep.mubr.msk.f32.mxu0 %vm223_vm1, %v9995_v1  ;;  %v10017_v1 = vld [vmem:[#allocation2 + $0xe2] sm:$0xff]  ;;  %12547 = vst [vmem:[#allocation31_spill] sm:$0xff] %v10019_v62 }
  0xca   : > { %12546 = vst [vmem:[#allocation30_spill] sm:$0xff] %v10017_v1 }
  0xcc   : > { %8038 = vmatmul.mubr.msk.f32.gmra.mrb[14].mxu0 %vm223_vm1, %v10001_v63  ;;  %v10027_v63 = vld [vmem:[#allocation2 + $0x10a] sm:$0xff] }
  0xcd   : > { %8040 = vmatprep.mubr.msk.f32.mxu0 %vm223_vm1, %v10003_v2  ;;  %v10025_v2 = vld [vmem:[#allocation2 + $0xfa] sm:$0xff]  ;;  %12549 = vst [vmem:[#allocation33_spill] sm:$0xff] %v10027_v63 }
  0xce   : > { %12548 = vst [vmem:[#allocation32_spill] sm:$0xff] %v10025_v2 }
  0xd0   : > { %8041 = vmatmul.mubr.msk.f32.gmra.mrb[16].mxu0 %vm223_vm1, %v10009_v40  ;;  %v10035_v40 = vld [vmem:[#allocation2 + $0x122] sm:$0xff] }
  0xd1   : > { %8043 = vmatprep.mubr.msk.f32.mxu0 %vm223_vm1, %v10011_v41  ;;  %v10033_v41 = vld [vmem:[#allocation2 + $0x112] sm:$0xff]  ;;  %12551 = vst [vmem:[#allocation35_spill] sm:$0xff] %v10035_v40 }
  0xd2   : > { %12550 = vst [vmem:[#allocation34_spill] sm:$0xff] %v10033_v41 }
  0xd4   : > { %8044 = vmatmul.mubr.msk.f32.gmra.mrb[18].mxu0 %vm223_vm1, %v10017_v1  ;;  %v10043_v1 = vld [vmem:[#allocation2 + $0x13a] sm:$0xff] }
  0xd5   : > { %8046 = vmatprep.mubr.msk.f32.mxu0 %vm223_vm1, %v10019_v62  ;;  %v10041_v62 = vld [vmem:[#allocation2 + $0x12a] sm:$0xff]  ;;  %12552 = vst [vmem:[#allocation36_spill] sm:$0xff] %v10043_v1 }
  0xd8   : > { %8047 = vmatmul.mubr.msk.f32.gmra.mrb[20].mxu0 %vm223_vm1, %v10025_v2  ;;  %v10051_v2 = vld [vmem:[#allocation2 + $0x152] sm:$0xff] }
  0xd9   : > { %8049 = vmatprep.mubr.msk.f32.mxu0 %vm223_vm1, %v10027_v63  ;;  %v10049_v63 = vld [vmem:[#allocation2 + $0x142] sm:$0xff]  ;;  %12553 = vst [vmem:[#allocation37_spill] sm:$0xff] %v10051_v2 }
  0xdc   : > { %8050 = vmatmul.mubr.msk.f32.gmra.mrb[22].mxu0 %vm223_vm1, %v10033_v41  ;;  %v10059_v41 = vld [vmem:[#allocation2 + $0x16a] sm:$0xff] }
  0xdd   : > { %8052 = vmatprep.mubr.msk.f32.mxu0 %vm223_vm1, %v10035_v40  ;;  %v10057_v40 = vld [vmem:[#allocation2 + $0x15a] sm:$0xff]  ;;  %12555 = vst [vmem:[#allocation39_spill] sm:$0xff] %v10059_v41 }
  0xde   : > { %12554 = vst [vmem:[#allocation38_spill] sm:$0xff] %v10057_v40 }
  0xe0   : > { %8053 = vmatmul.mubr.msk.f32.gmra.mrb[24].mxu0 %vm223_vm1, %v10041_v62 }
  0xe1   : > { %8055 = vmatprep.mubr.msk.f32.mxu0 %vm223_vm1, %v10043_v1  ;;  %v10065_v1 = vld [vmem:[#allocation2 + $0x172] sm:$0xff] }
  0xe4   : > { %8056 = vmatmul.mubr.msk.f32.gmra.mrb[26].mxu0 %vm223_vm1, %v10049_v63 }
  0xe5   : > { %8058 = vmatprep.mubr.msk.f32.mxu0 %vm223_vm1, %v10051_v2  ;;  %v6816_v2 = vld [vmem:[%s12388_s1 + $0x18] sm:$0xf] }
  0xe8   : > { %8059 = vmatmul.mubr.msk.f32.gmra.mrb[28].mxu0 %vm223_vm1, %v10057_v40  ;;  %v12556_v40 = vrot.slane %v9812_v6, 4  ;;  %v10140_v6 = vld [vmem:[#allocation2 + $0x188] sm:$0xff] }
  0xe9   : > { %8061 = vmatprep.mubr.msk.f32.mxu0 %vm223_vm1, %v10059_v41 }
  0xec   : > { %8062 = vmatmul.mubr.msk.f32.gmra.mrb[30].mxu0 %vm223_vm1, %v10065_v1 }
  0xed   : > { %8066 = vmatprep.mubr.msk.f32.mxu0 %vm223_vm1, %v9807_v5  ;;  %v10134_v5 = vld [vmem:[#allocation2 + $0x180] sm:$0xff] }
  0xf0   : > { %8067 = vmatmul.mubr.msk.f32.vlgmr.msra.gmra.mrb[0].mxu0 %vm223_vm1, %v9819_v7  ;;  %v10149_v7 = vld [vmem:[%s12388_s1 + $0x20] sm:$0xff] }
  0xf1   : > { %8115 = vmatpush3.msk.msra.mxu0 %vm588_vm0, %v12556_v40  ;;  %8069 = vmatprep.mubr.msk.f32.mxu0 %vm223_vm1, %v9821_v8  ;;  %v10210_v40 = vld [vmem:[#allocation2 + $0x181] sm:$0xff] }
  0xf2   : > { %8164 = vmatprep.subr.msk.mxu0 %vm588_vm0, %v6816_v2  ;;  %12560 = vst [vmem:[#allocation40_spill] sm:$0xff] %v10210_v40 }
  0xf4   : > { %8070 = vmatmul.mubr.msk.f32.gmra.mrb[2].mxu0 %vm223_vm1, %v9829_v10 }
  0xf5   : > { %8072 = vmatprep.mubr.msk.f32.mxu0 %vm223_vm1, %v9831_v11 }
  0xf8   : > { %8073 = vmatmul.mubr.msk.f32.gmra.mrb[4].mxu0 %vm223_vm1, %v9837_v9 }
  0xf9   : > { %8075 = vmatprep.mubr.msk.f32.mxu0 %vm223_vm1, %v9839_v12 }
  0xfc   : > { %8076 = vmatmul.mubr.msk.f32.gmra.mrb[6].mxu0 %vm223_vm1, %v9845_v13 }
  0xfd   : > { %8078 = vmatprep.mubr.msk.f32.mxu0 %vm223_vm1, %v9847_v14 }
 0x100   : > { %8079 = vmatmul.mubr.msk.f32.gmra.mrb[8].mxu0 %vm223_vm1, %v9853_v15 }
 0x101   : > { %8081 = vmatprep.mubr.msk.f32.mxu0 %vm223_vm1, %v9855_v16 }
 0x104   : > { %8082 = vmatmul.mubr.msk.f32.gmra.mrb[10].mxu0 %vm223_vm1, %v9861_v17 }
 0x105   : > { %8084 = vmatprep.mubr.msk.f32.mxu0 %vm223_vm1, %v9863_v18 }
 0x108   : > { %8085 = vmatmul.mubr.msk.f32.gmra.mrb[12].mxu0 %vm223_vm1, %v9869_v19 }
 0x109   : > { %8087 = vmatprep.mubr.msk.f32.mxu0 %vm223_vm1, %v9871_v20 }
 0x10c   : > { %8088 = vmatmul.mubr.msk.f32.gmra.mrb[14].mxu0 %vm223_vm1, %v9877_v21 }
 0x10d   : > { %8090 = vmatprep.mubr.msk.f32.mxu0 %vm223_vm1, %v9879_v22 }
 0x110   : > { %8091 = vmatmul.mubr.msk.f32.gmra.mrb[16].mxu0 %vm223_vm1, %v9885_v23 }
 0x111   : > { %8093 = vmatprep.mubr.msk.f32.mxu0 %vm223_vm1, %v9887_v24 }
 0x114   : > { %8094 = vmatmul.mubr.msk.f32.gmra.mrb[18].mxu0 %vm223_vm1, %v9893_v25 }
 0x115   : > { %8096 = vmatprep.mubr.msk.f32.mxu0 %vm223_vm1, %v9895_v26 }
 0x118   : > { %8097 = vmatmul.mubr.msk.f32.gmra.mrb[20].mxu0 %vm223_vm1, %v9901_v27 }
 0x119   : > { %8099 = vmatprep.mubr.msk.f32.mxu0 %vm223_vm1, %v9903_v31 }
 0x11c   : > { %8100 = vmatmul.mubr.msk.f32.gmra.mrb[22].mxu0 %vm223_vm1, %v9909_v32 }
 0x11d   : > { %8102 = vmatprep.mubr.msk.f32.mxu0 %vm223_vm1, %v9911_v37 }
 0x120   : > { %8103 = vmatmul.mubr.msk.f32.gmra.mrb[24].mxu0 %vm223_vm1, %v9917_v38 }
 0x121   : > { %8105 = vmatprep.mubr.msk.f32.mxu0 %vm223_vm1, %v9919_v39 }
 0x124   : > { %8106 = vmatmul.mubr.msk.f32.gmra.mrb[26].mxu0 %vm223_vm1, %v9929_v42 }
 0x125   : > { %8108 = vmatprep.mubr.msk.f32.mxu0 %vm223_vm1, %v9931_v3 }
 0x128   : > { %8109 = vmatmul.mubr.msk.f32.gmra.mrb[28].mxu0 %vm223_vm1, %v9937_v4 }
 0x129   : > { %8111 = vmatprep.mubr.msk.f32.mxu0 %vm223_vm1, %v10134_v5 }
 0x12c   : > { %8112 = vmatmul.mubr.msk.f32.gmra.mrb[30].mxu0 %vm223_vm1, %v10140_v6 }
 0x12d   : > { %8116 = vmatprep.mubr.msk.f32.mxu0 %vm223_vm1, %v9667_v28  ;;  %v12558_v28 = vld [vmem:[#allocation11_spill] sm:$0xff] }
 0x130   : > { %8117 = vmatmul.mubr.msk.f32.vlgmr.msra.gmra.mrb[0].mxu0 %vm223_vm1, %v9669_v29  ;;  %v12559_v29 = vld [vmem:[#allocation12_spill] sm:$0xff] }
 0x131   : > { %8165 = vmatpush3.msk.msra.mxu0 %vm588_vm0, %v6816_v2  ;;  %8119 = vmatprep.mubr.msk.f32.mxu0 %vm223_vm1, %v9671_v30  ;;  %v12557_v2 = vld [vmem:[#allocation10_spill] sm:$0xff] }
 0x132   : > { %8214 = vmatprep.subr.msk.mxu0 %vm588_vm0, %v10149_v7 }
 0x134   : > { %8120 = vmatmul.mubr.msk.f32.gmra.mrb[2].mxu0 %vm223_vm1, %v9684_v33 }
 0x135   : > { %8122 = vmatprep.mubr.msk.f32.mxu0 %vm223_vm1, %v9688_v34 }
 0x138   : > { %8123 = vmatmul.mubr.msk.f32.gmra.mrb[4].mxu0 %vm223_vm1, %v9694_v35 }
 0x139   : > { %8125 = vmatprep.mubr.msk.f32.mxu0 %vm223_vm1, %v9696_v36 }
 0x13c   : > { %8126 = vmatmul.mubr.msk.f32.gmra.mrb[6].mxu0 %vm223_vm1, %v9714_v43 }
 0x13d   : > { %8128 = vmatprep.mubr.msk.f32.mxu0 %vm223_vm1, %v9716_v44 }
 0x140   : > { %8129 = vmatmul.mubr.msk.f32.gmra.mrb[8].mxu0 %vm223_vm1, %v9722_v45 }
 0x141   : > { %8131 = vmatprep.mubr.msk.f32.mxu0 %vm223_vm1, %v9724_v46 }
 0x144   : > { %8132 = vmatmul.mubr.msk.f32.gmra.mrb[10].mxu0 %vm223_vm1, %v9730_v47 }
 0x145   : > { %8134 = vmatprep.mubr.msk.f32.mxu0 %vm223_vm1, %v9732_v48 }
 0x148   : > { %8135 = vmatmul.mubr.msk.f32.gmra.mrb[12].mxu0 %vm223_vm1, %v9738_v49 }
 0x149   : > { %8137 = vmatprep.mubr.msk.f32.mxu0 %vm223_vm1, %v9740_v50 }
 0x14c   : > { %8138 = vmatmul.mubr.msk.f32.gmra.mrb[14].mxu0 %vm223_vm1, %v9746_v51 }
 0x14d   : > { %8140 = vmatprep.mubr.msk.f32.mxu0 %vm223_vm1, %v9748_v52 }
 0x150   : > { %8141 = vmatmul.mubr.msk.f32.gmra.mrb[16].mxu0 %vm223_vm1, %v9754_v53 }
 0x151   : > { %8143 = vmatprep.mubr.msk.f32.mxu0 %vm223_vm1, %v9756_v54 }
 0x154   : > { %8144 = vmatmul.mubr.msk.f32.gmra.mrb[18].mxu0 %vm223_vm1, %v9762_v55 }
 0x155   : > { %8146 = vmatprep.mubr.msk.f32.mxu0 %vm223_vm1, %v9764_v56 }
 0x158   : > { %8147 = vmatmul.mubr.msk.f32.gmra.mrb[20].mxu0 %vm223_vm1, %v9770_v57 }
 0x159   : > { %8149 = vmatprep.mubr.msk.f32.mxu0 %vm223_vm1, %v9772_v58  ;;  %v12561_v58 = vld [vmem:[#allocation13_spill] sm:$0xff] }
 0x15c   : > { %8150 = vmatmul.mubr.msk.f32.gmra.mrb[22].mxu0 %vm223_vm1, %v9778_v59 }
 0x15d   : > { %8152 = vmatprep.mubr.msk.f32.mxu0 %vm223_vm1, %v9780_v60  ;;  %v10216_v60 = vld [vmem:[#allocation2 + $0x189] sm:$0xff] }
 0x15e   : > { %12562 = vst [vmem:[#allocation41_spill] sm:$0xff] %v10216_v60 }
 0x160   : > { %8153 = vmatmul.mubr.msk.f32.gmra.mrb[24].mxu0 %vm223_vm1, %v9786_v61  ;;  %v12572_v61 = vld [vmem:[#allocation23_spill] sm:$0xff] }
 0x161   : > { %8155 = vmatprep.mubr.msk.f32.mxu0 %vm223_vm1, %v12557_v2  ;;  %v12563_v2 = vld [vmem:[#allocation14_spill] sm:$0xff] }
 0x164   : > { %8156 = vmatmul.mubr.msk.f32.gmra.mrb[26].mxu0 %vm223_vm1, %v12558_v28  ;;  %v2565_v28 = vrot.slane %v10149_v7, 4 }
 0x165   : > { %8158 = vmatprep.mubr.msk.f32.mxu0 %vm223_vm1, %v12559_v29  ;;  %v12568_v29 = vld [vmem:[#allocation19_spill] sm:$0xff] }
 0x168   : > { %8159 = vmatmul.mubr.msk.f32.gmra.mrb[28].mxu0 %vm223_vm1, %v12561_v58  ;;  %v12564_v58 = vld [vmem:[#allocation15_spill] sm:$0xff] }
 0x169   : > { %8161 = vmatprep.mubr.msk.f32.mxu0 %vm223_vm1, %v10210_v40  ;;  %v12565_v40 = vld [vmem:[#allocation16_spill] sm:$0xff] }
 0x16c   : > { %8162 = vmatmul.mubr.msk.f32.gmra.mrb[30].mxu0 %vm223_vm1, %v10216_v60  ;;  %v12566_v60 = vld [vmem:[#allocation17_spill] sm:$0xff] }
 0x16d   : > { %8166 = vmatprep.mubr.msk.f32.mxu0 %vm223_vm1, %v12563_v2  ;;  %v12567_v2 = vld [vmem:[#allocation18_spill] sm:$0xff] }
 0x170   : > { %8167 = vmatmul.mubr.msk.f32.vlgmr.msra.gmra.mrb[0].mxu0 %vm223_vm1, %v9950_v0  ;;  %v12569_v0 = vld [vmem:[#allocation20_spill] sm:$0xff] }
 0x171   : > { %8215 = vmatpush3.msk.msra.mxu0 %vm588_vm0, %v10149_v7  ;;  %8169 = vmatprep.mubr.msk.f32.mxu0 %vm223_vm1, %v12564_v58  ;;  %v12570_v7 = vld [vmem:[#allocation21_spill] sm:$0xff]  ;;  %v12571_v58 = vld [vmem:[#allocation22_spill] sm:$0xff] }
 0x172   : > { %8264 = vmatprep.subr.msk.mxu0 %vm588_vm0, %v2565_v28 }
 0x174   : > { %8170 = vmatmul.mubr.msk.f32.gmra.mrb[2].mxu0 %vm223_vm1, %v12565_v40  ;;  %v12573_v40 = vld [vmem:[#allocation24_spill] sm:$0xff] }
 0x175   : > { %8172 = vmatprep.mubr.msk.f32.mxu0 %vm223_vm1, %v12566_v60  ;;  %v12574_v60 = vld [vmem:[#allocation25_spill] sm:$0xff] }
 0x178   : > { %8173 = vmatmul.mubr.msk.f32.gmra.mrb[4].mxu0 %vm223_vm1, %v12567_v2  ;;  %v12575_v2 = vld [vmem:[#allocation26_spill] sm:$0xff] }
 0x179   : > { %8175 = vmatprep.mubr.msk.f32.mxu0 %vm223_vm1, %v12568_v29  ;;  %v12576_v29 = vld [vmem:[#allocation27_spill] sm:$0xff] }
 0x17c   : > { %8176 = vmatmul.mubr.msk.f32.gmra.mrb[6].mxu0 %vm223_vm1, %v12569_v0  ;;  %v12577_v0 = vld [vmem:[#allocation28_spill] sm:$0xff] }
 0x17d   : > { %8178 = vmatprep.mubr.msk.f32.mxu0 %vm223_vm1, %v12570_v7  ;;  %v12578_v7 = vld [vmem:[#allocation29_spill] sm:$0xff] }
 0x180   : > { %8179 = vmatmul.mubr.msk.f32.gmra.mrb[8].mxu0 %vm223_vm1, %v12571_v58  ;;  %v12579_v58 = vld [vmem:[#allocation30_spill] sm:$0xff] }
 0x181   : > { %8181 = vmatprep.mubr.msk.f32.mxu0 %vm223_vm1, %v12572_v61  ;;  %v12580_v61 = vld [vmem:[#allocation31_spill] sm:$0xff] }
 0x184   : > { %8182 = vmatmul.mubr.msk.f32.gmra.mrb[10].mxu0 %vm223_vm1, %v12573_v40  ;;  %v12581_v40 = vld [vmem:[#allocation32_spill] sm:$0xff] }
 0x185   : > { %8184 = vmatprep.mubr.msk.f32.mxu0 %vm223_vm1, %v12574_v60  ;;  %v12582_v60 = vld [vmem:[#allocation33_spill] sm:$0xff] }
 0x188   : > { %8185 = vmatmul.mubr.msk.f32.gmra.mrb[12].mxu0 %vm223_vm1, %v12575_v2  ;;  %v12583_v2 = vld [vmem:[#allocation34_spill] sm:$0xff] }
 0x189   : > { %8187 = vmatprep.mubr.msk.f32.mxu0 %vm223_vm1, %v12576_v29  ;;  %v12584_v29 = vld [vmem:[#allocation35_spill] sm:$0xff] }
 0x18c   : > { %8188 = vmatmul.mubr.msk.f32.gmra.mrb[14].mxu0 %vm223_vm1, %v12577_v0 }
 0x18d   : > { %8190 = vmatprep.mubr.msk.f32.mxu0 %vm223_vm1, %v12578_v7  ;;  %v12585_v7 = vld [vmem:[#allocation36_spill] sm:$0xff] }
 0x190   : > { %8191 = vmatmul.mubr.msk.f32.gmra.mrb[16].mxu0 %vm223_vm1, %v12579_v58 }
 0x191   : > { %8193 = vmatprep.mubr.msk.f32.mxu0 %vm223_vm1, %v12580_v61  ;;  %v12586_v61 = vld [vmem:[#allocation37_spill] sm:$0xff] }
 0x194   : > { %8194 = vmatmul.mubr.msk.f32.gmra.mrb[18].mxu0 %vm223_vm1, %v12581_v40  ;;  %v12587_v40 = vld [vmem:[#allocation38_spill] sm:$0xff] }
 0x195   : > { %8196 = vmatprep.mubr.msk.f32.mxu0 %vm223_vm1, %v12582_v60 }
 0x198   : > { %8197 = vmatmul.mubr.msk.f32.gmra.mrb[20].mxu0 %vm223_vm1, %v12583_v2  ;;  %v10282_v2 = vld [vmem:[#allocation2 + $0x182] sm:$0xff] }
 0x199   : > { %8199 = vmatprep.mubr.msk.f32.mxu0 %vm223_vm1, %v12584_v29 }
 0x19c   : > { %8200 = vmatmul.mubr.msk.f32.gmra.mrb[22].mxu0 %vm223_vm1, %v10041_v62 }
 0x19d   : > { %8202 = vmatprep.mubr.msk.f32.mxu0 %vm223_vm1, %v12585_v7  ;;  %v10288_v7 = vld [vmem:[#allocation2 + $0x18a] sm:$0xff] }
 0x1a0   : > { %8203 = vmatmul.mubr.msk.f32.gmra.mrb[24].mxu0 %vm223_vm1, %v10049_v63 }
 0x1a1   : > { %8205 = vmatprep.mubr.msk.f32.mxu0 %vm223_vm1, %v12586_v61 }
 0x1a4   : > { %8206 = vmatmul.mubr.msk.f32.gmra.mrb[26].mxu0 %vm223_vm1, %v12587_v40 }
 0x1a5   : > { %8208 = vmatprep.mubr.msk.f32.mxu0 %vm223_vm1, %v10059_v41  ;;  %v6917_v41 = vld [vmem:[%s12388_s1 + $0x28] sm:$0xf] }
 0x1a8   : > { %8209 = vmatmul.mubr.msk.f32.gmra.mrb[28].mxu0 %vm223_vm1, %v10065_v1 }
 0x1a9   : > { %8211 = vmatprep.mubr.msk.f32.mxu0 %vm223_vm1, %v10282_v2 }
 0x1ac   : > { %8212 = vmatmul.mubr.msk.f32.gmra.mrb[30].mxu0 %vm223_vm1, %v10288_v7 }
 0x1ad   : > { %8216 = vmatprep.mubr.msk.f32.mxu0 %vm223_vm1, %v9821_v8  ;;  %v414_v8 = vld [vmem:[#allocation2 + $0x198] sm:$0xff] }
 0x1b0   : > { %8217 = vmatmul.mubr.msk.f32.vlgmr.msra.gmra.mrb[0].mxu0 %vm223_vm1, %v9829_v10  ;;  %v415_v10 = vld [vmem:[#allocation2 + $0x1a0] sm:$0xff] }
 0x1b1   : > { %8265 = vmatpush3.msk.msra.mxu0 %vm588_vm0, %v2565_v28  ;;  %8219 = vmatprep.mubr.msk.f32.mxu0 %vm223_vm1, %v9831_v11  ;;  %v12588_v11 = vmov 0.0  }
 0x1b2   : > { %8314 = vmatprep.subr.msk.mxu0 %vm588_vm0, %v6917_v41  ;;  %270 = vst.msk [vmem:[#allocation3] sm:$0xff] %vm269_vm4, %v12588_v11  ;;  %271 = vst.msk [vmem:[#allocation3 + $0x8] sm:$0xff] %vm269_vm4, %v12588_v11 }
 0x1b3   : > { %275 = vst.msk [vmem:[#allocation3 + $0x198] sm:$0xff] %vm269_vm4, %v12588_v11  ;;  %276 = vst.msk [vmem:[#allocation3 + $0x1a0] sm:$0xff] %vm269_vm4, %v12588_v11 }
 0x1b4   : > { %8220 = vmatmul.mubr.msk.f32.gmra.mrb[2].mxu0 %vm223_vm1, %v9837_v9  ;;  %v12608_v9 = vld [vmem:[#allocation25_spill] sm:$0xff]  ;;  %273 = vst.msk [vmem:[#allocation3 + $0x10] sm:$0x3] %vm272_vm5, %v12588_v11  ;;  %277 = vst.msk [vmem:[#allocation3 + $0x1a8] sm:$0x3] %vm272_vm5, %v12588_v11 }
 0x1b5   : > { %8222 = vmatprep.mubr.msk.f32.mxu0 %vm223_vm1, %v9839_v12  ;;  %v12609_v12 = vld [vmem:[#allocation26_spill] sm:$0xff]  ;;  %279 = vst.msk [vmem:[#allocation3] sm:$0x1] %vm278_vm6, %v12588_v11  ;;  %280 = vst.msk [vmem:[#allocation3 + $0x18] sm:$0x1] %vm278_vm6, %v12588_v11 }
 0x1b6   : > { %281 = vst.msk [vmem:[#allocation3 + $0x30] sm:$0x1] %vm278_vm6, %v12588_v11  ;;  %282 = vst.msk [vmem:[#allocation3 + $0x48] sm:$0x1] %vm278_vm6, %v12588_v11 }
 0x1b7   : > { %283 = vst.msk [vmem:[#allocation3 + $0x60] sm:$0x1] %vm278_vm6, %v12588_v11  ;;  %284 = vst.msk [vmem:[#allocation3 + $0x78] sm:$0x1] %vm278_vm6, %v12588_v11 }
 0x1b8   : > { %8223 = vmatmul.mubr.msk.f32.gmra.mrb[4].mxu0 %vm223_vm1, %v9845_v13  ;;  %v12610_v13 = vld [vmem:[#allocation27_spill] sm:$0xff]  ;;  %285 = vst.msk [vmem:[#allocation3 + $0x90] sm:$0x1] %vm278_vm6, %v12588_v11  ;;  %286 = vst.msk [vmem:[#allocation3 + $0xa8] sm:$0x1] %vm278_vm6, %v12588_v11 }
 0x1b9   : > { %8225 = vmatprep.mubr.msk.f32.mxu0 %vm223_vm1, %v9847_v14  ;;  %v12611_v14 = vld [vmem:[#allocation29_spill] sm:$0xff]  ;;  %287 = vst.msk [vmem:[#allocation3 + $0xc0] sm:$0x1] %vm278_vm6, %v12588_v11  ;;  %288 = vst.msk [vmem:[#allocation3 + $0xd8] sm:$0x1] %vm278_vm6, %v12588_v11 }
 0x1ba   : > { %289 = vst.msk [vmem:[#allocation3 + $0xf0] sm:$0x1] %vm278_vm6, %v12588_v11  ;;  %290 = vst.msk [vmem:[#allocation3 + $0x108] sm:$0x1] %vm278_vm6, %v12588_v11 }
 0x1bb   : > { %291 = vst.msk [vmem:[#allocation3 + $0x120] sm:$0x1] %vm278_vm6, %v12588_v11  ;;  %292 = vst.msk [vmem:[#allocation3 + $0x138] sm:$0x1] %vm278_vm6, %v12588_v11 }
 0x1bc   : > { %8226 = vmatmul.mubr.msk.f32.gmra.mrb[6].mxu0 %vm223_vm1, %v9853_v15  ;;  %v12612_v15 = vld [vmem:[#allocation31_spill] sm:$0xff]  ;;  %293 = vst.msk [vmem:[#allocation3 + $0x150] sm:$0x1] %vm278_vm6, %v12588_v11  ;;  %294 = vst.msk [vmem:[#allocation3 + $0x168] sm:$0x1] %vm278_vm6, %v12588_v11 }
 0x1bd   : > { %8228 = vmatprep.mubr.msk.f32.mxu0 %vm223_vm1, %v9855_v16  ;;  %v12613_v16 = vld [vmem:[#allocation32_spill] sm:$0xff]  ;;  %295 = vst.msk [vmem:[#allocation3 + $0x180] sm:$0x1] %vm278_vm6, %v12588_v11  ;;  %296 = vst.msk [vmem:[#allocation3 + $0x198] sm:$0x1] %vm278_vm6, %v12588_v11 }
 0x1be   : > { %298 = vst.msk [vmem:[#allocation3 + $0x29] sm:$0x1] %vm278_vm6, %v12588_v11  ;;  %299 = vst.msk [vmem:[#allocation3 + $0x41] sm:$0x1] %vm278_vm6, %v12588_v11 }
 0x1bf   : > { %300 = vst.msk [vmem:[#allocation3 + $0x59] sm:$0x1] %vm278_vm6, %v12588_v11  ;;  %301 = vst.msk [vmem:[#allocation3 + $0x71] sm:$0x1] %vm278_vm6, %v12588_v11 }
 0x1c0   : > { %8229 = vmatmul.mubr.msk.f32.gmra.mrb[8].mxu0 %vm223_vm1, %v9861_v17  ;;  %v12614_v17 = vld [vmem:[#allocation34_spill] sm:$0xff]  ;;  %302 = vst.msk [vmem:[#allocation3 + $0x89] sm:$0x1] %vm278_vm6, %v12588_v11  ;;  %303 = vst.msk [vmem:[#allocation3 + $0xa1] sm:$0x1] %vm278_vm6, %v12588_v11 }
 0x1c1   : > { %8231 = vmatprep.mubr.msk.f32.mxu0 %vm223_vm1, %v9863_v18  ;;  %v12615_v18 = vld [vmem:[#allocation36_spill] sm:$0xff]  ;;  %304 = vst.msk [vmem:[#allocation3 + $0xb9] sm:$0x1] %vm278_vm6, %v12588_v11  ;;  %305 = vst.msk [vmem:[#allocation3 + $0xd1] sm:$0x1] %vm278_vm6, %v12588_v11 }
 0x1c2   : > { %306 = vst.msk [vmem:[#allocation3 + $0xe9] sm:$0x1] %vm278_vm6, %v12588_v11  ;;  %307 = vst.msk [vmem:[#allocation3 + $0x101] sm:$0x1] %vm278_vm6, %v12588_v11 }
 0x1c3   : > { %308 = vst.msk [vmem:[#allocation3 + $0x119] sm:$0x1] %vm278_vm6, %v12588_v11  ;;  %309 = vst.msk [vmem:[#allocation3 + $0x131] sm:$0x1] %vm278_vm6, %v12588_v11 }
 0x1c4   : > { %8232 = vmatmul.mubr.msk.f32.gmra.mrb[10].mxu0 %vm223_vm1, %v9869_v19  ;;  %310 = vst.msk [vmem:[#allocation3 + $0x149] sm:$0x1] %vm278_vm6, %v12588_v11  ;;  %311 = vst.msk [vmem:[#allocation3 + $0x161] sm:$0x1] %vm278_vm6, %v12588_v11 }
 0x1c5   : > { %8234 = vmatprep.mubr.msk.f32.mxu0 %vm223_vm1, %v9871_v20  ;;  %312 = vst.msk [vmem:[#allocation3 + $0x179] sm:$0x1] %vm278_vm6, %v12588_v11  ;;  %313 = vst.msk [vmem:[#allocation3 + $0x191] sm:$0x1] %vm278_vm6, %v12588_v11 }
 0x1c6   : > { %297 = vst.msk [vmem:[#allocation3 + $0x11] sm:$0x1] %vm278_vm6, %v12588_v11  ;;  %314 = vst.msk [vmem:[#allocation3 + $0x1a9] sm:$0x1] %vm278_vm6, %v12588_v11 }
 0x1c8   : > { %8235 = vmatmul.mubr.msk.f32.gmra.mrb[12].mxu0 %vm223_vm1, %v9877_v21 }
 0x1c9   : > { %8237 = vmatprep.mubr.msk.f32.mxu0 %vm223_vm1, %v9879_v22 }
 0x1cc   : > { %8238 = vmatmul.mubr.msk.f32.gmra.mrb[14].mxu0 %vm223_vm1, %v9885_v23 }
 0x1cd   : > { %8240 = vmatprep.mubr.msk.f32.mxu0 %vm223_vm1, %v9887_v24 }
 0x1d0   : > { %8241 = vmatmul.mubr.msk.f32.gmra.mrb[16].mxu0 %vm223_vm1, %v9893_v25 }
 0x1d1   : > { %8243 = vmatprep.mubr.msk.f32.mxu0 %vm223_vm1, %v9895_v26 }
 0x1d4   : > { %8244 = vmatmul.mubr.msk.f32.gmra.mrb[18].mxu0 %vm223_vm1, %v9901_v27 }
 0x1d5   : > { %8246 = vmatprep.mubr.msk.f32.mxu0 %vm223_vm1, %v9903_v31 }
 0x1d8   : > { %8247 = vmatmul.mubr.msk.f32.gmra.mrb[20].mxu0 %vm223_vm1, %v9909_v32 }
 0x1d9   : > { %8249 = vmatprep.mubr.msk.f32.mxu0 %vm223_vm1, %v9911_v37 }
 0x1dc   : > { %8250 = vmatmul.mubr.msk.f32.gmra.mrb[22].mxu0 %vm223_vm1, %v9917_v38 }
 0x1dd   : > { %8252 = vmatprep.mubr.msk.f32.mxu0 %vm223_vm1, %v9919_v39 }
 0x1e0   : > { %8253 = vmatmul.mubr.msk.f32.gmra.mrb[24].mxu0 %vm223_vm1, %v9929_v42 }
 0x1e1   : > { %8255 = vmatprep.mubr.msk.f32.mxu0 %vm223_vm1, %v9931_v3 }
 0x1e4   : > { %8256 = vmatmul.mubr.msk.f32.gmra.mrb[26].mxu0 %vm223_vm1, %v9937_v4 }
 0x1e5   : > { %8258 = vmatprep.mubr.msk.f32.mxu0 %vm223_vm1, %v10134_v5 }
 0x1e8   : > { %8259 = vmatmul.mubr.msk.f32.gmra.mrb[28].mxu0 %vm223_vm1, %v10140_v6 }
 0x1e9   : > { %8261 = vmatprep.mubr.msk.f32.mxu0 %vm223_vm1, %v414_v8 }
 0x1ec   : > { %8262 = vmatmul.mubr.msk.f32.gmra.mrb[30].mxu0 %vm223_vm1, %v415_v10 }
 0x1ed   : > { %8266 = vmatprep.mubr.msk.f32.mxu0 %vm223_vm1, %v9671_v30  ;;  %v12589_v30 = vld [vmem:[#allocation7_spill] sm:$0xff] }
 0x1f0   : > { %8267 = vmatmul.mubr.msk.f32.vlgmr.msra.gmra.mrb[0].mxu0 %vm223_vm1, %v9684_v33  ;;  %v12590_v33 = vld [vmem:[#allocation8_spill] sm:$0xff] }
 0x1f1   : > { %8315 = vmatpush3.msk.msra.mxu0 %vm588_vm0, %v6917_v41  ;;  %8269 = vmatprep.mubr.msk.f32.mxu0 %vm223_vm1, %v9688_v34  ;;  %v12591_v34 = vld [vmem:[#allocation9_spill] sm:$0xff] }
 0x1f4   : > { %8270 = vmatmul.mubr.msk.f32.gmra.mrb[2].mxu0 %vm223_vm1, %v9694_v35  ;;  %v12592_v35 = vld [vmem:[#allocation10_spill] sm:$0xff] }
 0x1f5   : > { %8272 = vmatprep.mubr.msk.f32.mxu0 %vm223_vm1, %v9696_v36  ;;  %v12593_v36 = vld [vmem:[#allocation11_spill] sm:$0xff] }
 0x1f8   : > { %8273 = vmatmul.mubr.msk.f32.gmra.mrb[4].mxu0 %vm223_vm1, %v9714_v43  ;;  %v12594_v43 = vld [vmem:[#allocation12_spill] sm:$0xff] }
 0x1f9   : > { %8275 = vmatprep.mubr.msk.f32.mxu0 %vm223_vm1, %v9716_v44  ;;  %v12595_v44 = vld [vmem:[#allocation13_spill] sm:$0xff] }
 0x1fc   : > { %8276 = vmatmul.mubr.msk.f32.gmra.mrb[6].mxu0 %vm223_vm1, %v9722_v45  ;;  %v12596_v45 = vld [vmem:[#allocation40_spill] sm:$0xff] }
 0x1fd   : > { %8278 = vmatprep.mubr.msk.f32.mxu0 %vm223_vm1, %v9724_v46  ;;  %v450_v46 = vld [vmem:[#allocation2 + $0x199] sm:$0xff] }
 0x200   : > { %8279 = vmatmul.mubr.msk.f32.gmra.mrb[8].mxu0 %vm223_vm1, %v9730_v47  ;;  %v12597_v47 = vld [vmem:[#allocation41_spill] sm:$0xff] }
 0x201   : > { %8281 = vmatprep.mubr.msk.f32.mxu0 %vm223_vm1, %v9732_v48  ;;  %v451_v48 = vld [vmem:[#allocation2 + $0x1a1] sm:$0xff] }
 0x204   : > { %8282 = vmatmul.mubr.msk.f32.gmra.mrb[10].mxu0 %vm223_vm1, %v9738_v49  ;;  %v12598_v49 = vld [vmem:[#allocation15_spill] sm:$0xff] }
 0x205   : > { %8284 = vmatprep.mubr.msk.f32.mxu0 %vm223_vm1, %v9740_v50  ;;  %v12599_v50 = vld [vmem:[#allocation16_spill] sm:$0xff] }
 0x208   : > { %8285 = vmatmul.mubr.msk.f32.gmra.mrb[12].mxu0 %vm223_vm1, %v9746_v51  ;;  %v12600_v51 = vld [vmem:[#allocation17_spill] sm:$0xff] }
 0x209   : > { %8287 = vmatprep.mubr.msk.f32.mxu0 %vm223_vm1, %v9748_v52  ;;  %v12601_v52 = vld [vmem:[#allocation18_spill] sm:$0xff] }
 0x20c   : > { %8288 = vmatmul.mubr.msk.f32.gmra.mrb[14].mxu0 %vm223_vm1, %v9754_v53  ;;  %v12602_v53 = vld [vmem:[#allocation19_spill] sm:$0xff] }
 0x20d   : > { %8290 = vmatprep.mubr.msk.f32.mxu0 %vm223_vm1, %v9756_v54  ;;  %v12603_v54 = vld [vmem:[#allocation20_spill] sm:$0xff] }
 0x210   : > { %8291 = vmatmul.mubr.msk.f32.gmra.mrb[16].mxu0 %vm223_vm1, %v9762_v55  ;;  %v12604_v55 = vld [vmem:[#allocation21_spill] sm:$0xff] }
 0x211   : > { %8293 = vmatprep.mubr.msk.f32.mxu0 %vm223_vm1, %v9764_v56  ;;  %v12605_v56 = vld [vmem:[#allocation22_spill] sm:$0xff] }
 0x214   : > { %8294 = vmatmul.mubr.msk.f32.gmra.mrb[18].mxu0 %vm223_vm1, %v9770_v57  ;;  %v12606_v57 = vld [vmem:[#allocation23_spill] sm:$0xff] }
 0x215   : > { %8296 = vmatprep.mubr.msk.f32.mxu0 %vm223_vm1, %v12589_v30 }
 0x218   : > { %8297 = vmatmul.mubr.msk.f32.gmra.mrb[20].mxu0 %vm223_vm1, %v9778_v59  ;;  %v12607_v59 = vld [vmem:[#allocation24_spill] sm:$0xff] }
 0x219   : > { %8299 = vmatprep.mubr.msk.f32.mxu0 %vm223_vm1, %v12590_v33 }
 0x21c   : > { %8300 = vmatmul.mubr.msk.f32.gmra.mrb[22].mxu0 %vm223_vm1, %v12591_v34 }
 0x21d   : > { %8302 = vmatprep.mubr.msk.f32.mxu0 %vm223_vm1, %v12592_v35 }
 0x220   : > { %8303 = vmatmul.mubr.msk.f32.gmra.mrb[24].mxu0 %vm223_vm1, %v12593_v36 }
 0x221   : > { %8305 = vmatprep.mubr.msk.f32.mxu0 %vm223_vm1, %v12594_v43 }
 0x224   : > { %8306 = vmatmul.mubr.msk.f32.gmra.mrb[26].mxu0 %vm223_vm1, %v12595_v44 }
 0x225   : > { %8308 = vmatprep.mubr.msk.f32.mxu0 %vm223_vm1, %v12596_v45 }
 0x228   : > { %8309 = vmatmul.mubr.msk.f32.gmra.mrb[28].mxu0 %vm223_vm1, %v12597_v47 }
 0x229   : > { %8311 = vmatprep.mubr.msk.f32.mxu0 %vm223_vm1, %v450_v46 }
 0x22c   : > { %8312 = vmatmul.mubr.msk.f32.gmra.mrb[30].mxu0 %vm223_vm1, %v451_v48 }
 0x22d   : > { %8316 = vmatprep.mubr.msk.f32.mxu0 %vm223_vm1, %v12598_v49 }
 0x230   : > { %8317 = vmatmul.mubr.msk.f32.vlgmr.msra.gmra.mrb[0].mxu0 %vm223_vm1, %v12599_v50 }
 0x231   : > { %8319 = vmatprep.mubr.msk.f32.mxu0 %vm223_vm1, %v12600_v51 }
 0x234   : > { %8320 = vmatmul.mubr.msk.f32.gmra.mrb[2].mxu0 %vm223_vm1, %v12601_v52 }
 0x235   : > { %8322 = vmatprep.mubr.msk.f32.mxu0 %vm223_vm1, %v12602_v53 }
 0x238   : > { %8323 = vmatmul.mubr.msk.f32.gmra.mrb[4].mxu0 %vm223_vm1, %v12603_v54 }
 0x239   : > { %8325 = vmatprep.mubr.msk.f32.mxu0 %vm223_vm1, %v12604_v55 }
 0x23c   : > { %8326 = vmatmul.mubr.msk.f32.gmra.mrb[6].mxu0 %vm223_vm1, %v12605_v56 }
 0x23d   : > { %8328 = vmatprep.mubr.msk.f32.mxu0 %vm223_vm1, %v12606_v57 }
 0x240   : > { %8329 = vmatmul.mubr.msk.f32.gmra.mrb[8].mxu0 %vm223_vm1, %v12607_v59 }
 0x241   : > { %8331 = vmatprep.mubr.msk.f32.mxu0 %vm223_vm1, %v12608_v9 }
 0x244   : > { %8332 = vmatmul.mubr.msk.f32.gmra.mrb[10].mxu0 %vm223_vm1, %v12609_v12 }
 0x245   : > { %8334 = vmatprep.mubr.msk.f32.mxu0 %vm223_vm1, %v12610_v13 }
 0x248   : > { %8335 = vmatmul.mubr.msk.f32.gmra.mrb[12].mxu0 %vm223_vm1, %v12577_v0 }
 0x249   : > { %8337 = vmatprep.mubr.msk.f32.mxu0 %vm223_vm1, %v12611_v14 }
 0x24c   : > { %8338 = vmatmul.mubr.msk.f32.gmra.mrb[14].mxu0 %vm223_vm1, %v12579_v58  ;;  %v12616_v58 = vld [vmem:[#allocation39_spill] sm:$0xff] }
 0x24d   : > { %8340 = vmatprep.mubr.msk.f32.mxu0 %vm223_vm1, %v12612_v15 }
 0x250   : > { %8341 = vmatmul.mubr.msk.f32.gmra.mrb[16].mxu0 %vm223_vm1, %v12613_v16 }
 0x251   : > { %8343 = vmatprep.mubr.msk.f32.mxu0 %vm223_vm1, %v12582_v60  ;;  %v486_v60 = vld [vmem:[#allocation2 + $0x19a] sm:$0xff] }
 0x254   : > { %8344 = vmatmul.mubr.msk.f32.gmra.mrb[18].mxu0 %vm223_vm1, %v12614_v17 }
 0x255   : > { %8346 = vmatprep.mubr.msk.f32.mxu0 %vm223_vm1, %v12584_v29 }
 0x258   : > { %8347 = vmatmul.mubr.msk.f32.gmra.mrb[20].mxu0 %vm223_vm1, %v10041_v62  ;;  %v487_v62 = vld [vmem:[#allocation2 + $0x1a2] sm:$0xff] }
 0x259   : > { %8349 = vmatprep.mubr.msk.f32.mxu0 %vm223_vm1, %v12615_v18 }
 0x25c   : > { %8350 = vmatmul.mubr.msk.f32.gmra.mrb[22].mxu0 %vm223_vm1, %v10049_v63 }
 0x25d   : > { %8352 = vmatprep.mubr.msk.f32.mxu0 %vm223_vm1, %v12586_v61  ;;  %v10495_v61 = vld [vmem:[%s12389_s2] ss:$0 sm:$0xff] }
 0x260   : > { %8353 = vmatmul.mubr.msk.f32.gmra.mrb[24].mxu0 %vm223_vm1, %v12587_v40 }
 0x261   : > { %8355 = vmatprep.mubr.msk.f32.mxu0 %vm223_vm1, %v12616_v58 }
 0x264   : > { %8356 = vmatmul.mubr.msk.f32.gmra.mrb[26].mxu0 %vm223_vm1, %v10065_v1 }
 0x265   : > { %8358 = vmatprep.mubr.msk.f32.mxu0 %vm223_vm1, %v10282_v2 }
 0x268   : > { %8359 = vmatmul.mubr.msk.f32.gmra.mrb[28].mxu0 %vm223_vm1, %v10288_v7 }
 0x269   : > { %8361 = vmatprep.mubr.msk.f32.mxu0 %vm223_vm1, %v486_v60 }
 0x26c   : > { %8362 = vmatmul.mubr.msk.f32.gmra.mrb[30].mxu0 %vm223_vm1, %v487_v62 }
 0x303   : > { %v8318_v63 = vpop.f32.mrb[0].mxu0 }
 0x304   : > { %v10498_v1 = vadd.f32 %v8318_v63, %v10495_v61  ;;  %v2906_v19 = vpop.f32.mrb[1].mxu0 }
 0x305   : > { %v10501_v20 = vadd.f32 %v10495_v61, %v2906_v19 }
 0x306   : > { %v3137_v21 = vsel %vm269_vm4, %v10498_v1, 0.0 }
 0x307   : > { %v3136_v22 = vsel %vm269_vm4, %v10501_v20, 0.0  ;;  %v8321_v23 = vpop.f32.mrb[2].mxu0 }
 0x308   : > { %v2916_v24 = vpop.f32.mrb[3].mxu0  ;;  %v10508_v25 = vadd.f32 %v8321_v23, %v10495_v61  ;;  %v3138_v27 = vadd.f32 %v3137_v21, %v3136_v22 }
 0x309   : > { %v10511_v26 = vadd.f32 %v10495_v61, %v2916_v24 }
 0x30a   : > { %v3141_v39 = vsel %vm269_vm4, %v10508_v25, 0.0 }
 0x30b   : > { %v3139_v31 = vsel %vm269_vm4, %v10511_v26, 0.0  ;;  %v8324_v32 = vpop.f32.mrb[4].mxu0 }
 0x30c   : > { %v3140_v37 = vadd.f32 %v3139_v31, %v3138_v27  ;;  %v2926_v38 = vpop.f32.mrb[5].mxu0  ;;  %v10518_v42 = vadd.f32 %v8324_v32, %v10495_v61 }
 0x30d   : > { %v10521_v3 = vadd.f32 %v10495_v61, %v2926_v38 }
 0x30e   : > { %v3142_v4 = vadd.f32 %v3141_v39, %v3140_v37  ;;  %v3145_v29 = vsel %vm269_vm4, %v10518_v42, 0.0 }
 0x30f   : > { %v3143_v41 = vsel %vm269_vm4, %v10521_v3, 0.0  ;;  %v8327_v5 = vpop.f32.mrb[6].mxu0 }
 0x310   : > { %v3144_v6 = vadd.f32 %v3143_v41, %v3142_v4  ;;  %v2936_v28 = vpop.f32.mrb[7].mxu0  ;;  %v10528_v40 = vadd.f32 %v8327_v5, %v10495_v61 }
 0x311   : > { %v10531_v2 = vadd.f32 %v10495_v61, %v2936_v28 }
 0x312   : > { %v3146_v0 = vadd.f32 %v3145_v29, %v3144_v6  ;;  %v3149_v33 = vsel %vm269_vm4, %v10528_v40, 0.0 }
 0x313   : > { %v3147_v7 = vsel %vm269_vm4, %v10531_v2, 0.0  ;;  %v8330_v8 = vpop.f32.mrb[8].mxu0 }
 0x314   : > { %v3148_v10 = vadd.f32 %v3147_v7, %v3146_v0  ;;  %v2946_v30 = vpop.f32.mrb[9].mxu0  ;;  %v10538_v34 = vadd.f32 %v8330_v8, %v10495_v61 }
 0x315   : > { %v10541_v35 = vadd.f32 %v10495_v61, %v2946_v30 }
 0x316   : > { %v3150_v36 = vadd.f32 %v3149_v33, %v3148_v10  ;;  %v3153_v47 = vsel %vm269_vm4, %v10538_v34, 0.0 }
 0x317   : > { %v3151_v43 = vsel %vm269_vm4, %v10541_v35, 0.0  ;;  %v8333_v44 = vpop.f32.mrb[10].mxu0 }
 0x318   : > { %v3152_v45 = vadd.f32 %v3151_v43, %v3150_v36  ;;  %v2956_v46 = vpop.f32.mrb[11].mxu0  ;;  %v10548_v48 = vadd.f32 %v8333_v44, %v10495_v61 }
 0x319   : > { %v10551_v49 = vadd.f32 %v10495_v61, %v2956_v46 }
 0x31a   : > { %v3154_v50 = vadd.f32 %v3153_v47, %v3152_v45  ;;  %v3157_v55 = vsel %vm269_vm4, %v10548_v48, 0.0 }
 0x31b   : > { %v3155_v51 = vsel %vm269_vm4, %v10551_v49, 0.0  ;;  %v8336_v52 = vpop.f32.mrb[12].mxu0 }
 0x31c   : > { %v3156_v53 = vadd.f32 %v3155_v51, %v3154_v50  ;;  %v2966_v54 = vpop.f32.mrb[13].mxu0  ;;  %v10558_v56 = vadd.f32 %v8336_v52, %v10495_v61 }
 0x31d   : > { %v10561_v57 = vadd.f32 %v10495_v61, %v2966_v54 }
 0x31e   : > { %v3158_v59 = vadd.f32 %v3157_v55, %v3156_v53  ;;  %v3161_v15 = vsel %vm269_vm4, %v10558_v56, 0.0 }
 0x31f   : > { %v3159_v9 = vsel %vm269_vm4, %v10561_v57, 0.0  ;;  %v8339_v12 = vpop.f32.mrb[14].mxu0 }
 0x320   : > { %v3160_v13 = vadd.f32 %v3159_v9, %v3158_v59  ;;  %v2976_v14 = vpop.f32.mrb[15].mxu0  ;;  %v10568_v16 = vadd.f32 %v8339_v12, %v10495_v61 }
 0x321   : > { %v10571_v17 = vadd.f32 %v10495_v61, %v2976_v14 }
 0x322   : > { %v3162_v18 = vadd.f32 %v3161_v15, %v3160_v13  ;;  %v3165_v19 = vsel %vm269_vm4, %v10568_v16, 0.0 }
 0x323   : > { %v3163_v58 = vsel %vm269_vm4, %v10571_v17, 0.0  ;;  %v8342_v60 = vpop.f32.mrb[16].mxu0 }
 0x324   : > { %v3164_v62 = vadd.f32 %v3163_v58, %v3162_v18  ;;  %v2986_v63 = vpop.f32.mrb[17].mxu0  ;;  %v10578_v21 = vadd.f32 %v8342_v60, %v10495_v61 }
 0x325   : > { %v10581_v22 = vadd.f32 %v10495_v61, %v2986_v63 }
 0x326   : > { %v3166_v23 = vadd.f32 %v3165_v19, %v3164_v62  ;;  %v3169_v37 = vsel %vm269_vm4, %v10578_v21, 0.0 }
 0x327   : > { %v3167_v24 = vsel %vm269_vm4, %v10581_v22, 0.0  ;;  %v8345_v27 = vpop.f32.mrb[18].mxu0 }
 0x328   : > { %v3168_v31 = vadd.f32 %v3167_v24, %v3166_v23  ;;  %v2996_v32 = vpop.f32.mrb[19].mxu0  ;;  %v10588_v38 = vadd.f32 %v8345_v27, %v10495_v61 }
 0x329   : > { %v10591_v39 = vadd.f32 %v10495_v61, %v2996_v32 }
 0x32a   : > { %v3170_v4 = vadd.f32 %v3169_v37, %v3168_v31  ;;  %v3173_v29 = vsel %vm269_vm4, %v10588_v38, 0.0 }
 0x32b   : > { %v3171_v41 = vsel %vm269_vm4, %v10591_v39, 0.0  ;;  %v8348_v5 = vpop.f32.mrb[20].mxu0 }
 0x32c   : > { %v3172_v6 = vadd.f32 %v3171_v41, %v3170_v4  ;;  %v3006_v28 = vpop.f32.mrb[21].mxu0  ;;  %v10598_v0 = vadd.f32 %v8348_v5, %v10495_v61 }
 0x32d   : > { %v10601_v7 = vadd.f32 %v10495_v61, %v3006_v28 }
 0x32e   : > { %v3174_v8 = vadd.f32 %v3173_v29, %v3172_v6  ;;  %v3177_v43 = vsel %vm269_vm4, %v10598_v0, 0.0 }
 0x32f   : > { %v3175_v10 = vsel %vm269_vm4, %v10601_v7, 0.0  ;;  %v8351_v30 = vpop.f32.mrb[22].mxu0 }
 0x330   : > { %v3176_v33 = vadd.f32 %v3175_v10, %v3174_v8  ;;  %v3016_v36 = vpop.f32.mrb[23].mxu0  ;;  %v3127_v44 = vadd.f32 %v8351_v30, %v10495_v61 }
 0x331   : > { %v3126_v45 = vadd.f32 %v10495_v61, %v3016_v36 }
 0x332   : > { %v3178_v46 = vadd.f32 %v3177_v43, %v3176_v33  ;;  %v3181_v53 = vsel %vm269_vm4, %v3127_v44, 0.0 }
 0x333   : > { %v3179_v47 = vsel %vm269_vm4, %v3126_v45, 0.0  ;;  %v8354_v50 = vpop.f32.mrb[24].mxu0 }
 0x334   : > { %v3180_v51 = vadd.f32 %v3179_v47, %v3178_v46  ;;  %v3026_v52 = vpop.f32.mrb[25].mxu0  ;;  %v3129_v54 = vadd.f32 %v8354_v50, %v10495_v61 }
 0x335   : > { %v3128_v55 = vadd.f32 %v10495_v61, %v3026_v52 }
 0x336   : > { %v3182_v59 = vadd.f32 %v3181_v53, %v3180_v51  ;;  %v3185_v15 = vsel %vm269_vm4, %v3129_v54, 0.0 }
 0x337   : > { %v3183_v9 = vsel %vm269_vm4, %v3128_v55, 0.0  ;;  %v8357_v12 = vpop.f32.mrb[26].mxu0 }
 0x338   : > { %v3184_v13 = vadd.f32 %v3183_v9, %v3182_v59  ;;  %v3036_v14 = vpop.f32.mrb[27].mxu0  ;;  %v3131_v18 = vadd.f32 %v8357_v12, %v10495_v61 }
 0x339   : > { %v3130_v58 = vadd.f32 %v10495_v61, %v3036_v14 }
 0x33a   : > { %v3186_v60 = vadd.f32 %v3185_v15, %v3184_v13  ;;  %v3189_v24 = vsel %vm269_vm4, %v3131_v18, 0.0 }
 0x33b   : > { %v3187_v62 = vsel %vm269_vm4, %v3130_v58, 0.0  ;;  %v8360_v63 = vpop.f32.mrb[28].mxu0 }
 0x33c   : > { %v3188_v19 = vadd.f32 %v3187_v62, %v3186_v60  ;;  %v3046_v23 = vpop.f32.mrb[29].mxu0  ;;  %v3133_v27 = vadd.f32 %v8360_v63, %v10495_v61 }
 0x33d   : > { %v3132_v31 = vadd.f32 %v10495_v61, %v3046_v23 }
 0x33e   : > { %v3190_v32 = vadd.f32 %v3189_v24, %v3188_v19  ;;  %v3193_v6 = vsel %vm269_vm4, %v3133_v27, 0.0 }
 0x33f   : > { %v3191_v37 = vsel %vm269_vm4, %v3132_v31, 0.0  ;;  %v8363_v4 = vpop.f32.mrb[30].mxu0 }
 0x340   : > { %v3192_v41 = vadd.f32 %v3191_v37, %v3190_v32  ;;  %v3056_v5 = vpop.f32.mrb[31].mxu0  ;;  %v3135_v28 = vadd.f32 %v8363_v4, %v10495_v61 }
 0x341   : > { %v3134_v29 = vadd.f32 %v10495_v61, %v3056_v5 }
 0x342   : > { %v3194_v8 = vadd.f32 %v3193_v6, %v3192_v41  ;;  %v3197_v33 = vsel %vm269_vm4, %v3135_v28, 0.0 }
 0x343   : > { %v3195_v10 = vsel %vm269_vm4, %v3134_v29, 0.0 }
 0x344   : > { %v3196_v30 = vadd.f32 %v3195_v10, %v3194_v8 }
 0x346   : > { %v3198_v36 = vadd.f32 %v3197_v33, %v3196_v30 }
 0x348   : > { %v3199_v43 = vrot.slane %v3198_v36, 4 }
 0x34a   : > { %v3200_v46 = vadd.f32 %v3199_v43, %v3198_v36 }
 0x34c   : > { %v3201_v47 = vrot.slane %v3200_v46, 2 }
 0x34e   : > { %v3202_v50 = vadd.f32 %v3201_v47, %v3200_v46 }
 0x350   : > { %v3203_v51 = vrot.slane %v3202_v50, 1 }
 0x352   : > { %v3204_v52 = vadd.f32 %v3203_v51, %v3202_v50 }
 0x354   : > { %v3206_v53 = vmul.f32 0.00390625, %v3204_v52 }
 0x356   : > { %v10628_v59 = vsub.f32 %v10551_v49, %v3206_v53  ;;  %v10631_v9 = vsub.f32 %v10548_v48, %v3206_v53  ;;  %v10634_v61 = vsub.f32 %v10561_v57, %v3206_v53  ;;  %v10637_v12 = vsub.f32 %v10558_v56, %v3206_v53 }
 0x357   : > { %v10640_v13 = vsub.f32 %v10571_v17, %v3206_v53  ;;  %v10643_v14 = vsub.f32 %v10568_v16, %v3206_v53  ;;  %v10646_v15 = vsub.f32 %v10581_v22, %v3206_v53  ;;  %v10649_v49 = vsub.f32 %v10578_v21, %v3206_v53 }
 0x358   : > { %v10652_v48 = vsub.f32 %v10591_v39, %v3206_v53  ;;  %v10655_v57 = vsub.f32 %v10588_v38, %v3206_v53  ;;  %v10658_v56 = vsub.f32 %v10601_v7, %v3206_v53  ;;  %v10661_v17 = vsub.f32 %v10598_v0, %v3206_v53 }
 0x359   : > { %v10663_v16 = vsub.f32 %v3126_v45, %v3206_v53  ;;  %v10665_v60 = vsub.f32 %v3127_v44, %v3206_v53  ;;  %v10667_v22 = vsub.f32 %v3128_v55, %v3206_v53  ;;  %v10669_v21 = vsub.f32 %v3129_v54, %v3206_v53  ;;  %v3613_v55 = vld [vmem:[%s12390_s3 + $0x8] sm:$0xff] }
 0x35a   : > { %v10671_v62 = vsub.f32 %v3130_v58, %v3206_v53  ;;  %v10673_v39 = vsub.f32 %v3131_v18, %v3206_v53  ;;  %v10675_v38 = vsub.f32 %v3132_v31, %v3206_v53  ;;  %v10677_v63 = vsub.f32 %v3133_v27, %v3206_v53  ;;  %v3540_v18 = vld [vmem:[#allocation3 + $0x1] sm:$0xff]  ;;  %8364 = vmatprep.subr.mxu1 %v3613_v55 }
 0x35b   : > { %v10679_v7 = vsub.f32 %v3134_v29, %v3206_v53  ;;  %v10681_v0 = vsub.f32 %v3135_v28, %v3206_v53  ;;  %v10684_v45 = vsub.f32 %v10501_v20, %v3206_v53  ;;  %v10687_v44 = vsub.f32 %v10498_v1, %v3206_v53  ;;  %v10705_v1 = vld [vmem:[%s12390_s3] sm:$0xff]  ;;  %8365 = vmatpush3.msra.mxu1 %v3613_v55 }
 0x35c   : > { %v10690_v54 = vsub.f32 %v10511_v26, %v3206_v53  ;;  %v10696_v58 = vsub.f32 %v10508_v25, %v3206_v53  ;;  %v10708_v26 = vsub.f32 %v10521_v3, %v3206_v53  ;;  %8366 = vmatprep.mubr.msk.f32.mxu1 %vm269_vm4, %v3540_v18  ;;  %8414 = vmatprep.subr.mxu1 %v10705_v1 }
 0x35d   : > { %v3239_v19 = vmul.f32 %v10684_v45, %v10684_v45  ;;  %v3240_v20 = vmul.f32 %v10687_v44, %v10687_v44  ;;  %v10715_v23 = vsub.f32 %v10518_v42, %v3206_v53  ;;  %v10722_v3 = vsub.f32 %v10531_v2, %v3206_v53 }
 0x35e   : > { %v3241_v25 = vmul.f32 %v10690_v54, %v10690_v54  ;;  %v3242_v24 = vmul.f32 %v10696_v58, %v10696_v58  ;;  %v3243_v37 = vmul.f32 %v10708_v26, %v10708_v26  ;;  %v10728_v42 = vsub.f32 %v10528_v40, %v3206_v53 }
 0x35f   : > { %v3271_v27 = vsel %vm269_vm4, %v3239_v19, 0.0  ;;  %v3272_v31 = vsel %vm269_vm4, %v3240_v20, 0.0  ;;  %v3244_v5 = vmul.f32 %v10715_v23, %v10715_v23  ;;  %v10734_v29 = vsub.f32 %v10541_v35, %v3206_v53  ;;  %v3541_v20 = vld [vmem:[#allocation3 + $0x9] sm:$0xff] }
 0x360   : > { %v3273_v32 = vadd.f32 %v3272_v31, %v3271_v27  ;;  %v3274_v4 = vsel %vm269_vm4, %v3241_v25, 0.0  ;;  %v3276_v6 = vsel %vm269_vm4, %v3242_v24, 0.0  ;;  %v3245_v2 = vmul.f32 %v10722_v3, %v10722_v3  ;;  %8367 = vmatmul.mubr.msk.f32.vlgmr.msra.gmra.mrb[0].mxu1 %vm269_vm4, %v3541_v20 }
 0x361   : > { %v3278_v8 = vsel %vm269_vm4, %v3243_v37, 0.0  ;;  %v10740_v30 = vsub.f32 %v10538_v34, %v3206_v53  ;;  %v3246_v40 = vmul.f32 %v10728_v42, %v10728_v42  ;;  %v3280_v33 = vsel %vm269_vm4, %v3244_v5, 0.0  ;;  %8415 = vmatpush3.msra.mxu1 %v10705_v1 }
 0x362   : > { %v3275_v41 = vadd.f32 %v3274_v4, %v3273_v32  ;;  %v3247_v35 = vmul.f32 %v10734_v29, %v10734_v29  ;;  %v3282_v43 = vsel %vm269_vm4, %v3245_v2, 0.0  ;;  %v3249_v51 = vmul.f32 %v10628_v59, %v10628_v59 }
 0x363   : > { %v3248_v46 = vmul.f32 %v10740_v30, %v10740_v30  ;;  %v3284_v47 = vsel %vm269_vm4, %v3246_v40, 0.0  ;;  %v3250_v55 = vmul.f32 %v10631_v9, %v10631_v9  ;;  %v3251_v11 = vmul.f32 %v10634_v61, %v10634_v61 }
 0x364   : > { %v3277_v28 = vadd.f32 %v3276_v6, %v3275_v41  ;;  %v3286_v52 = vsel %vm269_vm4, %v3247_v35, 0.0  ;;  %v3290_v25 = vsel %vm269_vm4, %v3249_v51, 0.0  ;;  %v3252_v27 = vmul.f32 %v10637_v12, %v10637_v12 }
 0x365   : > { %v3288_v18 = vsel %vm269_vm4, %v3248_v46, 0.0  ;;  %v3292_v31 = vsel %vm269_vm4, %v3250_v55, 0.0  ;;  %v3253_v37 = vmul.f32 %v10640_v13, %v10640_v13  ;;  %v3294_v4 = vsel %vm269_vm4, %v3251_v11, 0.0 }
 0x366   : > { %v3279_v10 = vadd.f32 %v3278_v8, %v3277_v28  ;;  %v3254_v5 = vmul.f32 %v10643_v14, %v10643_v14  ;;  %v3296_v6 = vsel %vm269_vm4, %v3252_v27, 0.0  ;;  %v3255_v1 = vmul.f32 %v10646_v15, %v10646_v15 }
 0x367   : > { %v3298_v2 = vsel %vm269_vm4, %v3253_v37, 0.0 }
 0x368   : > { %v3281_v36 = vadd.f32 %v3280_v33, %v3279_v10  ;;  %v3256_v10 = vmul.f32 %v10649_v49, %v10649_v49  ;;  %v3300_v40 = vsel %vm269_vm4, %v3254_v5, 0.0  ;;  %v3302_v35 = vsel %vm269_vm4, %v3255_v1, 0.0 }
 0x36a   : > { %v3283_v34 = vadd.f32 %v3282_v43, %v3281_v36  ;;  %v3257_v36 = vmul.f32 %v10652_v48, %v10652_v48  ;;  %v3304_v46 = vsel %vm269_vm4, %v3256_v10, 0.0 }
 0x36c   : > { %v3285_v50 = vadd.f32 %v3284_v47, %v3283_v34  ;;  %v3258_v34 = vmul.f32 %v10655_v57, %v10655_v57  ;;  %v3306_v51 = vsel %vm269_vm4, %v3257_v36, 0.0 }
 0x36e   : > { %v3287_v53 = vadd.f32 %v3286_v52, %v3285_v50  ;;  %v3259_v50 = vmul.f32 %v10658_v56, %v10658_v56  ;;  %v3308_v55 = vsel %vm269_vm4, %v3258_v34, 0.0 }
 0x370   : > { %v3289_v19 = vadd.f32 %v3288_v18, %v3287_v53  ;;  %v3260_v53 = vmul.f32 %v10661_v17, %v10661_v17  ;;  %v3310_v20 = vsel %vm269_vm4, %v3259_v50, 0.0 }
 0x372   : > { %v3291_v24 = vadd.f32 %v3290_v25, %v3289_v19  ;;  %v3261_v19 = vmul.f32 %v10663_v16, %v10663_v16  ;;  %v3262_v25 = vmul.f32 %v10665_v60, %v10665_v60 }
 0x374   : > { %v3293_v32 = vadd.f32 %v3292_v31, %v3291_v24  ;;  %v3312_v24 = vsel %vm269_vm4, %v3260_v53, 0.0  ;;  %v3263_v31 = vmul.f32 %v10667_v22, %v10667_v22 }
 0x376   : > { %v3295_v41 = vadd.f32 %v3294_v4, %v3293_v32  ;;  %v3314_v32 = vsel %vm269_vm4, %v3261_v19, 0.0  ;;  %v3264_v4 = vmul.f32 %v10669_v21, %v10669_v21 }
 0x378   : > { %v3297_v28 = vadd.f32 %v3296_v6, %v3295_v41  ;;  %v3316_v41 = vsel %vm269_vm4, %v3262_v25, 0.0  ;;  %v3265_v6 = vmul.f32 %v10671_v62, %v10671_v62  ;;  %v3320_v10 = vsel %vm269_vm4, %v3264_v4, 0.0 }
 0x37a   : > { %v3299_v8 = vadd.f32 %v3298_v2, %v3297_v28  ;;  %v3318_v28 = vsel %vm269_vm4, %v3263_v31, 0.0  ;;  %v10881_v2 = vld [vmem:[%s12390_s3 + $0x10] sm:$0xff]  ;;  %v3322_v36 = vsel %vm269_vm4, %v3265_v6, 0.0 }
 0x37b   : > { %8464 = vmatprep.subr.mxu1 %v10881_v2 }
 0x37c   : > { %v3301_v33 = vadd.f32 %v3300_v40, %v3299_v8  ;;  %v3266_v8 = vmul.f32 %v10673_v39, %v10673_v39 }
 0x37e   : > { %v3303_v43 = vadd.f32 %v3302_v35, %v3301_v33  ;;  %v3267_v33 = vmul.f32 %v10675_v38, %v10675_v38  ;;  %v3324_v34 = vsel %vm269_vm4, %v3266_v8, 0.0 }
 0x380   : > { %v3305_v47 = vadd.f32 %v3304_v46, %v3303_v43  ;;  %v3268_v43 = vmul.f32 %v10677_v63, %v10677_v63  ;;  %v3326_v50 = vsel %vm269_vm4, %v3267_v33, 0.0 }
 0x382   : > { %v3307_v52 = vadd.f32 %v3306_v51, %v3305_v47  ;;  %v3269_v47 = vmul.f32 %v10679_v7, %v10679_v7  ;;  %v3328_v53 = vsel %vm269_vm4, %v3268_v43, 0.0 }
 0x384   : > { %v3309_v18 = vadd.f32 %v3308_v55, %v3307_v52  ;;  %v3270_v52 = vmul.f32 %v10681_v0, %v10681_v0 }
 0x386   : > { %v3311_v11 = vadd.f32 %v3310_v20, %v3309_v18  ;;  %v3330_v18 = vsel %vm269_vm4, %v3269_v47, 0.0  ;;  %v3332_v20 = vsel %vm269_vm4, %v3270_v52, 0.0 }
 0x388   : > { %v3313_v27 = vadd.f32 %v3312_v24, %v3311_v11 }
 0x38a   : > { %v3315_v37 = vadd.f32 %v3314_v32, %v3313_v27 }
 0x38c   : > { %v3317_v5 = vadd.f32 %v3316_v41, %v3315_v37 }
 0x38e   : > { %v3319_v1 = vadd.f32 %v3318_v28, %v3317_v5 }
 0x390   : > { %v3321_v40 = vadd.f32 %v3320_v10, %v3319_v1 }
 0x392   : > { %v3323_v35 = vadd.f32 %v3322_v36, %v3321_v40 }
 0x394   : > { %v3325_v46 = vadd.f32 %v3324_v34, %v3323_v35 }
 0x396   : > { %v3327_v51 = vadd.f32 %v3326_v50, %v3325_v46 }
 0x398   : > { %v3329_v55 = vadd.f32 %v3328_v53, %v3327_v51 }
 0x39a   : > { %v3331_v19 = vadd.f32 %v3330_v18, %v3329_v55 }
 0x39c   : > { %v3333_v11 = vadd.f32 %v3332_v20, %v3331_v19 }
 0x39e   : > { %v3334_v25 = vrot.slane %v3333_v11, 4 }
 0x3a0   : > { %v3335_v24 = vadd.f32 %v3334_v25, %v3333_v11 }
 0x3a2   : > { %v3336_v27 = vrot.slane %v3335_v24, 2 }
 0x3a4   : > { %v3337_v31 = vadd.f32 %v3336_v27, %v3335_v24 }
 0x3a6   : > { %v3338_v32 = vrot.slane %v3337_v31, 1 }
 0x3a8   : > { %v3339_v37 = vadd.f32 %v3338_v32, %v3337_v31 }
 0x3aa   : > { %v3340_v4 = vmul.f32 0.00390625, %v3339_v37 }
 0x3ac   : > { %v3341_v41 = vadd.f32 1e-05, %v3340_v4 }
 0x3ae   : > { %9366 = vrsqrt.f32 %v3341_v41 }
 0x3b8   : > { %v9367_v5 = vpop.eup %9366 }
 0x3b9   : > { %v3373_v6 = vmul.f32 %v9367_v5, %v10679_v7  ;;  %v3343_v8 = vmul.f32 %v9367_v5, %v10684_v45  ;;  %v10905_v10 = vmul.f32 %v9367_v5, %v10687_v44  ;;  %v10908_v40 = vmul.f32 %v9367_v5, %v10690_v54 }
 0x3ba   : > { %v10911_v33 = vmul.f32 %v9367_v5, %v10696_v58  ;;  %v10914_v36 = vmul.f32 %v9367_v5, %v10708_v26  ;;  %v10917_v7 = vmul.f32 %v9367_v5, %v10715_v23  ;;  %v10920_v35 = vmul.f32 %v9367_v5, %v10722_v3 }
 0x3bb   : > { %vm3405_vm7 = vcmp.gt.f32.partialorder %v3373_v6, 0.0  ;;  %v3437_v28 = vmul.f32 0.2, %v3373_v6  ;;  %v10923_v45 = vmul.f32 %v9367_v5, %v10728_v42  ;;  %v10926_v44 = vmul.f32 %v9367_v5, %v10734_v29 }
 0x3bc   : > { %v10929_v54 = vmul.f32 %v9367_v5, %v10740_v30  ;;  %v10932_v58 = vmul.f32 %v9367_v5, %v10628_v59  ;;  %v10935_v26 = vmul.f32 %v9367_v5, %v10677_v63  ;;  %v10938_v23 = vmul.f32 %v9367_v5, %v10681_v0 }
 0x3bd   : > { %v3469_v1 = vsel %vm3405_vm7, %v3373_v6, %v3437_v28  ;;  %v10941_v3 = vmul.f32 %v9367_v5, %v10631_v9  ;;  %v10944_v42 = vmul.f32 %v9367_v5, %v10634_v61  ;;  %v10947_v29 = vmul.f32 %v9367_v5, %v10637_v12 }
 0x3be   : > { %3502 = vst.msk [vmem:[#allocation3 + $0x181] sm:$0xff] %vm269_vm4, %v3469_v1  ;;  %v10950_v30 = vmul.f32 %v9367_v5, %v10640_v13  ;;  %v10953_v59 = vmul.f32 %v9367_v5, %v10643_v14  ;;  %v10956_v63 = vmul.f32 %v9367_v5, %v10646_v15  ;;  %v10959_v0 = vmul.f32 %v9367_v5, %v10649_v49 }
 0x3bf   : > { %v10962_v9 = vmul.f32 %v9367_v5, %v10652_v48  ;;  %v10965_v61 = vmul.f32 %v9367_v5, %v10655_v57  ;;  %v10968_v12 = vmul.f32 %v9367_v5, %v10658_v56  ;;  %v10971_v13 = vmul.f32 %v9367_v5, %v10661_v17 }
 0x3c0   : > { %v10974_v14 = vmul.f32 %v9367_v5, %v10663_v16  ;;  %v10977_v15 = vmul.f32 %v9367_v5, %v10665_v60  ;;  %v10980_v49 = vmul.f32 %v9367_v5, %v10667_v22  ;;  %v10983_v48 = vmul.f32 %v9367_v5, %v10669_v21 }
 0x3c1   : > { %v10986_v57 = vmul.f32 %v9367_v5, %v10671_v62  ;;  %v10989_v56 = vmul.f32 %v9367_v5, %v10673_v39  ;;  %v10992_v17 = vmul.f32 %v9367_v5, %v10675_v38  ;;  %vm3375_vm8 = vcmp.gt.f32.partialorder %v3343_v8, 0.0 }
 0x3c2   : > { %vm3376_vm9 = vcmp.gt.f32.partialorder %v10905_v10, 0.0  ;;  %vm3377_vm10 = vcmp.gt.f32.partialorder %v10908_v40, 0.0  ;;  %vm3378_vm11 = vcmp.gt.f32.partialorder %v10911_v33, 0.0  ;;  %vm3379_vm12 = vcmp.gt.f32.partialorder %v10914_v36, 0.0 }
 0x3c3   : > { %vm3380_vm13 = vcmp.gt.f32.partialorder %v10917_v7, 0.0  ;;  %vm3384_vm1 = vcmp.gt.f32.partialorder %v10929_v54, 0.0  ;;  %vm3385_vm2 = vcmp.gt.f32.partialorder %v10932_v58, 0.0  ;;  %v3407_v16 = vmul.f32 0.2, %v3343_v8 }
 0x3c4   : > { %v3408_v60 = vmul.f32 0.2, %v10905_v10  ;;  %vm3390_vm14 = vcmp.gt.f32.partialorder %v10953_v59, 0.0  ;;  %v3409_v22 = vmul.f32 0.2, %v10908_v40  ;;  %vm3395_vm3 = vcmp.gt.f32.partialorder %v10968_v12, 0.0 }
 0x3c5   : > { %v3410_v21 = vmul.f32 0.2, %v10911_v33  ;;  %v3411_v62 = vmul.f32 0.2, %v10914_v36  ;;  %vm3396_vm7 = vcmp.gt.f32.partialorder %v10971_v13, 0.0  ;;  %v3439_v34 = vsel %vm3375_vm8, %v3343_v8, %v3407_v16 }
 0x3c6   : > { %v3412_v39 = vmul.f32 0.2, %v10917_v7  ;;  %v3413_v38 = vmul.f32 0.2, %v10920_v35  ;;  %v3414_v43 = vmul.f32 0.2, %v10923_v45  ;;  %v3440_v51 = vsel %vm3376_vm9, %v10905_v10, %v3408_v60 }
 0x3c7   : > { %vm3397_vm0 = vcmp.gt.f32.partialorder %v10974_v14, 0.0  ;;  %v3415_v46 = vmul.f32 0.2, %v10926_v44  ;;  %v3416_v47 = vmul.f32 0.2, %v10929_v54  ;;  %3472 = vst.msk [vmem:[#allocation3 + $0x19] sm:$0xff] %vm269_vm4, %v3439_v34  ;;  %v3441_v18 = vsel %vm3377_vm10, %v10908_v40, %v3409_v22 }
 0x3c8   : > { %v3417_v50 = vmul.f32 0.2, %v10932_v58  ;;  %vm3401_vm8 = vcmp.gt.f32.partialorder %v10986_v57, 0.0  ;;  %vm3402_vm15 = vcmp.gt.f32.partialorder %v10989_v56, 0.0  ;;  %vm3403_vm5 = vcmp.gt.f32.partialorder %v10992_v17, 0.0  ;;  %3473 = vst.msk [vmem:[#allocation3 + $0x21] sm:$0xff] %vm269_vm4, %v3440_v51 }
 0x3c9   : > { %vm3404_vm6 = vcmp.gt.f32.partialorder %v10935_v26, 0.0  ;;  %v3418_v52 = vmul.f32 0.2, %v10941_v3  ;;  %v3419_v53 = vmul.f32 0.2, %v10944_v42  ;;  %vm3406_vm9 = vcmp.gt.f32.partialorder %v10938_v23, 0.0 }
 0x3ca   : > { %v3420_v55 = vmul.f32 0.2, %v10947_v29  ;;  %v3421_v19 = vmul.f32 0.2, %v10950_v30  ;;  %v3422_v20 = vmul.f32 0.2, %v10953_v59  ;;  %v3442_v25 = vsel %vm3378_vm11, %v10911_v33, %v3410_v21 }
 0x3cb   : > { %v3423_v11 = vmul.f32 0.2, %v10956_v63  ;;  %3474 = vst.msk [vmem:[#allocation3 + $0x31] sm:$0xff] %vm269_vm4, %v3441_v18  ;;  %v3424_v24 = vmul.f32 0.2, %v10959_v0  ;;  %v3443_v32 = vsel %vm3379_vm12, %v10914_v36, %v3411_v62  ;;  %3475 = vst.msk [vmem:[#allocation3 + $0x39] sm:$0xff] %vm269_vm4, %v3442_v25  ;;  %v3444_v5 = vsel %vm3380_vm13, %v10917_v7, %v3412_v39 }
 0x3cc   : > { %v3425_v27 = vmul.f32 0.2, %v10962_v9  ;;  %v3426_v31 = vmul.f32 0.2, %v10965_v61  ;;  %v3427_v37 = vmul.f32 0.2, %v10968_v12  ;;  %v3448_v60 = vsel %vm3384_vm1, %v10929_v54, %v3416_v47 }
 0x3cd   : > { %v3428_v4 = vmul.f32 0.2, %v10971_v13  ;;  %v3429_v41 = vmul.f32 0.2, %v10974_v14  ;;  %3476 = vst.msk [vmem:[#allocation3 + $0x49] sm:$0xff] %vm269_vm4, %v3443_v32  ;;  %vm12617_vm10 = vcmp.gt.f32.partialorder %v10920_v35, 0.0 }
 0x3ce   : > { %v3430_v6 = vmul.f32 0.2, %v10977_v15  ;;  %v3431_v28 = vmul.f32 0.2, %v10980_v49  ;;  %v3432_v1 = vmul.f32 0.2, %v10983_v48  ;;  %v3445_v8 = vsel %vm12617_vm10, %v10920_v35, %v3413_v38 }
 0x3cf   : > { %3477 = vst.msk [vmem:[#allocation3 + $0x51] sm:$0xff] %vm269_vm4, %v3444_v5  ;;  %v3433_v10 = vmul.f32 0.2, %v10986_v57  ;;  %v3434_v40 = vmul.f32 0.2, %v10989_v56  ;;  %vm12618_vm11 = vcmp.gt.f32.partialorder %v10923_v45, 0.0  ;;  %v3460_v39 = vsel %vm3396_vm7, %v10971_v13, %v3428_v4 }
 0x3d0   : > { %v3435_v33 = vmul.f32 0.2, %v10992_v17  ;;  %v3446_v36 = vsel %vm12618_vm11, %v10923_v45, %v3414_v43  ;;  %3478 = vst.msk [vmem:[#allocation3 + $0x61] sm:$0xff] %vm269_vm4, %v3445_v8  ;;  %v3436_v7 = vmul.f32 0.2, %v10935_v26  ;;  %vm12619_vm12 = vcmp.gt.f32.partialorder %v10926_v44, 0.0 }
 0x3d1   : > { %v3438_v16 = vmul.f32 0.2, %v10938_v23  ;;  %v3447_v35 = vsel %vm12619_vm12, %v10926_v44, %v3415_v46  ;;  %3479 = vst.msk [vmem:[#allocation3 + $0x69] sm:$0xff] %vm269_vm4, %v3446_v36  ;;  %v11090_v22 = vld [vmem:[#allocation3 + $0x19] sm:$0xff]  ;;  %v3449_v45 = vsel %vm3385_vm2, %v10932_v58, %v3417_v50  ;;  %vm12620_vm13 = vcmp.gt.f32.partialorder %v10941_v3, 0.0  ;;  %3481 = vst.msk [vmem:[#allocation3 + $0x81] sm:$0xff] %vm269_vm4, %v3448_v60 }
 0x3d2   : > { %v3450_v21 = vsel %vm12620_vm13, %v10941_v3, %v3418_v52  ;;  %vm12621_vm10 = vcmp.gt.f32.partialorder %v10944_v42, 0.0  ;;  %vm12622_vm11 = vcmp.gt.f32.partialorder %v10947_v29, 0.0  ;;  %3480 = vst.msk [vmem:[#allocation3 + $0x79] sm:$0xff] %vm269_vm4, %v3447_v35  ;;  %8369 = vmatprep.mubr.msk.f32.mxu1 %vm269_vm4, %v11090_v22  ;;  %v11108_v58 = vld [vmem:[#allocation3 + $0x21] sm:$0xff]  ;;  %vm12623_vm1 = vcmp.gt.f32.partialorder %v10950_v30, 0.0  ;;  %3482 = vst.msk [vmem:[#allocation3 + $0x91] sm:$0xff] %vm269_vm4, %v3449_v45 }
 0x3d3   : > { %v3451_v44 = vsel %vm12621_vm10, %v10944_v42, %v3419_v53  ;;  %v3452_v54 = vsel %vm12622_vm11, %v10947_v29, %v3420_v55  ;;  %v3453_v3 = vsel %vm12623_vm1, %v10950_v30, %v3421_v19  ;;  %v3454_v42 = vsel %vm3390_vm14, %v10953_v59, %v3422_v20  ;;  %3483 = vst.msk [vmem:[#allocation3 + $0x99] sm:$0xff] %vm269_vm4, %v3450_v21  ;;  %v11128_v30 = vld [vmem:[#allocation3 + $0x31] sm:$0xff]  ;;  %v3504_v5 = vld [vmem:[#allocation3] sm:$0xff] }
 0x3d4   : > { %vm12624_vm2 = vcmp.gt.f32.partialorder %v10956_v63, 0.0  ;;  %vm12625_vm12 = vcmp.gt.f32.partialorder %v10959_v0, 0.0  ;;  %3484 = vst.msk [vmem:[#allocation3 + $0xa9] sm:$0xff] %vm269_vm4, %v3451_v44  ;;  %3485 = vst.msk [vmem:[#allocation3 + $0xb1] sm:$0xff] %vm269_vm4, %v3452_v54  ;;  %8370 = vmatmul.mubr.msk.f32.gmra.mrb[2].mxu1 %vm269_vm4, %v11108_v58  ;;  %vm12626_vm14 = vcmp.gt.f32.partialorder %v10962_v9, 0.0  ;;  %vm12627_vm13 = vcmp.gt.f32.partialorder %v10965_v61, 0.0 }
 0x3d5   : > { %v3455_v29 = vsel %vm12624_vm2, %v10956_v63, %v3423_v11  ;;  %v3456_v62 = vsel %vm12625_vm12, %v10959_v0, %v3424_v24  ;;  %v3457_v59 = vsel %vm12626_vm14, %v10962_v9, %v3425_v27  ;;  %v3458_v63 = vsel %vm12627_vm13, %v10965_v61, %v3426_v31  ;;  %3486 = vst.msk [vmem:[#allocation3 + $0xc1] sm:$0xff] %vm269_vm4, %v3453_v3  ;;  %v11303_v8 = vld [vmem:[#allocation3 + $0x18] sm:$0xff] }
 0x3d6   : > { %v3459_v0 = vsel %vm3395_vm3, %v10968_v12, %v3427_v37  ;;  %3487 = vst.msk [vmem:[#allocation3 + $0xc9] sm:$0xff] %vm269_vm4, %v3454_v42  ;;  %3488 = vst.msk [vmem:[#allocation3 + $0xd9] sm:$0xff] %vm269_vm4, %v3455_v29  ;;  %8372 = vmatprep.mubr.msk.f32.mxu1 %vm269_vm4, %v11128_v30  ;;  %v3461_v9 = vsel %vm3397_vm0, %v10974_v14, %v3429_v41  ;;  %vm12628_vm3 = vcmp.gt.f32.partialorder %v10977_v15, 0.0  ;;  %vm12629_vm7 = vcmp.gt.f32.partialorder %v10980_v49, 0.0  ;;  %v11325_v36 = vld [vmem:[#allocation3 + $0x50] sm:$0xff] }
 0x3d7   : > { %3489 = vst.msk [vmem:[#allocation3 + $0xe1] sm:$0xff] %vm269_vm4, %v3456_v62  ;;  %v3462_v61 = vsel %vm12628_vm3, %v10977_v15, %v3430_v6  ;;  %v3463_v12 = vsel %vm12629_vm7, %v10980_v49, %v3431_v28  ;;  %vm12630_vm10 = vcmp.gt.f32.partialorder %v10983_v48, 0.0  ;;  %3490 = vst.msk [vmem:[#allocation3 + $0xf1] sm:$0xff] %vm269_vm4, %v3457_v59  ;;  %v3465_v14 = vsel %vm3401_vm8, %v10986_v57, %v3433_v10  ;;  %v11180_v57 = vld [vmem:[#allocation3 + $0x39] sm:$0xff]  ;;  %v3505_v28 = vld [vmem:[#allocation3 + $0x8] sm:$0xff] }
 0x3d8   : > { %v3464_v13 = vsel %vm12630_vm10, %v10983_v48, %v3432_v1  ;;  %3491 = vst.msk [vmem:[#allocation3 + $0xf9] sm:$0xff] %vm269_vm4, %v3458_v63  ;;  %3492 = vst.msk [vmem:[#allocation3 + $0x109] sm:$0xff] %vm269_vm4, %v3459_v0  ;;  %v3466_v15 = vsel %vm3402_vm15, %v10989_v56, %v3434_v40  ;;  %v3467_v49 = vsel %vm3403_vm5, %v10992_v17, %v3435_v33  ;;  %8373 = vmatmul.mubr.msk.f32.gmra.mrb[4].mxu1 %vm269_vm4, %v11180_v57  ;;  %v11196_v17 = vld [vmem:[#allocation3 + $0x51] sm:$0xff]  ;;  %v11204_v38 = vld [vmem:[#allocation3 + $0x69] sm:$0xff] }
 0x3d9   : > { %3493 = vst.msk [vmem:[#allocation3 + $0x111] sm:$0xff] %vm269_vm4, %v3460_v39  ;;  %v3468_v48 = vsel %vm3404_vm6, %v10935_v26, %v3436_v7  ;;  %3494 = vst.msk [vmem:[#allocation3 + $0x121] sm:$0xff] %vm269_vm4, %v3461_v9  ;;  %v3470_v56 = vsel %vm3406_vm9, %v10938_v23, %v3438_v16  ;;  %v11191_v26 = vld [vmem:[#allocation3 + $0x49] sm:$0xff]  ;;  %v11200_v23 = vld [vmem:[#allocation3 + $0x61] sm:$0xff] }
 0x3da   : > { %3495 = vst.msk [vmem:[#allocation3 + $0x129] sm:$0xff] %vm269_vm4, %v3462_v61  ;;  %3496 = vst.msk [vmem:[#allocation3 + $0x139] sm:$0xff] %vm269_vm4, %v3463_v12  ;;  %8375 = vmatprep.mubr.msk.f32.mxu1 %vm269_vm4, %v11191_v26  ;;  %v11208_v43 = vld [vmem:[#allocation3 + $0x79] sm:$0xff]  ;;  %v11212_v34 = vld [vmem:[#allocation3 + $0x81] sm:$0xff] }
 0x3db   : > { %3497 = vst.msk [vmem:[#allocation3 + $0x141] sm:$0xff] %vm269_vm4, %v3464_v13  ;;  %3498 = vst.msk [vmem:[#allocation3 + $0x151] sm:$0xff] %vm269_vm4, %v3465_v14  ;;  %v11216_v46 = vld [vmem:[#allocation3 + $0x91] sm:$0xff]  ;;  %v11220_v47 = vld [vmem:[#allocation3 + $0x99] sm:$0xff] }
 0x3dc   : > { %3499 = vst.msk [vmem:[#allocation3 + $0x159] sm:$0xff] %vm269_vm4, %v3466_v15  ;;  %3500 = vst.msk [vmem:[#allocation3 + $0x169] sm:$0xff] %vm269_vm4, %v3467_v49  ;;  %8376 = vmatmul.mubr.msk.f32.gmra.mrb[6].mxu1 %vm269_vm4, %v11196_v17  ;;  %v11224_v50 = vld [vmem:[#allocation3 + $0xa9] sm:$0xff]  ;;  %v11228_v51 = vld [vmem:[#allocation3 + $0xb1] sm:$0xff] }
 0x3dd   : > { %3501 = vst.msk [vmem:[#allocation3 + $0x171] sm:$0xff] %vm269_vm4, %v3468_v48  ;;  %3503 = vst.msk [vmem:[#allocation3 + $0x189] sm:$0xff] %vm269_vm4, %v3470_v56  ;;  %8378 = vmatprep.mubr.msk.f32.mxu1 %vm269_vm4, %v11200_v23  ;;  %v11232_v52 = vld [vmem:[#allocation3 + $0xc1] sm:$0xff]  ;;  %v11236_v53 = vld [vmem:[#allocation3 + $0xc9] sm:$0xff] }
 0x3de   : > { %v11240_v55 = vld [vmem:[#allocation3 + $0xd9] sm:$0xff]  ;;  %v11244_v18 = vld [vmem:[#allocation3 + $0xe1] sm:$0xff]  ;;  %v11248_v19 = vld [vmem:[#allocation3 + $0xf1] sm:$0xff] }
 0x3df   : > { %v11252_v20 = vld [vmem:[#allocation3 + $0xf9] sm:$0xff]  ;;  %v11256_v11 = vld [vmem:[#allocation3 + $0x109] sm:$0xff] }
 0x3e0   : > { %8379 = vmatmul.mubr.msk.f32.gmra.mrb[8].mxu1 %vm269_vm4, %v11204_v38  ;;  %v11260_v25 = vld [vmem:[#allocation3 + $0x111] sm:$0xff]  ;;  %v11264_v24 = vld [vmem:[#allocation3 + $0x121] sm:$0xff] }
 0x3e1   : > { %8381 = vmatprep.mubr.msk.f32.mxu1 %vm269_vm4, %v11208_v43  ;;  %v11268_v27 = vld [vmem:[#allocation3 + $0x129] sm:$0xff]  ;;  %v11272_v31 = vld [vmem:[#allocation3 + $0x139] sm:$0xff] }
 0x3e2   : > { %12631 = vst [vmem:[#allocation14_spill] sm:$0xff] %v11268_v27  ;;  %12632 = vst [vmem:[#allocation28_spill] sm:$0xff] %v11272_v31  ;;  %v11276_v32 = vld [vmem:[#allocation3 + $0x141] sm:$0xff]  ;;  %v11280_v37 = vld [vmem:[#allocation3 + $0x151] sm:$0xff] }
 0x3e3   : > { %12633 = vst [vmem:[#allocation30_spill] sm:$0xff] %v11276_v32  ;;  %12634 = vst [vmem:[#allocation33_spill] sm:$0xff] %v11280_v37  ;;  %v11284_v4 = vld [vmem:[#allocation3 + $0x159] sm:$0xff]  ;;  %v11288_v41 = vld [vmem:[#allocation3 + $0x169] sm:$0xff] }
 0x3e4   : > { %8382 = vmatmul.mubr.msk.f32.gmra.mrb[10].mxu1 %vm269_vm4, %v11212_v34  ;;  %12635 = vst [vmem:[#allocation35_spill] sm:$0xff] %v11284_v4  ;;  %12636 = vst [vmem:[#allocation37_spill] sm:$0xff] %v11288_v41  ;;  %v11292_v6 = vld [vmem:[#allocation3 + $0x171] sm:$0xff]  ;;  %v11300_v1 = vld [vmem:[%s12390_s3 + $0x18] sm:$0xff] }
 0x3e5   : > { %8384 = vmatprep.mubr.msk.f32.mxu1 %vm269_vm4, %v11216_v46  ;;  %12637 = vst [vmem:[#allocation38_spill] sm:$0xff] %v11292_v6  ;;  %v11309_v10 = vld [vmem:[#allocation3 + $0x20] sm:$0xff]  ;;  %v11313_v40 = vld [vmem:[#allocation3 + $0x30] sm:$0xff]  ;;  %v11317_v33 = vld [vmem:[#allocation3 + $0x38] sm:$0xff] }
 0x3e6   : > { %v11329_v7 = vld [vmem:[#allocation3 + $0x60] sm:$0xff]  ;;  %v11333_v16 = vld [vmem:[#allocation3 + $0x68] sm:$0xff]  ;;  %v11337_v35 = vld [vmem:[#allocation3 + $0x78] sm:$0xff] }
 0x3e7   : > { %v11341_v60 = vld [vmem:[#allocation3 + $0x80] sm:$0xff]  ;;  %v11345_v45 = vld [vmem:[#allocation3 + $0x90] sm:$0xff]  ;;  %v11349_v21 = vld [vmem:[#allocation3 + $0x98] sm:$0xff] }
 0x3e8   : > { %8385 = vmatmul.mubr.msk.f32.gmra.mrb[12].mxu1 %vm269_vm4, %v11220_v47  ;;  %v11353_v44 = vld [vmem:[#allocation3 + $0xa8] sm:$0xff]  ;;  %v11357_v54 = vld [vmem:[#allocation3 + $0xb0] sm:$0xff]  ;;  %v11361_v3 = vld [vmem:[#allocation3 + $0xc0] sm:$0xff] }
 0x3e9   : > { %8387 = vmatprep.mubr.msk.f32.mxu1 %vm269_vm4, %v11224_v50  ;;  %v11365_v42 = vld [vmem:[#allocation3 + $0xc8] sm:$0xff]  ;;  %v11369_v29 = vld [vmem:[#allocation3 + $0xd8] sm:$0xff]  ;;  %v11373_v62 = vld [vmem:[#allocation3 + $0xe0] sm:$0xff] }
 0x3ea   : > { %v11377_v59 = vld [vmem:[#allocation3 + $0xf0] sm:$0xff]  ;;  %v11381_v63 = vld [vmem:[#allocation3 + $0xf8] sm:$0xff]  ;;  %v11385_v0 = vld [vmem:[#allocation3 + $0x108] sm:$0xff] }
 0x3eb   : > { %v11389_v39 = vld [vmem:[#allocation3 + $0x110] sm:$0xff]  ;;  %v11393_v9 = vld [vmem:[#allocation3 + $0x120] sm:$0xff]  ;;  %v11397_v61 = vld [vmem:[#allocation3 + $0x128] sm:$0xff] }
 0x3ec   : > { %8388 = vmatmul.mubr.msk.f32.gmra.mrb[14].mxu1 %vm269_vm4, %v11228_v51  ;;  %v11401_v12 = vld [vmem:[#allocation3 + $0x138] sm:$0xff]  ;;  %v11405_v13 = vld [vmem:[#allocation3 + $0x140] sm:$0xff]  ;;  %v11409_v14 = vld [vmem:[#allocation3 + $0x150] sm:$0xff] }
 0x3ed   : > { %8390 = vmatprep.mubr.msk.f32.mxu1 %vm269_vm4, %v11232_v52  ;;  %v11413_v15 = vld [vmem:[#allocation3 + $0x158] sm:$0xff]  ;;  %v11417_v49 = vld [vmem:[#allocation3 + $0x168] sm:$0xff]  ;;  %v11421_v56 = vld [vmem:[#allocation3 + $0x170] sm:$0xff] }
 0x3ee   : > { %v3576_v48 = vld [vmem:[#allocation3 + $0x2] sm:$0xff] }
 0x3f0   : > { %8391 = vmatmul.mubr.msk.f32.gmra.mrb[16].mxu1 %vm269_vm4, %v11236_v53 }
 0x3f1   : > { %8393 = vmatprep.mubr.msk.f32.mxu1 %vm269_vm4, %v11240_v55 }
 0x3f4   : > { %8394 = vmatmul.mubr.msk.f32.gmra.mrb[18].mxu1 %vm269_vm4, %v11244_v18 }
 0x3f5   : > { %8396 = vmatprep.mubr.msk.f32.mxu1 %vm269_vm4, %v11248_v19 }
 0x3f8   : > { %8397 = vmatmul.mubr.msk.f32.gmra.mrb[20].mxu1 %vm269_vm4, %v11252_v20 }
 0x3f9   : > { %8399 = vmatprep.mubr.msk.f32.mxu1 %vm269_vm4, %v11256_v11 }
 0x3fc   : > { %8400 = vmatmul.mubr.msk.f32.gmra.mrb[22].mxu1 %vm269_vm4, %v11260_v25 }
 0x3fd   : > { %8402 = vmatprep.mubr.msk.f32.mxu1 %vm269_vm4, %v11264_v24 }
 0x400   : > { %8403 = vmatmul.mubr.msk.f32.gmra.mrb[24].mxu1 %vm269_vm4, %v11268_v27 }
 0x401   : > { %8405 = vmatprep.mubr.msk.f32.mxu1 %vm269_vm4, %v11272_v31 }
 0x404   : > { %8406 = vmatmul.mubr.msk.f32.gmra.mrb[26].mxu1 %vm269_vm4, %v11276_v32 }
 0x405   : > { %8408 = vmatprep.mubr.msk.f32.mxu1 %vm269_vm4, %v11280_v37 }
 0x408   : > { %8409 = vmatmul.mubr.msk.f32.gmra.mrb[28].mxu1 %vm269_vm4, %v11284_v4 }
 0x409   : > { %8411 = vmatprep.mubr.msk.f32.mxu1 %vm269_vm4, %v11288_v41  ;;  %v11438_v41 = vld [vmem:[#allocation3 + $0x22] sm:$0xff] }
 0x40a   : > { %12639 = vst [vmem:[#allocation8_spill] sm:$0xff] %v11438_v41 }
 0x40c   : > { %8412 = vmatmul.mubr.msk.f32.gmra.mrb[30].mxu1 %vm269_vm4, %v11292_v6  ;;  %v11432_v6 = vld [vmem:[#allocation3 + $0x1a] sm:$0xff] }
 0x40d   : > { %8416 = vmatprep.mubr.msk.f32.mxu1 %vm269_vm4, %v3504_v5  ;;  %v3577_v5 = vld [vmem:[#allocation3 + $0xa] sm:$0xff]  ;;  %12638 = vst [vmem:[#allocation7_spill] sm:$0xff] %v11432_v6 }
 0x410   : > { %8417 = vmatmul.mubr.msk.f32.vlgmr.msra.gmra.mrb[0].mxu1 %vm269_vm4, %v3505_v28  ;;  %v11429_v28 = vld [vmem:[%s12390_s3 + $0x20] sm:$0xff] }
 0x411   : > { %8465 = vmatpush3.msra.mxu1 %v10881_v2  ;;  %8419 = vmatprep.mubr.msk.f32.mxu1 %vm269_vm4, %v11303_v8  ;;  %v11321_v2 = vld [vmem:[#allocation3 + $0x48] sm:$0xff] }
 0x412   : > { %8514 = vmatprep.subr.mxu1 %v11300_v1 }
 0x414   : > { %8420 = vmatmul.mubr.msk.f32.gmra.mrb[2].mxu1 %vm269_vm4, %v11309_v10 }
 0x415   : > { %8422 = vmatprep.mubr.msk.f32.mxu1 %vm269_vm4, %v11313_v40 }
 0x418   : > { %8423 = vmatmul.mubr.msk.f32.gmra.mrb[4].mxu1 %vm269_vm4, %v11317_v33 }
 0x419   : > { %8425 = vmatprep.mubr.msk.f32.mxu1 %vm269_vm4, %v11321_v2 }
 0x41c   : > { %8426 = vmatmul.mubr.msk.f32.gmra.mrb[6].mxu1 %vm269_vm4, %v11325_v36 }
 0x41d   : > { %8428 = vmatprep.mubr.msk.f32.mxu1 %vm269_vm4, %v11329_v7 }
 0x420   : > { %8429 = vmatmul.mubr.msk.f32.gmra.mrb[8].mxu1 %vm269_vm4, %v11333_v16 }
 0x421   : > { %8431 = vmatprep.mubr.msk.f32.mxu1 %vm269_vm4, %v11337_v35 }
 0x424   : > { %8432 = vmatmul.mubr.msk.f32.gmra.mrb[10].mxu1 %vm269_vm4, %v11341_v60 }
 0x425   : > { %8434 = vmatprep.mubr.msk.f32.mxu1 %vm269_vm4, %v11345_v45 }
 0x428   : > { %8435 = vmatmul.mubr.msk.f32.gmra.mrb[12].mxu1 %vm269_vm4, %v11349_v21 }
 0x429   : > { %8437 = vmatprep.mubr.msk.f32.mxu1 %vm269_vm4, %v11353_v44 }
 0x42c   : > { %8438 = vmatmul.mubr.msk.f32.gmra.mrb[14].mxu1 %vm269_vm4, %v11357_v54 }
 0x42d   : > { %8440 = vmatprep.mubr.msk.f32.mxu1 %vm269_vm4, %v11361_v3 }
 0x430   : > { %8441 = vmatmul.mubr.msk.f32.gmra.mrb[16].mxu1 %vm269_vm4, %v11365_v42 }
 0x431   : > { %8443 = vmatprep.mubr.msk.f32.mxu1 %vm269_vm4, %v11369_v29 }
 0x434   : > { %8444 = vmatmul.mubr.msk.f32.gmra.mrb[18].mxu1 %vm269_vm4, %v11373_v62 }
 0x435   : > { %8446 = vmatprep.mubr.msk.f32.mxu1 %vm269_vm4, %v11377_v59 }
 0x438   : > { %8447 = vmatmul.mubr.msk.f32.gmra.mrb[20].mxu1 %vm269_vm4, %v11381_v63 }
 0x439   : > { %8449 = vmatprep.mubr.msk.f32.mxu1 %vm269_vm4, %v11385_v0 }
 0x43c   : > { %8450 = vmatmul.mubr.msk.f32.gmra.mrb[22].mxu1 %vm269_vm4, %v11389_v39 }
 0x43d   : > { %8452 = vmatprep.mubr.msk.f32.mxu1 %vm269_vm4, %v11393_v9 }
 0x440   : > { %8453 = vmatmul.mubr.msk.f32.gmra.mrb[24].mxu1 %vm269_vm4, %v11397_v61 }
 0x441   : > { %8455 = vmatprep.mubr.msk.f32.mxu1 %vm269_vm4, %v11401_v12 }
 0x444   : > { %8456 = vmatmul.mubr.msk.f32.gmra.mrb[26].mxu1 %vm269_vm4, %v11405_v13 }
 0x445   : > { %8458 = vmatprep.mubr.msk.f32.mxu1 %vm269_vm4, %v11409_v14 }
 0x448   : > { %8459 = vmatmul.mubr.msk.f32.gmra.mrb[28].mxu1 %vm269_vm4, %v11413_v15 }
 0x449   : > { %8461 = vmatprep.mubr.msk.f32.mxu1 %vm269_vm4, %v11417_v49 }
 0x44c   : > { %8462 = vmatmul.mubr.msk.f32.gmra.mrb[30].mxu1 %vm269_vm4, %v11421_v56 }
 0x44d   : > { %8466 = vmatprep.mubr.msk.f32.mxu1 %vm269_vm4, %v3576_v48  ;;  %v11442_v48 = vld [vmem:[#allocation3 + $0x32] sm:$0xff] }
 0x44e   : > { %12640 = vst [vmem:[#allocation9_spill] sm:$0xff] %v11442_v48 }
 0x450   : > { %8467 = vmatmul.mubr.msk.f32.vlgmr.msra.gmra.mrb[0].mxu1 %vm269_vm4, %v3577_v5  ;;  %v11446_v5 = vld [vmem:[#allocation3 + $0x3a] sm:$0xff] }
 0x451   : > { %8515 = vmatpush3.msra.mxu1 %v11300_v1  ;;  %8469 = vmatprep.mubr.msk.f32.mxu1 %vm269_vm4, %v11432_v6  ;;  %12641 = vst [vmem:[#allocation10_spill] sm:$0xff] %v11446_v5  ;;  %v11450_v1 = vld [vmem:[#allocation3 + $0x4a] sm:$0xff]  ;;  %v11454_v6 = vld [vmem:[#allocation3 + $0x52] sm:$0xff] }
 0x452   : > { %8564 = vmatprep.subr.mxu1 %v11429_v28  ;;  %12642 = vst [vmem:[#allocation11_spill] sm:$0xff] %v11450_v1  ;;  %12643 = vst [vmem:[#allocation12_spill] sm:$0xff] %v11454_v6 }
 0x454   : > { %8470 = vmatmul.mubr.msk.f32.gmra.mrb[2].mxu1 %vm269_vm4, %v11438_v41  ;;  %v11458_v41 = vld [vmem:[#allocation3 + $0x62] sm:$0xff] }
 0x455   : > { %8472 = vmatprep.mubr.msk.f32.mxu1 %vm269_vm4, %v11442_v48  ;;  %12644 = vst [vmem:[#allocation13_spill] sm:$0xff] %v11458_v41  ;;  %v11462_v48 = vld [vmem:[#allocation3 + $0x6a] sm:$0xff] }
 0x456   : > { %12645 = vst [vmem:[#allocation40_spill] sm:$0xff] %v11462_v48 }
 0x458   : > { %8473 = vmatmul.mubr.msk.f32.gmra.mrb[4].mxu1 %vm269_vm4, %v11446_v5  ;;  %v11466_v5 = vld [vmem:[#allocation3 + $0x7a] sm:$0xff] }
 0x459   : > { %8475 = vmatprep.mubr.msk.f32.mxu1 %vm269_vm4, %v11450_v1  ;;  %12646 = vst [vmem:[#allocation41_spill] sm:$0xff] %v11466_v5  ;;  %v11470_v1 = vld [vmem:[#allocation3 + $0x82] sm:$0xff] }
 0x45a   : > { %12647 = vst [vmem:[#allocation15_spill] sm:$0xff] %v11470_v1 }
 0x45c   : > { %8476 = vmatmul.mubr.msk.f32.gmra.mrb[6].mxu1 %vm269_vm4, %v11454_v6  ;;  %v11474_v6 = vld [vmem:[#allocation3 + $0x92] sm:$0xff] }
 0x45d   : > { %8478 = vmatprep.mubr.msk.f32.mxu1 %vm269_vm4, %v11458_v41  ;;  %12648 = vst [vmem:[#allocation16_spill] sm:$0xff] %v11474_v6  ;;  %v11478_v41 = vld [vmem:[#allocation3 + $0x9a] sm:$0xff] }
 0x45e   : > { %12649 = vst [vmem:[#allocation17_spill] sm:$0xff] %v11478_v41 }
 0x460   : > { %8479 = vmatmul.mubr.msk.f32.gmra.mrb[8].mxu1 %vm269_vm4, %v11462_v48  ;;  %v11482_v48 = vld [vmem:[#allocation3 + $0xaa] sm:$0xff] }
 0x461   : > { %8481 = vmatprep.mubr.msk.f32.mxu1 %vm269_vm4, %v11466_v5  ;;  %12650 = vst [vmem:[#allocation18_spill] sm:$0xff] %v11482_v48  ;;  %v11486_v5 = vld [vmem:[#allocation3 + $0xb2] sm:$0xff] }
 0x462   : > { %12651 = vst [vmem:[#allocation19_spill] sm:$0xff] %v11486_v5 }
 0x464   : > { %8482 = vmatmul.mubr.msk.f32.gmra.mrb[10].mxu1 %vm269_vm4, %v11470_v1  ;;  %v11490_v1 = vld [vmem:[#allocation3 + $0xc2] sm:$0xff] }
 0x465   : > { %8484 = vmatprep.mubr.msk.f32.mxu1 %vm269_vm4, %v11474_v6  ;;  %12652 = vst [vmem:[#allocation20_spill] sm:$0xff] %v11490_v1  ;;  %v11494_v6 = vld [vmem:[#allocation3 + $0xca] sm:$0xff] }
 0x466   : > { %12653 = vst [vmem:[#allocation21_spill] sm:$0xff] %v11494_v6 }
 0x468   : > { %8485 = vmatmul.mubr.msk.f32.gmra.mrb[12].mxu1 %vm269_vm4, %v11478_v41  ;;  %v11498_v41 = vld [vmem:[#allocation3 + $0xda] sm:$0xff] }
 0x469   : > { %8487 = vmatprep.mubr.msk.f32.mxu1 %vm269_vm4, %v11482_v48  ;;  %12654 = vst [vmem:[#allocation22_spill] sm:$0xff] %v11498_v41  ;;  %v11502_v48 = vld [vmem:[#allocation3 + $0xe2] sm:$0xff] }
 0x46a   : > { %12655 = vst [vmem:[#allocation23_spill] sm:$0xff] %v11502_v48 }
 0x46c   : > { %8488 = vmatmul.mubr.msk.f32.gmra.mrb[14].mxu1 %vm269_vm4, %v11486_v5  ;;  %v11506_v5 = vld [vmem:[#allocation3 + $0xf2] sm:$0xff] }
 0x46d   : > { %8490 = vmatprep.mubr.msk.f32.mxu1 %vm269_vm4, %v11490_v1  ;;  %12656 = vst [vmem:[#allocation24_spill] sm:$0xff] %v11506_v5  ;;  %v11510_v1 = vld [vmem:[#allocation3 + $0xfa] sm:$0xff] }
 0x46e   : > { %12657 = vst [vmem:[#allocation25_spill] sm:$0xff] %v11510_v1 }
 0x470   : > { %8491 = vmatmul.mubr.msk.f32.gmra.mrb[16].mxu1 %vm269_vm4, %v11494_v6  ;;  %v11514_v6 = vld [vmem:[#allocation3 + $0x10a] sm:$0xff] }
 0x471   : > { %8493 = vmatprep.mubr.msk.f32.mxu1 %vm269_vm4, %v11498_v41  ;;  %12658 = vst [vmem:[#allocation26_spill] sm:$0xff] %v11514_v6  ;;  %v11518_v41 = vld [vmem:[#allocation3 + $0x112] sm:$0xff] }
 0x472   : > { %12659 = vst [vmem:[#allocation27_spill] sm:$0xff] %v11518_v41 }
 0x474   : > { %8494 = vmatmul.mubr.msk.f32.gmra.mrb[18].mxu1 %vm269_vm4, %v11502_v48  ;;  %v11522_v48 = vld [vmem:[#allocation3 + $0x122] sm:$0xff] }
 0x475   : > { %8496 = vmatprep.mubr.msk.f32.mxu1 %vm269_vm4, %v11506_v5  ;;  %12660 = vst [vmem:[#allocation29_spill] sm:$0xff] %v11522_v48  ;;  %v11526_v5 = vld [vmem:[#allocation3 + $0x12a] sm:$0xff] }
 0x476   : > { %12661 = vst [vmem:[#allocation31_spill] sm:$0xff] %v11526_v5 }
 0x478   : > { %8497 = vmatmul.mubr.msk.f32.gmra.mrb[20].mxu1 %vm269_vm4, %v11510_v1  ;;  %v11530_v1 = vld [vmem:[#allocation3 + $0x13a] sm:$0xff] }
 0x479   : > { %8499 = vmatprep.mubr.msk.f32.mxu1 %vm269_vm4, %v11514_v6  ;;  %12662 = vst [vmem:[#allocation32_spill] sm:$0xff] %v11530_v1  ;;  %v11534_v6 = vld [vmem:[#allocation3 + $0x142] sm:$0xff] }
 0x47c   : > { %8500 = vmatmul.mubr.msk.f32.gmra.mrb[22].mxu1 %vm269_vm4, %v11518_v41  ;;  %v11538_v41 = vld [vmem:[#allocation3 + $0x152] sm:$0xff] }
 0x47d   : > { %8502 = vmatprep.mubr.msk.f32.mxu1 %vm269_vm4, %v11522_v48  ;;  %12663 = vst [vmem:[#allocation34_spill] sm:$0xff] %v11538_v41  ;;  %v11542_v48 = vld [vmem:[#allocation3 + $0x15a] sm:$0xff] }
 0x480   : > { %8503 = vmatmul.mubr.msk.f32.gmra.mrb[24].mxu1 %vm269_vm4, %v11526_v5  ;;  %v11546_v5 = vld [vmem:[#allocation3 + $0x16a] sm:$0xff] }
 0x481   : > { %8505 = vmatprep.mubr.msk.f32.mxu1 %vm269_vm4, %v11530_v1  ;;  %12664 = vst [vmem:[#allocation36_spill] sm:$0xff] %v11546_v5  ;;  %v11550_v1 = vld [vmem:[#allocation3 + $0x172] sm:$0xff] }
 0x484   : > { %8506 = vmatmul.mubr.msk.f32.gmra.mrb[26].mxu1 %vm269_vm4, %v11534_v6 }
 0x485   : > { %8508 = vmatprep.mubr.msk.f32.mxu1 %vm269_vm4, %v11538_v41  ;;  %v7116_v41 = vld [vmem:[%s12390_s3 + $0x28] sm:$0xff] }
 0x488   : > { %8509 = vmatmul.mubr.msk.f32.gmra.mrb[28].mxu1 %vm269_vm4, %v11542_v48 }
 0x489   : > { %8511 = vmatprep.mubr.msk.f32.mxu1 %vm269_vm4, %v11546_v5 }
 0x48c   : > { %8512 = vmatmul.mubr.msk.f32.gmra.mrb[30].mxu1 %vm269_vm4, %v11550_v1 }
 0x48d   : > { %8516 = vmatprep.mubr.msk.f32.mxu1 %vm269_vm4, %v11303_v8  ;;  %v11618_v8 = vld [vmem:[#allocation3 + $0x180] sm:$0xff] }
 0x490   : > { %8517 = vmatmul.mubr.msk.f32.vlgmr.msra.gmra.mrb[0].mxu1 %vm269_vm4, %v11309_v10  ;;  %v11622_v10 = vld [vmem:[#allocation3 + $0x188] sm:$0xff] }
 0x491   : > { %8565 = vmatpush3.msra.mxu1 %v11429_v28  ;;  %8519 = vmatprep.mubr.msk.f32.mxu1 %vm269_vm4, %v11313_v40  ;;  %v7213_v28 = vld [vmem:[%s12390_s3 + $0x30] sm:$0xff] }
 0x492   : > { %8614 = vmatprep.subr.mxu1 %v7116_v41 }
 0x494   : > { %8520 = vmatmul.mubr.msk.f32.gmra.mrb[2].mxu1 %vm269_vm4, %v11317_v33 }
 0x495   : > { %8522 = vmatprep.mubr.msk.f32.mxu1 %vm269_vm4, %v11321_v2 }
 0x498   : > { %8523 = vmatmul.mubr.msk.f32.gmra.mrb[4].mxu1 %vm269_vm4, %v11325_v36 }
 0x499   : > { %8525 = vmatprep.mubr.msk.f32.mxu1 %vm269_vm4, %v11329_v7 }
 0x49c   : > { %8526 = vmatmul.mubr.msk.f32.gmra.mrb[6].mxu1 %vm269_vm4, %v11333_v16 }
 0x49d   : > { %8528 = vmatprep.mubr.msk.f32.mxu1 %vm269_vm4, %v11337_v35 }
 0x4a0   : > { %8529 = vmatmul.mubr.msk.f32.gmra.mrb[8].mxu1 %vm269_vm4, %v11341_v60 }
 0x4a1   : > { %8531 = vmatprep.mubr.msk.f32.mxu1 %vm269_vm4, %v11345_v45 }
 0x4a4   : > { %8532 = vmatmul.mubr.msk.f32.gmra.mrb[10].mxu1 %vm269_vm4, %v11349_v21 }
 0x4a5   : > { %8534 = vmatprep.mubr.msk.f32.mxu1 %vm269_vm4, %v11353_v44 }
 0x4a8   : > { %8535 = vmatmul.mubr.msk.f32.gmra.mrb[12].mxu1 %vm269_vm4, %v11357_v54 }
 0x4a9   : > { %8537 = vmatprep.mubr.msk.f32.mxu1 %vm269_vm4, %v11361_v3 }
 0x4ac   : > { %8538 = vmatmul.mubr.msk.f32.gmra.mrb[14].mxu1 %vm269_vm4, %v11365_v42 }
 0x4ad   : > { %8540 = vmatprep.mubr.msk.f32.mxu1 %vm269_vm4, %v11369_v29 }
 0x4b0   : > { %8541 = vmatmul.mubr.msk.f32.gmra.mrb[16].mxu1 %vm269_vm4, %v11373_v62 }
 0x4b1   : > { %8543 = vmatprep.mubr.msk.f32.mxu1 %vm269_vm4, %v11377_v59 }
 0x4b4   : > { %8544 = vmatmul.mubr.msk.f32.gmra.mrb[18].mxu1 %vm269_vm4, %v11381_v63 }
 0x4b5   : > { %8546 = vmatprep.mubr.msk.f32.mxu1 %vm269_vm4, %v11385_v0 }
 0x4b8   : > { %8547 = vmatmul.mubr.msk.f32.gmra.mrb[20].mxu1 %vm269_vm4, %v11389_v39 }
 0x4b9   : > { %8549 = vmatprep.mubr.msk.f32.mxu1 %vm269_vm4, %v11393_v9 }
 0x4bc   : > { %8550 = vmatmul.mubr.msk.f32.gmra.mrb[22].mxu1 %vm269_vm4, %v11397_v61 }
 0x4bd   : > { %8552 = vmatprep.mubr.msk.f32.mxu1 %vm269_vm4, %v11401_v12 }
 0x4c0   : > { %8553 = vmatmul.mubr.msk.f32.gmra.mrb[24].mxu1 %vm269_vm4, %v11405_v13 }
 0x4c1   : > { %8555 = vmatprep.mubr.msk.f32.mxu1 %vm269_vm4, %v11409_v14 }
 0x4c4   : > { %8556 = vmatmul.mubr.msk.f32.gmra.mrb[26].mxu1 %vm269_vm4, %v11413_v15 }
 0x4c5   : > { %8558 = vmatprep.mubr.msk.f32.mxu1 %vm269_vm4, %v11417_v49 }
 0x4c8   : > { %8559 = vmatmul.mubr.msk.f32.gmra.mrb[28].mxu1 %vm269_vm4, %v11421_v56 }
 0x4c9   : > { %8561 = vmatprep.mubr.msk.f32.mxu1 %vm269_vm4, %v11618_v8 }
 0x4cc   : > { %8562 = vmatmul.mubr.msk.f32.gmra.mrb[30].mxu1 %vm269_vm4, %v11622_v10 }
 0x4cd   : > { %8566 = vmatprep.mubr.msk.f32.mxu1 %vm269_vm4, %v11090_v22  ;;  %v12665_v22 = vld [vmem:[#allocation37_spill] sm:$0xff] }
 0x4d0   : > { %8567 = vmatmul.mubr.msk.f32.vlgmr.msra.gmra.mrb[0].mxu1 %vm269_vm4, %v11108_v58  ;;  %v12666_v58 = vld [vmem:[#allocation38_spill] sm:$0xff] }
 0x4d1   : > { %8615 = vmatpush3.msra.mxu1 %v7116_v41  ;;  %8569 = vmatprep.mubr.msk.f32.mxu1 %vm269_vm4, %v11128_v30  ;;  %v11689_v41 = vld [vmem:[#allocation3 + $0x181] sm:$0xff] }
 0x4d2   : > { %8664 = vmatprep.subr.mxu1 %v7213_v28  ;;  %12667 = vst [vmem:[#allocation39_spill] sm:$0xff] %v11689_v41 }
 0x4d4   : > { %8570 = vmatmul.mubr.msk.f32.gmra.mrb[2].mxu1 %vm269_vm4, %v11180_v57 }
 0x4d5   : > { %8572 = vmatprep.mubr.msk.f32.mxu1 %vm269_vm4, %v11191_v26 }
 0x4d8   : > { %8573 = vmatmul.mubr.msk.f32.gmra.mrb[4].mxu1 %vm269_vm4, %v11196_v17 }
 0x4d9   : > { %8575 = vmatprep.mubr.msk.f32.mxu1 %vm269_vm4, %v11200_v23 }
 0x4dc   : > { %8576 = vmatmul.mubr.msk.f32.gmra.mrb[6].mxu1 %vm269_vm4, %v11204_v38 }
 0x4dd   : > { %8578 = vmatprep.mubr.msk.f32.mxu1 %vm269_vm4, %v11208_v43 }
 0x4e0   : > { %8579 = vmatmul.mubr.msk.f32.gmra.mrb[8].mxu1 %vm269_vm4, %v11212_v34 }
 0x4e1   : > { %8581 = vmatprep.mubr.msk.f32.mxu1 %vm269_vm4, %v11216_v46 }
 0x4e4   : > { %8582 = vmatmul.mubr.msk.f32.gmra.mrb[10].mxu1 %vm269_vm4, %v11220_v47 }
 0x4e5   : > { %8584 = vmatprep.mubr.msk.f32.mxu1 %vm269_vm4, %v11224_v50 }
 0x4e8   : > { %8585 = vmatmul.mubr.msk.f32.gmra.mrb[12].mxu1 %vm269_vm4, %v11228_v51 }
 0x4e9   : > { %8587 = vmatprep.mubr.msk.f32.mxu1 %vm269_vm4, %v11232_v52 }
 0x4ec   : > { %8588 = vmatmul.mubr.msk.f32.gmra.mrb[14].mxu1 %vm269_vm4, %v11236_v53 }
 0x4ed   : > { %8590 = vmatprep.mubr.msk.f32.mxu1 %vm269_vm4, %v11240_v55 }
 0x4f0   : > { %8591 = vmatmul.mubr.msk.f32.gmra.mrb[16].mxu1 %vm269_vm4, %v11244_v18 }
 0x4f1   : > { %8593 = vmatprep.mubr.msk.f32.mxu1 %vm269_vm4, %v11248_v19 }
 0x4f4   : > { %8594 = vmatmul.mubr.msk.f32.gmra.mrb[18].mxu1 %vm269_vm4, %v11252_v20 }
 0x4f5   : > { %8596 = vmatprep.mubr.msk.f32.mxu1 %vm269_vm4, %v11256_v11 }
 0x4f8   : > { %8597 = vmatmul.mubr.msk.f32.gmra.mrb[20].mxu1 %vm269_vm4, %v11260_v25 }
 0x4f9   : > { %8599 = vmatprep.mubr.msk.f32.mxu1 %vm269_vm4, %v11264_v24 }
 0x4fc   : > { %8600 = vmatmul.mubr.msk.f32.gmra.mrb[22].mxu1 %vm269_vm4, %v11268_v27  ;;  %v12676_v27 = vld [vmem:[#allocation40_spill] sm:$0xff] }
 0x4fd   : > { %8602 = vmatprep.mubr.msk.f32.mxu1 %vm269_vm4, %v11272_v31  ;;  %v11693_v31 = vld [vmem:[#allocation3 + $0x189] sm:$0xff] }
 0x4fe   : > { %12668 = vst [vmem:[#allocation42_spill] sm:$0xff] %v11693_v31 }
 0x500   : > { %8603 = vmatmul.mubr.msk.f32.gmra.mrb[24].mxu1 %vm269_vm4, %v11276_v32  ;;  %v12673_v32 = vld [vmem:[#allocation11_spill] sm:$0xff] }
 0x501   : > { %8605 = vmatprep.mubr.msk.f32.mxu1 %vm269_vm4, %v11280_v37  ;;  %v12669_v37 = vld [vmem:[#allocation7_spill] sm:$0xff] }
 0x504   : > { %8606 = vmatmul.mubr.msk.f32.gmra.mrb[26].mxu1 %vm269_vm4, %v11284_v4  ;;  %v12670_v4 = vld [vmem:[#allocation8_spill] sm:$0xff] }
 0x505   : > { %8608 = vmatprep.mubr.msk.f32.mxu1 %vm269_vm4, %v12665_v22  ;;  %v7214_v22 = vld [vmem:[%s12390_s3 + $0x38] sm:$0xff] }
 0x508   : > { %8609 = vmatmul.mubr.msk.f32.gmra.mrb[28].mxu1 %vm269_vm4, %v12666_v58  ;;  %v12671_v58 = vld [vmem:[#allocation9_spill] sm:$0xff] }
 0x509   : > { %8611 = vmatprep.mubr.msk.f32.mxu1 %vm269_vm4, %v11689_v41  ;;  %v12672_v41 = vld [vmem:[#allocation10_spill] sm:$0xff] }
 0x50c   : > { %8612 = vmatmul.mubr.msk.f32.gmra.mrb[30].mxu1 %vm269_vm4, %v11693_v31  ;;  %v12674_v31 = vld [vmem:[#allocation12_spill] sm:$0xff] }
 0x50d   : > { %8616 = vmatprep.mubr.msk.f32.mxu1 %vm269_vm4, %v12669_v37  ;;  %v12675_v37 = vld [vmem:[#allocation13_spill] sm:$0xff] }
 0x510   : > { %8617 = vmatmul.mubr.msk.f32.vlgmr.msra.gmra.mrb[0].mxu1 %vm269_vm4, %v12670_v4  ;;  %v12677_v4 = vld [vmem:[#allocation41_spill] sm:$0xff] }
 0x511   : > { %8665 = vmatpush3.msra.mxu1 %v7213_v28  ;;  %8619 = vmatprep.mubr.msk.f32.mxu1 %vm269_vm4, %v12671_v58  ;;  %v12678_v28 = vld [vmem:[#allocation15_spill] sm:$0xff]  ;;  %v12679_v58 = vld [vmem:[#allocation16_spill] sm:$0xff] }
 0x512   : > { %8714 = vmatprep.subr.mxu1 %v7214_v22 }
 0x514   : > { %8620 = vmatmul.mubr.msk.f32.gmra.mrb[2].mxu1 %vm269_vm4, %v12672_v41  ;;  %v12680_v41 = vld [vmem:[#allocation17_spill] sm:$0xff] }
 0x515   : > { %8622 = vmatprep.mubr.msk.f32.mxu1 %vm269_vm4, %v12673_v32  ;;  %v12681_v32 = vld [vmem:[#allocation18_spill] sm:$0xff] }
 0x518   : > { %8623 = vmatmul.mubr.msk.f32.gmra.mrb[4].mxu1 %vm269_vm4, %v12674_v31  ;;  %v12682_v31 = vld [vmem:[#allocation19_spill] sm:$0xff] }
 0x519   : > { %8625 = vmatprep.mubr.msk.f32.mxu1 %vm269_vm4, %v12675_v37  ;;  %v12683_v37 = vld [vmem:[#allocation20_spill] sm:$0xff] }
 0x51c   : > { %8626 = vmatmul.mubr.msk.f32.gmra.mrb[6].mxu1 %vm269_vm4, %v12676_v27  ;;  %v12684_v27 = vld [vmem:[#allocation21_spill] sm:$0xff] }
 0x51d   : > { %8628 = vmatprep.mubr.msk.f32.mxu1 %vm269_vm4, %v12677_v4  ;;  %v12685_v4 = vld [vmem:[#allocation22_spill] sm:$0xff] }
 0x520   : > { %8629 = vmatmul.mubr.msk.f32.gmra.mrb[8].mxu1 %vm269_vm4, %v12678_v28  ;;  %v12686_v28 = vld [vmem:[#allocation23_spill] sm:$0xff] }
 0x521   : > { %8631 = vmatprep.mubr.msk.f32.mxu1 %vm269_vm4, %v12679_v58  ;;  %v12687_v58 = vld [vmem:[#allocation24_spill] sm:$0xff] }
 0x524   : > { %8632 = vmatmul.mubr.msk.f32.gmra.mrb[10].mxu1 %vm269_vm4, %v12680_v41  ;;  %v12688_v41 = vld [vmem:[#allocation25_spill] sm:$0xff] }
 0x525   : > { %8634 = vmatprep.mubr.msk.f32.mxu1 %vm269_vm4, %v12681_v32  ;;  %v12689_v32 = vld [vmem:[#allocation26_spill] sm:$0xff] }
 0x528   : > { %8635 = vmatmul.mubr.msk.f32.gmra.mrb[12].mxu1 %vm269_vm4, %v12682_v31  ;;  %v12690_v31 = vld [vmem:[#allocation27_spill] sm:$0xff] }
 0x529   : > { %8637 = vmatprep.mubr.msk.f32.mxu1 %vm269_vm4, %v12683_v37  ;;  %v12691_v37 = vld [vmem:[#allocation29_spill] sm:$0xff] }
 0x52c   : > { %8638 = vmatmul.mubr.msk.f32.gmra.mrb[14].mxu1 %vm269_vm4, %v12684_v27  ;;  %v12692_v27 = vld [vmem:[#allocation31_spill] sm:$0xff] }
 0x52d   : > { %8640 = vmatprep.mubr.msk.f32.mxu1 %vm269_vm4, %v12685_v4  ;;  %v12693_v4 = vld [vmem:[#allocation32_spill] sm:$0xff] }
 0x530   : > { %8641 = vmatmul.mubr.msk.f32.gmra.mrb[16].mxu1 %vm269_vm4, %v12686_v28 }
 0x531   : > { %8643 = vmatprep.mubr.msk.f32.mxu1 %vm269_vm4, %v12687_v58  ;;  %v12694_v58 = vld [vmem:[#allocation34_spill] sm:$0xff] }
 0x534   : > { %8644 = vmatmul.mubr.msk.f32.gmra.mrb[18].mxu1 %vm269_vm4, %v12688_v41 }
 0x535   : > { %8646 = vmatprep.mubr.msk.f32.mxu1 %vm269_vm4, %v12689_v32 }
 0x538   : > { %8647 = vmatmul.mubr.msk.f32.gmra.mrb[20].mxu1 %vm269_vm4, %v12690_v31 }
 0x539   : > { %8649 = vmatprep.mubr.msk.f32.mxu1 %vm269_vm4, %v12691_v37  ;;  %v11760_v37 = vld [vmem:[#allocation3 + $0x182] sm:$0xff] }
 0x53c   : > { %8650 = vmatmul.mubr.msk.f32.gmra.mrb[22].mxu1 %vm269_vm4, %v12692_v27 }
 0x53d   : > { %8652 = vmatprep.mubr.msk.f32.mxu1 %vm269_vm4, %v12693_v4  ;;  %v11764_v4 = vld [vmem:[#allocation3 + $0x18a] sm:$0xff] }
 0x540   : > { %8653 = vmatmul.mubr.msk.f32.gmra.mrb[24].mxu1 %vm269_vm4, %v11534_v6 }
 0x541   : > { %8655 = vmatprep.mubr.msk.f32.mxu1 %vm269_vm4, %v12694_v58 }
 0x544   : > { %8656 = vmatmul.mubr.msk.f32.gmra.mrb[26].mxu1 %vm269_vm4, %v11542_v48 }
 0x545   : > { %8658 = vmatprep.mubr.msk.f32.mxu1 %vm269_vm4, %v11546_v5  ;;  %v7215_v5 = vld [vmem:[%s12390_s3 + $0x40] sm:$0xff] }
 0x548   : > { %8659 = vmatmul.mubr.msk.f32.gmra.mrb[28].mxu1 %vm269_vm4, %v11550_v1 }
 0x549   : > { %8661 = vmatprep.mubr.msk.f32.mxu1 %vm269_vm4, %v11760_v37 }
 0x54c   : > { %8662 = vmatmul.mubr.msk.f32.gmra.mrb[30].mxu1 %vm269_vm4, %v11764_v4 }
 0x54d   : > { %8666 = vmatprep.mubr.msk.f32.mxu1 %vm269_vm4, %v11313_v40  ;;  %v3538_v40 = vld [vmem:[#allocation3 + $0x198] sm:$0xff] }
 0x550   : > { %8667 = vmatmul.mubr.msk.f32.vlgmr.msra.gmra.mrb[0].mxu1 %vm269_vm4, %v11317_v33  ;;  %v3539_v33 = vld [vmem:[#allocation3 + $0x1a0] sm:$0xff] }
 0x551   : > { %8715 = vmatpush3.msra.mxu1 %v7214_v22  ;;  %8669 = vmatprep.mubr.msk.f32.mxu1 %vm269_vm4, %v11321_v2  ;;  %v12714_v2 = vld [vmem:[#allocation18_spill] sm:$0xff] }
 0x552   : > { %8764 = vmatprep.subr.mxu1 %v7215_v5 }
 0x554   : > { %8670 = vmatmul.mubr.msk.f32.gmra.mrb[2].mxu1 %vm269_vm4, %v11325_v36  ;;  %v12715_v36 = vld [vmem:[#allocation19_spill] sm:$0xff] }
 0x555   : > { %8672 = vmatprep.mubr.msk.f32.mxu1 %vm269_vm4, %v11329_v7  ;;  %v12716_v7 = vld [vmem:[#allocation20_spill] sm:$0xff] }
 0x558   : > { %8673 = vmatmul.mubr.msk.f32.gmra.mrb[4].mxu1 %vm269_vm4, %v11333_v16  ;;  %v12717_v16 = vld [vmem:[#allocation21_spill] sm:$0xff] }
 0x559   : > { %8675 = vmatprep.mubr.msk.f32.mxu1 %vm269_vm4, %v11337_v35  ;;  %v12718_v35 = vld [vmem:[#allocation22_spill] sm:$0xff] }
 0x55c   : > { %8676 = vmatmul.mubr.msk.f32.gmra.mrb[6].mxu1 %vm269_vm4, %v11341_v60  ;;  %v12719_v60 = vld [vmem:[#allocation24_spill] sm:$0xff] }
 0x55d   : > { %8678 = vmatprep.mubr.msk.f32.mxu1 %vm269_vm4, %v11345_v45  ;;  %v12720_v45 = vld [vmem:[#allocation29_spill] sm:$0xff] }
 0x560   : > { %8679 = vmatmul.mubr.msk.f32.gmra.mrb[8].mxu1 %vm269_vm4, %v11349_v21  ;;  %v12721_v21 = vld [vmem:[#allocation32_spill] sm:$0xff] }
 0x561   : > { %8681 = vmatprep.mubr.msk.f32.mxu1 %vm269_vm4, %v11353_v44 }
 0x564   : > { %8682 = vmatmul.mubr.msk.f32.gmra.mrb[10].mxu1 %vm269_vm4, %v11357_v54 }
 0x565   : > { %8684 = vmatprep.mubr.msk.f32.mxu1 %vm269_vm4, %v11361_v3 }
 0x568   : > { %8685 = vmatmul.mubr.msk.f32.gmra.mrb[12].mxu1 %vm269_vm4, %v11365_v42 }
 0x569   : > { %8687 = vmatprep.mubr.msk.f32.mxu1 %vm269_vm4, %v11369_v29 }
 0x56c   : > { %8688 = vmatmul.mubr.msk.f32.gmra.mrb[14].mxu1 %vm269_vm4, %v11373_v62 }
 0x56d   : > { %8690 = vmatprep.mubr.msk.f32.mxu1 %vm269_vm4, %v11377_v59 }
 0x570   : > { %8691 = vmatmul.mubr.msk.f32.gmra.mrb[16].mxu1 %vm269_vm4, %v11381_v63 }
 0x571   : > { %8693 = vmatprep.mubr.msk.f32.mxu1 %vm269_vm4, %v11385_v0 }
 0x574   : > { %8694 = vmatmul.mubr.msk.f32.gmra.mrb[18].mxu1 %vm269_vm4, %v11389_v39 }
 0x575   : > { %8696 = vmatprep.mubr.msk.f32.mxu1 %vm269_vm4, %v11393_v9 }
 0x578   : > { %8697 = vmatmul.mubr.msk.f32.gmra.mrb[20].mxu1 %vm269_vm4, %v11397_v61 }
 0x579   : > { %8699 = vmatprep.mubr.msk.f32.mxu1 %vm269_vm4, %v11401_v12 }
 0x57c   : > { %8700 = vmatmul.mubr.msk.f32.gmra.mrb[22].mxu1 %vm269_vm4, %v11405_v13 }
 0x57d   : > { %8702 = vmatprep.mubr.msk.f32.mxu1 %vm269_vm4, %v11409_v14 }
 0x580   : > { %8703 = vmatmul.mubr.msk.f32.gmra.mrb[24].mxu1 %vm269_vm4, %v11413_v15 }
 0x581   : > { %8705 = vmatprep.mubr.msk.f32.mxu1 %vm269_vm4, %v11417_v49 }
 0x584   : > { %8706 = vmatmul.mubr.msk.f32.gmra.mrb[26].mxu1 %vm269_vm4, %v11421_v56 }
 0x585   : > { %8708 = vmatprep.mubr.msk.f32.mxu1 %vm269_vm4, %v11618_v8 }
 0x588   : > { %8709 = vmatmul.mubr.msk.f32.gmra.mrb[28].mxu1 %vm269_vm4, %v11622_v10 }
 0x589   : > { %8711 = vmatprep.mubr.msk.f32.mxu1 %vm269_vm4, %v3538_v40 }
 0x58c   : > { %8712 = vmatmul.mubr.msk.f32.gmra.mrb[30].mxu1 %vm269_vm4, %v3539_v33 }
 0x58d   : > { %8716 = vmatprep.mubr.msk.f32.mxu1 %vm269_vm4, %v11128_v30  ;;  %v12695_v30 = vld [vmem:[#allocation14_spill] sm:$0xff] }
 0x590   : > { %8717 = vmatmul.mubr.msk.f32.vlgmr.msra.gmra.mrb[0].mxu1 %vm269_vm4, %v11180_v57  ;;  %v12696_v57 = vld [vmem:[#allocation28_spill] sm:$0xff] }
 0x591   : > { %8765 = vmatpush3.msra.mxu1 %v7215_v5  ;;  %8719 = vmatprep.mubr.msk.f32.mxu1 %vm269_vm4, %v11191_v26  ;;  %v12697_v26 = vld [vmem:[#allocation30_spill] sm:$0xff] }
 0x594   : > { %8720 = vmatmul.mubr.msk.f32.gmra.mrb[2].mxu1 %vm269_vm4, %v11196_v17  ;;  %v12698_v17 = vld [vmem:[#allocation33_spill] sm:$0xff] }
 0x595   : > { %8722 = vmatprep.mubr.msk.f32.mxu1 %vm269_vm4, %v11200_v23  ;;  %v12699_v23 = vld [vmem:[#allocation35_spill] sm:$0xff] }
 0x598   : > { %8723 = vmatmul.mubr.msk.f32.gmra.mrb[4].mxu1 %vm269_vm4, %v11204_v38  ;;  %v12700_v38 = vld [vmem:[#allocation37_spill] sm:$0xff] }
 0x599   : > { %8725 = vmatprep.mubr.msk.f32.mxu1 %vm269_vm4, %v11208_v43  ;;  %v12701_v43 = vld [vmem:[#allocation38_spill] sm:$0xff] }
 0x59c   : > { %8726 = vmatmul.mubr.msk.f32.gmra.mrb[6].mxu1 %vm269_vm4, %v11212_v34  ;;  %v12702_v34 = vld [vmem:[#allocation39_spill] sm:$0xff] }
 0x59d   : > { %8728 = vmatprep.mubr.msk.f32.mxu1 %vm269_vm4, %v11216_v46  ;;  %v3574_v46 = vld [vmem:[#allocation3 + $0x199] sm:$0xff] }
 0x5a0   : > { %8729 = vmatmul.mubr.msk.f32.gmra.mrb[8].mxu1 %vm269_vm4, %v11220_v47  ;;  %v12703_v47 = vld [vmem:[#allocation42_spill] sm:$0xff] }
 0x5a1   : > { %8731 = vmatprep.mubr.msk.f32.mxu1 %vm269_vm4, %v11224_v50  ;;  %v3575_v50 = vld [vmem:[#allocation3 + $0x1a1] sm:$0xff] }
 0x5a4   : > { %8732 = vmatmul.mubr.msk.f32.gmra.mrb[10].mxu1 %vm269_vm4, %v11228_v51  ;;  %v12704_v51 = vld [vmem:[#allocation9_spill] sm:$0xff] }
 0x5a5   : > { %8734 = vmatprep.mubr.msk.f32.mxu1 %vm269_vm4, %v11232_v52  ;;  %v12705_v52 = vld [vmem:[#allocation10_spill] sm:$0xff] }
 0x5a8   : > { %8735 = vmatmul.mubr.msk.f32.gmra.mrb[12].mxu1 %vm269_vm4, %v11236_v53  ;;  %v12706_v53 = vld [vmem:[#allocation11_spill] sm:$0xff] }
 0x5a9   : > { %8737 = vmatprep.mubr.msk.f32.mxu1 %vm269_vm4, %v11240_v55  ;;  %v12707_v55 = vld [vmem:[#allocation12_spill] sm:$0xff] }
 0x5ac   : > { %8738 = vmatmul.mubr.msk.f32.gmra.mrb[14].mxu1 %vm269_vm4, %v11244_v18  ;;  %v12708_v18 = vld [vmem:[#allocation13_spill] sm:$0xff] }
 0x5ad   : > { %8740 = vmatprep.mubr.msk.f32.mxu1 %vm269_vm4, %v11248_v19  ;;  %v12709_v19 = vld [vmem:[#allocation40_spill] sm:$0xff] }
 0x5b0   : > { %8741 = vmatmul.mubr.msk.f32.gmra.mrb[16].mxu1 %vm269_vm4, %v11252_v20  ;;  %v12710_v20 = vld [vmem:[#allocation41_spill] sm:$0xff] }
 0x5b1   : > { %8743 = vmatprep.mubr.msk.f32.mxu1 %vm269_vm4, %v11256_v11  ;;  %v12711_v11 = vld [vmem:[#allocation15_spill] sm:$0xff] }
 0x5b4   : > { %8744 = vmatmul.mubr.msk.f32.gmra.mrb[18].mxu1 %vm269_vm4, %v11260_v25  ;;  %v12712_v25 = vld [vmem:[#allocation16_spill] sm:$0xff] }
 0x5b5   : > { %8746 = vmatprep.mubr.msk.f32.mxu1 %vm269_vm4, %v11264_v24  ;;  %v12713_v24 = vld [vmem:[#allocation17_spill] sm:$0xff] }
 0x5b8   : > { %8747 = vmatmul.mubr.msk.f32.gmra.mrb[20].mxu1 %vm269_vm4, %v12695_v30 }
 0x5b9   : > { %8749 = vmatprep.mubr.msk.f32.mxu1 %vm269_vm4, %v12696_v57 }
 0x5bc   : > { %8750 = vmatmul.mubr.msk.f32.gmra.mrb[22].mxu1 %vm269_vm4, %v12697_v26 }
 0x5bd   : > { %8752 = vmatprep.mubr.msk.f32.mxu1 %vm269_vm4, %v12698_v17 }
 0x5c0   : > { %8753 = vmatmul.mubr.msk.f32.gmra.mrb[24].mxu1 %vm269_vm4, %v12699_v23 }
 0x5c1   : > { %8755 = vmatprep.mubr.msk.f32.mxu1 %vm269_vm4, %v12700_v38 }
 0x5c4   : > { %8756 = vmatmul.mubr.msk.f32.gmra.mrb[26].mxu1 %vm269_vm4, %v12701_v43 }
 0x5c5   : > { %8758 = vmatprep.mubr.msk.f32.mxu1 %vm269_vm4, %v12702_v34 }
 0x5c8   : > { %8759 = vmatmul.mubr.msk.f32.gmra.mrb[28].mxu1 %vm269_vm4, %v12703_v47 }
 0x5c9   : > { %8761 = vmatprep.mubr.msk.f32.mxu1 %vm269_vm4, %v3574_v46 }
 0x5cc   : > { %8762 = vmatmul.mubr.msk.f32.gmra.mrb[30].mxu1 %vm269_vm4, %v3575_v50 }
 0x5cd   : > { %8766 = vmatprep.mubr.msk.f32.mxu1 %vm269_vm4, %v12704_v51 }
 0x5d0   : > { %8767 = vmatmul.mubr.msk.f32.vlgmr.msra.gmra.mrb[0].mxu1 %vm269_vm4, %v12705_v52 }
 0x5d1   : > { %8769 = vmatprep.mubr.msk.f32.mxu1 %vm269_vm4, %v12706_v53 }
 0x5d4   : > { %8770 = vmatmul.mubr.msk.f32.gmra.mrb[2].mxu1 %vm269_vm4, %v12707_v55 }
 0x5d5   : > { %8772 = vmatprep.mubr.msk.f32.mxu1 %vm269_vm4, %v12708_v18 }
 0x5d8   : > { %8773 = vmatmul.mubr.msk.f32.gmra.mrb[4].mxu1 %vm269_vm4, %v12709_v19 }
 0x5d9   : > { %8775 = vmatprep.mubr.msk.f32.mxu1 %vm269_vm4, %v12710_v20 }
 0x5dc   : > { %8776 = vmatmul.mubr.msk.f32.gmra.mrb[6].mxu1 %vm269_vm4, %v12711_v11 }
 0x5dd   : > { %8778 = vmatprep.mubr.msk.f32.mxu1 %vm269_vm4, %v12712_v25 }
 0x5e0   : > { %8779 = vmatmul.mubr.msk.f32.gmra.mrb[8].mxu1 %vm269_vm4, %v12713_v24 }
 0x5e1   : > { %8781 = vmatprep.mubr.msk.f32.mxu1 %vm269_vm4, %v12714_v2 }
 0x5e4   : > { %8782 = vmatmul.mubr.msk.f32.gmra.mrb[10].mxu1 %vm269_vm4, %v12715_v36 }
 0x5e5   : > { %8784 = vmatprep.mubr.msk.f32.mxu1 %vm269_vm4, %v12716_v7 }
 0x5e8   : > { %8785 = vmatmul.mubr.msk.f32.gmra.mrb[12].mxu1 %vm269_vm4, %v12717_v16 }
 0x5e9   : > { %8787 = vmatprep.mubr.msk.f32.mxu1 %vm269_vm4, %v12718_v35 }
 0x5ec   : > { %8788 = vmatmul.mubr.msk.f32.gmra.mrb[14].mxu1 %vm269_vm4, %v12686_v28 }
 0x5ed   : > { %8790 = vmatprep.mubr.msk.f32.mxu1 %vm269_vm4, %v12719_v60 }
 0x5f0   : > { %8791 = vmatmul.mubr.msk.f32.gmra.mrb[16].mxu1 %vm269_vm4, %v12688_v41 }
 0x5f1   : > { %8793 = vmatprep.mubr.msk.f32.mxu1 %vm269_vm4, %v12689_v32  ;;  %v12722_v32 = vld [vmem:[#allocation36_spill] sm:$0xff] }
 0x5f4   : > { %8794 = vmatmul.mubr.msk.f32.gmra.mrb[18].mxu1 %vm269_vm4, %v12690_v31  ;;  %v3611_v31 = vld [vmem:[#allocation3 + $0x1a2] sm:$0xff] }
 0x5f5   : > { %8796 = vmatprep.mubr.msk.f32.mxu1 %vm269_vm4, %v12720_v45 }
 0x5f8   : > { %8797 = vmatmul.mubr.msk.f32.gmra.mrb[20].mxu1 %vm269_vm4, %v12692_v27  ;;  %v3610_v27 = vld [vmem:[#allocation3 + $0x19a] sm:$0xff] }
 0x5f9   : > { %8799 = vmatprep.mubr.msk.f32.mxu1 %vm269_vm4, %v12721_v21 }
 0x5fc   : > { %8800 = vmatmul.mubr.msk.f32.gmra.mrb[22].mxu1 %vm269_vm4, %v11534_v6  ;;  %v11960_v6 = vld [vmem:[%s12391_s4] ss:$0 sm:$0xff] }
 0x5fd   : > { %8802 = vmatprep.mubr.msk.f32.mxu1 %vm269_vm4, %v12694_v58 }
 0x600   : > { %8803 = vmatmul.mubr.msk.f32.gmra.mrb[24].mxu1 %vm269_vm4, %v11542_v48 }
 0x601   : > { %8805 = vmatprep.mubr.msk.f32.mxu1 %vm269_vm4, %v12722_v32 }
 0x604   : > { %8806 = vmatmul.mubr.msk.f32.gmra.mrb[26].mxu1 %vm269_vm4, %v11550_v1 }
 0x605   : > { %8808 = vmatprep.mubr.msk.f32.mxu1 %vm269_vm4, %v11760_v37 }
 0x608   : > { %8809 = vmatmul.mubr.msk.f32.gmra.mrb[28].mxu1 %vm269_vm4, %v11764_v4 }
 0x609   : > { %8811 = vmatprep.mubr.msk.f32.mxu1 %vm269_vm4, %v3610_v27 }
 0x60c   : > { %8812 = vmatmul.mubr.msk.f32.gmra.mrb[30].mxu1 %vm269_vm4, %v3611_v31 }
 0x6a3   : > { %v8768_v44 = vpop.f32.mrb[0].mxu1 }
 0x6a4   : > { %v11963_v54 = vadd.f32 %v8768_v44, %v11960_v6  ;;  %v6005_v3 = vpop.f32.mrb[1].mxu1 }
 0x6a5   : > { %v11966_v42 = vadd.f32 %v11960_v6, %v6005_v3 }
 0x6a6   : > { %v6236_v29 = vsel %vm269_vm4, %v11963_v54, 0.0 }
 0x6a7   : > { %v6235_v62 = vsel %vm269_vm4, %v11966_v42, 0.0  ;;  %v8771_v59 = vpop.f32.mrb[2].mxu1 }
 0x6a8   : > { %v6015_v63 = vpop.f32.mrb[3].mxu1  ;;  %v11973_v0 = vadd.f32 %v8771_v59, %v11960_v6  ;;  %v6237_v9 = vadd.f32 %v6236_v29, %v6235_v62 }
 0x6a9   : > { %v11976_v39 = vadd.f32 %v11960_v6, %v6015_v63 }
 0x6aa   : > { %v6240_v15 = vsel %vm269_vm4, %v11973_v0, 0.0 }
 0x6ab   : > { %v6238_v61 = vsel %vm269_vm4, %v11976_v39, 0.0  ;;  %v8774_v12 = vpop.f32.mrb[4].mxu1 }
 0x6ac   : > { %v6239_v13 = vadd.f32 %v6238_v61, %v6237_v9  ;;  %v6025_v14 = vpop.f32.mrb[5].mxu1  ;;  %v11983_v49 = vadd.f32 %v8774_v12, %v11960_v6 }
 0x6ad   : > { %v11986_v56 = vadd.f32 %v11960_v6, %v6025_v14 }
 0x6ae   : > { %v6241_v48 = vadd.f32 %v6240_v15, %v6239_v13  ;;  %v6244_v22 = vsel %vm269_vm4, %v11983_v49, 0.0 }
 0x6af   : > { %v6242_v5 = vsel %vm269_vm4, %v11986_v56, 0.0  ;;  %v8777_v1 = vpop.f32.mrb[6].mxu1 }
 0x6b0   : > { %v6243_v8 = vadd.f32 %v6242_v5, %v6241_v48  ;;  %v6035_v10 = vpop.f32.mrb[7].mxu1  ;;  %v11993_v58 = vadd.f32 %v8777_v1, %v11960_v6 }
 0x6b1   : > { %v11996_v41 = vadd.f32 %v11960_v6, %v6035_v10 }
 0x6b2   : > { %v6245_v37 = vadd.f32 %v6244_v22, %v6243_v8  ;;  %v6248_v30 = vsel %vm269_vm4, %v11993_v58, 0.0 }
 0x6b3   : > { %v6246_v4 = vsel %vm269_vm4, %v11996_v41, 0.0  ;;  %v8780_v28 = vpop.f32.mrb[8].mxu1 }
 0x6b4   : > { %v6247_v40 = vadd.f32 %v6246_v4, %v6245_v37  ;;  %v6045_v33 = vpop.f32.mrb[9].mxu1  ;;  %v12003_v57 = vadd.f32 %v8780_v28, %v11960_v6 }
 0x6b5   : > { %v12006_v26 = vadd.f32 %v11960_v6, %v6045_v33 }
 0x6b6   : > { %v6249_v17 = vadd.f32 %v6248_v30, %v6247_v40  ;;  %v6252_v46 = vsel %vm269_vm4, %v12003_v57, 0.0 }
 0x6b7   : > { %v6250_v23 = vsel %vm269_vm4, %v12006_v26, 0.0  ;;  %v8783_v38 = vpop.f32.mrb[10].mxu1 }
 0x6b8   : > { %v6251_v43 = vadd.f32 %v6250_v23, %v6249_v17  ;;  %v6055_v34 = vpop.f32.mrb[11].mxu1  ;;  %v12013_v47 = vadd.f32 %v8783_v38, %v11960_v6 }
 0x6b9   : > { %v12016_v50 = vadd.f32 %v11960_v6, %v6055_v34 }
 0x6ba   : > { %v6253_v51 = vadd.f32 %v6252_v46, %v6251_v43  ;;  %v6256_v19 = vsel %vm269_vm4, %v12013_v47, 0.0 }
 0x6bb   : > { %v6254_v52 = vsel %vm269_vm4, %v12016_v50, 0.0  ;;  %v8786_v53 = vpop.f32.mrb[12].mxu1 }
 0x6bc   : > { %v6255_v55 = vadd.f32 %v6254_v52, %v6253_v51  ;;  %v6065_v18 = vpop.f32.mrb[13].mxu1  ;;  %v12023_v20 = vadd.f32 %v8786_v53, %v11960_v6 }
 0x6bd   : > { %v12026_v11 = vadd.f32 %v11960_v6, %v6065_v18 }
 0x6be   : > { %v6257_v25 = vadd.f32 %v6256_v19, %v6255_v55  ;;  %v6260_v16 = vsel %vm269_vm4, %v12023_v20, 0.0 }
 0x6bf   : > { %v6258_v24 = vsel %vm269_vm4, %v12026_v11, 0.0  ;;  %v8789_v2 = vpop.f32.mrb[14].mxu1 }
 0x6c0   : > { %v6259_v36 = vadd.f32 %v6258_v24, %v6257_v25  ;;  %v6075_v7 = vpop.f32.mrb[15].mxu1  ;;  %v12033_v35 = vadd.f32 %v8789_v2, %v11960_v6 }
 0x6c1   : > { %v12036_v60 = vadd.f32 %v11960_v6, %v6075_v7 }
 0x6c2   : > { %v6261_v45 = vadd.f32 %v6260_v16, %v6259_v36  ;;  %v6264_v44 = vsel %vm269_vm4, %v12033_v35, 0.0 }
 0x6c3   : > { %v6262_v21 = vsel %vm269_vm4, %v12036_v60, 0.0  ;;  %v8792_v32 = vpop.f32.mrb[16].mxu1 }
 0x6c4   : > { %v6263_v27 = vadd.f32 %v6262_v21, %v6261_v45  ;;  %v6085_v31 = vpop.f32.mrb[17].mxu1  ;;  %v12043_v3 = vadd.f32 %v8792_v32, %v11960_v6 }
 0x6c5   : > { %v12046_v29 = vadd.f32 %v11960_v6, %v6085_v31 }
 0x6c6   : > { %v6265_v62 = vadd.f32 %v6264_v44, %v6263_v27  ;;  %v6268_v12 = vsel %vm269_vm4, %v12043_v3, 0.0 }
 0x6c7   : > { %v6266_v59 = vsel %vm269_vm4, %v12046_v29, 0.0  ;;  %v8795_v63 = vpop.f32.mrb[18].mxu1 }
 0x6c8   : > { %v6267_v9 = vadd.f32 %v6266_v59, %v6265_v62  ;;  %v6095_v61 = vpop.f32.mrb[19].mxu1  ;;  %v12053_v13 = vadd.f32 %v8795_v63, %v11960_v6 }
 0x6c9   : > { %v12056_v14 = vadd.f32 %v11960_v6, %v6095_v61 }
 0x6ca   : > { %v6269_v15 = vadd.f32 %v6268_v12, %v6267_v9  ;;  %v6272_v10 = vsel %vm269_vm4, %v12053_v13, 0.0 }
 0x6cb   : > { %v6270_v48 = vsel %vm269_vm4, %v12056_v14, 0.0  ;;  %v8798_v5 = vpop.f32.mrb[20].mxu1 }
 0x6cc   : > { %v6271_v1 = vadd.f32 %v6270_v48, %v6269_v15  ;;  %v6105_v8 = vpop.f32.mrb[21].mxu1  ;;  %v12063_v22 = vadd.f32 %v8798_v5, %v11960_v6 }
 0x6cd   : > { %v12066_v37 = vadd.f32 %v11960_v6, %v6105_v8 }
 0x6ce   : > { %v6273_v4 = vadd.f32 %v6272_v10, %v6271_v1  ;;  %v6276_v17 = vsel %vm269_vm4, %v12063_v22, 0.0 }
 0x6cf   : > { %v6274_v28 = vsel %vm269_vm4, %v12066_v37, 0.0  ;;  %v8801_v40 = vpop.f32.mrb[22].mxu1 }
 0x6d0   : > { %v6275_v33 = vadd.f32 %v6274_v28, %v6273_v4  ;;  %v6115_v30 = vpop.f32.mrb[23].mxu1  ;;  %v6226_v23 = vadd.f32 %v8801_v40, %v11960_v6 }
 0x6d1   : > { %v6225_v38 = vadd.f32 %v11960_v6, %v6115_v30 }
 0x6d2   : > { %v6277_v43 = vadd.f32 %v6276_v17, %v6275_v33  ;;  %v6280_v53 = vsel %vm269_vm4, %v6226_v23, 0.0 }
 0x6d3   : > { %v6278_v34 = vsel %vm269_vm4, %v6225_v38, 0.0  ;;  %v8804_v46 = vpop.f32.mrb[24].mxu1 }
 0x6d4   : > { %v6279_v51 = vadd.f32 %v6278_v34, %v6277_v43  ;;  %v6125_v52 = vpop.f32.mrb[25].mxu1  ;;  %v6228_v55 = vadd.f32 %v8804_v46, %v11960_v6 }
 0x6d5   : > { %v6227_v18 = vadd.f32 %v11960_v6, %v6125_v52 }
 0x6d6   : > { %v6281_v19 = vadd.f32 %v6280_v53, %v6279_v51  ;;  %v6284_v7 = vsel %vm269_vm4, %v6228_v55, 0.0 }
 0x6d7   : > { %v6282_v25 = vsel %vm269_vm4, %v6227_v18, 0.0  ;;  %v8807_v24 = vpop.f32.mrb[26].mxu1 }
 0x6d8   : > { %v6283_v2 = vadd.f32 %v6282_v25, %v6281_v19  ;;  %v6135_v36 = vpop.f32.mrb[27].mxu1  ;;  %v6230_v16 = vadd.f32 %v8807_v24, %v11960_v6 }
 0x6d9   : > { %v6229_v45 = vadd.f32 %v11960_v6, %v6135_v36 }
 0x6da   : > { %v6285_v21 = vadd.f32 %v6284_v7, %v6283_v2  ;;  %v6288_v62 = vsel %vm269_vm4, %v6230_v16, 0.0 }
 0x6db   : > { %v6286_v32 = vsel %vm269_vm4, %v6229_v45, 0.0  ;;  %v8810_v27 = vpop.f32.mrb[28].mxu1 }
 0x6dc   : > { %v6287_v31 = vadd.f32 %v6286_v32, %v6285_v21  ;;  %v6145_v44 = vpop.f32.mrb[29].mxu1  ;;  %v6232_v59 = vadd.f32 %v8810_v27, %v11960_v6 }
 0x6dd   : > { %v6231_v63 = vadd.f32 %v11960_v6, %v6145_v44 }
 0x6de   : > { %v6289_v9 = vadd.f32 %v6288_v62, %v6287_v31  ;;  %v6292_v5 = vsel %vm269_vm4, %v6232_v59, 0.0 }
 0x6df   : > { %v6290_v61 = vsel %vm269_vm4, %v6231_v63, 0.0  ;;  %v8813_v12 = vpop.f32.mrb[30].mxu1 }
 0x6e0   : > { %v6291_v15 = vadd.f32 %v6290_v61, %v6289_v9  ;;  %v6155_v48 = vpop.f32.mrb[31].mxu1  ;;  %v6234_v1 = vadd.f32 %v8813_v12, %v11960_v6 }
 0x6e1   : > { %v6233_v8 = vadd.f32 %v11960_v6, %v6155_v48 }
 0x6e2   : > { %v6293_v10 = vadd.f32 %v6292_v5, %v6291_v15  ;;  %v6296_v40 = vsel %vm269_vm4, %v6234_v1, 0.0 }
 0x6e3   : > { %v6294_v4 = vsel %vm269_vm4, %v6233_v8, 0.0 }
 0x6e4   : > { %v6295_v28 = vadd.f32 %v6294_v4, %v6293_v10 }
 0x6e6   : > { %v6297_v33 = vadd.f32 %v6296_v40, %v6295_v28 }
 0x6e8   : > { %v6298_v30 = vrot.slane %v6297_v33, 4 }
 0x6ea   : > { %v6299_v17 = vadd.f32 %v6298_v30, %v6297_v33 }
 0x6ec   : > { %v6300_v43 = vrot.slane %v6299_v17, 2 }
 0x6ee   : > { %v6301_v34 = vadd.f32 %v6300_v43, %v6299_v17 }
 0x6f0   : > { %v6302_v46 = vrot.slane %v6301_v34, 1 }
 0x6f2   : > { %v6303_v51 = vadd.f32 %v6302_v46, %v6301_v34 }
 0x6f4   : > { %v6304_v52 = vmul.f32 0.00390625, %v6303_v51 }
 0x6f6   : > { %v12093_v53 = vsub.f32 %v12016_v50, %v6304_v52  ;;  %v12096_v19 = vsub.f32 %v12013_v47, %v6304_v52  ;;  %v12099_v6 = vsub.f32 %v12026_v11, %v6304_v52  ;;  %v12102_v25 = vsub.f32 %v12023_v20, %v6304_v52 }
 0x6f7   : > { %v12105_v24 = vsub.f32 %v12036_v60, %v6304_v52  ;;  %v12108_v2 = vsub.f32 %v12033_v35, %v6304_v52  ;;  %v12111_v36 = vsub.f32 %v12046_v29, %v6304_v52  ;;  %v12114_v50 = vsub.f32 %v12043_v3, %v6304_v52 }
 0x6f8   : > { %v12117_v47 = vsub.f32 %v12056_v14, %v6304_v52  ;;  %v12120_v11 = vsub.f32 %v12053_v13, %v6304_v52  ;;  %v12123_v20 = vsub.f32 %v12066_v37, %v6304_v52  ;;  %v12126_v60 = vsub.f32 %v12063_v22, %v6304_v52 }
 0x6f9   : > { %v12128_v35 = vsub.f32 %v6225_v38, %v6304_v52  ;;  %v12130_v7 = vsub.f32 %v6226_v23, %v6304_v52  ;;  %v12132_v29 = vsub.f32 %v6227_v18, %v6304_v52  ;;  %v12134_v3 = vsub.f32 %v6228_v55, %v6304_v52 }
 0x6fa   : > { %v12136_v21 = vsub.f32 %v6229_v45, %v6304_v52  ;;  %v12138_v14 = vsub.f32 %v6230_v16, %v6304_v52  ;;  %v12140_v13 = vsub.f32 %v6231_v63, %v6304_v52  ;;  %v12142_v32 = vsub.f32 %v6232_v59, %v6304_v52 }
 0x6fb   : > { %v12144_v37 = vsub.f32 %v6233_v8, %v6304_v52  ;;  %v12146_v22 = vsub.f32 %v6234_v1, %v6304_v52  ;;  %v12149_v38 = vsub.f32 %v11966_v42, %v6304_v52  ;;  %v12152_v23 = vsub.f32 %v11963_v54, %v6304_v52 }
 0x6fc   : > { %v12155_v55 = vsub.f32 %v11976_v39, %v6304_v52  ;;  %v12158_v18 = vsub.f32 %v11973_v0, %v6304_v52  ;;  %v12165_v27 = vsub.f32 %v11986_v56, %v6304_v52  ;;  %v12170_v54 = vsub.f32 %v11983_v49, %v6304_v52 }
 0x6fd   : > { %v6337_v16 = vmul.f32 %v12149_v38, %v12149_v38  ;;  %v6338_v45 = vmul.f32 %v12152_v23, %v12152_v23  ;;  %v12177_v62 = vsub.f32 %v11996_v41, %v6304_v52  ;;  %v12183_v49 = vsub.f32 %v11993_v58, %v6304_v52 }
 0x6fe   : > { %v6339_v42 = vmul.f32 %v12155_v55, %v12155_v55  ;;  %v6340_v39 = vmul.f32 %v12158_v18, %v12158_v18  ;;  %v6341_v56 = vmul.f32 %v12165_v27, %v12165_v27  ;;  %v6342_v9 = vmul.f32 %v12170_v54, %v12170_v54 }
 0x6ff   : > { %v6369_v0 = vsel %vm269_vm4, %v6337_v16, 0.0  ;;  %v6370_v31 = vsel %vm269_vm4, %v6338_v45, 0.0  ;;  %v12189_v15 = vsub.f32 %v12006_v26, %v6304_v52  ;;  %v6343_v41 = vmul.f32 %v12177_v62, %v12177_v62 }
 0x700   : > { %v6371_v44 = vadd.f32 %v6370_v31, %v6369_v0  ;;  %v6372_v59 = vsel %vm269_vm4, %v6339_v42, 0.0  ;;  %v6374_v61 = vsel %vm269_vm4, %v6340_v39, 0.0  ;;  %v6376_v48 = vsel %vm269_vm4, %v6341_v56, 0.0 }
 0x701   : > { %v12195_v1 = vsub.f32 %v12003_v57, %v6304_v52  ;;  %v6344_v58 = vmul.f32 %v12183_v49, %v12183_v49  ;;  %v6378_v8 = vsel %vm269_vm4, %v6342_v9, 0.0  ;;  %v6345_v4 = vmul.f32 %v12189_v15, %v12189_v15 }
 0x702   : > { %v6373_v63 = vadd.f32 %v6372_v59, %v6371_v44  ;;  %v6380_v26 = vsel %vm269_vm4, %v6343_v41, 0.0  ;;  %v6347_v57 = vmul.f32 %v12093_v53, %v12093_v53  ;;  %v6348_v34 = vmul.f32 %v12096_v19, %v12096_v19 }
 0x703   : > { %v6346_v40 = vmul.f32 %v12195_v1, %v12195_v1  ;;  %v6382_v33 = vsel %vm269_vm4, %v6344_v58, 0.0  ;;  %v6384_v17 = vsel %vm269_vm4, %v6345_v4, 0.0  ;;  %v6349_v52 = vmul.f32 %v12099_v6, %v12099_v6 }
 0x704   : > { %v6375_v12 = vadd.f32 %v6374_v61, %v6373_v63  ;;  %v6388_v16 = vsel %vm269_vm4, %v6347_v57, 0.0  ;;  %v6350_v42 = vmul.f32 %v12102_v25, %v12102_v25  ;;  %v6390_v39 = vsel %vm269_vm4, %v6348_v34, 0.0 }
 0x705   : > { %v6386_v46 = vsel %vm269_vm4, %v6346_v40, 0.0  ;;  %v6351_v31 = vmul.f32 %v12105_v24, %v12105_v24  ;;  %v6392_v44 = vsel %vm269_vm4, %v6349_v52, 0.0  ;;  %v6352_v59 = vmul.f32 %v12108_v2, %v12108_v2 }
 0x706   : > { %v6377_v5 = vadd.f32 %v6376_v48, %v6375_v12  ;;  %v6394_v63 = vsel %vm269_vm4, %v6350_v42, 0.0  ;;  %v6353_v61 = vmul.f32 %v12111_v36, %v12111_v36  ;;  %v6354_v48 = vmul.f32 %v12114_v50, %v12114_v50 }
 0x707   : > { %v6396_v12 = vsel %vm269_vm4, %v6351_v31, 0.0 }
 0x708   : > { %v6379_v10 = vadd.f32 %v6378_v8, %v6377_v5  ;;  %v6398_v5 = vsel %vm269_vm4, %v6352_v59, 0.0  ;;  %v6355_v8 = vmul.f32 %v12117_v47, %v12117_v47 }
 0x70a   : > { %v6381_v28 = vadd.f32 %v6380_v26, %v6379_v10  ;;  %v6400_v10 = vsel %vm269_vm4, %v6353_v61, 0.0  ;;  %v6356_v26 = vmul.f32 %v12120_v11, %v12120_v11 }
 0x70c   : > { %v6383_v30 = vadd.f32 %v6382_v33, %v6381_v28  ;;  %v6402_v28 = vsel %vm269_vm4, %v6354_v48, 0.0  ;;  %v6357_v33 = vmul.f32 %v12123_v20, %v12123_v20 }
 0x70e   : > { %v6385_v43 = vadd.f32 %v6384_v17, %v6383_v30  ;;  %v6404_v30 = vsel %vm269_vm4, %v6355_v8, 0.0  ;;  %v6358_v17 = vmul.f32 %v12126_v60, %v12126_v60 }
 0x710   : > { %v6387_v51 = vadd.f32 %v6386_v46, %v6385_v43  ;;  %v6406_v43 = vsel %vm269_vm4, %v6356_v26, 0.0  ;;  %v6359_v46 = vmul.f32 %v12128_v35, %v12128_v35 }
 0x712   : > { %v6389_v45 = vadd.f32 %v6388_v16, %v6387_v51  ;;  %v6408_v51 = vsel %vm269_vm4, %v6357_v33, 0.0  ;;  %v6360_v16 = vmul.f32 %v12130_v7, %v12130_v7 }
 0x714   : > { %v6391_v0 = vadd.f32 %v6390_v39, %v6389_v45  ;;  %v6410_v45 = vsel %vm269_vm4, %v6358_v17, 0.0  ;;  %v6361_v39 = vmul.f32 %v12132_v29, %v12132_v29 }
 0x716   : > { %v6393_v56 = vadd.f32 %v6392_v44, %v6391_v0  ;;  %v6412_v0 = vsel %vm269_vm4, %v6359_v46, 0.0  ;;  %v6362_v44 = vmul.f32 %v12134_v3, %v12134_v3 }
 0x718   : > { %v6395_v9 = vadd.f32 %v6394_v63, %v6393_v56  ;;  %v6414_v56 = vsel %vm269_vm4, %v6360_v16, 0.0  ;;  %v6363_v63 = vmul.f32 %v12136_v21, %v12136_v21 }
 0x71a   : > { %v6397_v41 = vadd.f32 %v6396_v12, %v6395_v9  ;;  %v6416_v9 = vsel %vm269_vm4, %v6361_v39, 0.0  ;;  %v6364_v12 = vmul.f32 %v12138_v14, %v12138_v14 }
 0x71c   : > { %v6399_v58 = vadd.f32 %v6398_v5, %v6397_v41  ;;  %v6418_v41 = vsel %vm269_vm4, %v6362_v44, 0.0  ;;  %v6365_v5 = vmul.f32 %v12140_v13, %v12140_v13 }
 0x71e   : > { %v6401_v4 = vadd.f32 %v6400_v10, %v6399_v58  ;;  %v6420_v58 = vsel %vm269_vm4, %v6363_v63, 0.0  ;;  %v6366_v10 = vmul.f32 %v12142_v32, %v12142_v32 }
 0x720   : > { %v6403_v40 = vadd.f32 %v6402_v28, %v6401_v4  ;;  %v6422_v4 = vsel %vm269_vm4, %v6364_v12, 0.0  ;;  %v6367_v28 = vmul.f32 %v12144_v37, %v12144_v37 }
 0x722   : > { %v6405_v57 = vadd.f32 %v6404_v30, %v6403_v40  ;;  %v6424_v40 = vsel %vm269_vm4, %v6365_v5, 0.0  ;;  %v6368_v30 = vmul.f32 %v12146_v22, %v12146_v22 }
 0x724   : > { %v6407_v34 = vadd.f32 %v6406_v43, %v6405_v57  ;;  %v6426_v57 = vsel %vm269_vm4, %v6366_v10, 0.0  ;;  %v6428_v43 = vsel %vm269_vm4, %v6367_v28, 0.0  ;;  %v6430_v46 = vsel %vm269_vm4, %v6368_v30, 0.0 }
 0x726   : > { %v6409_v52 = vadd.f32 %v6408_v51, %v6407_v34 }
 0x728   : > { %v6411_v42 = vadd.f32 %v6410_v45, %v6409_v52 }
 0x72a   : > { %v6413_v31 = vadd.f32 %v6412_v0, %v6411_v42 }
 0x72c   : > { %v6415_v59 = vadd.f32 %v6414_v56, %v6413_v31 }
 0x72e   : > { %v6417_v61 = vadd.f32 %v6416_v9, %v6415_v59 }
 0x730   : > { %v6419_v48 = vadd.f32 %v6418_v41, %v6417_v61 }
 0x732   : > { %v6421_v8 = vadd.f32 %v6420_v58, %v6419_v48 }
 0x734   : > { %v6423_v26 = vadd.f32 %v6422_v4, %v6421_v8 }
 0x736   : > { %v6425_v33 = vadd.f32 %v6424_v40, %v6423_v26 }
 0x738   : > { %v6427_v17 = vadd.f32 %v6426_v57, %v6425_v33 }
 0x73a   : > { %v6429_v34 = vadd.f32 %v6428_v43, %v6427_v17 }
 0x73c   : > { %v6431_v51 = vadd.f32 %v6430_v46, %v6429_v34 }
 0x73e   : > { %v6432_v52 = vrot.slane %v6431_v51, 4 }
 0x740   : > { %v6433_v16 = vadd.f32 %v6432_v52, %v6431_v51 }
 0x742   : > { %v6434_v45 = vrot.slane %v6433_v16, 2 }
 0x744   : > { %v6435_v42 = vadd.f32 %v6434_v45, %v6433_v16 }
 0x746   : > { %v6436_v39 = vrot.slane %v6435_v42, 1 }
 0x748   : > { %v6437_v0 = vadd.f32 %v6436_v39, %v6435_v42 }
 0x74a   : > { %v6438_v31 = vmul.f32 0.00390625, %v6437_v0 }
 0x74c   : > { %v6439_v44 = vadd.f32 1e-05, %v6438_v31 }
 0x74e   : > { %9368 = vrsqrt.f32 %v6439_v44 }
 0x758   : > { %v12274_v56 = vpop.eup %9368 }
 0x759   : > { %v6458_v59 = vmul.f32 %v12274_v56, %v12114_v50  ;;  %v6442_v63 = vmul.f32 %v12274_v56, %v12152_v23  ;;  %v6457_v9 = vmul.f32 %v12274_v56, %v12111_v36  ;;  %v6441_v61 = vmul.f32 %v12274_v56, %v12149_v38 }
 0x75a   : > { %v6443_v48 = vmul.f32 %v12274_v56, %v12155_v55  ;;  %v6459_v5 = vmul.f32 %v12274_v56, %v12117_v47  ;;  %v6444_v36 = vmul.f32 %v12274_v56, %v12158_v18  ;;  %v6460_v38 = vmul.f32 %v12274_v56, %v12120_v11 }
 0x75b   : > { %vm6489_vm4 = vcmp.gt.f32.partialorder %v6457_v9, 0.0  ;;  %v6521_v12 = vmul.f32 0.2, %v6457_v9  ;;  %vm6473_vm15 = vcmp.gt.f32.partialorder %v6441_v61, 0.0  ;;  %v6505_v41 = vmul.f32 0.2, %v6441_v61 }
 0x75c   : > { %v6522_v8 = vmul.f32 0.2, %v6458_v59  ;;  %v6506_v23 = vmul.f32 0.2, %v6442_v63  ;;  %vm6490_vm0 = vcmp.gt.f32.partialorder %v6458_v59, 0.0  ;;  %vm6474_vm5 = vcmp.gt.f32.partialorder %v6442_v63, 0.0 }
 0x75d   : > { %v6553_v50 = vsel %vm6489_vm4, %v6457_v9, %v6521_v12  ;;  %v6537_v58 = vsel %vm6473_vm15, %v6441_v61, %v6505_v41  ;;  %v6523_v55 = vmul.f32 0.2, %v6459_v5  ;;  %v6507_v26 = vmul.f32 0.2, %v6443_v48 }
 0x75e   : > { %6601 = vxpose.xlu1.b32.start [1/16] (narrow) %v6553_v50, 8  ;;  %6569 = vxpose.xlu0.b32.start [1/16] (narrow) %v6537_v58, 8  ;;  %v6554_v10 = vsel %vm6490_vm0, %v6458_v59, %v6522_v8  ;;  %v6538_v4 = vsel %vm6474_vm5, %v6442_v63, %v6506_v23  ;;  %vm6491_vm6 = vcmp.gt.f32.partialorder %v6459_v5, 0.0  ;;  %vm6475_vm8 = vcmp.gt.f32.partialorder %v6443_v48, 0.0 }
 0x75f   : > { %v6445_v47 = vmul.f32 %v12274_v56, %v12165_v27  ;;  %v6461_v28 = vmul.f32 %v12274_v56, %v12123_v20  ;;  %v6555_v40 = vsel %vm6491_vm6, %v6459_v5, %v6523_v55  ;;  %v6539_v33 = vsel %vm6475_vm8, %v6443_v48, %v6507_v26 }
 0x760   : > { %v6524_v18 = vmul.f32 0.2, %v6460_v38  ;;  %v6508_v30 = vmul.f32 0.2, %v6444_v36  ;;  %vm6492_vm9 = vcmp.gt.f32.partialorder %v6460_v38, 0.0  ;;  %vm6476_vm11 = vcmp.gt.f32.partialorder %v6444_v36, 0.0 }
 0x761   : > { %v6446_v11 = vmul.f32 %v12274_v56, %v12170_v54  ;;  %v6462_v57 = vmul.f32 %v12274_v56, %v12126_v60  ;;  %v6525_v27 = vmul.f32 0.2, %v6461_v28  ;;  %v6509_v34 = vmul.f32 0.2, %v6445_v47 }
 0x762   : > { %6602 = vxpose.xlu1.b32.cont [2/16] (narrow) %v6554_v10, 8  ;;  %6570 = vxpose.xlu0.b32.cont [2/16] (narrow) %v6538_v4, 8  ;;  %v6556_v17 = vsel %vm6492_vm9, %v6460_v38, %v6524_v18  ;;  %v6540_v43 = vsel %vm6476_vm11, %v6444_v36, %v6508_v30  ;;  %vm6493_vm1 = vcmp.gt.f32.partialorder %v6461_v28, 0.0  ;;  %vm6477_vm2 = vcmp.gt.f32.partialorder %v6445_v47, 0.0 }
 0x763   : > { %v6447_v20 = vmul.f32 %v12274_v56, %v12177_v62  ;;  %v6463_v46 = vmul.f32 %v12274_v56, %v12128_v35  ;;  %v6557_v51 = vsel %vm6493_vm1, %v6461_v28, %v6525_v27  ;;  %v6541_v52 = vsel %vm6477_vm2, %v6445_v47, %v6509_v34 }
 0x764   : > { %v6526_v54 = vmul.f32 0.2, %v6462_v57  ;;  %v6510_v16 = vmul.f32 0.2, %v6446_v11  ;;  %vm6494_vm12 = vcmp.gt.f32.partialorder %v6462_v57, 0.0  ;;  %vm6478_vm14 = vcmp.gt.f32.partialorder %v6446_v11, 0.0 }
 0x765   : > { %v6448_v60 = vmul.f32 %v12274_v56, %v12183_v49  ;;  %v6464_v45 = vmul.f32 %v12274_v56, %v12130_v7  ;;  %v6527_v62 = vmul.f32 0.2, %v6463_v46  ;;  %v6511_v0 = vmul.f32 0.2, %v6447_v20 }
 0x766   : > { %6603 = vxpose.xlu1.b32.cont [3/16] (narrow) %v6555_v40, 8  ;;  %6571 = vxpose.xlu0.b32.cont [3/16] (narrow) %v6539_v33, 8  ;;  %v6558_v42 = vsel %vm6494_vm12, %v6462_v57, %v6526_v54  ;;  %v6542_v39 = vsel %vm6478_vm14, %v6446_v11, %v6510_v16  ;;  %vm6495_vm13 = vcmp.gt.f32.partialorder %v6463_v46, 0.0  ;;  %vm6479_vm3 = vcmp.gt.f32.partialorder %v6447_v20, 0.0 }
 0x767   : > { %v6449_v35 = vmul.f32 %v12274_v56, %v12189_v15  ;;  %v6465_v31 = vmul.f32 %v12274_v56, %v12132_v29  ;;  %v6559_v44 = vsel %vm6495_vm13, %v6463_v46, %v6527_v62  ;;  %v6543_v59 = vsel %vm6479_vm3, %v6447_v20, %v6511_v0 }
 0x768   : > { %v6528_v49 = vmul.f32 0.2, %v6464_v45  ;;  %v6512_v63 = vmul.f32 0.2, %v6448_v60  ;;  %vm6496_vm7 = vcmp.gt.f32.partialorder %v6464_v45, 0.0  ;;  %vm6480_vm10 = vcmp.gt.f32.partialorder %v6448_v60, 0.0 }
 0x769   : > { %v6450_v7 = vmul.f32 %v12274_v56, %v12195_v1  ;;  %v6466_v9 = vmul.f32 %v12274_v56, %v12134_v3  ;;  %v6529_v15 = vmul.f32 0.2, %v6465_v31  ;;  %v6513_v41 = vmul.f32 0.2, %v6449_v35 }
 0x76a   : > { %6604 = vxpose.xlu1.b32.cont [4/16] (narrow) %v6556_v17, 8  ;;  %6572 = vxpose.xlu0.b32.cont [4/16] (narrow) %v6540_v43, 8  ;;  %v6560_v61 = vsel %vm6496_vm7, %v6464_v45, %v6528_v49  ;;  %v6544_v12 = vsel %vm6480_vm10, %v6448_v60, %v6512_v63  ;;  %vm6497_vm4 = vcmp.gt.f32.partialorder %v6465_v31, 0.0  ;;  %vm6481_vm15 = vcmp.gt.f32.partialorder %v6449_v35, 0.0 }
 0x76b   : > { %v6451_v29 = vmul.f32 %v12274_v56, %v12093_v53  ;;  %v6467_v48 = vmul.f32 %v12274_v56, %v12136_v21  ;;  %v6561_v5 = vsel %vm6497_vm4, %v6465_v31, %v6529_v15  ;;  %v6545_v50 = vsel %vm6481_vm15, %v6449_v35, %v6513_v41 }
 0x76c   : > { %v6530_v1 = vmul.f32 0.2, %v6466_v9  ;;  %v6514_v58 = vmul.f32 0.2, %v6450_v7  ;;  %vm6498_vm0 = vcmp.gt.f32.partialorder %v6466_v9, 0.0  ;;  %vm6482_vm5 = vcmp.gt.f32.partialorder %v6450_v7, 0.0 }
 0x76d   : > { %v6452_v3 = vmul.f32 %v12274_v56, %v12096_v19  ;;  %v6468_v8 = vmul.f32 %v12274_v56, %v12138_v14  ;;  %v6531_v53 = vmul.f32 0.2, %v6467_v48  ;;  %v6515_v38 = vmul.f32 0.2, %v6451_v29 }
 0x76e   : > { %6605 = vxpose.xlu1.b32.cont [5/16] (narrow) %v6557_v51, 8  ;;  %6573 = vxpose.xlu0.b32.cont [5/16] (narrow) %v6541_v52, 8  ;;  %v6562_v23 = vsel %vm6498_vm0, %v6466_v9, %v6530_v1  ;;  %v6546_v36 = vsel %vm6482_vm5, %v6450_v7, %v6514_v58  ;;  %vm6499_vm6 = vcmp.gt.f32.partialorder %v6467_v48, 0.0  ;;  %vm6483_vm8 = vcmp.gt.f32.partialorder %v6451_v29, 0.0 }
 0x76f   : > { %v6453_v21 = vmul.f32 %v12274_v56, %v12099_v6  ;;  %v6469_v10 = vmul.f32 %v12274_v56, %v12140_v13  ;;  %v6563_v4 = vsel %vm6499_vm6, %v6467_v48, %v6531_v53  ;;  %v6547_v55 = vsel %vm6483_vm8, %v6451_v29, %v6515_v38 }
 0x770   : > { %v6532_v19 = vmul.f32 0.2, %v6468_v8  ;;  %v6516_v26 = vmul.f32 0.2, %v6452_v3  ;;  %vm6500_vm9 = vcmp.gt.f32.partialorder %v6468_v8, 0.0  ;;  %vm6484_vm11 = vcmp.gt.f32.partialorder %v6452_v3, 0.0 }
 0x771   : > { %v6454_v14 = vmul.f32 %v12274_v56, %v12102_v25  ;;  %v6470_v47 = vmul.f32 %v12274_v56, %v12142_v32  ;;  %v6533_v6 = vmul.f32 0.2, %v6469_v10  ;;  %v6517_v33 = vmul.f32 0.2, %v6453_v21 }
 0x772   : > { %6606 = vxpose.xlu1.b32.cont [6/16] (narrow) %v6558_v42, 8  ;;  %6574 = vxpose.xlu0.b32.cont [6/16] (narrow) %v6542_v39, 8  ;;  %v6564_v28 = vsel %vm6500_vm9, %v6468_v8, %v6532_v19  ;;  %v6548_v40 = vsel %vm6484_vm11, %v6452_v3, %v6516_v26  ;;  %vm6501_vm1 = vcmp.gt.f32.partialorder %v6469_v10, 0.0  ;;  %vm6485_vm2 = vcmp.gt.f32.partialorder %v6453_v21, 0.0 }
 0x773   : > { %v6471_v13 = vmul.f32 %v12274_v56, %v12144_v37  ;;  %v6455_v18 = vmul.f32 %v12274_v56, %v12105_v24  ;;  %v6565_v30 = vsel %vm6501_vm1, %v6469_v10, %v6533_v6  ;;  %v6549_v11 = vsel %vm6485_vm2, %v6453_v21, %v6517_v33 }
 0x774   : > { %v6534_v25 = vmul.f32 0.2, %v6470_v47  ;;  %v6518_v57 = vmul.f32 0.2, %v6454_v14  ;;  %vm6502_vm12 = vcmp.gt.f32.partialorder %v6470_v47, 0.0  ;;  %vm6486_vm14 = vcmp.gt.f32.partialorder %v6454_v14, 0.0 }
 0x775   : > { %v6456_v32 = vmul.f32 %v12274_v56, %v12108_v2  ;;  %v6472_v17 = vmul.f32 %v12274_v56, %v12146_v22  ;;  %v6535_v37 = vmul.f32 0.2, %v6471_v13  ;;  %v6519_v34 = vmul.f32 0.2, %v6455_v18 }
 0x776   : > { %6607 = vxpose.xlu1.b32.cont [7/16] (narrow) %v6559_v44, 8  ;;  %6575 = vxpose.xlu0.b32.cont [7/16] (narrow) %v6543_v59, 8  ;;  %v6566_v43 = vsel %vm6502_vm12, %v6470_v47, %v6534_v25  ;;  %v6550_v27 = vsel %vm6486_vm14, %v6454_v14, %v6518_v57  ;;  %vm6503_vm13 = vcmp.gt.f32.partialorder %v6471_v13, 0.0  ;;  %vm6487_vm3 = vcmp.gt.f32.partialorder %v6455_v18, 0.0 }
 0x777   : > { %v6567_v24 = vsel %vm6503_vm13, %v6471_v13, %v6535_v37  ;;  %v6551_v20 = vsel %vm6487_vm3, %v6455_v18, %v6519_v34  ;;  %v6536_v46 = vmul.f32 0.2, %v6472_v17  ;;  %v6520_v51 = vmul.f32 0.2, %v6456_v32 }
 0x778   : > { %vm6504_vm7 = vcmp.gt.f32.partialorder %v6472_v17, 0.0  ;;  %vm6488_vm10 = vcmp.gt.f32.partialorder %v6456_v32, 0.0 }
 0x779   : > { %v6568_v2 = vsel %vm6504_vm7, %v6472_v17, %v6536_v46  ;;  %v6552_v22 = vsel %vm6488_vm10, %v6456_v32, %v6520_v51 }
 0x77a   : > { %6608 = vxpose.xlu1.b32.cont [8/16] (narrow) %v6560_v61, 8  ;;  %6576 = vxpose.xlu0.b32.cont [8/16] (narrow) %v6544_v12, 8 }
 0x77e   : > { %6609 = vxpose.xlu1.b32.cont [9/16] (narrow) %v6561_v5, 8  ;;  %6577 = vxpose.xlu0.b32.cont [9/16] (narrow) %v6545_v50, 8 }
 0x782   : > { %6610 = vxpose.xlu1.b32.cont [10/16] (narrow) %v6562_v23, 8  ;;  %6578 = vxpose.xlu0.b32.cont [10/16] (narrow) %v6546_v36, 8 }
 0x786   : > { %6611 = vxpose.xlu1.b32.cont [11/16] (narrow) %v6563_v4, 8  ;;  %6579 = vxpose.xlu0.b32.cont [11/16] (narrow) %v6547_v55, 8 }
 0x78a   : > { %6612 = vxpose.xlu1.b32.cont [12/16] (narrow) %v6564_v28, 8  ;;  %6580 = vxpose.xlu0.b32.cont [12/16] (narrow) %v6548_v40, 8 }
 0x78e   : > { %6613 = vxpose.xlu1.b32.cont [13/16] (narrow) %v6565_v30, 8  ;;  %6581 = vxpose.xlu0.b32.cont [13/16] (narrow) %v6549_v11, 8 }
 0x792   : > { %6614 = vxpose.xlu1.b32.cont [14/16] (narrow) %v6566_v43, 8  ;;  %6582 = vxpose.xlu0.b32.cont [14/16] (narrow) %v6550_v27, 8 }
 0x796   : > { %6615 = vxpose.xlu1.b32.cont [15/16] (narrow) %v6567_v24, 8  ;;  %6583 = vxpose.xlu0.b32.cont [15/16] (narrow) %v6551_v20, 8 }
 0x79a   : > { %6616 = vxpose.xlu1.b32.end [16/16] (narrow) %v6568_v2, 8  ;;  %6584 = vxpose.xlu0.b32.end [16/16] (narrow) %v6552_v22, 8 }
 0x7de   : > { %v6617_v56 = vpop.trf.xlu1  ;;  %v6585_v52 = vpop.trf.xlu0 }
 0x7df   : > { %6634 = vst [vmem:[%s217_s14 + $0x8] sm:$0xff] %v6617_v56  ;;  %6633 = vst [vmem:[%s217_s14] sm:$0xff] %v6585_v52 }
 0x7e0   : > { %9383 = shalt.err (!%p9380_p3)
}
 0x7e1   : > { %s9384_s8 = scalar_lea.hbm %s12347_s25, 256  ;;  %s9388_s11 = scalar_lea.hbm %s12392_s5, 512 }
 0x7e2   : > { %p9385_p4 = scmp.ne.s32.totalorder %s12347_s25, %s9384_s8  ;;  %p9389_p9 = scmp.lt.u32.totalorder %s12347_s25, %s12392_s5 }
 0x7e3   : > { %p9390_p10 = scmp.lt.u32.totalorder %s9388_s11, %s9384_s8  ;;  %p9392_p12 = scmp.lt.u32.totalorder %s9384_s8, %s12347_s25 }
 0x7e4   : > { %p9386_p7 = pnand %p9385_p4, %p9504_p5 }
 0x7e5   : > { %p9391_p11 = por %p9390_p10, %p9389_p9 }
 0x7e6   : > { %p9387_p8 = pneg %p9386_p7 }
 0x7e7   : > { %p9393_p13 = por %p9392_p12, %p9391_p11 }
 0x7e9   : > { %p9394_p0 = pnand %p9393_p13, %p9387_p8 }
 0x7eb   : > { %9397 = shalt.err (!%p9394_p0)
}
 0x7ec   : > { %9326 = dma.vmem_to_hbm [thread:$0]  (%p9504_p5), %s12342_s15, 256, %s12347_s25, %s6636_s26  }
 0x7ed PF: > { %p9332_p1 = scmp.ge.s32.totalorder %s9432_s21, 2  ;;  %s6662_s14 = sand.u32 1, %s9420_s18  }
 0x7ee   : > { %s6663_s16 = scalar_lea.sflag [#allocation5], %s6662_s14 }
 0x7ef   : > { %p9329_p2 = pnand %p9332_p1, %p9508_p6 }
 0x7f1   : > { %9415 = dma.done.wait (!%p9329_p2), %s6663_s16, 256  }
 0x7f2   : > { %9417 = vsyncadd (!%p9329_p2), %s6663_s16, 4294967040  ;;  %p15_p3 = scmp.ge.s32.totalorder %s9491_s24, 4   ;;  %s12723_s18 = smov %s9424_s19 }
 0x7f3   : > { %s12724_s19 = smov %s9428_s20  ;;  %s12725_s20 = smov %s9502_s27 }
 0x7f4   : > { %s12726_s21 = smov %s9491_s24  ;;  %17 = sbr.rel (!%p15_p3) target bundleno = 3 (0x3), region = 83 }
 0x7fb   :  { %6668 = vsyncpa [#allocation5], 1 }
 0x7fc   :  { %6670 = vsyncpa [#allocation5 + $0x1], 1 }

</bundles_post_ra>
